<compile_context>
chip_gen: v6e
topology: v6e:2x2x1
jax: 0.10.0
libtpu: 0.0.40
codegen_flags: <defaults>
</compile_context>

<pallas_src>
import functools

import numpy as np
import jax
import jax.numpy as jnp
from jax import lax
from jax.experimental import pallas as pl
from jax.experimental.pallas import tpu as pltpu


# ----------------------------------------------------------------------------
# Fused ESA kernel: one grid step = one block of B images, fully in VMEM.
# ----------------------------------------------------------------------------
def _esa_kernel(x_ref, w1_ref, b1_ref, w2c_ref, b2_ref, g2_ref, pmask_ref,
                w3c_ref, b3_ref, s3_ref, upt_ref, wf_ref, bf_ref, w4_ref,
                b4_ref, o_ref, *, B, HW, HP, n2, n3, f):
    # HP = (H//2)*(W//2): pixels per phase block; HW = 4*HP pixels per image.
    dot = functools.partial(jnp.dot, preferred_element_type=jnp.float32)

    x = x_ref[...]                                    # (C, B*HW)   lane-dense
    c1 = dot(w1_ref[...], x) + b1_ref[...]            # (f, B*HW)   conv1 (1x1)

    # conv2: fused per-tap channel mix (one matmul for all 9 taps & B images).
    mixed = dot(w2c_ref[...], c1)                     # (9*f, B*HW)

    pmask = pmask_ref[...] > 0.5                      # (n3, n2) pool-window masks
    c3u_parts = []
    for b in range(B):
        # ---- conv2 (3x3, stride 2, VALID): per-tap phase-block gather -------
        acc = None
        for k in range(9):
            dy, dx = k // 3, k % 3
            ph = (dy % 2) * 2 + (dx % 2)              # phase read by this tap
            col = b * HW + ph * HP                    # lane-aligned (256-mult)
            lhs = mixed[k * f:(k + 1) * f, col:col + HP]        # (f, HP)
            contrib = dot(lhs, g2_ref[k])             # (f, n2) spatial gather
            acc = contrib if acc is None else acc + contrib
        acc = acc + b2_ref[...]                       # (f, n2)

        # ---- max_pool2d(kernel=7, stride=3): masked lane reduction ----------
        masked = jnp.where(pmask[None, :, :], acc[:, None, :], -jnp.inf)
        vmax = jnp.max(masked, axis=-1)               # (f, n3)

        # ---- conv3 (3x3, padding 1) on the tiny pooled grid ------------------
        m3 = dot(w3c_ref[...], vmax)                  # (9*f, n3) channel mix
        c3 = None
        for k in range(9):
            part = dot(m3[k * f:(k + 1) * f, :], s3_ref[k])     # (f, n3)
            c3 = part if c3 is None else c3 + part
        c3 = c3 + b3_ref[...]                         # (f, n3)

        # ---- bilinear upsample to full resolution (permuted pixel order) ----
        c3u_parts.append(dot(c3, upt_ref[...]))       # (f, HW)

    c3u = c3u_parts[0] if B == 1 else jnp.concatenate(c3u_parts, axis=1)

    # conv_f (1x1), add, conv4 (1x1), sigmoid gate, rescale the input ----------
    cf = dot(wf_ref[...], c1) + bf_ref[...]           # (f, B*HW)
    c4 = dot(w4_ref[...], c3u + cf) + b4_ref[...]     # (C, B*HW)
    gate = 1.0 / (1.0 + jnp.exp(-c4))                 # sigmoid
    o_ref[...] = x * gate                             # lane-dense store


# ----------------------------------------------------------------------------
# Shape-only constants (numpy, built at trace time, used as matmul operands).
# ----------------------------------------------------------------------------
def _phase_perm(H, W):
    # perm[new_idx] = old row-major index; new order = (h%2, w%2, h//2, w//2).
    Hp, Wp = H // 2, W // 2
    perm = np.empty(H * W, np.int64)
    for h in range(H):
        for w in range(W):
            new = ((h % 2) * 2 + (w % 2)) * (Hp * Wp) + (h // 2) * Wp + (w // 2)
            perm[new] = h * W + w
    return perm


def _conv2_gather_matrices(H, W):
    # Per tap (dy, dx): 0/1 matrix mapping the tap's 16x16 phase grid to the
    # 15x15 stride-2 conv output grid.
    Hp, Wp = H // 2, W // 2
    H2, W2 = (H - 3) // 2 + 1, (W - 3) // 2 + 1
    g = np.zeros((9, Hp * Wp, H2 * W2), np.float32)
    for dy in range(3):
        for dx in range(3):
            k = dy * 3 + dx
            for ho in range(H2):
                for wo in range(W2):
                    hp, wp = ho + dy // 2, wo + dx // 2
                    g[k, hp * Wp + wp, ho * W2 + wo] = 1.0
    return g


def _pool_masks(H2, W2, kernel=7, stride=3):
    H3, W3 = (H2 - kernel) // stride + 1, (W2 - kernel) // stride + 1
    m = np.zeros((H3 * W3, H2 * W2), np.float32)
    for py in range(H3):
        for px in range(W3):
            for ho in range(stride * py, stride * py + kernel):
                for wo in range(stride * px, stride * px + kernel):
                    m[py * W3 + px, ho * W2 + wo] = 1.0
    return m


def _conv3_shift_matrices(h, w):
    # s[k, source, dest] = 1 for the 3x3 pad-1 conv on the pooled grid.
    n = h * w
    s = np.zeros((9, n, n), np.float32)
    for dy in range(3):
        for dx in range(3):
            k = dy * 3 + dx
            for py in range(h):
                for px in range(w):
                    qy, qx = py + dy - 1, px + dx - 1
                    if 0 <= qy < h and 0 <= qx < w:
                        s[k, qy * w + qx, py * w + px] = 1.0
    return s


def _bilinear_weights(in_size, out_size):
    # Exact PyTorch F.interpolate(mode="bilinear", align_corners=False) weights.
    w = np.zeros((out_size, in_size), np.float32)
    scale = in_size / out_size
    for o in range(out_size):
        src = max((o + 0.5) * scale - 0.5, 0.0)
        i0 = min(int(np.floor(src)), in_size - 1)
        i1 = min(i0 + 1, in_size - 1)
        t = src - i0
        w[o, i0] += 1.0 - t
        w[o, i1] += t
    return w


def _bilinear_matrix(in_h, in_w, out_h, out_w):
    wy = _bilinear_weights(in_h, out_h)               # (out_h, in_h)
    wx = _bilinear_weights(in_w, out_w)               # (out_w, in_w)
    a = np.einsum("yi,xj->yxij", wy, wx).reshape(out_h * out_w, in_h * in_w)
    return a.astype(np.float32)


def _pick_images_per_step(N):
    # Prefer >= 2 grid steps (v7x has two TensorCores) and keep the block batch
    # small enough to stay well inside the default scoped-VMEM limit.
    for b in (4, 2):
        if N % b == 0 and N // b >= 2:
            return b
    return 1


# ----------------------------------------------------------------------------
# Wrapper: layout plumbing (channel-major + phase-major pixels) + pallas_call.
# ----------------------------------------------------------------------------
@jax.jit
def esa_pallas(x, params):
    N, C, H, W = x.shape
    f = params["conv1_w"].shape[0]
    assert H % 2 == 0 and W % 2 == 0, "spatial dims must be even"
    H2, W2 = (H - 3) // 2 + 1, (W - 3) // 2 + 1
    assert H2 >= 7 and W2 >= 7, "input too small for the 7x7 max-pool"
    H3, W3 = (H2 - 7) // 3 + 1, (W2 - 7) // 3 + 1
    Hp, Wp = H // 2, W // 2
    HW, HP, n2, n3 = H * W, Hp * Wp, H2 * W2, H3 * W3

    # Weights: channel-major means the PyTorch (out, in) layout is used as-is.
    w1 = params["conv1_w"].reshape(f, C)
    b1 = params["conv1_b"].reshape(f, 1)
    # conv2 / conv3 channel-mix weights stacked tap-major: rows = (k*f + c_out).
    w2c = jnp.transpose(params["conv2_w"], (2, 3, 0, 1)).reshape(9 * f, f)
    b2 = params["conv2_b"].reshape(f, 1)
    w3c = jnp.transpose(params["conv3_w"], (2, 3, 0, 1)).reshape(9 * f, f)
    b3 = params["conv3_b"].reshape(f, 1)
    wf = params["convf_w"].reshape(f, f)
    bf = params["convf_b"].reshape(f, 1)
    w4 = params["conv4_w"].reshape(C, f)
    b4 = params["conv4_b"].reshape(C, 1)

    # Shape-only constants.
    g2 = jnp.asarray(_conv2_gather_matrices(H, W))              # (9, HP, n2)
    pmask = jnp.asarray(_pool_masks(H2, W2))                    # (n3, n2)
    s3 = jnp.asarray(_conv3_shift_matrices(H3, W3))             # (9, n3, n3)
    perm = _phase_perm(H, W)                                    # perm[new] = old
    upt = jnp.asarray(_bilinear_matrix(H3, W3, H, W)[perm, :].T)  # (n3, HW)

    # Input layout: phase-major pixels, channel-major, images along lanes.
    x_pm = (x.reshape(N, C, Hp, 2, Wp, 2)
              .transpose(0, 1, 3, 5, 2, 4)          # (N, C, h%2, w%2, h//2, w//2)
              .reshape(N, C, HW)
              .transpose(1, 0, 2)
              .reshape(C, N * HW))

    B = _pick_images_per_step(N)
    grid = (N // B,)

    def const_spec(a):
        nd = a.ndim
        return pl.BlockSpec(a.shape, lambda i: (0,) * nd)

    weights = (w1, b1, w2c, b2, g2, pmask, w3c, b3, s3, upt, wf, bf, w4, b4)
    kernel = functools.partial(_esa_kernel, B=B, HW=HW, HP=HP, n2=n2, n3=n3, f=f)

    out_pm = pl.pallas_call(
        kernel,
        out_shape=jax.ShapeDtypeStruct((C, N * HW), x.dtype),
        grid_spec=pltpu.PrefetchScalarGridSpec(
            num_scalar_prefetch=0,
            grid=grid,
            in_specs=[pl.BlockSpec((C, B * HW), lambda i: (0, i))]
                     + [const_spec(a) for a in weights],
            out_specs=pl.BlockSpec((C, B * HW), lambda i: (0, i)),
        ),
        compiler_params=pltpu.CompilerParams(
            dimension_semantics=("parallel",)),
    )(x_pm, *weights)

    # Undo channel-major / phase-major layout.
    out = (out_pm.reshape(C, N, HW)
                 .transpose(1, 0, 2)
                 .reshape(N, C, 2, 2, Hp, Wp)
                 .transpose(0, 1, 4, 2, 5, 3)
                 .reshape(N, C, H, W))
    return out


# ----------------------------------------------------------------------------
# Pure-JAX reference (faithful transcription of the PyTorch forward).
# ----------------------------------------------------------------------------
def _conv2d_ref(x, w, b, stride, padding):
    out = lax.conv_general_dilated(
        x, w, window_strides=(stride, stride),
        padding=[(padding, padding), (padding, padding)],
        dimension_numbers=("NCHW", "OIHW", "NCHW"))
    return out + b.reshape(1, -1, 1, 1)


def _maxpool_ref(x, k, s):
    return lax.reduce_window(x, -jnp.inf, lax.max,
                             window_dimensions=(1, 1, k, k),
                             window_strides=(1, 1, s, s),
                             padding="VALID")


def _upsample_bilinear_ref(x, out_h, out_w):
    n, c, h, w = x.shape

    def axis(in_size, out_size):
        o = jnp.arange(out_size, dtype=jnp.float32)
        src = jnp.maximum((o + 0.5) * (in_size / out_size) - 0.5, 0.0)
        i0 = jnp.clip(jnp.floor(src).astype(jnp.int32), 0, in_size - 1)
        i1 = jnp.clip(i0 + 1, 0, in_size - 1)
        t = src - i0.astype(jnp.float32)
        return i0, i1, t

    y0, y1, ty = axis(h, out_h)
    x0, x1, tx = axis(w, out_w)
    rows = (x[:, :, y0, :] * (1.0 - ty)[None, None, :, None]
            + x[:, :, y1, :] * ty[None, None, :, None])
    return (rows[:, :, :, x0] * (1.0 - tx)[None, None, None, :]
            + rows[:, :, :, x1] * tx[None, None, None, :])


def esa_ref(x, p):
    c1_ = _conv2d_ref(x, p["conv1_w"], p["conv1_b"], 1, 0)
    c1 = _conv2d_ref(c1_, p["conv2_w"], p["conv2_b"], 2, 0)
    v_max = _maxpool_ref(c1, 7, 3)
    c3 = _conv2d_ref(v_max, p["conv3_w"], p["conv3_b"], 1, 1)
    c3 = _upsample_bilinear_ref(c3, x.shape[2], x.shape[3])
    cf = _conv2d_ref(c1_, p["convf_w"], p["convf_b"], 1, 0)
    c4 = _conv2d_ref(c3 + cf, p["conv4_w"], p["conv4_b"], 1, 0)
    return x * jax.nn.sigmoid(c4)


if __name__ == "__main__":
    key = jax.random.PRNGKey(0)
    N, n_feats, H, W = 4, 32, 32, 32
    f = 16
    ks = jax.random.split(key, 11)

    def init(k, shape, scale):
        return scale * jax.random.normal(k, shape, dtype=jnp.float32)

    params = {
        "conv1_w": init(ks[0], (f, n_feats, 1, 1), 0.15),
        "conv1_b": init(ks[1], (f,), 0.1),
        "conv2_w": init(ks[2], (f, f, 3, 3), 0.1),
        "conv2_b": init(ks[3], (f,), 0.1),
        "conv3_w": init(ks[4], (f, f, 3, 3), 0.1),
        "conv3_b": init(ks[5], (f,), 0.1),
        "convf_w": init(ks[6], (f, f, 1, 1), 0.15),
        "convf_b": init(ks[7], (f,), 0.1),
        "conv4_w": init(ks[8], (n_feats, f, 1, 1), 0.15),
        "conv4_b": init(ks[9], (n_feats,), 0.1),
    }
    x = jax.random.normal(ks[10], (N, n_feats, H, W), dtype=jnp.float32)

    out = jax.block_until_ready(esa_pallas(x, params))
    ref = esa_ref(x, params)

    assert out.shape == (N, n_feats, H, W) and out.dtype == x.dtype
    max_err = float(jnp.max(jnp.abs(out - ref)))
    assert max_err < 2e-2, f"Pallas ESA mismatch vs reference: {max_err}"
    print("KERNEL_OK")
</pallas_src>

<mosaic_0001>
module attributes {stable_mosaic.version = 11 : i64} {
  func.func @_esa_kernel(%arg0: i32, %arg1: memref<32x2048xf32, #tpu.memory_space<vmem>>, %arg2: memref<16x32xf32, #tpu.memory_space<vmem>>, %arg3: memref<16x1xf32, #tpu.memory_space<vmem>>, %arg4: memref<144x16xf32, #tpu.memory_space<vmem>>, %arg5: memref<16x1xf32, #tpu.memory_space<vmem>>, %arg6: memref<9x256x225xf32, #tpu.memory_space<vmem>>, %arg7: memref<9x225xf32, #tpu.memory_space<vmem>>, %arg8: memref<144x16xf32, #tpu.memory_space<vmem>>, %arg9: memref<16x1xf32, #tpu.memory_space<vmem>>, %arg10: memref<9x9x9xf32, #tpu.memory_space<vmem>>, %arg11: memref<9x1024xf32, #tpu.memory_space<vmem>>, %arg12: memref<16x16xf32, #tpu.memory_space<vmem>>, %arg13: memref<16x1xf32, #tpu.memory_space<vmem>>, %arg14: memref<32x16xf32, #tpu.memory_space<vmem>>, %arg15: memref<32x1xf32, #tpu.memory_space<vmem>>, %arg16: memref<32x2048xf32, #tpu.memory_space<vmem>>) attributes {dimension_semantics = [#tpu.dimension_semantics<parallel>], iteration_bounds = array<i64: 2>, scalar_prefetch = 0 : i64, scratch_operands = 0 : i64, tpu.core_type = #tpu.core_type<tc>, window_params = [{transform_indices = @transform_0, window_bounds = array<i64: 32, 2048>}, {pipeline_mode = #tpu.pipeline_mode<synchronous>, transform_indices = @transform_1, window_bounds = array<i64: 16, 32>}, {pipeline_mode = #tpu.pipeline_mode<synchronous>, transform_indices = @transform_2, window_bounds = array<i64: 16, 1>}, {pipeline_mode = #tpu.pipeline_mode<synchronous>, transform_indices = @transform_3, window_bounds = array<i64: 144, 16>}, {pipeline_mode = #tpu.pipeline_mode<synchronous>, transform_indices = @transform_4, window_bounds = array<i64: 16, 1>}, {pipeline_mode = #tpu.pipeline_mode<synchronous>, transform_indices = @transform_5, window_bounds = array<i64: 9, 256, 225>}, {pipeline_mode = #tpu.pipeline_mode<synchronous>, transform_indices = @transform_6, window_bounds = array<i64: 9, 225>}, {pipeline_mode = #tpu.pipeline_mode<synchronous>, transform_indices = @transform_7, window_bounds = array<i64: 144, 16>}, {pipeline_mode = #tpu.pipeline_mode<synchronous>, transform_indices = @transform_8, window_bounds = array<i64: 16, 1>}, {pipeline_mode = #tpu.pipeline_mode<synchronous>, transform_indices = @transform_9, window_bounds = array<i64: 9, 9, 9>}, {pipeline_mode = #tpu.pipeline_mode<synchronous>, transform_indices = @transform_10, window_bounds = array<i64: 9, 1024>}, {pipeline_mode = #tpu.pipeline_mode<synchronous>, transform_indices = @transform_11, window_bounds = array<i64: 16, 16>}, {pipeline_mode = #tpu.pipeline_mode<synchronous>, transform_indices = @transform_12, window_bounds = array<i64: 16, 1>}, {pipeline_mode = #tpu.pipeline_mode<synchronous>, transform_indices = @transform_13, window_bounds = array<i64: 32, 16>}, {pipeline_mode = #tpu.pipeline_mode<synchronous>, transform_indices = @transform_14, window_bounds = array<i64: 32, 1>}, {transform_indices = @transform_15, window_bounds = array<i64: 32, 2048>}]} {
    %c0 = arith.constant 0 : index
    %c0_0 = arith.constant 0 : index
    %0 = vector.load %arg1[%c0, %c0_0] : memref<32x2048xf32, #tpu.memory_space<vmem>>, vector<32x2048xf32>
    %c0_1 = arith.constant 0 : index
    %c0_2 = arith.constant 0 : index
    %1 = vector.load %arg2[%c0_1, %c0_2] : memref<16x32xf32, #tpu.memory_space<vmem>>, vector<16x32xf32>
    %cst = arith.constant dense<0.000000e+00> : vector<16x2048xf32>
    %2 = tpu.matmul %1, %0, %cst {dimension_numbers = #tpu.dot_dimension_numbers<[1], [0], [0], [1], [0, 0, 1, 1], [], []>} : vector<16x32xf32>, vector<32x2048xf32>, vector<16x2048xf32> -> vector<16x2048xf32>
    %c0_3 = arith.constant 0 : index
    %c0_4 = arith.constant 0 : index
    %3 = vector.load %arg3[%c0_3, %c0_4] : memref<16x1xf32, #tpu.memory_space<vmem>>, vector<16x1xf32>
    %4 = vector.broadcast %3 : vector<16x1xf32> to vector<16x2048xf32>
    %5 = arith.addf %2, %4 : vector<16x2048xf32>
    %c0_5 = arith.constant 0 : index
    %c0_6 = arith.constant 0 : index
    %6 = vector.load %arg4[%c0_5, %c0_6] : memref<144x16xf32, #tpu.memory_space<vmem>>, vector<144x16xf32>
    %cst_7 = arith.constant dense<0.000000e+00> : vector<144x2048xf32>
    %7 = tpu.matmul %6, %5, %cst_7 {dimension_numbers = #tpu.dot_dimension_numbers<[1], [0], [0], [1], [0, 0, 1, 1], [], []>} : vector<144x16xf32>, vector<16x2048xf32>, vector<144x2048xf32> -> vector<144x2048xf32>
    %c0_8 = arith.constant 0 : index
    %c0_9 = arith.constant 0 : index
    %8 = vector.load %arg7[%c0_8, %c0_9] : memref<9x225xf32, #tpu.memory_space<vmem>>, vector<9x225xf32>
    %cst_10 = arith.constant 5.000000e-01 : f32
    %9 = vector.broadcast %cst_10 : f32 to vector<9x225xf32>
    %10 = arith.cmpf ogt, %8, %9 : vector<9x225xf32>
    %11 = vector.extract_strided_slice %7 {offsets = [0, 0], sizes = [16, 256], strides = [1, 1]} : vector<144x2048xf32> to vector<16x256xf32>
    %c0_11 = arith.constant 0 : index
    %c0_12 = arith.constant 0 : index
    %c0_13 = arith.constant 0 : index
    %12 = vector.load %arg6[%c0_11, %c0_12, %c0_13] : memref<9x256x225xf32, #tpu.memory_space<vmem>>, vector<1x256x225xf32>
    %13 = vector.shape_cast %12 : vector<1x256x225xf32> to vector<256x225xf32>
    %cst_14 = arith.constant dense<0.000000e+00> : vector<16x225xf32>
    %14 = tpu.matmul %11, %13, %cst_14 {dimension_numbers = #tpu.dot_dimension_numbers<[1], [0], [0], [1], [0, 0, 1, 1], [], []>} : vector<16x256xf32>, vector<256x225xf32>, vector<16x225xf32> -> vector<16x225xf32>
    %15 = vector.extract_strided_slice %7 {offsets = [16, 256], sizes = [16, 256], strides = [1, 1]} : vector<144x2048xf32> to vector<16x256xf32>
    %c1 = arith.constant 1 : index
    %c0_15 = arith.constant 0 : index
    %c0_16 = arith.constant 0 : index
    %16 = vector.load %arg6[%c1, %c0_15, %c0_16] : memref<9x256x225xf32, #tpu.memory_space<vmem>>, vector<1x256x225xf32>
    %17 = vector.shape_cast %16 : vector<1x256x225xf32> to vector<256x225xf32>
    %cst_17 = arith.constant dense<0.000000e+00> : vector<16x225xf32>
    %18 = tpu.matmul %15, %17, %cst_17 {dimension_numbers = #tpu.dot_dimension_numbers<[1], [0], [0], [1], [0, 0, 1, 1], [], []>} : vector<16x256xf32>, vector<256x225xf32>, vector<16x225xf32> -> vector<16x225xf32>
    %19 = arith.addf %14, %18 : vector<16x225xf32>
    %20 = vector.extract_strided_slice %7 {offsets = [32, 0], sizes = [16, 256], strides = [1, 1]} : vector<144x2048xf32> to vector<16x256xf32>
    %c2 = arith.constant 2 : index
    %c0_18 = arith.constant 0 : index
    %c0_19 = arith.constant 0 : index
    %21 = vector.load %arg6[%c2, %c0_18, %c0_19] : memref<9x256x225xf32, #tpu.memory_space<vmem>>, vector<1x256x225xf32>
    %22 = vector.shape_cast %21 : vector<1x256x225xf32> to vector<256x225xf32>
    %cst_20 = arith.constant dense<0.000000e+00> : vector<16x225xf32>
    %23 = tpu.matmul %20, %22, %cst_20 {dimension_numbers = #tpu.dot_dimension_numbers<[1], [0], [0], [1], [0, 0, 1, 1], [], []>} : vector<16x256xf32>, vector<256x225xf32>, vector<16x225xf32> -> vector<16x225xf32>
    %24 = arith.addf %19, %23 : vector<16x225xf32>
    %25 = vector.extract_strided_slice %7 {offsets = [48, 512], sizes = [16, 256], strides = [1, 1]} : vector<144x2048xf32> to vector<16x256xf32>
    %c3 = arith.constant 3 : index
    %c0_21 = arith.constant 0 : index
    %c0_22 = arith.constant 0 : index
    %26 = vector.load %arg6[%c3, %c0_21, %c0_22] : memref<9x256x225xf32, #tpu.memory_space<vmem>>, vector<1x256x225xf32>
    %27 = vector.shape_cast %26 : vector<1x256x225xf32> to vector<256x225xf32>
    %cst_23 = arith.constant dense<0.000000e+00> : vector<16x225xf32>
    %28 = tpu.matmul %25, %27, %cst_23 {dimension_numbers = #tpu.dot_dimension_numbers<[1], [0], [0], [1], [0, 0, 1, 1], [], []>} : vector<16x256xf32>, vector<256x225xf32>, vector<16x225xf32> -> vector<16x225xf32>
    %29 = arith.addf %24, %28 : vector<16x225xf32>
    %30 = vector.extract_strided_slice %7 {offsets = [64, 768], sizes = [16, 256], strides = [1, 1]} : vector<144x2048xf32> to vector<16x256xf32>
    %c4 = arith.constant 4 : index
    %c0_24 = arith.constant 0 : index
    %c0_25 = arith.constant 0 : index
    %31 = vector.load %arg6[%c4, %c0_24, %c0_25] : memref<9x256x225xf32, #tpu.memory_space<vmem>>, vector<1x256x225xf32>
    %32 = vector.shape_cast %31 : vector<1x256x225xf32> to vector<256x225xf32>
    %cst_26 = arith.constant dense<0.000000e+00> : vector<16x225xf32>
    %33 = tpu.matmul %30, %32, %cst_26 {dimension_numbers = #tpu.dot_dimension_numbers<[1], [0], [0], [1], [0, 0, 1, 1], [], []>} : vector<16x256xf32>, vector<256x225xf32>, vector<16x225xf32> -> vector<16x225xf32>
    %34 = arith.addf %29, %33 : vector<16x225xf32>
    %35 = vector.extract_strided_slice %7 {offsets = [80, 512], sizes = [16, 256], strides = [1, 1]} : vector<144x2048xf32> to vector<16x256xf32>
    %c5 = arith.constant 5 : index
    %c0_27 = arith.constant 0 : index
    %c0_28 = arith.constant 0 : index
    %36 = vector.load %arg6[%c5, %c0_27, %c0_28] : memref<9x256x225xf32, #tpu.memory_space<vmem>>, vector<1x256x225xf32>
    %37 = vector.shape_cast %36 : vector<1x256x225xf32> to vector<256x225xf32>
    %cst_29 = arith.constant dense<0.000000e+00> : vector<16x225xf32>
    %38 = tpu.matmul %35, %37, %cst_29 {dimension_numbers = #tpu.dot_dimension_numbers<[1], [0], [0], [1], [0, 0, 1, 1], [], []>} : vector<16x256xf32>, vector<256x225xf32>, vector<16x225xf32> -> vector<16x225xf32>
    %39 = arith.addf %34, %38 : vector<16x225xf32>
    %40 = vector.extract_strided_slice %7 {offsets = [96, 0], sizes = [16, 256], strides = [1, 1]} : vector<144x2048xf32> to vector<16x256xf32>
    %c6 = arith.constant 6 : index
    %c0_30 = arith.constant 0 : index
    %c0_31 = arith.constant 0 : index
    %41 = vector.load %arg6[%c6, %c0_30, %c0_31] : memref<9x256x225xf32, #tpu.memory_space<vmem>>, vector<1x256x225xf32>
    %42 = vector.shape_cast %41 : vector<1x256x225xf32> to vector<256x225xf32>
    %cst_32 = arith.constant dense<0.000000e+00> : vector<16x225xf32>
    %43 = tpu.matmul %40, %42, %cst_32 {dimension_numbers = #tpu.dot_dimension_numbers<[1], [0], [0], [1], [0, 0, 1, 1], [], []>} : vector<16x256xf32>, vector<256x225xf32>, vector<16x225xf32> -> vector<16x225xf32>
    %44 = arith.addf %39, %43 : vector<16x225xf32>
    %45 = vector.extract_strided_slice %7 {offsets = [112, 256], sizes = [16, 256], strides = [1, 1]} : vector<144x2048xf32> to vector<16x256xf32>
    %c7 = arith.constant 7 : index
    %c0_33 = arith.constant 0 : index
    %c0_34 = arith.constant 0 : index
    %46 = vector.load %arg6[%c7, %c0_33, %c0_34] : memref<9x256x225xf32, #tpu.memory_space<vmem>>, vector<1x256x225xf32>
    %47 = vector.shape_cast %46 : vector<1x256x225xf32> to vector<256x225xf32>
    %cst_35 = arith.constant dense<0.000000e+00> : vector<16x225xf32>
    %48 = tpu.matmul %45, %47, %cst_35 {dimension_numbers = #tpu.dot_dimension_numbers<[1], [0], [0], [1], [0, 0, 1, 1], [], []>} : vector<16x256xf32>, vector<256x225xf32>, vector<16x225xf32> -> vector<16x225xf32>
    %49 = arith.addf %44, %48 : vector<16x225xf32>
    %50 = vector.extract_strided_slice %7 {offsets = [128, 0], sizes = [16, 256], strides = [1, 1]} : vector<144x2048xf32> to vector<16x256xf32>
    %c8 = arith.constant 8 : index
    %c0_36 = arith.constant 0 : index
    %c0_37 = arith.constant 0 : index
    %51 = vector.load %arg6[%c8, %c0_36, %c0_37] : memref<9x256x225xf32, #tpu.memory_space<vmem>>, vector<1x256x225xf32>
    %52 = vector.shape_cast %51 : vector<1x256x225xf32> to vector<256x225xf32>
    %cst_38 = arith.constant dense<0.000000e+00> : vector<16x225xf32>
    %53 = tpu.matmul %50, %52, %cst_38 {dimension_numbers = #tpu.dot_dimension_numbers<[1], [0], [0], [1], [0, 0, 1, 1], [], []>} : vector<16x256xf32>, vector<256x225xf32>, vector<16x225xf32> -> vector<16x225xf32>
    %54 = arith.addf %49, %53 : vector<16x225xf32>
    %c0_39 = arith.constant 0 : index
    %c0_40 = arith.constant 0 : index
    %55 = vector.load %arg5[%c0_39, %c0_40] : memref<16x1xf32, #tpu.memory_space<vmem>>, vector<16x1xf32>
    %56 = vector.broadcast %55 : vector<16x1xf32> to vector<16x225xf32>
    %57 = arith.addf %54, %56 : vector<16x225xf32>
    %58 = vector.shape_cast %10 : vector<9x225xi1> to vector<1x9x225xi1>
    %59 = vector.shape_cast %57 : vector<16x225xf32> to vector<16x1x225xf32>
    %cst_41 = arith.constant 0xFF800000 : f32
    %60 = vector.shape_cast %58 : vector<1x9x225xi1> to vector<1x9x225xi1>
    %61 = vector.broadcast %60 : vector<1x9x225xi1> to vector<16x9x225xi1>
    %62 = vector.shape_cast %59 : vector<16x1x225xf32> to vector<16x1x225xf32>
    %63 = vector.broadcast %62 : vector<16x1x225xf32> to vector<16x9x225xf32>
    %64 = vector.broadcast %cst_41 : f32 to vector<16x9x225xf32>
    %65 = arith.select %61, %63, %64 : vector<16x9x225xi1>, vector<16x9x225xf32>
    %cst_42 = arith.constant dense<0xFF800000> : vector<16x9xf32>
    %66 = vector.multi_reduction <maximumf>, %65, %cst_42 [2] : vector<16x9x225xf32> to vector<16x9xf32>
    %c0_43 = arith.constant 0 : index
    %c0_44 = arith.constant 0 : index
    %67 = vector.load %arg8[%c0_43, %c0_44] : memref<144x16xf32, #tpu.memory_space<vmem>>, vector<144x16xf32>
    %cst_45 = arith.constant dense<0.000000e+00> : vector<144x9xf32>
    %68 = tpu.matmul %67, %66, %cst_45 {dimension_numbers = #tpu.dot_dimension_numbers<[1], [0], [0], [1], [0, 0, 1, 1], [], []>} : vector<144x16xf32>, vector<16x9xf32>, vector<144x9xf32> -> vector<144x9xf32>
    %69 = vector.extract_strided_slice %68 {offsets = [0, 0], sizes = [16, 9], strides = [1, 1]} : vector<144x9xf32> to vector<16x9xf32>
    %c0_46 = arith.constant 0 : index
    %c0_47 = arith.constant 0 : index
    %c0_48 = arith.constant 0 : index
    %70 = vector.load %arg10[%c0_46, %c0_47, %c0_48] : memref<9x9x9xf32, #tpu.memory_space<vmem>>, vector<1x9x9xf32>
    %71 = vector.shape_cast %70 : vector<1x9x9xf32> to vector<9x9xf32>
    %cst_49 = arith.constant dense<0.000000e+00> : vector<16x9xf32>
    %72 = tpu.matmul %69, %71, %cst_49 {dimension_numbers = #tpu.dot_dimension_numbers<[1], [0], [0], [1], [0, 0, 1, 1], [], []>} : vector<16x9xf32>, vector<9x9xf32>, vector<16x9xf32> -> vector<16x9xf32>
    %73 = vector.extract_strided_slice %68 {offsets = [16, 0], sizes = [16, 9], strides = [1, 1]} : vector<144x9xf32> to vector<16x9xf32>
    %c1_50 = arith.constant 1 : index
    %c0_51 = arith.constant 0 : index
    %c0_52 = arith.constant 0 : index
    %74 = vector.load %arg10[%c1_50, %c0_51, %c0_52] : memref<9x9x9xf32, #tpu.memory_space<vmem>>, vector<1x9x9xf32>
    %75 = vector.shape_cast %74 : vector<1x9x9xf32> to vector<9x9xf32>
    %cst_53 = arith.constant dense<0.000000e+00> : vector<16x9xf32>
    %76 = tpu.matmul %73, %75, %cst_53 {dimension_numbers = #tpu.dot_dimension_numbers<[1], [0], [0], [1], [0, 0, 1, 1], [], []>} : vector<16x9xf32>, vector<9x9xf32>, vector<16x9xf32> -> vector<16x9xf32>
    %77 = arith.addf %72, %76 : vector<16x9xf32>
    %78 = vector.extract_strided_slice %68 {offsets = [32, 0], sizes = [16, 9], strides = [1, 1]} : vector<144x9xf32> to vector<16x9xf32>
    %c2_54 = arith.constant 2 : index
    %c0_55 = arith.constant 0 : index
    %c0_56 = arith.constant 0 : index
    %79 = vector.load %arg10[%c2_54, %c0_55, %c0_56] : memref<9x9x9xf32, #tpu.memory_space<vmem>>, vector<1x9x9xf32>
    %80 = vector.shape_cast %79 : vector<1x9x9xf32> to vector<9x9xf32>
    %cst_57 = arith.constant dense<0.000000e+00> : vector<16x9xf32>
    %81 = tpu.matmul %78, %80, %cst_57 {dimension_numbers = #tpu.dot_dimension_numbers<[1], [0], [0], [1], [0, 0, 1, 1], [], []>} : vector<16x9xf32>, vector<9x9xf32>, vector<16x9xf32> -> vector<16x9xf32>
    %82 = arith.addf %77, %81 : vector<16x9xf32>
    %83 = vector.extract_strided_slice %68 {offsets = [48, 0], sizes = [16, 9], strides = [1, 1]} : vector<144x9xf32> to vector<16x9xf32>
    %c3_58 = arith.constant 3 : index
    %c0_59 = arith.constant 0 : index
    %c0_60 = arith.constant 0 : index
    %84 = vector.load %arg10[%c3_58, %c0_59, %c0_60] : memref<9x9x9xf32, #tpu.memory_space<vmem>>, vector<1x9x9xf32>
    %85 = vector.shape_cast %84 : vector<1x9x9xf32> to vector<9x9xf32>
    %cst_61 = arith.constant dense<0.000000e+00> : vector<16x9xf32>
    %86 = tpu.matmul %83, %85, %cst_61 {dimension_numbers = #tpu.dot_dimension_numbers<[1], [0], [0], [1], [0, 0, 1, 1], [], []>} : vector<16x9xf32>, vector<9x9xf32>, vector<16x9xf32> -> vector<16x9xf32>
    %87 = arith.addf %82, %86 : vector<16x9xf32>
    %88 = vector.extract_strided_slice %68 {offsets = [64, 0], sizes = [16, 9], strides = [1, 1]} : vector<144x9xf32> to vector<16x9xf32>
    %c4_62 = arith.constant 4 : index
    %c0_63 = arith.constant 0 : index
    %c0_64 = arith.constant 0 : index
    %89 = vector.load %arg10[%c4_62, %c0_63, %c0_64] : memref<9x9x9xf32, #tpu.memory_space<vmem>>, vector<1x9x9xf32>
    %90 = vector.shape_cast %89 : vector<1x9x9xf32> to vector<9x9xf32>
    %cst_65 = arith.constant dense<0.000000e+00> : vector<16x9xf32>
    %91 = tpu.matmul %88, %90, %cst_65 {dimension_numbers = #tpu.dot_dimension_numbers<[1], [0], [0], [1], [0, 0, 1, 1], [], []>} : vector<16x9xf32>, vector<9x9xf32>, vector<16x9xf32> -> vector<16x9xf32>
    %92 = arith.addf %87, %91 : vector<16x9xf32>
    %93 = vector.extract_strided_slice %68 {offsets = [80, 0], sizes = [16, 9], strides = [1, 1]} : vector<144x9xf32> to vector<16x9xf32>
    %c5_66 = arith.constant 5 : index
    %c0_67 = arith.constant 0 : index
    %c0_68 = arith.constant 0 : index
    %94 = vector.load %arg10[%c5_66, %c0_67, %c0_68] : memref<9x9x9xf32, #tpu.memory_space<vmem>>, vector<1x9x9xf32>
    %95 = vector.shape_cast %94 : vector<1x9x9xf32> to vector<9x9xf32>
    %cst_69 = arith.constant dense<0.000000e+00> : vector<16x9xf32>
    %96 = tpu.matmul %93, %95, %cst_69 {dimension_numbers = #tpu.dot_dimension_numbers<[1], [0], [0], [1], [0, 0, 1, 1], [], []>} : vector<16x9xf32>, vector<9x9xf32>, vector<16x9xf32> -> vector<16x9xf32>
    %97 = arith.addf %92, %96 : vector<16x9xf32>
    %98 = vector.extract_strided_slice %68 {offsets = [96, 0], sizes = [16, 9], strides = [1, 1]} : vector<144x9xf32> to vector<16x9xf32>
    %c6_70 = arith.constant 6 : index
    %c0_71 = arith.constant 0 : index
    %c0_72 = arith.constant 0 : index
    %99 = vector.load %arg10[%c6_70, %c0_71, %c0_72] : memref<9x9x9xf32, #tpu.memory_space<vmem>>, vector<1x9x9xf32>
    %100 = vector.shape_cast %99 : vector<1x9x9xf32> to vector<9x9xf32>
    %cst_73 = arith.constant dense<0.000000e+00> : vector<16x9xf32>
    %101 = tpu.matmul %98, %100, %cst_73 {dimension_numbers = #tpu.dot_dimension_numbers<[1], [0], [0], [1], [0, 0, 1, 1], [], []>} : vector<16x9xf32>, vector<9x9xf32>, vector<16x9xf32> -> vector<16x9xf32>
    %102 = arith.addf %97, %101 : vector<16x9xf32>
    %103 = vector.extract_strided_slice %68 {offsets = [112, 0], sizes = [16, 9], strides = [1, 1]} : vector<144x9xf32> to vector<16x9xf32>
    %c7_74 = arith.constant 7 : index
    %c0_75 = arith.constant 0 : index
    %c0_76 = arith.constant 0 : index
    %104 = vector.load %arg10[%c7_74, %c0_75, %c0_76] : memref<9x9x9xf32, #tpu.memory_space<vmem>>, vector<1x9x9xf32>
    %105 = vector.shape_cast %104 : vector<1x9x9xf32> to vector<9x9xf32>
    %cst_77 = arith.constant dense<0.000000e+00> : vector<16x9xf32>
    %106 = tpu.matmul %103, %105, %cst_77 {dimension_numbers = #tpu.dot_dimension_numbers<[1], [0], [0], [1], [0, 0, 1, 1], [], []>} : vector<16x9xf32>, vector<9x9xf32>, vector<16x9xf32> -> vector<16x9xf32>
    %107 = arith.addf %102, %106 : vector<16x9xf32>
    %108 = vector.extract_strided_slice %68 {offsets = [128, 0], sizes = [16, 9], strides = [1, 1]} : vector<144x9xf32> to vector<16x9xf32>
    %c8_78 = arith.constant 8 : index
    %c0_79 = arith.constant 0 : index
    %c0_80 = arith.constant 0 : index
    %109 = vector.load %arg10[%c8_78, %c0_79, %c0_80] : memref<9x9x9xf32, #tpu.memory_space<vmem>>, vector<1x9x9xf32>
    %110 = vector.shape_cast %109 : vector<1x9x9xf32> to vector<9x9xf32>
    %cst_81 = arith.constant dense<0.000000e+00> : vector<16x9xf32>
    %111 = tpu.matmul %108, %110, %cst_81 {dimension_numbers = #tpu.dot_dimension_numbers<[1], [0], [0], [1], [0, 0, 1, 1], [], []>} : vector<16x9xf32>, vector<9x9xf32>, vector<16x9xf32> -> vector<16x9xf32>
    %112 = arith.addf %107, %111 : vector<16x9xf32>
    %c0_82 = arith.constant 0 : index
    %c0_83 = arith.constant 0 : index
    %113 = vector.load %arg9[%c0_82, %c0_83] : memref<16x1xf32, #tpu.memory_space<vmem>>, vector<16x1xf32>
    %114 = vector.broadcast %113 : vector<16x1xf32> to vector<16x9xf32>
    %115 = arith.addf %112, %114 : vector<16x9xf32>
    %c0_84 = arith.constant 0 : index
    %c0_85 = arith.constant 0 : index
    %116 = vector.load %arg11[%c0_84, %c0_85] : memref<9x1024xf32, #tpu.memory_space<vmem>>, vector<9x1024xf32>
    %cst_86 = arith.constant dense<0.000000e+00> : vector<16x1024xf32>
    %117 = tpu.matmul %115, %116, %cst_86 {dimension_numbers = #tpu.dot_dimension_numbers<[1], [0], [0], [1], [0, 0, 1, 1], [], []>} : vector<16x9xf32>, vector<9x1024xf32>, vector<16x1024xf32> -> vector<16x1024xf32>
    %118 = vector.extract_strided_slice %7 {offsets = [0, 1024], sizes = [16, 256], strides = [1, 1]} : vector<144x2048xf32> to vector<16x256xf32>
    %c0_87 = arith.constant 0 : index
    %c0_88 = arith.constant 0 : index
    %c0_89 = arith.constant 0 : index
    %119 = vector.load %arg6[%c0_87, %c0_88, %c0_89] : memref<9x256x225xf32, #tpu.memory_space<vmem>>, vector<1x256x225xf32>
    %120 = vector.shape_cast %119 : vector<1x256x225xf32> to vector<256x225xf32>
    %cst_90 = arith.constant dense<0.000000e+00> : vector<16x225xf32>
    %121 = tpu.matmul %118, %120, %cst_90 {dimension_numbers = #tpu.dot_dimension_numbers<[1], [0], [0], [1], [0, 0, 1, 1], [], []>} : vector<16x256xf32>, vector<256x225xf32>, vector<16x225xf32> -> vector<16x225xf32>
    %122 = vector.extract_strided_slice %7 {offsets = [16, 1280], sizes = [16, 256], strides = [1, 1]} : vector<144x2048xf32> to vector<16x256xf32>
    %c1_91 = arith.constant 1 : index
    %c0_92 = arith.constant 0 : index
    %c0_93 = arith.constant 0 : index
    %123 = vector.load %arg6[%c1_91, %c0_92, %c0_93] : memref<9x256x225xf32, #tpu.memory_space<vmem>>, vector<1x256x225xf32>
    %124 = vector.shape_cast %123 : vector<1x256x225xf32> to vector<256x225xf32>
    %cst_94 = arith.constant dense<0.000000e+00> : vector<16x225xf32>
    %125 = tpu.matmul %122, %124, %cst_94 {dimension_numbers = #tpu.dot_dimension_numbers<[1], [0], [0], [1], [0, 0, 1, 1], [], []>} : vector<16x256xf32>, vector<256x225xf32>, vector<16x225xf32> -> vector<16x225xf32>
    %126 = arith.addf %121, %125 : vector<16x225xf32>
    %127 = vector.extract_strided_slice %7 {offsets = [32, 1024], sizes = [16, 256], strides = [1, 1]} : vector<144x2048xf32> to vector<16x256xf32>
    %c2_95 = arith.constant 2 : index
    %c0_96 = arith.constant 0 : index
    %c0_97 = arith.constant 0 : index
    %128 = vector.load %arg6[%c2_95, %c0_96, %c0_97] : memref<9x256x225xf32, #tpu.memory_space<vmem>>, vector<1x256x225xf32>
    %129 = vector.shape_cast %128 : vector<1x256x225xf32> to vector<256x225xf32>
    %cst_98 = arith.constant dense<0.000000e+00> : vector<16x225xf32>
    %130 = tpu.matmul %127, %129, %cst_98 {dimension_numbers = #tpu.dot_dimension_numbers<[1], [0], [0], [1], [0, 0, 1, 1], [], []>} : vector<16x256xf32>, vector<256x225xf32>, vector<16x225xf32> -> vector<16x225xf32>
    %131 = arith.addf %126, %130 : vector<16x225xf32>
    %132 = vector.extract_strided_slice %7 {offsets = [48, 1536], sizes = [16, 256], strides = [1, 1]} : vector<144x2048xf32> to vector<16x256xf32>
    %c3_99 = arith.constant 3 : index
    %c0_100 = arith.constant 0 : index
    %c0_101 = arith.constant 0 : index
    %133 = vector.load %arg6[%c3_99, %c0_100, %c0_101] : memref<9x256x225xf32, #tpu.memory_space<vmem>>, vector<1x256x225xf32>
    %134 = vector.shape_cast %133 : vector<1x256x225xf32> to vector<256x225xf32>
    %cst_102 = arith.constant dense<0.000000e+00> : vector<16x225xf32>
    %135 = tpu.matmul %132, %134, %cst_102 {dimension_numbers = #tpu.dot_dimension_numbers<[1], [0], [0], [1], [0, 0, 1, 1], [], []>} : vector<16x256xf32>, vector<256x225xf32>, vector<16x225xf32> -> vector<16x225xf32>
    %136 = arith.addf %131, %135 : vector<16x225xf32>
    %137 = vector.extract_strided_slice %7 {offsets = [64, 1792], sizes = [16, 256], strides = [1, 1]} : vector<144x2048xf32> to vector<16x256xf32>
    %c4_103 = arith.constant 4 : index
    %c0_104 = arith.constant 0 : index
    %c0_105 = arith.constant 0 : index
    %138 = vector.load %arg6[%c4_103, %c0_104, %c0_105] : memref<9x256x225xf32, #tpu.memory_space<vmem>>, vector<1x256x225xf32>
    %139 = vector.shape_cast %138 : vector<1x256x225xf32> to vector<256x225xf32>
    %cst_106 = arith.constant dense<0.000000e+00> : vector<16x225xf32>
    %140 = tpu.matmul %137, %139, %cst_106 {dimension_numbers = #tpu.dot_dimension_numbers<[1], [0], [0], [1], [0, 0, 1, 1], [], []>} : vector<16x256xf32>, vector<256x225xf32>, vector<16x225xf32> -> vector<16x225xf32>
    %141 = arith.addf %136, %140 : vector<16x225xf32>
    %142 = vector.extract_strided_slice %7 {offsets = [80, 1536], sizes = [16, 256], strides = [1, 1]} : vector<144x2048xf32> to vector<16x256xf32>
    %c5_107 = arith.constant 5 : index
    %c0_108 = arith.constant 0 : index
    %c0_109 = arith.constant 0 : index
    %143 = vector.load %arg6[%c5_107, %c0_108, %c0_109] : memref<9x256x225xf32, #tpu.memory_space<vmem>>, vector<1x256x225xf32>
    %144 = vector.shape_cast %143 : vector<1x256x225xf32> to vector<256x225xf32>
    %cst_110 = arith.constant dense<0.000000e+00> : vector<16x225xf32>
    %145 = tpu.matmul %142, %144, %cst_110 {dimension_numbers = #tpu.dot_dimension_numbers<[1], [0], [0], [1], [0, 0, 1, 1], [], []>} : vector<16x256xf32>, vector<256x225xf32>, vector<16x225xf32> -> vector<16x225xf32>
    %146 = arith.addf %141, %145 : vector<16x225xf32>
    %147 = vector.extract_strided_slice %7 {offsets = [96, 1024], sizes = [16, 256], strides = [1, 1]} : vector<144x2048xf32> to vector<16x256xf32>
    %c6_111 = arith.constant 6 : index
    %c0_112 = arith.constant 0 : index
    %c0_113 = arith.constant 0 : index
    %148 = vector.load %arg6[%c6_111, %c0_112, %c0_113] : memref<9x256x225xf32, #tpu.memory_space<vmem>>, vector<1x256x225xf32>
    %149 = vector.shape_cast %148 : vector<1x256x225xf32> to vector<256x225xf32>
    %cst_114 = arith.constant dense<0.000000e+00> : vector<16x225xf32>
    %150 = tpu.matmul %147, %149, %cst_114 {dimension_numbers = #tpu.dot_dimension_numbers<[1], [0], [0], [1], [0, 0, 1, 1], [], []>} : vector<16x256xf32>, vector<256x225xf32>, vector<16x225xf32> -> vector<16x225xf32>
    %151 = arith.addf %146, %150 : vector<16x225xf32>
    %152 = vector.extract_strided_slice %7 {offsets = [112, 1280], sizes = [16, 256], strides = [1, 1]} : vector<144x2048xf32> to vector<16x256xf32>
    %c7_115 = arith.constant 7 : index
    %c0_116 = arith.constant 0 : index
    %c0_117 = arith.constant 0 : index
    %153 = vector.load %arg6[%c7_115, %c0_116, %c0_117] : memref<9x256x225xf32, #tpu.memory_space<vmem>>, vector<1x256x225xf32>
    %154 = vector.shape_cast %153 : vector<1x256x225xf32> to vector<256x225xf32>
    %cst_118 = arith.constant dense<0.000000e+00> : vector<16x225xf32>
    %155 = tpu.matmul %152, %154, %cst_118 {dimension_numbers = #tpu.dot_dimension_numbers<[1], [0], [0], [1], [0, 0, 1, 1], [], []>} : vector<16x256xf32>, vector<256x225xf32>, vector<16x225xf32> -> vector<16x225xf32>
    %156 = arith.addf %151, %155 : vector<16x225xf32>
    %157 = vector.extract_strided_slice %7 {offsets = [128, 1024], sizes = [16, 256], strides = [1, 1]} : vector<144x2048xf32> to vector<16x256xf32>
    %c8_119 = arith.constant 8 : index
    %c0_120 = arith.constant 0 : index
    %c0_121 = arith.constant 0 : index
    %158 = vector.load %arg6[%c8_119, %c0_120, %c0_121] : memref<9x256x225xf32, #tpu.memory_space<vmem>>, vector<1x256x225xf32>
    %159 = vector.shape_cast %158 : vector<1x256x225xf32> to vector<256x225xf32>
    %cst_122 = arith.constant dense<0.000000e+00> : vector<16x225xf32>
    %160 = tpu.matmul %157, %159, %cst_122 {dimension_numbers = #tpu.dot_dimension_numbers<[1], [0], [0], [1], [0, 0, 1, 1], [], []>} : vector<16x256xf32>, vector<256x225xf32>, vector<16x225xf32> -> vector<16x225xf32>
    %161 = arith.addf %156, %160 : vector<16x225xf32>
    %c0_123 = arith.constant 0 : index
    %c0_124 = arith.constant 0 : index
    %162 = vector.load %arg5[%c0_123, %c0_124] : memref<16x1xf32, #tpu.memory_space<vmem>>, vector<16x1xf32>
    %163 = vector.broadcast %162 : vector<16x1xf32> to vector<16x225xf32>
    %164 = arith.addf %161, %163 : vector<16x225xf32>
    %165 = vector.shape_cast %10 : vector<9x225xi1> to vector<1x9x225xi1>
    %166 = vector.shape_cast %164 : vector<16x225xf32> to vector<16x1x225xf32>
    %cst_125 = arith.constant 0xFF800000 : f32
    %167 = vector.shape_cast %165 : vector<1x9x225xi1> to vector<1x9x225xi1>
    %168 = vector.broadcast %167 : vector<1x9x225xi1> to vector<16x9x225xi1>
    %169 = vector.shape_cast %166 : vector<16x1x225xf32> to vector<16x1x225xf32>
    %170 = vector.broadcast %169 : vector<16x1x225xf32> to vector<16x9x225xf32>
    %171 = vector.broadcast %cst_125 : f32 to vector<16x9x225xf32>
    %172 = arith.select %168, %170, %171 : vector<16x9x225xi1>, vector<16x9x225xf32>
    %cst_126 = arith.constant dense<0xFF800000> : vector<16x9xf32>
    %173 = vector.multi_reduction <maximumf>, %172, %cst_126 [2] : vector<16x9x225xf32> to vector<16x9xf32>
    %c0_127 = arith.constant 0 : index
    %c0_128 = arith.constant 0 : index
    %174 = vector.load %arg8[%c0_127, %c0_128] : memref<144x16xf32, #tpu.memory_space<vmem>>, vector<144x16xf32>
    %cst_129 = arith.constant dense<0.000000e+00> : vector<144x9xf32>
    %175 = tpu.matmul %174, %173, %cst_129 {dimension_numbers = #tpu.dot_dimension_numbers<[1], [0], [0], [1], [0, 0, 1, 1], [], []>} : vector<144x16xf32>, vector<16x9xf32>, vector<144x9xf32> -> vector<144x9xf32>
    %176 = vector.extract_strided_slice %175 {offsets = [0, 0], sizes = [16, 9], strides = [1, 1]} : vector<144x9xf32> to vector<16x9xf32>
    %c0_130 = arith.constant 0 : index
    %c0_131 = arith.constant 0 : index
    %c0_132 = arith.constant 0 : index
    %177 = vector.load %arg10[%c0_130, %c0_131, %c0_132] : memref<9x9x9xf32, #tpu.memory_space<vmem>>, vector<1x9x9xf32>
    %178 = vector.shape_cast %177 : vector<1x9x9xf32> to vector<9x9xf32>
    %cst_133 = arith.constant dense<0.000000e+00> : vector<16x9xf32>
    %179 = tpu.matmul %176, %178, %cst_133 {dimension_numbers = #tpu.dot_dimension_numbers<[1], [0], [0], [1], [0, 0, 1, 1], [], []>} : vector<16x9xf32>, vector<9x9xf32>, vector<16x9xf32> -> vector<16x9xf32>
    %180 = vector.extract_strided_slice %175 {offsets = [16, 0], sizes = [16, 9], strides = [1, 1]} : vector<144x9xf32> to vector<16x9xf32>
    %c1_134 = arith.constant 1 : index
    %c0_135 = arith.constant 0 : index
    %c0_136 = arith.constant 0 : index
    %181 = vector.load %arg10[%c1_134, %c0_135, %c0_136] : memref<9x9x9xf32, #tpu.memory_space<vmem>>, vector<1x9x9xf32>
    %182 = vector.shape_cast %181 : vector<1x9x9xf32> to vector<9x9xf32>
    %cst_137 = arith.constant dense<0.000000e+00> : vector<16x9xf32>
    %183 = tpu.matmul %180, %182, %cst_137 {dimension_numbers = #tpu.dot_dimension_numbers<[1], [0], [0], [1], [0, 0, 1, 1], [], []>} : vector<16x9xf32>, vector<9x9xf32>, vector<16x9xf32> -> vector<16x9xf32>
    %184 = arith.addf %179, %183 : vector<16x9xf32>
    %185 = vector.extract_strided_slice %175 {offsets = [32, 0], sizes = [16, 9], strides = [1, 1]} : vector<144x9xf32> to vector<16x9xf32>
    %c2_138 = arith.constant 2 : index
    %c0_139 = arith.constant 0 : index
    %c0_140 = arith.constant 0 : index
    %186 = vector.load %arg10[%c2_138, %c0_139, %c0_140] : memref<9x9x9xf32, #tpu.memory_space<vmem>>, vector<1x9x9xf32>
    %187 = vector.shape_cast %186 : vector<1x9x9xf32> to vector<9x9xf32>
    %cst_141 = arith.constant dense<0.000000e+00> : vector<16x9xf32>
    %188 = tpu.matmul %185, %187, %cst_141 {dimension_numbers = #tpu.dot_dimension_numbers<[1], [0], [0], [1], [0, 0, 1, 1], [], []>} : vector<16x9xf32>, vector<9x9xf32>, vector<16x9xf32> -> vector<16x9xf32>
    %189 = arith.addf %184, %188 : vector<16x9xf32>
    %190 = vector.extract_strided_slice %175 {offsets = [48, 0], sizes = [16, 9], strides = [1, 1]} : vector<144x9xf32> to vector<16x9xf32>
    %c3_142 = arith.constant 3 : index
    %c0_143 = arith.constant 0 : index
    %c0_144 = arith.constant 0 : index
    %191 = vector.load %arg10[%c3_142, %c0_143, %c0_144] : memref<9x9x9xf32, #tpu.memory_space<vmem>>, vector<1x9x9xf32>
    %192 = vector.shape_cast %191 : vector<1x9x9xf32> to vector<9x9xf32>
    %cst_145 = arith.constant dense<0.000000e+00> : vector<16x9xf32>
    %193 = tpu.matmul %190, %192, %cst_145 {dimension_numbers = #tpu.dot_dimension_numbers<[1], [0], [0], [1], [0, 0, 1, 1], [], []>} : vector<16x9xf32>, vector<9x9xf32>, vector<16x9xf32> -> vector<16x9xf32>
    %194 = arith.addf %189, %193 : vector<16x9xf32>
    %195 = vector.extract_strided_slice %175 {offsets = [64, 0], sizes = [16, 9], strides = [1, 1]} : vector<144x9xf32> to vector<16x9xf32>
    %c4_146 = arith.constant 4 : index
    %c0_147 = arith.constant 0 : index
    %c0_148 = arith.constant 0 : index
    %196 = vector.load %arg10[%c4_146, %c0_147, %c0_148] : memref<9x9x9xf32, #tpu.memory_space<vmem>>, vector<1x9x9xf32>
    %197 = vector.shape_cast %196 : vector<1x9x9xf32> to vector<9x9xf32>
    %cst_149 = arith.constant dense<0.000000e+00> : vector<16x9xf32>
    %198 = tpu.matmul %195, %197, %cst_149 {dimension_numbers = #tpu.dot_dimension_numbers<[1], [0], [0], [1], [0, 0, 1, 1], [], []>} : vector<16x9xf32>, vector<9x9xf32>, vector<16x9xf32> -> vector<16x9xf32>
    %199 = arith.addf %194, %198 : vector<16x9xf32>
    %200 = vector.extract_strided_slice %175 {offsets = [80, 0], sizes = [16, 9], strides = [1, 1]} : vector<144x9xf32> to vector<16x9xf32>
    %c5_150 = arith.constant 5 : index
    %c0_151 = arith.constant 0 : index
    %c0_152 = arith.constant 0 : index
    %201 = vector.load %arg10[%c5_150, %c0_151, %c0_152] : memref<9x9x9xf32, #tpu.memory_space<vmem>>, vector<1x9x9xf32>
    %202 = vector.shape_cast %201 : vector<1x9x9xf32> to vector<9x9xf32>
    %cst_153 = arith.constant dense<0.000000e+00> : vector<16x9xf32>
    %203 = tpu.matmul %200, %202, %cst_153 {dimension_numbers = #tpu.dot_dimension_numbers<[1], [0], [0], [1], [0, 0, 1, 1], [], []>} : vector<16x9xf32>, vector<9x9xf32>, vector<16x9xf32> -> vector<16x9xf32>
    %204 = arith.addf %199, %203 : vector<16x9xf32>
    %205 = vector.extract_strided_slice %175 {offsets = [96, 0], sizes = [16, 9], strides = [1, 1]} : vector<144x9xf32> to vector<16x9xf32>
    %c6_154 = arith.constant 6 : index
    %c0_155 = arith.constant 0 : index
    %c0_156 = arith.constant 0 : index
    %206 = vector.load %arg10[%c6_154, %c0_155, %c0_156] : memref<9x9x9xf32, #tpu.memory_space<vmem>>, vector<1x9x9xf32>
    %207 = vector.shape_cast %206 : vector<1x9x9xf32> to vector<9x9xf32>
    %cst_157 = arith.constant dense<0.000000e+00> : vector<16x9xf32>
    %208 = tpu.matmul %205, %207, %cst_157 {dimension_numbers = #tpu.dot_dimension_numbers<[1], [0], [0], [1], [0, 0, 1, 1], [], []>} : vector<16x9xf32>, vector<9x9xf32>, vector<16x9xf32> -> vector<16x9xf32>
    %209 = arith.addf %204, %208 : vector<16x9xf32>
    %210 = vector.extract_strided_slice %175 {offsets = [112, 0], sizes = [16, 9], strides = [1, 1]} : vector<144x9xf32> to vector<16x9xf32>
    %c7_158 = arith.constant 7 : index
    %c0_159 = arith.constant 0 : index
    %c0_160 = arith.constant 0 : index
    %211 = vector.load %arg10[%c7_158, %c0_159, %c0_160] : memref<9x9x9xf32, #tpu.memory_space<vmem>>, vector<1x9x9xf32>
    %212 = vector.shape_cast %211 : vector<1x9x9xf32> to vector<9x9xf32>
    %cst_161 = arith.constant dense<0.000000e+00> : vector<16x9xf32>
    %213 = tpu.matmul %210, %212, %cst_161 {dimension_numbers = #tpu.dot_dimension_numbers<[1], [0], [0], [1], [0, 0, 1, 1], [], []>} : vector<16x9xf32>, vector<9x9xf32>, vector<16x9xf32> -> vector<16x9xf32>
    %214 = arith.addf %209, %213 : vector<16x9xf32>
    %215 = vector.extract_strided_slice %175 {offsets = [128, 0], sizes = [16, 9], strides = [1, 1]} : vector<144x9xf32> to vector<16x9xf32>
    %c8_162 = arith.constant 8 : index
    %c0_163 = arith.constant 0 : index
    %c0_164 = arith.constant 0 : index
    %216 = vector.load %arg10[%c8_162, %c0_163, %c0_164] : memref<9x9x9xf32, #tpu.memory_space<vmem>>, vector<1x9x9xf32>
    %217 = vector.shape_cast %216 : vector<1x9x9xf32> to vector<9x9xf32>
    %cst_165 = arith.constant dense<0.000000e+00> : vector<16x9xf32>
    %218 = tpu.matmul %215, %217, %cst_165 {dimension_numbers = #tpu.dot_dimension_numbers<[1], [0], [0], [1], [0, 0, 1, 1], [], []>} : vector<16x9xf32>, vector<9x9xf32>, vector<16x9xf32> -> vector<16x9xf32>
    %219 = arith.addf %214, %218 : vector<16x9xf32>
    %c0_166 = arith.constant 0 : index
    %c0_167 = arith.constant 0 : index
    %220 = vector.load %arg9[%c0_166, %c0_167] : memref<16x1xf32, #tpu.memory_space<vmem>>, vector<16x1xf32>
    %221 = vector.broadcast %220 : vector<16x1xf32> to vector<16x9xf32>
    %222 = arith.addf %219, %221 : vector<16x9xf32>
    %c0_168 = arith.constant 0 : index
    %c0_169 = arith.constant 0 : index
    %223 = vector.load %arg11[%c0_168, %c0_169] : memref<9x1024xf32, #tpu.memory_space<vmem>>, vector<9x1024xf32>
    %cst_170 = arith.constant dense<0.000000e+00> : vector<16x1024xf32>
    %224 = tpu.matmul %222, %223, %cst_170 {dimension_numbers = #tpu.dot_dimension_numbers<[1], [0], [0], [1], [0, 0, 1, 1], [], []>} : vector<16x9xf32>, vector<9x1024xf32>, vector<16x1024xf32> -> vector<16x1024xf32>
    %225 = tpu.concatenate %117, %224 in 1 : vector<16x1024xf32>, vector<16x1024xf32> -> vector<16x2048xf32>
    %c0_171 = arith.constant 0 : index
    %c0_172 = arith.constant 0 : index
    %226 = vector.load %arg12[%c0_171, %c0_172] : memref<16x16xf32, #tpu.memory_space<vmem>>, vector<16x16xf32>
    %cst_173 = arith.constant dense<0.000000e+00> : vector<16x2048xf32>
    %227 = tpu.matmul %226, %5, %cst_173 {dimension_numbers = #tpu.dot_dimension_numbers<[1], [0], [0], [1], [0, 0, 1, 1], [], []>} : vector<16x16xf32>, vector<16x2048xf32>, vector<16x2048xf32> -> vector<16x2048xf32>
    %c0_174 = arith.constant 0 : index
    %c0_175 = arith.constant 0 : index
    %228 = vector.load %arg13[%c0_174, %c0_175] : memref<16x1xf32, #tpu.memory_space<vmem>>, vector<16x1xf32>
    %229 = vector.broadcast %228 : vector<16x1xf32> to vector<16x2048xf32>
    %230 = arith.addf %227, %229 : vector<16x2048xf32>
    %c0_176 = arith.constant 0 : index
    %c0_177 = arith.constant 0 : index
    %231 = vector.load %arg14[%c0_176, %c0_177] : memref<32x16xf32, #tpu.memory_space<vmem>>, vector<32x16xf32>
    %232 = arith.addf %225, %230 : vector<16x2048xf32>
    %cst_178 = arith.constant dense<0.000000e+00> : vector<32x2048xf32>
    %233 = tpu.matmul %231, %232, %cst_178 {dimension_numbers = #tpu.dot_dimension_numbers<[1], [0], [0], [1], [0, 0, 1, 1], [], []>} : vector<32x16xf32>, vector<16x2048xf32>, vector<32x2048xf32> -> vector<32x2048xf32>
    %c0_179 = arith.constant 0 : index
    %c0_180 = arith.constant 0 : index
    %234 = vector.load %arg15[%c0_179, %c0_180] : memref<32x1xf32, #tpu.memory_space<vmem>>, vector<32x1xf32>
    %235 = vector.broadcast %234 : vector<32x1xf32> to vector<32x2048xf32>
    %236 = arith.addf %233, %235 : vector<32x2048xf32>
    %cst_181 = arith.constant 0.000000e+00 : f32
    %237 = vector.broadcast %cst_181 : f32 to vector<32x2048xf32>
    %238 = arith.subf %237, %236 : vector<32x2048xf32>
    %239 = math.exp %238 : vector<32x2048xf32>
    %cst_182 = arith.constant 1.000000e+00 : f32
    %240 = vector.broadcast %cst_182 : f32 to vector<32x2048xf32>
    %241 = arith.addf %240, %239 : vector<32x2048xf32>
    %cst_183 = arith.constant 1.000000e+00 : f32
    %242 = vector.broadcast %cst_183 : f32 to vector<32x2048xf32>
    %243 = arith.divf %242, %241 : vector<32x2048xf32>
    %244 = arith.mulf %0, %243 : vector<32x2048xf32>
    %c0_184 = arith.constant 0 : index
    %c0_185 = arith.constant 0 : index
    %245 = vector.load %arg16[%c0_184, %c0_185] : memref<32x2048xf32, #tpu.memory_space<vmem>>, vector<32x2048xf32>
    tpu.vector_store %arg16[%c0_184, %c0_185], %244 {strides = array<i32>} : memref<32x2048xf32, #tpu.memory_space<vmem>>, vector<32x2048xf32>,
    return
  }
  func.func @transform_0(%arg0: i32) -> (i32, i32) {
    %c0_i32 = arith.constant 0 : i32
    %c0_i32_0 = arith.constant 0 : i32
    return %c0_i32, %arg0 : i32, i32
  }
  func.func @transform_1(%arg0: i32) -> (i32, i32) {
    %c0_i32 = arith.constant 0 : i32
    %c0_i32_0 = arith.constant 0 : i32
    %c0_i32_1 = arith.constant 0 : i32
    return %c0_i32, %c0_i32_0 : i32, i32
  }
  func.func @transform_2(%arg0: i32) -> (i32, i32) {
    %c0_i32 = arith.constant 0 : i32
    %c0_i32_0 = arith.constant 0 : i32
    %c0_i32_1 = arith.constant 0 : i32
    return %c0_i32, %c0_i32_0 : i32, i32
  }
  func.func @transform_3(%arg0: i32) -> (i32, i32) {
    %c0_i32 = arith.constant 0 : i32
    %c0_i32_0 = arith.constant 0 : i32
    %c0_i32_1 = arith.constant 0 : i32
    return %c0_i32, %c0_i32_0 : i32, i32
  }
  func.func @transform_4(%arg0: i32) -> (i32, i32) {
    %c0_i32 = arith.constant 0 : i32
    %c0_i32_0 = arith.constant 0 : i32
    %c0_i32_1 = arith.constant 0 : i32
    return %c0_i32, %c0_i32_0 : i32, i32
  }
  func.func @transform_5(%arg0: i32) -> (i32, i32, i32) {
    %c0_i32 = arith.constant 0 : i32
    %c0_i32_0 = arith.constant 0 : i32
    %c0_i32_1 = arith.constant 0 : i32
    %c0_i32_2 = arith.constant 0 : i32
    return %c0_i32, %c0_i32_0, %c0_i32_1 : i32, i32, i32
  }
  func.func @transform_6(%arg0: i32) -> (i32, i32) {
    %c0_i32 = arith.constant 0 : i32
    %c0_i32_0 = arith.constant 0 : i32
    %c0_i32_1 = arith.constant 0 : i32
    return %c0_i32, %c0_i32_0 : i32, i32
  }
  func.func @transform_7(%arg0: i32) -> (i32, i32) {
    %c0_i32 = arith.constant 0 : i32
    %c0_i32_0 = arith.constant 0 : i32
    %c0_i32_1 = arith.constant 0 : i32
    return %c0_i32, %c0_i32_0 : i32, i32
  }
  func.func @transform_8(%arg0: i32) -> (i32, i32) {
    %c0_i32 = arith.constant 0 : i32
    %c0_i32_0 = arith.constant 0 : i32
    %c0_i32_1 = arith.constant 0 : i32
    return %c0_i32, %c0_i32_0 : i32, i32
  }
  func.func @transform_9(%arg0: i32) -> (i32, i32, i32) {
    %c0_i32 = arith.constant 0 : i32
    %c0_i32_0 = arith.constant 0 : i32
    %c0_i32_1 = arith.constant 0 : i32
    %c0_i32_2 = arith.constant 0 : i32
    return %c0_i32, %c0_i32_0, %c0_i32_1 : i32, i32, i32
  }
  func.func @transform_10(%arg0: i32) -> (i32, i32) {
    %c0_i32 = arith.constant 0 : i32
    %c0_i32_0 = arith.constant 0 : i32
    %c0_i32_1 = arith.constant 0 : i32
    return %c0_i32, %c0_i32_0 : i32, i32
  }
  func.func @transform_11(%arg0: i32) -> (i32, i32) {
    %c0_i32 = arith.constant 0 : i32
    %c0_i32_0 = arith.constant 0 : i32
    %c0_i32_1 = arith.constant 0 : i32
    return %c0_i32, %c0_i32_0 : i32, i32
  }
  func.func @transform_12(%arg0: i32) -> (i32, i32) {
    %c0_i32 = arith.constant 0 : i32
    %c0_i32_0 = arith.constant 0 : i32
    %c0_i32_1 = arith.constant 0 : i32
    return %c0_i32, %c0_i32_0 : i32, i32
  }
  func.func @transform_13(%arg0: i32) -> (i32, i32) {
    %c0_i32 = arith.constant 0 : i32
    %c0_i32_0 = arith.constant 0 : i32
    %c0_i32_1 = arith.constant 0 : i32
    return %c0_i32, %c0_i32_0 : i32, i32
  }
  func.func @transform_14(%arg0: i32) -> (i32, i32) {
    %c0_i32 = arith.constant 0 : i32
    %c0_i32_0 = arith.constant 0 : i32
    %c0_i32_1 = arith.constant 0 : i32
    return %c0_i32, %c0_i32_0 : i32, i32
  }
  func.func @transform_15(%arg0: i32) -> (i32, i32) {
    %c0_i32 = arith.constant 0 : i32
    %c0_i32_0 = arith.constant 0 : i32
    return %c0_i32, %arg0 : i32, i32
  }
}

</mosaic_0001>

<bundles_post_ra>
// kernel: esa_pallas.1
= control target key start
LH: loop header
LB: loop body
LE: loop exit
PB: predicated region body
PF: predicated region fallthrough
CT: control target
= control target key end

     0   :  { %s19586_s0 = inlined_call_operand.vmem [shape: f32[32,4096], index: 0, kind: input, shape index: {}]   ;;  %s19587_s1 = inlined_call_operand.vmem [shape: f32[16,32], index: 1, kind: input, shape index: {}]   ;;  %s19588_s2 = inlined_call_operand.vmem [shape: f32[16,1], index: 2, kind: input, shape index: {}]   ;;  %s19589_s3 = inlined_call_operand.vmem [shape: f32[144,16], index: 3, kind: input, shape index: {}]   ;;  %s19590_s4 = inlined_call_operand.vmem [shape: f32[16,1], index: 4, kind: input, shape index: {}]   ;;  %s19591_s5 = inlined_call_operand.vmem [shape: f32[9,256,225], index: 5, kind: input, shape index: {}]   ;;  %s19592_s6 = inlined_call_operand.vmem [shape: f32[9,225], index: 6, kind: input, shape index: {}]   ;;  %s19593_s7 = inlined_call_operand.vmem [shape: f32[144,16], index: 7, kind: input, shape index: {}]   ;;  %s19594_s8 = inlined_call_operand.vmem [shape: f32[16,1], index: 8, kind: input, shape index: {}]   ;;  %s19595_s9 = inlined_call_operand.vmem [shape: f32[9,9,9], index: 9, kind: input, shape index: {}]   ;;  %s19596_s10 = inlined_call_operand.vmem [shape: f32[9,1024], index: 10, kind: input, shape index: {}]   ;;  %s19597_s11 = inlined_call_operand.vmem [shape: f32[16,16], index: 11, kind: input, shape index: {}]   ;;  %s19598_s12 = inlined_call_operand.vmem [shape: f32[16,1], index: 12, kind: input, shape index: {}]   ;;  %s19599_s13 = inlined_call_operand.vmem [shape: f32[32,16], index: 13, kind: input, shape index: {}]   ;;  %s19600_s14 = inlined_call_operand.vmem [shape: f32[32,1], index: 14, kind: input, shape index: {}]   ;;  %s19601_s15 = inlined_call_operand.vmem [shape: f32[32,4096], index: 15, kind: output, shape index: {}]  }
   0x1   :  { %19644 = sst [smem:[#allocation55_spill]] %s19586_s0 }
   0x2   :  { %19645 = sst [smem:[#allocation56_spill]] %s19587_s1 }
   0x3   :  { %s12995_s18 = smov 0   ;;  %s12997_s19 = smov 0  }
   0x4   :  { %s12999_s20 = smov 0  }
   0x5 LB: > { %s19602_s21 = sadd.s32 4294967295, %s12910_s20   ;;  %s13012_s22 = sadd.s32 1, %s12910_s20   ;;  %s12910_s20 = sphi %s12999_s20, %s19763_s20   ;;  %s12906_s19 = sphi %s12997_s19, %s19762_s19   ;;  %s12902_s18 = sphi %s12995_s18, %s19761_s18  }
   0x6   : > { %s29_s23 = ssub.s32 %s12910_s20, %s13012_s22  ;;  %s32_s24 = sadd.s32 1, %s12906_s19 }
   0x7   : > { %p30_p0 = scmp.eq.s32.totalorder %s29_s23, 0  ;;  %p39_p1 = scmp.ne.s32.totalorder %s12906_s19, %s12902_s18 }
   0x8   : > { %p40_p2 = scmp.eq.s32.totalorder %s12910_s20, 0  ;;  %p363_p3 = scmp.eq.s32.totalorder %s19602_s21, 1 }
   0x9   : > { %s13023_s25 = scalar_select %p30_p0, %s12906_s19, %s32_s24  }
   0xa   : > { %p41_p4 = por %p40_p2, %p39_p1  ;;  %p13025_p5 = por %p363_p3, %p39_p1 }
   0xb   : > { %p10733_p6 = scmp.ge.s32.totalorder %s12910_s20, 2 }
   0xd   : > { %427 = sbr.rel (%p10733_p6) target bundleno = 60 (0x3c), region = 72 }
  0x12   : > { %430 = sbr.rel (!%p41_p4) target bundleno = 60 (0x3c), region = 76  ;;  %s432_s27 = sand.u32 (%p41_p4), 1, %s12906_s19  }
  0x13   : > { %s11603_s28 = sshll.u32 (%p41_p4), %s12910_s20, 7  ;;  %s10734_s29 = sshll.u32 (%p41_p4), %s432_s27, 9 }
  0x14   : > { %s19647_s0 = sld [smem:[#allocation55_spill]] (%p41_p4)  ;;  %s13040_s23 = scalar_lea.vmem (%p41_p4), [#allocation2], %s10734_s29 }
  0x1a   : > { %s13035_s17 = scalar_lea.vmem %s19647_s0, %s11603_s28 }
  0x1b   : > { %v450_v0 = vld [vmem:[%s13035_s17] sm:$0xff]  ;;  %v452_v1 = vld [vmem:[%s13035_s17 + $0x8] sm:$0xff]  ;;  %v454_v2 = vld [vmem:[%s13035_s17 + $0x10] sm:$0xff] }
  0x1c   : > { %451 = vst [vmem:[%s13040_s23] sm:$0xff] %v450_v0  ;;  %453 = vst [vmem:[%s13040_s23 + $0x8] sm:$0xff] %v452_v1  ;;  %v456_v3 = vld [vmem:[%s13035_s17 + $0x18] sm:$0xff]  ;;  %v458_v4 = vld [vmem:[%s13035_s17 + $0x20] sm:$0xff] }
  0x1d   : > { %455 = vst [vmem:[%s13040_s23 + $0x10] sm:$0xff] %v454_v2  ;;  %v460_v5 = vld [vmem:[%s13035_s17 + $0x28] sm:$0xff]  ;;  %457 = vst [vmem:[%s13040_s23 + $0x18] sm:$0xff] %v456_v3  ;;  %v462_v6 = vld [vmem:[%s13035_s17 + $0x30] sm:$0xff] }
  0x1e   : > { %459 = vst [vmem:[%s13040_s23 + $0x20] sm:$0xff] %v458_v4  ;;  %461 = vst [vmem:[%s13040_s23 + $0x28] sm:$0xff] %v460_v5  ;;  %v464_v7 = vld [vmem:[%s13035_s17 + $0x38] sm:$0xff]  ;;  %v466_v8 = vld [vmem:[%s13035_s17 + $0x40] sm:$0xff] }
  0x1f   : > { %463 = vst [vmem:[%s13040_s23 + $0x30] sm:$0xff] %v462_v6  ;;  %465 = vst [vmem:[%s13040_s23 + $0x38] sm:$0xff] %v464_v7  ;;  %v468_v9 = vld [vmem:[%s13035_s17 + $0x48] sm:$0xff]  ;;  %v470_v10 = vld [vmem:[%s13035_s17 + $0x50] sm:$0xff] }
  0x20   : > { %467 = vst [vmem:[%s13040_s23 + $0x40] sm:$0xff] %v466_v8  ;;  %v472_v11 = vld [vmem:[%s13035_s17 + $0x58] sm:$0xff]  ;;  %469 = vst [vmem:[%s13040_s23 + $0x48] sm:$0xff] %v468_v9  ;;  %v474_v12 = vld [vmem:[%s13035_s17 + $0x60] sm:$0xff] }
  0x21   : > { %471 = vst [vmem:[%s13040_s23 + $0x50] sm:$0xff] %v470_v10  ;;  %473 = vst [vmem:[%s13040_s23 + $0x58] sm:$0xff] %v472_v11  ;;  %v476_v13 = vld [vmem:[%s13035_s17 + $0x68] sm:$0xff]  ;;  %v478_v14 = vld [vmem:[%s13035_s17 + $0x70] sm:$0xff] }
  0x22   : > { %475 = vst [vmem:[%s13040_s23 + $0x60] sm:$0xff] %v474_v12  ;;  %477 = vst [vmem:[%s13040_s23 + $0x68] sm:$0xff] %v476_v13  ;;  %v480_v15 = vld [vmem:[%s13035_s17 + $0x78] sm:$0xff]  ;;  %v482_v16 = vld [vmem:[%s13035_s17 + $0x100] sm:$0xff] }
  0x23   : > { %479 = vst [vmem:[%s13040_s23 + $0x70] sm:$0xff] %v478_v14  ;;  %v484_v17 = vld [vmem:[%s13035_s17 + $0x108] sm:$0xff]  ;;  %481 = vst [vmem:[%s13040_s23 + $0x78] sm:$0xff] %v480_v15  ;;  %v486_v18 = vld [vmem:[%s13035_s17 + $0x110] sm:$0xff] }
  0x24   : > { %483 = vst [vmem:[%s13040_s23 + $0x80] sm:$0xff] %v482_v16  ;;  %485 = vst [vmem:[%s13040_s23 + $0x88] sm:$0xff] %v484_v17  ;;  %v488_v19 = vld [vmem:[%s13035_s17 + $0x118] sm:$0xff]  ;;  %v490_v20 = vld [vmem:[%s13035_s17 + $0x120] sm:$0xff] }
  0x25   : > { %487 = vst [vmem:[%s13040_s23 + $0x90] sm:$0xff] %v486_v18  ;;  %489 = vst [vmem:[%s13040_s23 + $0x98] sm:$0xff] %v488_v19  ;;  %v492_v21 = vld [vmem:[%s13035_s17 + $0x128] sm:$0xff]  ;;  %v494_v22 = vld [vmem:[%s13035_s17 + $0x130] sm:$0xff] }
  0x26   : > { %491 = vst [vmem:[%s13040_s23 + $0xa0] sm:$0xff] %v490_v20  ;;  %v496_v23 = vld [vmem:[%s13035_s17 + $0x138] sm:$0xff]  ;;  %493 = vst [vmem:[%s13040_s23 + $0xa8] sm:$0xff] %v492_v21  ;;  %v498_v24 = vld [vmem:[%s13035_s17 + $0x140] sm:$0xff] }
  0x27   : > { %495 = vst [vmem:[%s13040_s23 + $0xb0] sm:$0xff] %v494_v22  ;;  %497 = vst [vmem:[%s13040_s23 + $0xb8] sm:$0xff] %v496_v23  ;;  %v500_v25 = vld [vmem:[%s13035_s17 + $0x148] sm:$0xff]  ;;  %v502_v26 = vld [vmem:[%s13035_s17 + $0x150] sm:$0xff] }
  0x28   : > { %499 = vst [vmem:[%s13040_s23 + $0xc0] sm:$0xff] %v498_v24  ;;  %501 = vst [vmem:[%s13040_s23 + $0xc8] sm:$0xff] %v500_v25  ;;  %v504_v27 = vld [vmem:[%s13035_s17 + $0x158] sm:$0xff]  ;;  %v506_v28 = vld [vmem:[%s13035_s17 + $0x160] sm:$0xff] }
  0x29   : > { %503 = vst [vmem:[%s13040_s23 + $0xd0] sm:$0xff] %v502_v26  ;;  %v508_v29 = vld [vmem:[%s13035_s17 + $0x168] sm:$0xff]  ;;  %505 = vst [vmem:[%s13040_s23 + $0xd8] sm:$0xff] %v504_v27  ;;  %v510_v30 = vld [vmem:[%s13035_s17 + $0x170] sm:$0xff] }
  0x2a   : > { %507 = vst [vmem:[%s13040_s23 + $0xe0] sm:$0xff] %v506_v28  ;;  %509 = vst [vmem:[%s13040_s23 + $0xe8] sm:$0xff] %v508_v29  ;;  %v512_v31 = vld [vmem:[%s13035_s17 + $0x178] sm:$0xff]  ;;  %v514_v32 = vld [vmem:[%s13035_s17 + $0x200] sm:$0xff] }
  0x2b   : > { %511 = vst [vmem:[%s13040_s23 + $0xf0] sm:$0xff] %v510_v30  ;;  %513 = vst [vmem:[%s13040_s23 + $0xf8] sm:$0xff] %v512_v31  ;;  %v516_v33 = vld [vmem:[%s13035_s17 + $0x208] sm:$0xff]  ;;  %v518_v34 = vld [vmem:[%s13035_s17 + $0x210] sm:$0xff] }
  0x2c   : > { %515 = vst [vmem:[%s13040_s23 + $0x100] sm:$0xff] %v514_v32  ;;  %v520_v35 = vld [vmem:[%s13035_s17 + $0x218] sm:$0xff]  ;;  %517 = vst [vmem:[%s13040_s23 + $0x108] sm:$0xff] %v516_v33  ;;  %v522_v36 = vld [vmem:[%s13035_s17 + $0x220] sm:$0xff] }
  0x2d   : > { %519 = vst [vmem:[%s13040_s23 + $0x110] sm:$0xff] %v518_v34  ;;  %521 = vst [vmem:[%s13040_s23 + $0x118] sm:$0xff] %v520_v35  ;;  %v524_v37 = vld [vmem:[%s13035_s17 + $0x228] sm:$0xff]  ;;  %v526_v38 = vld [vmem:[%s13035_s17 + $0x230] sm:$0xff] }
  0x2e   : > { %523 = vst [vmem:[%s13040_s23 + $0x120] sm:$0xff] %v522_v36  ;;  %525 = vst [vmem:[%s13040_s23 + $0x128] sm:$0xff] %v524_v37  ;;  %v528_v39 = vld [vmem:[%s13035_s17 + $0x238] sm:$0xff]  ;;  %v530_v40 = vld [vmem:[%s13035_s17 + $0x240] sm:$0xff] }
  0x2f   : > { %527 = vst [vmem:[%s13040_s23 + $0x130] sm:$0xff] %v526_v38  ;;  %v532_v41 = vld [vmem:[%s13035_s17 + $0x248] sm:$0xff]  ;;  %529 = vst [vmem:[%s13040_s23 + $0x138] sm:$0xff] %v528_v39  ;;  %v534_v42 = vld [vmem:[%s13035_s17 + $0x250] sm:$0xff] }
  0x30   : > { %531 = vst [vmem:[%s13040_s23 + $0x140] sm:$0xff] %v530_v40  ;;  %533 = vst [vmem:[%s13040_s23 + $0x148] sm:$0xff] %v532_v41  ;;  %v536_v43 = vld [vmem:[%s13035_s17 + $0x258] sm:$0xff]  ;;  %v538_v44 = vld [vmem:[%s13035_s17 + $0x260] sm:$0xff] }
  0x31   : > { %535 = vst [vmem:[%s13040_s23 + $0x150] sm:$0xff] %v534_v42  ;;  %537 = vst [vmem:[%s13040_s23 + $0x158] sm:$0xff] %v536_v43  ;;  %v540_v45 = vld [vmem:[%s13035_s17 + $0x268] sm:$0xff]  ;;  %v542_v46 = vld [vmem:[%s13035_s17 + $0x270] sm:$0xff] }
  0x32   : > { %539 = vst [vmem:[%s13040_s23 + $0x160] sm:$0xff] %v538_v44  ;;  %v544_v47 = vld [vmem:[%s13035_s17 + $0x278] sm:$0xff]  ;;  %541 = vst [vmem:[%s13040_s23 + $0x168] sm:$0xff] %v540_v45  ;;  %v546_v48 = vld [vmem:[%s13035_s17 + $0x300] sm:$0xff] }
  0x33   : > { %543 = vst [vmem:[%s13040_s23 + $0x170] sm:$0xff] %v542_v46  ;;  %545 = vst [vmem:[%s13040_s23 + $0x178] sm:$0xff] %v544_v47  ;;  %v548_v49 = vld [vmem:[%s13035_s17 + $0x308] sm:$0xff]  ;;  %v550_v50 = vld [vmem:[%s13035_s17 + $0x310] sm:$0xff] }
  0x34   : > { %547 = vst [vmem:[%s13040_s23 + $0x180] sm:$0xff] %v546_v48  ;;  %549 = vst [vmem:[%s13040_s23 + $0x188] sm:$0xff] %v548_v49  ;;  %v552_v51 = vld [vmem:[%s13035_s17 + $0x318] sm:$0xff]  ;;  %v554_v52 = vld [vmem:[%s13035_s17 + $0x320] sm:$0xff] }
  0x35   : > { %551 = vst [vmem:[%s13040_s23 + $0x190] sm:$0xff] %v550_v50  ;;  %v556_v53 = vld [vmem:[%s13035_s17 + $0x328] sm:$0xff]  ;;  %553 = vst [vmem:[%s13040_s23 + $0x198] sm:$0xff] %v552_v51  ;;  %v558_v54 = vld [vmem:[%s13035_s17 + $0x330] sm:$0xff] }
  0x36   : > { %555 = vst [vmem:[%s13040_s23 + $0x1a0] sm:$0xff] %v554_v52  ;;  %557 = vst [vmem:[%s13040_s23 + $0x1a8] sm:$0xff] %v556_v53  ;;  %v560_v55 = vld [vmem:[%s13035_s17 + $0x338] sm:$0xff]  ;;  %v562_v56 = vld [vmem:[%s13035_s17 + $0x340] sm:$0xff] }
  0x37   : > { %559 = vst [vmem:[%s13040_s23 + $0x1b0] sm:$0xff] %v558_v54  ;;  %561 = vst [vmem:[%s13040_s23 + $0x1b8] sm:$0xff] %v560_v55  ;;  %v564_v57 = vld [vmem:[%s13035_s17 + $0x348] sm:$0xff]  ;;  %v566_v58 = vld [vmem:[%s13035_s17 + $0x350] sm:$0xff] }
  0x38   : > { %563 = vst [vmem:[%s13040_s23 + $0x1c0] sm:$0xff] %v562_v56  ;;  %v568_v59 = vld [vmem:[%s13035_s17 + $0x358] sm:$0xff]  ;;  %565 = vst [vmem:[%s13040_s23 + $0x1c8] sm:$0xff] %v564_v57  ;;  %v570_v60 = vld [vmem:[%s13035_s17 + $0x360] sm:$0xff] }
  0x39   : > { %567 = vst [vmem:[%s13040_s23 + $0x1d0] sm:$0xff] %v566_v58  ;;  %569 = vst [vmem:[%s13040_s23 + $0x1d8] sm:$0xff] %v568_v59  ;;  %v572_v61 = vld [vmem:[%s13035_s17 + $0x368] sm:$0xff]  ;;  %v574_v62 = vld [vmem:[%s13035_s17 + $0x370] sm:$0xff] }
  0x3a   : > { %571 = vst [vmem:[%s13040_s23 + $0x1e0] sm:$0xff] %v570_v60  ;;  %573 = vst [vmem:[%s13040_s23 + $0x1e8] sm:$0xff] %v572_v61  ;;  %v576_v63 = vld [vmem:[%s13035_s17 + $0x378] sm:$0xff] }
  0x3b   : > { %575 = vst [vmem:[%s13040_s23 + $0x1f0] sm:$0xff] %v574_v62  ;;  %577 = vst [vmem:[%s13040_s23 + $0x1f8] sm:$0xff] %v576_v63 }
  0x3c PF: > { %p10737_p7 = scmp.ge.s32.totalorder %s12910_s20, 1  ;;  %p582_p8 = scmp.lt.s32.totalorder %s12910_s20, 3 }
  0x3e   : > { %p583_p9 = pnand %p10737_p7, %p582_p8 }
  0x40   : > { %586 = sbr.rel (%p583_p9) target bundleno = 3505 (0xdb1), region = 99 }
  0x45   : > { %s589_s24 = sand.u32 1, %s12902_s18   ;;  %v19605_v0 = vmov 0.0   ;;  %v704_v1 = vld [vmem:[%s19588_s2 + $0x8] sm:$0xff]  ;;  %v12913_v2 = vmov 0   ;;  %s19648_s1 = sld [smem:[#allocation56_spill]]  ;;  %vm715_vm0 = vcmask 261120  }
  0x46   : > { %s13170_s27 = sshll.u32 %s589_s24, 9  ;;  %786 = vmatprep.mubr.f32.mxu0 %v19605_v0  ;;  %863 = vmatprep.mubr.f32.mxu1 %v19605_v0  ;;  %vm1356_vm1 = vcmask 130048   ;;  %vm4249_vm4 = vcmask 1040384   ;;  %vm4251_vm7 = vcmask 786432   ;;  %vm4244_vm8 = vcmask 793600  }
  0x47   : > { %11932 = vset.pattern.permute.xlu0 %v12913_v2  ;;  %11933 = vset.pattern.permute.xlu1 %v12913_v2  ;;  %s13178_s30 = scalar_lea.vmem [#allocation2], %s13170_s27  ;;  %vm4452_vm9 = vcmask 130112   ;;  %vm4589_vm10 = vcmask 1041409   ;;  %vm4591_vm11 = vcmask 1042434   ;;  %vm4593_vm12 = vcmask 1043459   ;;  %s19265_s24 = scalar_lea.vmem [#allocation3], %s13170_s27 }
  0x48   : > { %v686_v3 = vld [vmem:[%s13178_s30 + $0x188] sm:$0xff]  ;;  %v688_v4 = vld [vmem:[%s13178_s30 + $0x198] sm:$0xff]  ;;  %v685_v5 = vld [vmem:[%s13178_s30 + $0x180] sm:$0xff]  ;;  %712 = vperm.xlu0 %11932, %v704_v1   ;;  %vm4595_vm13 = vcmask 1044484   ;;  %vm4597_vm14 = vcmask 1045509   ;;  %vm4599_vm15 = vcmask 1046534  }
  0x49   : > { %746 = vmatprep.subr.mxu0 %v686_v3  ;;  %823 = vmatprep.subr.mxu1 %v688_v4  ;;  %v687_v6 = vld [vmem:[%s13178_s30 + $0x190] sm:$0xff]  ;;  %v670_v7 = vld [vmem:[%s13178_s30 + $0x108] sm:$0xff]  ;;  %v672_v8 = vld [vmem:[%s13178_s30 + $0x118] sm:$0xff]  ;;  %s19760_s27 = sadd.s32 (%p13025_p5), 4294967295, %s12910_s20  }
  0x4a   : > { %747 = vmatpush1.msra.mxu0 %v685_v5  ;;  %824 = vmatpush1.msra.mxu1 %v687_v6  ;;  %v669_v9 = vld [vmem:[%s13178_s30 + $0x100] sm:$0xff]  ;;  %v671_v10 = vld [vmem:[%s13178_s30 + $0x110] sm:$0xff]  ;;  %v654_v11 = vld [vmem:[%s13178_s30 + $0x88] sm:$0xff]  ;;  %s11604_s28 = sshll.u32 (%p13025_p5), %s19760_s27, 7 }
  0x4b   : > { %748 = vmatprep.subr.mxu0 %v670_v7  ;;  %825 = vmatprep.subr.mxu1 %v672_v8  ;;  %v656_v12 = vld [vmem:[%s13178_s30 + $0x98] sm:$0xff]  ;;  %v653_v13 = vld [vmem:[%s13178_s30 + $0x80] sm:$0xff]  ;;  %v655_v14 = vld [vmem:[%s13178_s30 + $0x90] sm:$0xff]  ;;  %s19449_s26 = scalar_lea.vmem (%p13025_p5), %s19601_s15, %s11604_s28 }
  0x4c   : > { %749 = vmatpush1.msra.mxu0 %v669_v9  ;;  %826 = vmatpush1.msra.mxu1 %v671_v10  ;;  %v638_v15 = vld [vmem:[%s13178_s30 + $0x8] sm:$0xff]  ;;  %v640_v16 = vld [vmem:[%s13178_s30 + $0x18] sm:$0xff]  ;;  %v637_v17 = vld [vmem:[%s13178_s30] sm:$0xff] }
  0x4d   : > { %750 = vmatprep.subr.mxu0 %v654_v11  ;;  %827 = vmatprep.subr.mxu1 %v656_v12  ;;  %v639_v18 = vld [vmem:[%s13178_s30 + $0x10] sm:$0xff]  ;;  %v13199_v19 = vld [vmem:[%s19648_s1] sm:$0xff]  ;;  %v690_v20 = vld [vmem:[%s13178_s30 + $0x1a8] sm:$0xff] }
  0x4e   : > { %751 = vmatpush1.msra.mxu0 %v653_v13  ;;  %828 = vmatpush1.msra.mxu1 %v655_v14  ;;  %v692_v21 = vld [vmem:[%s13178_s30 + $0x1b8] sm:$0xff]  ;;  %v689_v22 = vld [vmem:[%s13178_s30 + $0x1a0] sm:$0xff]  ;;  %v691_v23 = vld [vmem:[%s13178_s30 + $0x1b0] sm:$0xff] }
  0x4f   : > { %752 = vmatprep.subr.mxu0 %v638_v15  ;;  %829 = vmatprep.subr.mxu1 %v640_v16  ;;  %v674_v24 = vld [vmem:[%s13178_s30 + $0x128] sm:$0xff]  ;;  %v676_v25 = vld [vmem:[%s13178_s30 + $0x138] sm:$0xff]  ;;  %v673_v26 = vld [vmem:[%s13178_s30 + $0x120] sm:$0xff] }
  0x50   : > { %753 = vmatpush1.msra.mxu0 %v637_v17  ;;  %830 = vmatpush1.msra.mxu1 %v639_v18  ;;  %v675_v27 = vld [vmem:[%s13178_s30 + $0x130] sm:$0xff]  ;;  %v13216_v28 = vld [vmem:[%s19648_s1 + $0x8] sm:$0xff]  ;;  %v660_v30 = vld [vmem:[%s13178_s30 + $0xb8] sm:$0xff] }
  0x51   : > { %10740 = vmatmul.mubr.msk.f32.vlgmr.msra.gmra.mxu0 %vm715_vm0, %v13199_v19  ;;  %10742 = vmatmul.mubr.msk.f32.vlgmr.msra.gmra.mxu1 %vm715_vm0, %v13199_v19  ;;  %v658_v29 = vld [vmem:[%s13178_s30 + $0xa8] sm:$0xff]  ;;  %v657_v31 = vld [vmem:[%s13178_s30 + $0xa0] sm:$0xff]  ;;  %v659_v32 = vld [vmem:[%s13178_s30 + $0xb0] sm:$0xff] }
  0x52   : > { %900 = vmatprep.subr.mxu0 %v690_v20  ;;  %977 = vmatprep.subr.mxu1 %v692_v21  ;;  %v642_v33 = vld [vmem:[%s13178_s30 + $0x28] sm:$0xff]  ;;  %v644_v34 = vld [vmem:[%s13178_s30 + $0x38] sm:$0xff]  ;;  %v641_v35 = vld [vmem:[%s13178_s30 + $0x20] sm:$0xff] }
  0x53   : > { %901 = vmatpush1.msra.mxu0 %v689_v22  ;;  %978 = vmatpush1.msra.mxu1 %v691_v23  ;;  %v643_v36 = vld [vmem:[%s13178_s30 + $0x30] sm:$0xff]  ;;  %v694_v37 = vld [vmem:[%s13178_s30 + $0x1c8] sm:$0xff]  ;;  %v696_v38 = vld [vmem:[%s13178_s30 + $0x1d8] sm:$0xff] }
  0x54   : > { %902 = vmatprep.subr.mxu0 %v674_v24  ;;  %979 = vmatprep.subr.mxu1 %v676_v25  ;;  %v693_v39 = vld [vmem:[%s13178_s30 + $0x1c0] sm:$0xff]  ;;  %v695_v40 = vld [vmem:[%s13178_s30 + $0x1d0] sm:$0xff]  ;;  %v678_v41 = vld [vmem:[%s13178_s30 + $0x148] sm:$0xff] }
  0x55   : > { %792 = vmatprep.mubr.f32.mxu0 %v19605_v0  ;;  %869 = vmatprep.mubr.f32.mxu1 %v19605_v0  ;;  %v680_v42 = vld [vmem:[%s13178_s30 + $0x158] sm:$0xff]  ;;  %v677_v43 = vld [vmem:[%s13178_s30 + $0x140] sm:$0xff]  ;;  %v679_v44 = vld [vmem:[%s13178_s30 + $0x150] sm:$0xff] }
  0x56   : > { %903 = vmatpush1.msra.mxu0 %v673_v26  ;;  %980 = vmatpush1.msra.mxu1 %v675_v27  ;;  %v662_v45 = vld [vmem:[%s13178_s30 + $0xc8] sm:$0xff]  ;;  %v664_v46 = vld [vmem:[%s13178_s30 + $0xd8] sm:$0xff]  ;;  %v661_v47 = vld [vmem:[%s13178_s30 + $0xc0] sm:$0xff] }
  0x57   : > { %10741 = vmatmul.mubr.msk.f32.gmra.mxu0 %vm715_vm0, %v13216_v28  ;;  %10743 = vmatmul.mubr.msk.f32.gmra.mxu1 %vm715_vm0, %v13216_v28  ;;  %v663_v48 = vld [vmem:[%s13178_s30 + $0xd0] sm:$0xff]  ;;  %v646_v49 = vld [vmem:[%s13178_s30 + $0x48] sm:$0xff]  ;;  %v648_v50 = vld [vmem:[%s13178_s30 + $0x58] sm:$0xff] }
  0x58   : > { %904 = vmatprep.subr.mxu0 %v658_v29  ;;  %981 = vmatprep.subr.mxu1 %v660_v30  ;;  %v645_v51 = vld [vmem:[%s13178_s30 + $0x40] sm:$0xff]  ;;  %v647_v52 = vld [vmem:[%s13178_s30 + $0x50] sm:$0xff]  ;;  %v698_v53 = vld [vmem:[%s13178_s30 + $0x1e8] sm:$0xff] }
  0x59   : > { %905 = vmatpush1.msra.mxu0 %v657_v31  ;;  %982 = vmatpush1.msra.mxu1 %v659_v32  ;;  %v700_v54 = vld [vmem:[%s13178_s30 + $0x1f8] sm:$0xff]  ;;  %v697_v55 = vld [vmem:[%s13178_s30 + $0x1e0] sm:$0xff]  ;;  %v699_v56 = vld [vmem:[%s13178_s30 + $0x1f0] sm:$0xff] }
  0x5a   : > { %906 = vmatprep.subr.mxu0 %v642_v33  ;;  %983 = vmatprep.subr.mxu1 %v644_v34  ;;  %v682_v57 = vld [vmem:[%s13178_s30 + $0x168] sm:$0xff]  ;;  %v684_v58 = vld [vmem:[%s13178_s30 + $0x178] sm:$0xff]  ;;  %v681_v59 = vld [vmem:[%s13178_s30 + $0x160] sm:$0xff] }
  0x5b   : > { %907 = vmatpush1.msra.mxu0 %v641_v35  ;;  %940 = vmatprep.mubr.f32.mxu0 %v19605_v0  ;;  %v683_v60 = vld [vmem:[%s13178_s30 + $0x170] sm:$0xff]  ;;  %v666_v61 = vld [vmem:[%s13178_s30 + $0xe8] sm:$0xff]  ;;  %v668_v62 = vld [vmem:[%s13178_s30 + $0xf8] sm:$0xff] }
  0x5c   : > { %984 = vmatpush1.msra.mxu1 %v643_v36  ;;  %1017 = vmatprep.mubr.f32.mxu1 %v19605_v0  ;;  %v665_v63 = vld [vmem:[%s13178_s30 + $0xe0] sm:$0xff]  ;;  %v667_v1 = vld [vmem:[%s13178_s30 + $0xf0] sm:$0xff]  ;;  %v650_v2 = vld [vmem:[%s13178_s30 + $0x68] sm:$0xff] }
  0x5d   : > { %10744 = vmatmul.mubr.msk.f32.vlgmr.msra.gmra.mxu0 %vm715_vm0, %v13199_v19  ;;  %10746 = vmatmul.mubr.msk.f32.vlgmr.msra.gmra.mxu1 %vm715_vm0, %v13199_v19  ;;  %v652_v3 = vld [vmem:[%s13178_s30 + $0x78] sm:$0xff]  ;;  %v649_v4 = vld [vmem:[%s13178_s30 + $0x60] sm:$0xff]  ;;  %v651_v5 = vld [vmem:[%s13178_s30 + $0x70] sm:$0xff] }
  0x5e   : > { %1054 = vmatprep.subr.mxu0 %v694_v37  ;;  %1131 = vmatprep.subr.mxu1 %v696_v38  ;;  %v703_v6 = vld [vmem:[%s19588_s2] sm:$0xff]  ;;  %v13355_v30 = vld [vmem:[%s19589_s3 + $0x8] sm:$0xff] }
  0x5f   : > { %1055 = vmatpush1.msra.mxu0 %v693_v39  ;;  %1132 = vmatpush1.msra.mxu1 %v695_v40  ;;  %v13340_v27 = vld [vmem:[%s19589_s3] sm:$0xff] }
  0x60   : > { %1056 = vmatprep.subr.mxu0 %v678_v41  ;;  %1133 = vmatprep.subr.mxu1 %v680_v42 }
  0x61   : > { %946 = vmatprep.mubr.f32.mxu0 %v19605_v0  ;;  %1023 = vmatprep.mubr.f32.mxu1 %v19605_v0 }
  0x62   : > { %1057 = vmatpush1.msra.mxu0 %v677_v43  ;;  %1134 = vmatpush1.msra.mxu1 %v679_v44 }
  0x63   : > { %10745 = vmatmul.mubr.msk.f32.gmra.mxu0 %vm715_vm0, %v13216_v28  ;;  %10747 = vmatmul.mubr.msk.f32.gmra.mxu1 %vm715_vm0, %v13216_v28 }
  0x64   : > { %1058 = vmatprep.subr.mxu0 %v662_v45  ;;  %1135 = vmatprep.subr.mxu1 %v664_v46  ;;  %v13398_v45 = vld [vmem:[%s19589_s3 + $0x10] sm:$0xff] }
  0x65   : > { %1059 = vmatpush1.msra.mxu0 %v661_v47  ;;  %1136 = vmatpush1.msra.mxu1 %v663_v48  ;;  %v13417_v48 = vld [vmem:[%s19589_s3 + $0x18] sm:$0xff] }
  0x66   : > { %1060 = vmatprep.subr.mxu0 %v646_v49  ;;  %1137 = vmatprep.subr.mxu1 %v648_v50 }
  0x67   : > { %1061 = vmatpush1.msra.mxu0 %v645_v51  ;;  %1094 = vmatprep.mubr.f32.mxu0 %v19605_v0 }
  0x68   : > { %1138 = vmatpush1.msra.mxu1 %v647_v52  ;;  %1171 = vmatprep.mubr.f32.mxu1 %v19605_v0 }
  0x69   : > { %10748 = vmatmul.mubr.msk.f32.vlgmr.msra.gmra.mxu0 %vm715_vm0, %v13199_v19  ;;  %10750 = vmatmul.mubr.msk.f32.vlgmr.msra.gmra.mxu1 %vm715_vm0, %v13199_v19 }
  0x6a   : > { %1208 = vmatprep.subr.mxu0 %v698_v53  ;;  %1285 = vmatprep.subr.mxu1 %v700_v54 }
  0x6b   : > { %1209 = vmatpush1.msra.mxu0 %v697_v55  ;;  %1286 = vmatpush1.msra.mxu1 %v699_v56  ;;  %v13438_v55 = vld [vmem:[%s19589_s3 + $0x20] sm:$0xff]  ;;  %v13451_v56 = vld [vmem:[%s19589_s3 + $0x28] sm:$0xff] }
  0x6c   : > { %1210 = vmatprep.subr.mxu0 %v682_v57  ;;  %1287 = vmatprep.subr.mxu1 %v684_v58  ;;  %v13462_v57 = vld [vmem:[%s19589_s3 + $0x30] sm:$0xff]  ;;  %v13473_v58 = vld [vmem:[%s19589_s3 + $0x38] sm:$0xff] }
  0x6d   : > { %1100 = vmatprep.mubr.f32.mxu0 %v19605_v0  ;;  %1177 = vmatprep.mubr.f32.mxu1 %v19605_v0 }
  0x6e   : > { %1211 = vmatpush1.msra.mxu0 %v681_v59  ;;  %1288 = vmatpush1.msra.mxu1 %v683_v60  ;;  %v13484_v59 = vld [vmem:[%s19589_s3 + $0x40] sm:$0xff]  ;;  %v13495_v60 = vld [vmem:[%s19589_s3 + $0x48] sm:$0xff] }
  0x6f   : > { %10749 = vmatmul.mubr.msk.f32.gmra.mxu0 %vm715_vm0, %v13216_v28  ;;  %10751 = vmatmul.mubr.msk.f32.gmra.mxu1 %vm715_vm0, %v13216_v28 }
  0x70   : > { %1212 = vmatprep.subr.mxu0 %v666_v61  ;;  %1289 = vmatprep.subr.mxu1 %v668_v62  ;;  %v13506_v61 = vld [vmem:[%s19589_s3 + $0x50] sm:$0xff]  ;;  %v13517_v62 = vld [vmem:[%s19589_s3 + $0x58] sm:$0xff] }
  0x71   : > { %1213 = vmatpush1.msra.mxu0 %v665_v63  ;;  %1290 = vmatpush1.msra.mxu1 %v667_v1  ;;  %v13528_v63 = vld [vmem:[%s19589_s3 + $0x60] sm:$0xff]  ;;  %v13539_v1 = vld [vmem:[%s19589_s3 + $0x68] sm:$0xff] }
  0x72   : > { %1214 = vmatprep.subr.mxu0 %v650_v2  ;;  %1291 = vmatprep.subr.mxu1 %v652_v3  ;;  %v13550_v2 = vld [vmem:[%s19589_s3 + $0x70] sm:$0xff]  ;;  %v13561_v3 = vld [vmem:[%s19589_s3 + $0x78] sm:$0xff] }
  0x73   : > { %1215 = vmatpush1.msra.mxu0 %v649_v4  ;;  %1248 = vmatprep.mubr.f32.mxu0 %v19605_v0 }
  0x74   : > { %1292 = vmatpush1.msra.mxu1 %v651_v5  ;;  %1325 = vmatprep.mubr.f32.mxu1 %v19605_v0 }
  0x75   : > { %10752 = vmatmul.mubr.msk.f32.vlgmr.msra.gmra.mxu0 %vm715_vm0, %v13199_v19  ;;  %10754 = vmatmul.mubr.msk.f32.vlgmr.msra.gmra.mxu1 %vm715_vm0, %v13199_v19 }
  0x76   : > { %1254 = vmatprep.mubr.f32.mxu0 %v19605_v0  ;;  %1331 = vmatprep.mubr.f32.mxu1 %v19605_v0 }
  0x77   : > { %707 = vperm.xlu0 %11932, %v703_v6   ;;  %v13576_v6 = vld [vmem:[%s19589_s3 + $0x80] sm:$0xff] }
  0x79   : > { %10753 = vmatmul.mubr.msk.f32.gmra.mxu0 %vm715_vm0, %v13216_v28  ;;  %10755 = vmatmul.mubr.msk.f32.gmra.mxu1 %vm715_vm0, %v13216_v28  ;;  %vm19643_vm0 = vcmask 1047559  }
  0x7a   : > { %1475 = vmatprep.mubr.f32.mxu0 %v19605_v0  ;;  %1628 = vmatprep.mubr.f32.mxu1 %v19605_v0 }
  0xc3   : > { %v13305_v11 = vpop.permute.xlu0 %712 }
  0xf2   : > { %v13307_v16 = vpop.permute.xlu0 %707 }
 0x111   : > { %v788_v7 = vpop.f32.mrf.mxu0  ;;  %v865_v8 = vpop.f32.mrf.mxu1 }
 0x112   : > { %v13330_v23 = vadd.f32 %v788_v7, %v13307_v16  ;;  %v13333_v24 = vadd.f32 %v865_v8, %v13307_v16 }
 0x113   : > { %v790_v9 = vpop.f32.mrf.mxu0  ;;  %v867_v10 = vpop.f32.mrf.mxu1 }
 0x114   : > { %v13322_v21 = vadd.f32 %v790_v9, %v13307_v16  ;;  %v13325_v22 = vadd.f32 %v867_v10, %v13307_v16  ;;  %19655 = vst [vmem:[#allocation10_spill] sm:$0xff] %v13330_v23  ;;  %19656 = vst [vmem:[#allocation11_spill] sm:$0xff] %v13333_v24  ;;  %v13591_v9 = vld [vmem:[%s19589_s3 + $0x88] sm:$0xff] }
 0x116   : > { %19653 = vst [vmem:[#allocation8_spill] sm:$0xff] %v13322_v21  ;;  %19654 = vst [vmem:[#allocation9_spill] sm:$0xff] %v13325_v22 }
 0x117   : > { %v794_v12 = vpop.f32.mrf.mxu0  ;;  %v871_v13 = vpop.f32.mrf.mxu1 }
 0x118   : > { %v13316_v19 = vadd.f32 %v794_v12, %v13305_v11  ;;  %v13319_v20 = vadd.f32 %v871_v13, %v13305_v11 }
 0x119   : > { %v796_v14 = vpop.f32.mrf.mxu0  ;;  %v873_v15 = vpop.f32.mrf.mxu1 }
 0x11a   : > { %v13310_v17 = vadd.f32 %v796_v14, %v13305_v11  ;;  %v13313_v18 = vadd.f32 %v873_v15, %v13305_v11  ;;  %19651 = vst [vmem:[#allocation6_spill] sm:$0xff] %v13316_v19  ;;  %19652 = vst [vmem:[#allocation7_spill] sm:$0xff] %v13319_v20 }
 0x11c   : > { %19649 = vst [vmem:[#allocation4_spill] sm:$0xff] %v13310_v17  ;;  %19650 = vst [vmem:[#allocation5_spill] sm:$0xff] %v13313_v18  ;;  %1439 = vmatprep.subr.mxu0 %v13310_v17  ;;  %1592 = vmatprep.subr.mxu1 %v13313_v18 }
 0x11d   : > { %v942_v25 = vpop.f32.mrf.mxu0  ;;  %v1019_v26 = vpop.f32.mrf.mxu1  ;;  %1440 = vmatpush1.msra.mxu0 %v13316_v19  ;;  %1593 = vmatpush1.msra.mxu1 %v13319_v20 }
 0x11e   : > { %1441 = vmatprep.subr.mxu0 %v13322_v21  ;;  %1594 = vmatprep.subr.mxu1 %v13325_v22  ;;  %v13384_v41 = vadd.f32 %v942_v25, %v13307_v16  ;;  %v13387_v42 = vadd.f32 %v1019_v26, %v13307_v16 }
 0x11f   : > { %v944_v28 = vpop.f32.mrf.mxu0  ;;  %v1021_v29 = vpop.f32.mrf.mxu1  ;;  %1442 = vmatpush1.msra.mxu0 %v13330_v23  ;;  %1595 = vmatpush1.msra.mxu1 %v13333_v24  ;;  %v11126_v24 = vld [vmem:[%s19591_s5 + $0x910] sm:$0xff] }
 0x120   : > { %10756 = vmatmul.mubr.msk.f32.vlgmr.msra.gmra.mxu0 %vm1356_vm1, %v13340_v27  ;;  %10774 = vmatmul.mubr.msk.f32.vlgmr.msra.gmra.mxu1 %vm1356_vm1, %v13340_v27  ;;  %v13376_v39 = vadd.f32 %v944_v28, %v13307_v16  ;;  %v13379_v40 = vadd.f32 %v1021_v29, %v13307_v16  ;;  %19663 = vst [vmem:[#allocation18_spill] sm:$0xff] %v13384_v41  ;;  %19664 = vst [vmem:[#allocation19_spill] sm:$0xff] %v13387_v42 }
 0x121   : > { %1481 = vmatprep.mubr.f32.mxu0 %v19605_v0  ;;  %1632 = vmatprep.mubr.f32.mxu1 %v19605_v0 }
 0x122   : > { %19661 = vst [vmem:[#allocation16_spill] sm:$0xff] %v13376_v39  ;;  %19662 = vst [vmem:[#allocation17_spill] sm:$0xff] %v13379_v40 }
 0x123   : > { %v948_v31 = vpop.f32.mrf.mxu0  ;;  %v1025_v32 = vpop.f32.mrf.mxu1 }
 0x124   : > { %10757 = vmatmul.mubr.msk.f32.gmra.mxu0 %vm1356_vm1, %v13355_v30  ;;  %10775 = vmatmul.mubr.msk.f32.gmra.mxu1 %vm1356_vm1, %v13355_v30  ;;  %v13370_v37 = vadd.f32 %v948_v31, %v13305_v11  ;;  %v13373_v38 = vadd.f32 %v1025_v32, %v13305_v11 }
 0x125   : > { %v950_v33 = vpop.f32.mrf.mxu0  ;;  %v1027_v34 = vpop.f32.mrf.mxu1  ;;  %1487 = vmatprep.mubr.f32.mxu0 %v19605_v0  ;;  %1636 = vmatprep.mubr.f32.mxu1 %v19605_v0 }
 0x126   : > { %v13364_v35 = vadd.f32 %v950_v33, %v13305_v11  ;;  %v13367_v36 = vadd.f32 %v1027_v34, %v13305_v11  ;;  %19659 = vst [vmem:[#allocation14_spill] sm:$0xff] %v13370_v37  ;;  %19660 = vst [vmem:[#allocation15_spill] sm:$0xff] %v13373_v38 }
 0x128   : > { %19657 = vst [vmem:[#allocation12_spill] sm:$0xff] %v13364_v35  ;;  %19658 = vst [vmem:[#allocation13_spill] sm:$0xff] %v13367_v36  ;;  %1737 = vmatprep.subr.mxu0 %v13364_v35  ;;  %1882 = vmatprep.subr.mxu1 %v13367_v36  ;;  %v11132_v36 = vld [vmem:[%s19591_s5 + $0x940] sm:$0xff] }
 0x129   : > { %v13389_v43 = vpop.f32.mrf.mxu0  ;;  %v13391_v44 = vpop.f32.mrf.mxu1  ;;  %1738 = vmatpush1.msra.mxu0 %v13370_v37  ;;  %1883 = vmatpush1.msra.mxu1 %v13373_v38  ;;  %v11100_v38 = vld [vmem:[%s19591_s5 + $0x840] sm:$0xff]  ;;  %v11098_v37 = vld [vmem:[%s19591_s5 + $0x830] sm:$0xff] }
 0x12a   : > { %1739 = vmatprep.subr.mxu0 %v13376_v39  ;;  %1884 = vmatprep.subr.mxu1 %v13379_v40  ;;  %v13625_v29 = vadd.f32 %v13389_v43, %v13307_v16  ;;  %v13629_v31 = vadd.f32 %v13391_v44, %v13307_v16  ;;  %v11102_v39 = vld [vmem:[%s19591_s5 + $0x850] sm:$0xff]  ;;  %v11128_v35 = vld [vmem:[%s19591_s5 + $0x920] sm:$0xff] }
 0x12b   : > { %v13402_v46 = vpop.f32.mrf.mxu0  ;;  %v13404_v47 = vpop.f32.mrf.mxu1  ;;  %1740 = vmatpush1.msra.mxu0 %v13384_v41  ;;  %1885 = vmatpush1.msra.mxu1 %v13387_v42  ;;  %v11016_v42 = vld [vmem:[%s19591_s5 + $0x5a0] sm:$0xff]  ;;  %v11014_v41 = vld [vmem:[%s19591_s5 + $0x590] sm:$0xff] }
 0x12c   : > { %10758 = vmatmul.mubr.msk.f32.gmra.mxu0 %vm1356_vm1, %v13398_v45  ;;  %10776 = vmatmul.mubr.msk.f32.gmra.mxu1 %vm1356_vm1, %v13398_v45  ;;  %v13613_v15 = vadd.f32 %v13402_v46, %v13307_v16  ;;  %v13617_v25 = vadd.f32 %v13404_v47, %v13307_v16  ;;  %19671 = vst [vmem:[#allocation26_spill] sm:$0xff] %v13625_v29  ;;  %19672 = vst [vmem:[#allocation27_spill] sm:$0xff] %v13629_v31 }
 0x12d   : > { %1491 = vmatprep.mubr.f32.mxu0 %v19605_v0  ;;  %1642 = vmatprep.mubr.f32.mxu1 %v19605_v0 }
 0x12e   : > { %19669 = vst [vmem:[#allocation24_spill] sm:$0xff] %v13613_v15  ;;  %19670 = vst [vmem:[#allocation25_spill] sm:$0xff] %v13617_v25 }
 0x12f   : > { %v13419_v49 = vpop.f32.mrf.mxu0  ;;  %v13421_v50 = vpop.f32.mrf.mxu1 }
 0x130   : > { %10759 = vmatmul.mubr.msk.f32.gmra.mxu0 %vm1356_vm1, %v13417_v48  ;;  %10777 = vmatmul.mubr.msk.f32.gmra.mxu1 %vm1356_vm1, %v13417_v48  ;;  %v13605_v13 = vadd.f32 %v13419_v49, %v13305_v11  ;;  %v13609_v14 = vadd.f32 %v13421_v50, %v13305_v11  ;;  %v2618_v49 = vld [vmem:[%s19591_s5 + $0xf8] sm:$0xff] }
 0x131   : > { %v1104_v51 = vpop.f32.mrf.mxu0  ;;  %v1181_v52 = vpop.f32.mrf.mxu1  ;;  %1495 = vmatprep.mubr.f32.mxu0 %v19605_v0  ;;  %1648 = vmatprep.mubr.f32.mxu1 %v19605_v0 }
 0x132   : > { %v13430_v53 = vadd.f32 %v1104_v51, %v13305_v11  ;;  %v13433_v54 = vadd.f32 %v1181_v52, %v13305_v11  ;;  %19667 = vst [vmem:[#allocation22_spill] sm:$0xff] %v13605_v13  ;;  %19668 = vst [vmem:[#allocation23_spill] sm:$0xff] %v13609_v14 }
 0x134   : > { %19665 = vst [vmem:[#allocation20_spill] sm:$0xff] %v13430_v53  ;;  %19666 = vst [vmem:[#allocation21_spill] sm:$0xff] %v13433_v54  ;;  %2023 = vmatprep.subr.mxu0 %v13430_v53  ;;  %2176 = vmatprep.subr.mxu1 %v13433_v54  ;;  %v11018_v53 = vld [vmem:[%s19591_s5 + $0x5b0] sm:$0xff] }
 0x135   : > { %10760 = vmatmul.mubr.msk.f32.gmra.mxu0 %vm1356_vm1, %v13438_v55  ;;  %10778 = vmatmul.mubr.msk.f32.gmra.mxu1 %vm1356_vm1, %v13438_v55  ;;  %v13563_v4 = vpop.f32.mrf.mxu0  ;;  %v13565_v5 = vpop.f32.mrf.mxu1 }
 0x136   : > { %1501 = vmatprep.mubr.f32.mxu0 %v19605_v0  ;;  %1652 = vmatprep.mubr.f32.mxu1 %v19605_v0  ;;  %v13771_v47 = vadd.f32 %v13563_v4, %v13307_v16 }
 0x137   : > { %v13578_v7 = vpop.f32.mrf.mxu0  ;;  %v13580_v8 = vpop.f32.mrf.mxu1 }
 0x138   : > { %v13759_v44 = vadd.f32 %v13578_v7, %v13307_v16  ;;  %v13763_v46 = vadd.f32 %v13580_v8, %v13307_v16  ;;  %19679 = vst [vmem:[#allocation34_spill] sm:$0xff] %v13771_v47 }
 0x139   : > { %10761 = vmatmul.mubr.msk.f32.gmra.mxu0 %vm1356_vm1, %v13451_v56  ;;  %10779 = vmatmul.mubr.msk.f32.gmra.mxu1 %vm1356_vm1, %v13451_v56  ;;  %v13593_v10 = vpop.f32.mrf.mxu0  ;;  %v13595_v12 = vpop.f32.mrf.mxu1 }
 0x13a   : > { %1507 = vmatprep.mubr.f32.mxu0 %v19605_v0  ;;  %1656 = vmatprep.mubr.f32.mxu1 %v19605_v0  ;;  %v13751_v34 = vadd.f32 %v13593_v10, %v13305_v11  ;;  %v13755_v43 = vadd.f32 %v13595_v12, %v13305_v11  ;;  %19677 = vst [vmem:[#allocation32_spill] sm:$0xff] %v13759_v44  ;;  %19678 = vst [vmem:[#allocation33_spill] sm:$0xff] %v13763_v46 }
 0x13b   : > { %v1258_v26 = vpop.f32.mrf.mxu0  ;;  %v1335_v28 = vpop.f32.mrf.mxu1 }
 0x13c   : > { %v13636_v32 = vadd.f32 %v1258_v26, %v13305_v11  ;;  %v13639_v33 = vadd.f32 %v1335_v28, %v13305_v11  ;;  %19675 = vst [vmem:[#allocation30_spill] sm:$0xff] %v13751_v34  ;;  %19676 = vst [vmem:[#allocation31_spill] sm:$0xff] %v13755_v43  ;;  %v13775_v11 = vadd.f32 %v13565_v5, %v13307_v16  ;;  %v10931_v16 = vld [vmem:[%s19591_s5 + $0x2f8] sm:$0xff] }
 0x13d   : > { %10762 = vmatmul.mubr.msk.f32.gmra.mxu0 %vm1356_vm1, %v13462_v57  ;;  %10780 = vmatmul.mubr.msk.f32.gmra.mxu1 %vm1356_vm1, %v13462_v57 }
 0x13e   : > { %1511 = vmatprep.mubr.f32.mxu0 %v19605_v0  ;;  %1660 = vmatprep.mubr.f32.mxu1 %v19605_v0  ;;  %19673 = vst [vmem:[#allocation28_spill] sm:$0xff] %v13636_v32  ;;  %19674 = vst [vmem:[#allocation29_spill] sm:$0xff] %v13639_v33 }
 0x13f   : > { %19680 = vst [vmem:[#allocation35_spill] sm:$0xff] %v13775_v11 }
 0x141   : > { %10763 = vmatmul.mubr.msk.f32.gmra.mxu0 %vm1356_vm1, %v13473_v58  ;;  %10781 = vmatmul.mubr.msk.f32.gmra.mxu1 %vm1356_vm1, %v13473_v58 }
 0x142   : > { %1515 = vmatprep.mubr.f32.mxu0 %v19605_v0  ;;  %1664 = vmatprep.mubr.f32.mxu1 %v19605_v0 }
 0x145   : > { %10764 = vmatmul.mubr.msk.f32.gmra.mxu0 %vm1356_vm1, %v13484_v59  ;;  %10782 = vmatmul.mubr.msk.f32.gmra.mxu1 %vm1356_vm1, %v13484_v59 }
 0x146   : > { %1519 = vmatprep.mubr.f32.mxu0 %v19605_v0  ;;  %1668 = vmatprep.mubr.f32.mxu1 %v19605_v0 }
 0x149   : > { %10765 = vmatmul.mubr.msk.f32.gmra.mxu0 %vm1356_vm1, %v13495_v60  ;;  %10783 = vmatmul.mubr.msk.f32.gmra.mxu1 %vm1356_vm1, %v13495_v60 }
 0x14a   : > { %1523 = vmatprep.mubr.f32.mxu0 %v19605_v0  ;;  %1672 = vmatprep.mubr.f32.mxu1 %v19605_v0 }
 0x14d   : > { %10766 = vmatmul.mubr.msk.f32.gmra.mxu0 %vm1356_vm1, %v13506_v61  ;;  %10784 = vmatmul.mubr.msk.f32.gmra.mxu1 %vm1356_vm1, %v13506_v61 }
 0x14e   : > { %1527 = vmatprep.mubr.f32.mxu0 %v19605_v0  ;;  %1676 = vmatprep.mubr.f32.mxu1 %v19605_v0 }
 0x151   : > { %10767 = vmatmul.mubr.msk.f32.gmra.mxu0 %vm1356_vm1, %v13517_v62  ;;  %10785 = vmatmul.mubr.msk.f32.gmra.mxu1 %vm1356_vm1, %v13517_v62 }
 0x152   : > { %1531 = vmatprep.mubr.f32.mxu0 %v19605_v0  ;;  %1680 = vmatprep.mubr.f32.mxu1 %v19605_v0 }
 0x155   : > { %10768 = vmatmul.mubr.msk.f32.gmra.mxu0 %vm1356_vm1, %v13528_v63  ;;  %10786 = vmatmul.mubr.msk.f32.gmra.mxu1 %vm1356_vm1, %v13528_v63 }
 0x156   : > { %1537 = vmatprep.mubr.f32.mxu0 %v19605_v0  ;;  %1684 = vmatprep.mubr.f32.mxu1 %v19605_v0 }
 0x159   : > { %10769 = vmatmul.mubr.msk.f32.gmra.mxu0 %vm1356_vm1, %v13539_v1  ;;  %10787 = vmatmul.mubr.msk.f32.gmra.mxu1 %vm1356_vm1, %v13539_v1 }
 0x15a   : > { %1543 = vmatprep.mubr.f32.mxu0 %v19605_v0  ;;  %1688 = vmatprep.mubr.f32.mxu1 %v19605_v0 }
 0x15d   : > { %10770 = vmatmul.mubr.msk.f32.gmra.mxu0 %vm1356_vm1, %v13550_v2  ;;  %10788 = vmatmul.mubr.msk.f32.gmra.mxu1 %vm1356_vm1, %v13550_v2 }
 0x15e   : > { %1547 = vmatprep.mubr.f32.mxu0 %v19605_v0  ;;  %1694 = vmatprep.mubr.f32.mxu1 %v19605_v0 }
 0x161   : > { %10771 = vmatmul.mubr.msk.f32.gmra.mxu0 %vm1356_vm1, %v13561_v3  ;;  %10789 = vmatmul.mubr.msk.f32.gmra.mxu1 %vm1356_vm1, %v13561_v3 }
 0x162   : > { %1551 = vmatprep.mubr.f32.mxu0 %v19605_v0  ;;  %1700 = vmatprep.mubr.f32.mxu1 %v19605_v0 }
 0x165   : > { %10772 = vmatmul.mubr.msk.f32.gmra.mxu0 %vm1356_vm1, %v13576_v6  ;;  %10790 = vmatmul.mubr.msk.f32.gmra.mxu1 %vm1356_vm1, %v13576_v6 }
 0x166   : > { %1557 = vmatprep.mubr.f32.mxu0 %v19605_v0  ;;  %1704 = vmatprep.mubr.f32.mxu1 %v19605_v0 }
 0x169   : > { %10773 = vmatmul.mubr.msk.f32.gmra.mxu0 %vm1356_vm1, %v13591_v9  ;;  %10791 = vmatmul.mubr.msk.f32.gmra.mxu1 %vm1356_vm1, %v13591_v9 }
 0x16a   : > { %1773 = vmatprep.mubr.f32.mxu0 %v19605_v0  ;;  %1918 = vmatprep.mubr.f32.mxu1 %v19605_v0 }
 0x16d   : > { %10792 = vmatmul.mubr.msk.f32.vlgmr.msra.gmra.mxu0 %vm1356_vm1, %v13340_v27  ;;  %10810 = vmatmul.mubr.msk.f32.vlgmr.msra.gmra.mxu1 %vm1356_vm1, %v13340_v27 }
 0x16e   : > { %2024 = vmatpush1.msra.mxu0 %v13605_v13  ;;  %2177 = vmatpush1.msra.mxu1 %v13609_v14 }
 0x16f   : > { %2025 = vmatprep.subr.mxu0 %v13613_v15  ;;  %2178 = vmatprep.subr.mxu1 %v13617_v25  ;;  %v10935_v15 = vld [vmem:[%s19591_s5 + $0x318] sm:$0xff] }
 0x170   : > { %2026 = vmatpush1.msra.mxu0 %v13625_v29  ;;  %2179 = vmatpush1.msra.mxu1 %v13629_v31  ;;  %v10939_v31 = vld [vmem:[%s19591_s5 + $0x338] sm:$0xff] }
 0x171   : > { %1777 = vmatprep.mubr.f32.mxu0 %v19605_v0  ;;  %1922 = vmatprep.mubr.f32.mxu1 %v19605_v0 }
 0x172   : > { %2321 = vmatprep.subr.mxu0 %v13636_v32  ;;  %2466 = vmatprep.subr.mxu1 %v13639_v33 }
 0x173   : > { %10793 = vmatmul.mubr.msk.f32.gmra.mxu0 %vm1356_vm1, %v13355_v30  ;;  %10811 = vmatmul.mubr.msk.f32.gmra.mxu1 %vm1356_vm1, %v13355_v30 }
 0x174   : > { %1781 = vmatprep.mubr.f32.mxu0 %v19605_v0  ;;  %1926 = vmatprep.mubr.f32.mxu1 %v19605_v0 }
 0x177   : > { %10794 = vmatmul.mubr.msk.f32.gmra.mxu0 %vm1356_vm1, %v13398_v45  ;;  %10812 = vmatmul.mubr.msk.f32.gmra.mxu1 %vm1356_vm1, %v13398_v45 }
 0x178   : > { %1785 = vmatprep.mubr.f32.mxu0 %v19605_v0  ;;  %1930 = vmatprep.mubr.f32.mxu1 %v19605_v0 }
 0x17b   : > { %10795 = vmatmul.mubr.msk.f32.gmra.mxu0 %vm1356_vm1, %v13417_v48  ;;  %10813 = vmatmul.mubr.msk.f32.gmra.mxu1 %vm1356_vm1, %v13417_v48 }
 0x17c   : > { %1789 = vmatprep.mubr.f32.mxu0 %v19605_v0  ;;  %1934 = vmatprep.mubr.f32.mxu1 %v19605_v0 }
 0x17f   : > { %10796 = vmatmul.mubr.msk.f32.gmra.mxu0 %vm1356_vm1, %v13438_v55  ;;  %10814 = vmatmul.mubr.msk.f32.gmra.mxu1 %vm1356_vm1, %v13438_v55 }
 0x180   : > { %1793 = vmatprep.mubr.f32.mxu0 %v19605_v0  ;;  %1938 = vmatprep.mubr.f32.mxu1 %v19605_v0 }
 0x183   : > { %10797 = vmatmul.mubr.msk.f32.gmra.mxu0 %vm1356_vm1, %v13451_v56  ;;  %10815 = vmatmul.mubr.msk.f32.gmra.mxu1 %vm1356_vm1, %v13451_v56 }
 0x184   : > { %1797 = vmatprep.mubr.f32.mxu0 %v19605_v0  ;;  %1942 = vmatprep.mubr.f32.mxu1 %v19605_v0 }
 0x187   : > { %10798 = vmatmul.mubr.msk.f32.gmra.mxu0 %vm1356_vm1, %v13462_v57  ;;  %10816 = vmatmul.mubr.msk.f32.gmra.mxu1 %vm1356_vm1, %v13462_v57 }
 0x188   : > { %1803 = vmatprep.mubr.f32.mxu0 %v19605_v0  ;;  %1946 = vmatprep.mubr.f32.mxu1 %v19605_v0 }
 0x18b   : > { %10799 = vmatmul.mubr.msk.f32.gmra.mxu0 %vm1356_vm1, %v13473_v58  ;;  %10817 = vmatmul.mubr.msk.f32.gmra.mxu1 %vm1356_vm1, %v13473_v58 }
 0x18c   : > { %1809 = vmatprep.mubr.f32.mxu0 %v19605_v0  ;;  %1950 = vmatprep.mubr.f32.mxu1 %v19605_v0 }
 0x18f   : > { %10800 = vmatmul.mubr.msk.f32.gmra.mxu0 %vm1356_vm1, %v13484_v59  ;;  %10818 = vmatmul.mubr.msk.f32.gmra.mxu1 %vm1356_vm1, %v13484_v59 }
 0x190   : > { %1813 = vmatprep.mubr.f32.mxu0 %v19605_v0  ;;  %1956 = vmatprep.mubr.f32.mxu1 %v19605_v0 }
 0x193   : > { %10801 = vmatmul.mubr.msk.f32.gmra.mxu0 %vm1356_vm1, %v13495_v60  ;;  %10819 = vmatmul.mubr.msk.f32.gmra.mxu1 %vm1356_vm1, %v13495_v60 }
 0x194   : > { %1817 = vmatprep.mubr.f32.mxu0 %v19605_v0  ;;  %1962 = vmatprep.mubr.f32.mxu1 %v19605_v0 }
 0x197   : > { %10802 = vmatmul.mubr.msk.f32.gmra.mxu0 %vm1356_vm1, %v13506_v61  ;;  %10820 = vmatmul.mubr.msk.f32.gmra.mxu1 %vm1356_vm1, %v13506_v61 }
 0x198   : > { %1823 = vmatprep.mubr.f32.mxu0 %v19605_v0  ;;  %1966 = vmatprep.mubr.f32.mxu1 %v19605_v0 }
 0x19b   : > { %10803 = vmatmul.mubr.msk.f32.gmra.mxu0 %vm1356_vm1, %v13517_v62  ;;  %10821 = vmatmul.mubr.msk.f32.gmra.mxu1 %vm1356_vm1, %v13517_v62 }
 0x19c   : > { %1829 = vmatprep.mubr.f32.mxu0 %v19605_v0  ;;  %1970 = vmatprep.mubr.f32.mxu1 %v19605_v0 }
 0x19f   : > { %10804 = vmatmul.mubr.msk.f32.gmra.mxu0 %vm1356_vm1, %v13528_v63  ;;  %10822 = vmatmul.mubr.msk.f32.gmra.mxu1 %vm1356_vm1, %v13528_v63 }
 0x1a0   : > { %1833 = vmatprep.mubr.f32.mxu0 %v19605_v0  ;;  %1974 = vmatprep.mubr.f32.mxu1 %v19605_v0 }
 0x1a3   : > { %10805 = vmatmul.mubr.msk.f32.gmra.mxu0 %vm1356_vm1, %v13539_v1  ;;  %10823 = vmatmul.mubr.msk.f32.gmra.mxu1 %vm1356_vm1, %v13539_v1 }
 0x1a4   : > { %1837 = vmatprep.mubr.f32.mxu0 %v19605_v0  ;;  %1978 = vmatprep.mubr.f32.mxu1 %v19605_v0 }
 0x1a7   : > { %10806 = vmatmul.mubr.msk.f32.gmra.mxu0 %vm1356_vm1, %v13550_v2  ;;  %10824 = vmatmul.mubr.msk.f32.gmra.mxu1 %vm1356_vm1, %v13550_v2 }
 0x1a8   : > { %1841 = vmatprep.mubr.f32.mxu0 %v19605_v0  ;;  %1982 = vmatprep.mubr.f32.mxu1 %v19605_v0 }
 0x1ab   : > { %10807 = vmatmul.mubr.msk.f32.gmra.mxu0 %vm1356_vm1, %v13561_v3  ;;  %10825 = vmatmul.mubr.msk.f32.gmra.mxu1 %vm1356_vm1, %v13561_v3 }
 0x1ac   : > { %1845 = vmatprep.mubr.f32.mxu0 %v19605_v0  ;;  %1986 = vmatprep.mubr.f32.mxu1 %v19605_v0 }
 0x1af   : > { %10808 = vmatmul.mubr.msk.f32.gmra.mxu0 %vm1356_vm1, %v13576_v6  ;;  %10826 = vmatmul.mubr.msk.f32.gmra.mxu1 %vm1356_vm1, %v13576_v6 }
 0x1b0   : > { %1849 = vmatprep.mubr.f32.mxu0 %v19605_v0  ;;  %1990 = vmatprep.mubr.f32.mxu1 %v19605_v0 }
 0x1b3   : > { %10809 = vmatmul.mubr.msk.f32.gmra.mxu0 %vm1356_vm1, %v13591_v9  ;;  %10827 = vmatmul.mubr.msk.f32.gmra.mxu1 %vm1356_vm1, %v13591_v9 }
 0x1b4   : > { %2059 = vmatprep.mubr.f32.mxu0 %v19605_v0  ;;  %2212 = vmatprep.mubr.f32.mxu1 %v19605_v0 }
 0x1b7   : > { %10828 = vmatmul.mubr.msk.f32.vlgmr.msra.gmra.mxu0 %vm1356_vm1, %v13340_v27  ;;  %10846 = vmatmul.mubr.msk.f32.vlgmr.msra.gmra.mxu1 %vm1356_vm1, %v13340_v27 }
 0x1b8   : > { %2322 = vmatpush1.msra.mxu0 %v13751_v34  ;;  %2467 = vmatpush1.msra.mxu1 %v13755_v43 }
 0x1b9   : > { %2323 = vmatprep.subr.mxu0 %v13759_v44  ;;  %2468 = vmatprep.subr.mxu1 %v13763_v46 }
 0x1ba   : > { %2324 = vmatpush1.msra.mxu0 %v13771_v47  ;;  %2469 = vmatpush1.msra.mxu1 %v13775_v11  ;;  %v2615_v47 = vld [vmem:[%s19591_s5 + $0xe0] sm:$0xff] }
 0x1bb   : > { %2065 = vmatprep.mubr.f32.mxu0 %v19605_v0  ;;  %2216 = vmatprep.mubr.f32.mxu1 %v19605_v0 }
 0x1bc   : > { %10829 = vmatmul.mubr.msk.f32.gmra.mxu0 %vm1356_vm1, %v13355_v30  ;;  %10847 = vmatmul.mubr.msk.f32.gmra.mxu1 %vm1356_vm1, %v13355_v30 }
 0x1bd   : > { %2071 = vmatprep.mubr.f32.mxu0 %v19605_v0  ;;  %2220 = vmatprep.mubr.f32.mxu1 %v19605_v0 }
 0x1be   : > { %2716 = vmatprep.subr.mxu0 %v10931_v16  ;;  %2793 = vmatprep.subr.mxu1 %v2618_v49 }
 0x1c0   : > { %10830 = vmatmul.mubr.msk.f32.gmra.mxu0 %vm1356_vm1, %v13398_v45  ;;  %10848 = vmatmul.mubr.msk.f32.gmra.mxu1 %vm1356_vm1, %v13398_v45 }
 0x1c1   : > { %2075 = vmatprep.mubr.f32.mxu0 %v19605_v0  ;;  %2226 = vmatprep.mubr.f32.mxu1 %v19605_v0 }
 0x1c4   : > { %10831 = vmatmul.mubr.msk.f32.gmra.mxu0 %vm1356_vm1, %v13417_v48  ;;  %10849 = vmatmul.mubr.msk.f32.gmra.mxu1 %vm1356_vm1, %v13417_v48 }
 0x1c5   : > { %2079 = vmatprep.mubr.f32.mxu0 %v19605_v0  ;;  %2232 = vmatprep.mubr.f32.mxu1 %v19605_v0 }
 0x1c8   : > { %10832 = vmatmul.mubr.msk.f32.gmra.mxu0 %vm1356_vm1, %v13438_v55  ;;  %10850 = vmatmul.mubr.msk.f32.gmra.mxu1 %vm1356_vm1, %v13438_v55 }
 0x1c9   : > { %2085 = vmatprep.mubr.f32.mxu0 %v19605_v0  ;;  %2236 = vmatprep.mubr.f32.mxu1 %v19605_v0 }
 0x1cc   : > { %10833 = vmatmul.mubr.msk.f32.gmra.mxu0 %vm1356_vm1, %v13451_v56  ;;  %10851 = vmatmul.mubr.msk.f32.gmra.mxu1 %vm1356_vm1, %v13451_v56 }
 0x1cd   : > { %2091 = vmatprep.mubr.f32.mxu0 %v19605_v0  ;;  %2240 = vmatprep.mubr.f32.mxu1 %v19605_v0 }
 0x1d0   : > { %10834 = vmatmul.mubr.msk.f32.gmra.mxu0 %vm1356_vm1, %v13462_v57  ;;  %10852 = vmatmul.mubr.msk.f32.gmra.mxu1 %vm1356_vm1, %v13462_v57 }
 0x1d1   : > { %2095 = vmatprep.mubr.f32.mxu0 %v19605_v0  ;;  %2244 = vmatprep.mubr.f32.mxu1 %v19605_v0 }
 0x1d4   : > { %10835 = vmatmul.mubr.msk.f32.gmra.mxu0 %vm1356_vm1, %v13473_v58  ;;  %10853 = vmatmul.mubr.msk.f32.gmra.mxu1 %vm1356_vm1, %v13473_v58 }
 0x1d5   : > { %2099 = vmatprep.mubr.f32.mxu0 %v19605_v0  ;;  %2248 = vmatprep.mubr.f32.mxu1 %v19605_v0 }
 0x1d8   : > { %10836 = vmatmul.mubr.msk.f32.gmra.mxu0 %vm1356_vm1, %v13484_v59  ;;  %10854 = vmatmul.mubr.msk.f32.gmra.mxu1 %vm1356_vm1, %v13484_v59 }
 0x1d9   : > { %2103 = vmatprep.mubr.f32.mxu0 %v19605_v0  ;;  %2252 = vmatprep.mubr.f32.mxu1 %v19605_v0 }
 0x1dc   : > { %10837 = vmatmul.mubr.msk.f32.gmra.mxu0 %vm1356_vm1, %v13495_v60  ;;  %10855 = vmatmul.mubr.msk.f32.gmra.mxu1 %vm1356_vm1, %v13495_v60 }
 0x1dd   : > { %2107 = vmatprep.mubr.f32.mxu0 %v19605_v0  ;;  %2256 = vmatprep.mubr.f32.mxu1 %v19605_v0 }
 0x1e0   : > { %10838 = vmatmul.mubr.msk.f32.gmra.mxu0 %vm1356_vm1, %v13506_v61  ;;  %10856 = vmatmul.mubr.msk.f32.gmra.mxu1 %vm1356_vm1, %v13506_v61  ;;  %v13849_v50 = vpop.f32.mrf.mxu0  ;;  %v1630_v51 = vpop.f32.mrf.mxu1 }
 0x1e1   : > { %2111 = vmatprep.mubr.f32.mxu0 %v19605_v0  ;;  %2260 = vmatprep.mubr.f32.mxu1 %v19605_v0 }
 0x1e2   : > { %v13853_v52 = vpop.f32.mrf.mxu0  ;;  %v1631_v4 = vpop.f32.mrf.mxu1 }
 0x1e4   : > { %10839 = vmatmul.mubr.msk.f32.gmra.mxu0 %vm1356_vm1, %v13517_v62  ;;  %10857 = vmatmul.mubr.msk.f32.gmra.mxu1 %vm1356_vm1, %v13517_v62  ;;  %v13859_v5 = vpop.f32.mrf.mxu0  ;;  %v1634_v7 = vpop.f32.mrf.mxu1 }
 0x1e5   : > { %2115 = vmatprep.mubr.f32.mxu0 %v19605_v0  ;;  %2264 = vmatprep.mubr.f32.mxu1 %v19605_v0 }
 0x1e6   : > { %v1635_v8 = vpop.f32.mrf.mxu1  ;;  %v13867_v10 = vpop.f32.mrf.mxu0 }
 0x1e8   : > { %10840 = vmatmul.mubr.msk.f32.gmra.mxu0 %vm1356_vm1, %v13528_v63  ;;  %10858 = vmatmul.mubr.msk.f32.gmra.mxu1 %vm1356_vm1, %v13528_v63 }
 0x1e9   : > { %2121 = vmatprep.mubr.f32.mxu0 %v19605_v0  ;;  %2268 = vmatprep.mubr.f32.mxu1 %v19605_v0 }
 0x1ec   : > { %10841 = vmatmul.mubr.msk.f32.gmra.mxu0 %vm1356_vm1, %v13539_v1  ;;  %10859 = vmatmul.mubr.msk.f32.gmra.mxu1 %vm1356_vm1, %v13539_v1  ;;  %v1489_v12 = vpop.f32.mrf.mxu0  ;;  %v13875_v26 = vpop.f32.mrf.mxu1 }
 0x1ed   : > { %2127 = vmatprep.mubr.f32.mxu0 %v19605_v0  ;;  %2272 = vmatprep.mubr.f32.mxu1 %v19605_v0 }
 0x1ee   : > { %v1490_v63 = vpop.f32.mrf.mxu0  ;;  %v13879_v28 = vpop.f32.mrf.mxu1 }
 0x1f0   : > { %10842 = vmatmul.mubr.msk.f32.gmra.mxu0 %vm1356_vm1, %v13550_v2  ;;  %10860 = vmatmul.mubr.msk.f32.gmra.mxu1 %vm1356_vm1, %v13550_v2  ;;  %v1493_v16 = vpop.f32.mrf.mxu0  ;;  %v13885_v49 = vpop.f32.mrf.mxu1 }
 0x1f1   : > { %2131 = vmatprep.mubr.f32.mxu0 %v19605_v0  ;;  %2278 = vmatprep.mubr.f32.mxu1 %v19605_v0 }
 0x1f2   : > { %v1494_v1 = vpop.f32.mrf.mxu0  ;;  %v13889_v51 = vpop.f32.mrf.mxu1 }
 0x1f4   : > { %10843 = vmatmul.mubr.msk.f32.gmra.mxu0 %vm1356_vm1, %v13561_v3  ;;  %10861 = vmatmul.mubr.msk.f32.gmra.mxu1 %vm1356_vm1, %v13561_v3 }
 0x1f5   : > { %2135 = vmatprep.mubr.f32.mxu0 %v19605_v0  ;;  %2284 = vmatprep.mubr.f32.mxu1 %v19605_v0  ;;  %v13897_v2 = vpop.f32.mrf.mxu0  ;;  %v1650_v4 = vpop.f32.mrf.mxu1 }
 0x1f7   : > { %v13899_v7 = vpop.f32.mrf.mxu0  ;;  %v1651_v8 = vpop.f32.mrf.mxu1 }
 0x1f8   : > { %10844 = vmatmul.mubr.msk.f32.gmra.mxu0 %vm1356_vm1, %v13576_v6  ;;  %10862 = vmatmul.mubr.msk.f32.gmra.mxu1 %vm1356_vm1, %v13576_v6 }
 0x1f9   : > { %2141 = vmatprep.mubr.f32.mxu0 %v19605_v0  ;;  %2288 = vmatprep.mubr.f32.mxu1 %v19605_v0  ;;  %v13907_v3 = vpop.f32.mrf.mxu0  ;;  %v1654_v12 = vpop.f32.mrf.mxu1 }
 0x1fa   : > { %v10930_v12 = vld [vmem:[%s19591_s5 + $0x2f0] sm:$0xff] }
 0x1fb   : > { %v13909_v63 = vpop.f32.mrf.mxu0  ;;  %v1655_v16 = vpop.f32.mrf.mxu1 }
 0x1fc   : > { %10845 = vmatmul.mubr.msk.f32.gmra.mxu0 %vm1356_vm1, %v13591_v9  ;;  %10863 = vmatmul.mubr.msk.f32.gmra.mxu1 %vm1356_vm1, %v13591_v9  ;;  %v2617_v16 = vld [vmem:[%s19591_s5 + $0xf0] sm:$0xff]  ;;  %v10929_v9 = vld [vmem:[%s19591_s5 + $0x2e8] sm:$0xff] }
 0x1fd   : > { %2357 = vmatprep.mubr.f32.mxu0 %v19605_v0  ;;  %2502 = vmatprep.mubr.f32.mxu1 %v19605_v0  ;;  %v1509_v6 = vpop.f32.mrf.mxu0  ;;  %v1658_v1 = vpop.f32.mrf.mxu1 }
 0x1fe   : > { %v2616_v6 = vld [vmem:[%s19591_s5 + $0xe8] sm:$0xff] }
 0x1ff   : > { %v1510_v4 = vpop.f32.mrf.mxu0  ;;  %v1659_v8 = vpop.f32.mrf.mxu1 }
 0x200   : > { %10864 = vmatmul.mubr.msk.f32.vlgmr.msra.gmra.mxu0 %vm1356_vm1, %v13340_v27  ;;  %10882 = vmatmul.mubr.msk.f32.vlgmr.msra.gmra.mxu1 %vm1356_vm1, %v13340_v27  ;;  %v10928_v27 = vld [vmem:[%s19591_s5 + $0x2e0] sm:$0xff] }
 0x201   : > { %2361 = vmatprep.mubr.f32.mxu0 %v19605_v0  ;;  %2506 = vmatprep.mubr.f32.mxu1 %v19605_v0  ;;  %v1513_v1 = vpop.f32.mrf.mxu0  ;;  %v1662_v4 = vpop.f32.mrf.mxu1 }
 0x202   : > { %2717 = vmatpush1.msra.mxu0 %v10930_v12  ;;  %2794 = vmatpush1.msra.mxu1 %v2617_v16  ;;  %v2614_v12 = vld [vmem:[%s19591_s5 + $0xd8] sm:$0xff]  ;;  %v10925_v4 = vld [vmem:[%s19591_s5 + $0x2c8] sm:$0xff] }
 0x203   : > { %v1514_v8 = vpop.f32.mrf.mxu0  ;;  %v1663_v11 = vpop.f32.mrf.mxu1  ;;  %2718 = vmatprep.subr.mxu0 %v10929_v9  ;;  %2795 = vmatprep.subr.mxu1 %v2616_v6  ;;  %v10926_v6 = vld [vmem:[%s19591_s5 + $0x2d0] sm:$0xff] }
 0x204   : > { %10865 = vmatmul.mubr.msk.f32.gmra.mxu0 %vm1356_vm1, %v13355_v30  ;;  %10883 = vmatmul.mubr.msk.f32.gmra.mxu1 %vm1356_vm1, %v13355_v30  ;;  %v10927_v11 = vld [vmem:[%s19591_s5 + $0x2d8] sm:$0xff]  ;;  %v10924_v8 = vld [vmem:[%s19591_s5 + $0x2c0] sm:$0xff] }
 0x205   : > { %2365 = vmatprep.mubr.f32.mxu0 %v19605_v0  ;;  %2510 = vmatprep.mubr.f32.mxu1 %v19605_v0  ;;  %v1517_v16 = vpop.f32.mrf.mxu0  ;;  %v1666_v9 = vpop.f32.mrf.mxu1 }
 0x206   : > { %2719 = vmatpush1.msra.mxu0 %v10928_v27  ;;  %2796 = vmatpush1.msra.mxu1 %v2615_v47  ;;  %v2613_v47 = vld [vmem:[%s19591_s5 + $0xd0] sm:$0xff] }
 0x207   : > { %2720 = vmatprep.subr.mxu0 %v10927_v11  ;;  %v1518_v30 = vpop.f32.mrf.mxu0  ;;  %v1667_v1 = vpop.f32.mrf.mxu1  ;;  %2797 = vmatprep.subr.mxu1 %v2614_v12  ;;  %v2612_v12 = vld [vmem:[%s19591_s5 + $0xc8] sm:$0xff] }
 0x208   : > { %10866 = vmatmul.mubr.msk.f32.gmra.mxu0 %vm1356_vm1, %v13398_v45  ;;  %10884 = vmatmul.mubr.msk.f32.gmra.mxu1 %vm1356_vm1, %v13398_v45  ;;  %v10923_v45 = vld [vmem:[%s19591_s5 + $0x2b8] sm:$0xff]  ;;  %v2611_v30 = vld [vmem:[%s19591_s5 + $0xc0] sm:$0xff] }
 0x209   : > { %2721 = vmatpush1.msra.mxu0 %v10926_v6  ;;  %2369 = vmatprep.mubr.f32.mxu0 %v19605_v0  ;;  %v1521_v27 = vpop.f32.mrf.mxu0  ;;  %v1670_v11 = vpop.f32.mrf.mxu1  ;;  %v10922_v6 = vld [vmem:[%s19591_s5 + $0x2b0] sm:$0xff]  ;;  %v2610_v1 = vld [vmem:[%s19591_s5 + $0xb8] sm:$0xff] }
 0x20a   : > { %2514 = vmatprep.mubr.f32.mxu1 %v19605_v0  ;;  %2722 = vmatprep.subr.mxu0 %v10925_v4  ;;  %v10920_v27 = vld [vmem:[%s19591_s5 + $0x2a0] sm:$0xff] }
 0x20b   : > { %2723 = vmatpush1.msra.mxu0 %v10924_v8  ;;  %2798 = vmatpush1.msra.mxu1 %v2613_v47  ;;  %v1522_v16 = vpop.f32.mrf.mxu0  ;;  %v1671_v9 = vpop.f32.mrf.mxu1  ;;  %v10921_v47 = vld [vmem:[%s19591_s5 + $0x2a8] sm:$0xff] }
 0x20c   : > { %10867 = vmatmul.mubr.msk.f32.gmra.mxu0 %vm1356_vm1, %v13417_v48  ;;  %10885 = vmatmul.mubr.msk.f32.gmra.mxu1 %vm1356_vm1, %v13417_v48  ;;  %v2609_v48 = vld [vmem:[%s19591_s5 + $0xb0] sm:$0xff]  ;;  %v10919_v16 = vld [vmem:[%s19591_s5 + $0x298] sm:$0xff]  ;;  %v2607_v9 = vld [vmem:[%s19591_s5 + $0xa0] sm:$0xff] }
 0x20d   : > { %2724 = vmatprep.subr.mxu0 %v10923_v45  ;;  %2799 = vmatprep.subr.mxu1 %v2612_v12  ;;  %v1525_v4 = vpop.f32.mrf.mxu0  ;;  %v1674_v8 = vpop.f32.mrf.mxu1  ;;  %v2608_v12 = vld [vmem:[%s19591_s5 + $0xa8] sm:$0xff] }
 0x20e   : > { %2725 = vmatpush1.msra.mxu0 %v10922_v6  ;;  %2800 = vmatpush1.msra.mxu1 %v2611_v30  ;;  %v2606_v4 = vld [vmem:[%s19591_s5 + $0x98] sm:$0xff] }
 0x20f   : > { %2373 = vmatprep.mubr.f32.mxu0 %v19605_v0  ;;  %2518 = vmatprep.mubr.f32.mxu1 %v19605_v0  ;;  %v1526_v11 = vpop.f32.mrf.mxu0  ;;  %v1675_v45 = vpop.f32.mrf.mxu1 }
 0x210   : > { %2801 = vmatprep.subr.mxu1 %v2610_v1  ;;  %10868 = vmatmul.mubr.msk.f32.gmra.mxu0 %vm1356_vm1, %v13438_v55  ;;  %v10918_v1 = vld [vmem:[%s19591_s5 + $0x290] sm:$0xff] }
 0x211   : > { %10886 = vmatmul.mubr.msk.f32.gmra.mxu1 %vm1356_vm1, %v13438_v55  ;;  %2726 = vmatprep.subr.mxu0 %v10921_v47  ;;  %v1529_v6 = vpop.f32.mrf.mxu0  ;;  %v1678_v30 = vpop.f32.mrf.mxu1  ;;  %v10917_v47 = vld [vmem:[%s19591_s5 + $0x288] sm:$0xff] }
 0x212   : > { %2802 = vmatpush1.msra.mxu1 %v2609_v48  ;;  %2727 = vmatpush1.msra.mxu0 %v10920_v27  ;;  %v2605_v48 = vld [vmem:[%s19591_s5 + $0x90] sm:$0xff]  ;;  %v10916_v27 = vld [vmem:[%s19591_s5 + $0x280] sm:$0xff] }
 0x213   : > { %2803 = vmatprep.subr.mxu1 %v2608_v12  ;;  %2728 = vmatprep.subr.mxu0 %v10919_v16  ;;  %v1530_v55 = vpop.f32.mrf.mxu0  ;;  %v1679_v8 = vpop.f32.mrf.mxu1  ;;  %v2604_v12 = vld [vmem:[%s19591_s5 + $0x88] sm:$0xff]  ;;  %v10915_v16 = vld [vmem:[%s19591_s5 + $0x278] sm:$0xff] }
 0x214   : > { %2804 = vmatpush1.msra.mxu1 %v2607_v9  ;;  %2377 = vmatprep.mubr.f32.mxu0 %v19605_v0  ;;  %v2603_v9 = vld [vmem:[%s19591_s5 + $0x80] sm:$0xff]  ;;  %v10913_v8 = vld [vmem:[%s19591_s5 + $0x268] sm:$0xff] }
 0x215   : > { %2522 = vmatprep.mubr.f32.mxu1 %v19605_v0  ;;  %2729 = vmatpush1.msra.mxu0 %v10918_v1  ;;  %v14031_v11 = vpop.f32.mrf.mxu0  ;;  %v1682_v45 = vpop.f32.mrf.mxu1  ;;  %v10914_v1 = vld [vmem:[%s19591_s5 + $0x270] sm:$0xff] }
 0x216   : > { %2805 = vmatprep.subr.mxu1 %v2606_v4  ;;  %10869 = vmatmul.mubr.msk.f32.gmra.mxu0 %vm1356_vm1, %v13451_v56 }
 0x217   : > { %10887 = vmatmul.mubr.msk.f32.gmra.mxu1 %vm1356_vm1, %v13451_v56  ;;  %2730 = vmatprep.subr.mxu0 %v10917_v47  ;;  %v14046_v6 = vpop.f32.mrf.mxu0  ;;  %v1683_v30 = vpop.f32.mrf.mxu1  ;;  %v2602_v56 = vld [vmem:[%s19591_s5 + $0x78] sm:$0xff]  ;;  %v2601_v47 = vld [vmem:[%s19591_s5 + $0x70] sm:$0xff] }
 0x218   : > { %2806 = vmatpush1.msra.mxu1 %v2605_v48  ;;  %2731 = vmatpush1.msra.mxu0 %v10916_v27  ;;  %v10912_v48 = vld [vmem:[%s19591_s5 + $0x260] sm:$0xff] }
 0x219   : > { %2807 = vmatprep.subr.mxu1 %v2604_v12  ;;  %2732 = vmatprep.subr.mxu0 %v10915_v16  ;;  %v14054_v4 = vpop.f32.mrf.mxu0  ;;  %v1686_v55 = vpop.f32.mrf.mxu1  ;;  %v2600_v12 = vld [vmem:[%s19591_s5 + $0x68] sm:$0xff]  ;;  %v2599_v16 = vld [vmem:[%s19591_s5 + $0x60] sm:$0xff] }
 0x21a   : > { %2808 = vmatpush1.msra.mxu1 %v2603_v9  ;;  %2381 = vmatprep.mubr.f32.mxu0 %v19605_v0 }
 0x21b   : > { %2526 = vmatprep.mubr.f32.mxu1 %v19605_v0  ;;  %2733 = vmatpush1.msra.mxu0 %v10914_v1  ;;  %v14067_v27 = vpop.f32.mrf.mxu0  ;;  %v1687_v45 = vpop.f32.mrf.mxu1  ;;  %v10911_v1 = vld [vmem:[%s19591_s5 + $0x258] sm:$0xff] }
 0x21c   : > { %2809 = vmatprep.subr.mxu1 %v2602_v56  ;;  %10870 = vmatmul.mubr.msk.f32.gmra.mxu0 %vm1356_vm1, %v13462_v57  ;;  %v2598_v56 = vld [vmem:[%s19591_s5 + $0x58] sm:$0xff]  ;;  %v2596_v45 = vld [vmem:[%s19591_s5 + $0x48] sm:$0xff] }
 0x21d   : > { %10888 = vmatmul.mubr.msk.f32.gmra.mxu1 %vm1356_vm1, %v13462_v57  ;;  %2734 = vmatprep.subr.mxu0 %v10913_v8  ;;  %v1545_v9 = vpop.f32.mrf.mxu0  ;;  %v14079_v30 = vpop.f32.mrf.mxu1  ;;  %v10910_v8 = vld [vmem:[%s19591_s5 + $0x250] sm:$0xff] }
 0x21e   : > { %2810 = vmatpush1.msra.mxu1 %v2601_v47  ;;  %2735 = vmatpush1.msra.mxu0 %v10912_v48  ;;  %v2597_v47 = vld [vmem:[%s19591_s5 + $0x50] sm:$0xff]  ;;  %v10909_v48 = vld [vmem:[%s19591_s5 + $0x248] sm:$0xff]  ;;  %v10908_v9 = vld [vmem:[%s19591_s5 + $0x240] sm:$0xff] }
 0x21f   : > { %2811 = vmatprep.subr.mxu1 %v2600_v12  ;;  %2387 = vmatprep.mubr.f32.mxu0 %v19605_v0  ;;  %v1546_v57 = vpop.f32.mrf.mxu0  ;;  %v14088_v55 = vpop.f32.mrf.mxu1 }
 0x220   : > { %2812 = vmatpush1.msra.mxu1 %v2599_v16  ;;  %2530 = vmatprep.mubr.f32.mxu1 %v19605_v0 }
 0x221   : > { %2736 = vmatprep.subr.mxu0 %v10911_v1  ;;  %2813 = vmatprep.subr.mxu1 %v2598_v56  ;;  %v1549_v12 = vpop.f32.mrf.mxu0  ;;  %v14103_v16 = vpop.f32.mrf.mxu1  ;;  %v2595_v1 = vld [vmem:[%s19591_s5 + $0x40] sm:$0xff] }
 0x222   : > { %10871 = vmatmul.mubr.msk.f32.gmra.mxu0 %vm1356_vm1, %v13473_v58  ;;  %10889 = vmatmul.mubr.msk.f32.gmra.mxu1 %vm1356_vm1, %v13473_v58  ;;  %v10907_v12 = vld [vmem:[%s19591_s5 + $0x238] sm:$0xff] }
 0x223   : > { %2737 = vmatpush1.msra.mxu0 %v10910_v8  ;;  %2814 = vmatpush1.msra.mxu1 %v2597_v47  ;;  %v1550_v56 = vpop.f32.mrf.mxu0  ;;  %v14115_v57 = vpop.f32.mrf.mxu1  ;;  %v2594_v58 = vld [vmem:[%s19591_s5 + $0x38] sm:$0xff]  ;;  %v19681_v8 = vmov 0.0   ;;  %v10906_v47 = vld [vmem:[%s19591_s5 + $0x230] sm:$0xff] }
 0x224   : > { %2738 = vmatprep.subr.mxu0 %v10909_v48  ;;  %2815 = vmatprep.subr.mxu1 %v2596_v45  ;;  %v2593_v48 = vld [vmem:[%s19591_s5 + $0x30] sm:$0xff]  ;;  %v10905_v45 = vld [vmem:[%s19591_s5 + $0x228] sm:$0xff]  ;;  %v10904_v56 = vld [vmem:[%s19591_s5 + $0x220] sm:$0xff] }
 0x225   : > { %2739 = vmatpush1.msra.mxu0 %v10908_v9  ;;  %2816 = vmatpush1.msra.mxu1 %v2595_v1  ;;  %v14123_v0 = vpop.f32.mrf.mxu0  ;;  %v1702_v46 = vpop.f32.mrf.mxu1 }
 0x226   : > { %2393 = vmatprep.mubr.f32.mxu0 %v19681_v8  ;;  %2534 = vmatprep.mubr.f32.mxu1 %v19681_v8  ;;  %v2592_v46 = vld [vmem:[%s19591_s5 + $0x28] sm:$0xff] }
 0x227   : > { %2740 = vmatprep.subr.mxu0 %v10907_v12  ;;  %2817 = vmatprep.subr.mxu1 %v2594_v58  ;;  %v14139_v9 = vpop.f32.mrf.mxu0  ;;  %v1703_v1 = vpop.f32.mrf.mxu1  ;;  %v2591_v12 = vld [vmem:[%s19591_s5 + $0x20] sm:$0xff] }
 0x228   : > { %10872 = vmatmul.mubr.msk.f32.gmra.mxu0 %vm1356_vm1, %v13484_v59  ;;  %10890 = vmatmul.mubr.msk.f32.gmra.mxu1 %vm1356_vm1, %v13484_v59  ;;  %v10903_v1 = vld [vmem:[%s19591_s5 + $0x218] sm:$0xff] }
 0x229   : > { %2741 = vmatpush1.msra.mxu0 %v10906_v47  ;;  %2818 = vmatpush1.msra.mxu1 %v2593_v48  ;;  %v14151_v58 = vpop.f32.mrf.mxu0  ;;  %v1706_v44 = vpop.f32.mrf.mxu1  ;;  %v2590_v59 = vld [vmem:[%s19591_s5 + $0x18] sm:$0xff]  ;;  %v2589_v47 = vld [vmem:[%s19591_s5 + $0x10] sm:$0xff]  ;;  %v10901_v48 = vld [vmem:[%s19591_s5 + $0x208] sm:$0xff] }
 0x22a   : > { %2742 = vmatprep.subr.mxu0 %v10905_v45  ;;  %2819 = vmatprep.subr.mxu1 %v2592_v46  ;;  %v10902_v44 = vld [vmem:[%s19591_s5 + $0x210] sm:$0xff] }
 0x22b   : > { %2743 = vmatpush1.msra.mxu0 %v10904_v56  ;;  %2820 = vmatpush1.msra.mxu1 %v2591_v12  ;;  %v14159_v43 = vpop.f32.mrf.mxu0  ;;  %v1707_v34 = vpop.f32.mrf.mxu1  ;;  %v10900_v56 = vld [vmem:[%s19591_s5 + $0x200] sm:$0xff] }
 0x22c   : > { %2397 = vmatprep.mubr.f32.mxu0 %v19681_v8  ;;  %2540 = vmatprep.mubr.f32.mxu1 %v19681_v8  ;;  %v2588_v34 = vld [vmem:[%s19591_s5 + $0x8] sm:$0xff]  ;;  %v2587_v12 = vld [vmem:[%s19591_s5] sm:$0xff] }
 0x22d   : > { %2744 = vmatprep.subr.mxu0 %v10903_v1  ;;  %2821 = vmatprep.subr.mxu1 %v2590_v59  ;;  %v1775_v45 = vpop.f32.mrf.mxu0  ;;  %v1920_v46 = vpop.f32.mrf.mxu1 }
 0x22e   : > { %10873 = vmatmul.mubr.msk.f32.gmra.mxu0 %vm1356_vm1, %v13495_v60  ;;  %10891 = vmatmul.mubr.msk.f32.gmra.mxu1 %vm1356_vm1, %v13495_v60  ;;  %v10963_v45 = vld [vmem:[%s19591_s5 + $0x3f8] sm:$0xff] }
 0x22f   : > { %2745 = vmatpush1.msra.mxu0 %v10902_v44  ;;  %2822 = vmatpush1.msra.mxu1 %v2589_v47  ;;  %v1776_v1 = vpop.f32.mrf.mxu0  ;;  %v1921_v59 = vpop.f32.mrf.mxu1  ;;  %v2650_v60 = vld [vmem:[%s19591_s5 + $0x1f8] sm:$0xff]  ;;  %v10962_v44 = vld [vmem:[%s19591_s5 + $0x3f0] sm:$0xff] }
 0x230   : > { %2746 = vmatprep.subr.mxu0 %v10901_v48  ;;  %2823 = vmatprep.subr.mxu1 %v2588_v34  ;;  %v2649_v47 = vld [vmem:[%s19591_s5 + $0x1f0] sm:$0xff]  ;;  %v10961_v48 = vld [vmem:[%s19591_s5 + $0x3e8] sm:$0xff]  ;;  %v2647_v1 = vld [vmem:[%s19591_s5 + $0x1e0] sm:$0xff] }
 0x231   : > { %2747 = vmatpush1.msra.mxu0 %v10900_v56  ;;  %2824 = vmatpush1.msra.mxu1 %v2587_v12  ;;  %v2648_v34 = vld [vmem:[%s19591_s5 + $0x1e8] sm:$0xff]  ;;  %v10960_v12 = vld [vmem:[%s19591_s5 + $0x3e0] sm:$0xff] }
 0x232   : > { %2401 = vmatprep.mubr.f32.mxu0 %v19681_v8  ;;  %2546 = vmatprep.mubr.f32.mxu1 %v19681_v8 }
 0x233   : > { %2748 = vmatprep.subr.mxu0 %v10963_v45  ;;  %2825 = vmatprep.subr.mxu1 %v2650_v60  ;;  %v1779_v46 = vpop.f32.mrf.mxu0  ;;  %v1924_v56 = vpop.f32.mrf.mxu1  ;;  %v10959_v60 = vld [vmem:[%s19591_s5 + $0x3d8] sm:$0xff] }
 0x234   : > { %10874 = vmatmul.mubr.msk.f32.gmra.mxu0 %vm1356_vm1, %v13506_v61  ;;  %10892 = vmatmul.mubr.msk.f32.gmra.mxu1 %vm1356_vm1, %v13506_v61  ;;  %v2646_v61 = vld [vmem:[%s19591_s5 + $0x1d8] sm:$0xff] }
 0x235   : > { %2749 = vmatpush2.msra.mxu0 %v10962_v44  ;;  %2826 = vmatpush2.msra.mxu1 %v2649_v47  ;;  %v1780_v59 = vpop.f32.mrf.mxu0  ;;  %v1925_v45 = vpop.f32.mrf.mxu1  ;;  %v10958_v44 = vld [vmem:[%s19591_s5 + $0x3d0] sm:$0xff] }
 0x236   : > { %2750 = vmatprep.subr.mxu0 %v10961_v48  ;;  %2827 = vmatprep.subr.mxu1 %v2648_v34  ;;  %v2645_v47 = vld [vmem:[%s19591_s5 + $0x1d0] sm:$0xff]  ;;  %v10957_v48 = vld [vmem:[%s19591_s5 + $0x3c8] sm:$0xff]  ;;  %v10956_v59 = vld [vmem:[%s19591_s5 + $0x3c0] sm:$0xff] }
 0x237   : > { %2751 = vmatpush2.msra.mxu0 %v10960_v12  ;;  %2828 = vmatpush2.msra.mxu1 %v2647_v1  ;;  %v1783_v46 = vpop.f32.mrf.mxu0  ;;  %v1928_v56 = vpop.f32.mrf.mxu1  ;;  %v2644_v34 = vld [vmem:[%s19591_s5 + $0x1c8] sm:$0xff]  ;;  %v2643_v45 = vld [vmem:[%s19591_s5 + $0x1c0] sm:$0xff] }
 0x238   : > { %2407 = vmatprep.mubr.f32.mxu0 %v19681_v8  ;;  %2550 = vmatprep.mubr.f32.mxu1 %v19681_v8  ;;  %v10955_v46 = vld [vmem:[%s19591_s5 + $0x3b8] sm:$0xff] }
 0x239   : > { %2752 = vmatprep.subr.mxu0 %v10959_v60  ;;  %2829 = vmatprep.subr.mxu1 %v2646_v61  ;;  %v1784_v12 = vpop.f32.mrf.mxu0  ;;  %v1929_v1 = vpop.f32.mrf.mxu1 }
 0x23a   : > { %10875 = vmatmul.mubr.msk.f32.gmra.mxu0 %vm1356_vm1, %v13517_v62  ;;  %10893 = vmatmul.mubr.msk.f32.gmra.mxu1 %vm1356_vm1, %v13517_v62  ;;  %v2642_v62 = vld [vmem:[%s19591_s5 + $0x1b8] sm:$0xff] }
 0x23b   : > { %2753 = vmatpush2.msra.mxu0 %v10958_v44  ;;  %2830 = vmatpush2.msra.mxu1 %v2645_v47  ;;  %v1787_v60 = vpop.f32.mrf.mxu0  ;;  %v1932_v61 = vpop.f32.mrf.mxu1  ;;  %v10954_v44 = vld [vmem:[%s19591_s5 + $0x3b0] sm:$0xff] }
 0x23c   : > { %2754 = vmatprep.subr.mxu0 %v10957_v48  ;;  %2831 = vmatprep.subr.mxu1 %v2644_v34  ;;  %v2641_v47 = vld [vmem:[%s19591_s5 + $0x1b0] sm:$0xff]  ;;  %v10953_v48 = vld [vmem:[%s19591_s5 + $0x3a8] sm:$0xff]  ;;  %v10952_v60 = vld [vmem:[%s19591_s5 + $0x3a0] sm:$0xff] }
 0x23d   : > { %2755 = vmatpush2.msra.mxu0 %v10956_v59  ;;  %2832 = vmatpush2.msra.mxu1 %v2643_v45  ;;  %v1788_v56 = vpop.f32.mrf.mxu0  ;;  %v1933_v12 = vpop.f32.mrf.mxu1  ;;  %v2640_v34 = vld [vmem:[%s19591_s5 + $0x1a8] sm:$0xff]  ;;  %v12190_v45 = vld [vmem:[%s19589_s3 + $0x60] sm:$0xff] }
 0x23e   : > { %2413 = vmatprep.mubr.f32.mxu0 %v19681_v8  ;;  %2554 = vmatprep.mubr.f32.mxu1 %v19681_v8  ;;  %v2639_v61 = vld [vmem:[%s19591_s5 + $0x1a0] sm:$0xff]  ;;  %v10951_v56 = vld [vmem:[%s19591_s5 + $0x398] sm:$0xff] }
 0x23f   : > { %2756 = vmatprep.subr.mxu0 %v10955_v46  ;;  %2833 = vmatprep.subr.mxu1 %v2642_v62  ;;  %v1791_v1 = vpop.f32.mrf.mxu0  ;;  %v1936_v59 = vpop.f32.mrf.mxu1  ;;  %v2638_v12 = vld [vmem:[%s19591_s5 + $0x198] sm:$0xff] }
 0x240   : > { %10876 = vmatmul.mubr.msk.f32.gmra.mxu0 %vm1356_vm1, %v12190_v45  ;;  %10894 = vmatmul.mubr.msk.f32.gmra.mxu1 %vm1356_vm1, %v12190_v45 }
 0x241   : > { %2757 = vmatpush2.msra.mxu0 %v10954_v44  ;;  %2834 = vmatpush2.msra.mxu1 %v2641_v47  ;;  %v1792_v46 = vpop.f32.mrf.mxu0  ;;  %v1937_v62 = vpop.f32.mrf.mxu1  ;;  %v10950_v44 = vld [vmem:[%s19591_s5 + $0x390] sm:$0xff] }
 0x242   : > { %2758 = vmatprep.subr.mxu0 %v10953_v48  ;;  %2835 = vmatprep.subr.mxu1 %v2640_v34  ;;  %v2637_v47 = vld [vmem:[%s19591_s5 + $0x190] sm:$0xff]  ;;  %v10949_v48 = vld [vmem:[%s19591_s5 + $0x388] sm:$0xff]  ;;  %v10948_v46 = vld [vmem:[%s19591_s5 + $0x380] sm:$0xff] }
 0x243   : > { %2759 = vmatpush2.msra.mxu0 %v10952_v60  ;;  %2836 = vmatpush2.msra.mxu1 %v2639_v61  ;;  %v1795_v1 = vpop.f32.mrf.mxu0  ;;  %v1940_v59 = vpop.f32.mrf.mxu1  ;;  %v2636_v34 = vld [vmem:[%s19591_s5 + $0x188] sm:$0xff]  ;;  %v2635_v62 = vld [vmem:[%s19591_s5 + $0x180] sm:$0xff] }
 0x244   : > { %2417 = vmatprep.mubr.f32.mxu0 %v19681_v8  ;;  %2558 = vmatprep.mubr.f32.mxu1 %v19681_v8  ;;  %v12191_v61 = vld [vmem:[%s19589_s3 + $0x68] sm:$0xff]  ;;  %v10947_v1 = vld [vmem:[%s19591_s5 + $0x378] sm:$0xff] }
 0x245   : > { %2760 = vmatprep.subr.mxu0 %v10951_v56  ;;  %2837 = vmatprep.subr.mxu1 %v2638_v12  ;;  %v1796_v45 = vpop.f32.mrf.mxu0  ;;  %v1941_v60 = vpop.f32.mrf.mxu1  ;;  %v2634_v59 = vld [vmem:[%s19591_s5 + $0x178] sm:$0xff] }
 0x246   : > { %10877 = vmatmul.mubr.msk.f32.gmra.mxu0 %vm1356_vm1, %v12191_v61  ;;  %10895 = vmatmul.mubr.msk.f32.gmra.mxu1 %vm1356_vm1, %v12191_v61 }
 0x247   : > { %2761 = vmatpush2.msra.mxu0 %v10950_v44  ;;  %2838 = vmatpush2.msra.mxu1 %v2637_v47  ;;  %v14307_v56 = vpop.f32.mrf.mxu0  ;;  %v1944_v12 = vpop.f32.mrf.mxu1  ;;  %v10946_v44 = vld [vmem:[%s19591_s5 + $0x370] sm:$0xff] }
 0x248   : > { %2762 = vmatprep.subr.mxu0 %v10949_v48  ;;  %2839 = vmatprep.subr.mxu1 %v2636_v34  ;;  %v2633_v47 = vld [vmem:[%s19591_s5 + $0x170] sm:$0xff]  ;;  %v10945_v48 = vld [vmem:[%s19591_s5 + $0x368] sm:$0xff]  ;;  %v10944_v12 = vld [vmem:[%s19591_s5 + $0x360] sm:$0xff] }
 0x249   : > { %2763 = vmatpush2.msra.mxu0 %v10948_v46  ;;  %2840 = vmatpush2.msra.mxu1 %v2635_v62  ;;  %v14315_v45 = vpop.f32.mrf.mxu0  ;;  %v1945_v60 = vpop.f32.mrf.mxu1  ;;  %v2632_v34 = vld [vmem:[%s19591_s5 + $0x168] sm:$0xff]  ;;  %v12192_v62 = vld [vmem:[%s19589_s3 + $0x70] sm:$0xff] }
 0x24a   : > { %2421 = vmatprep.mubr.f32.mxu0 %v19681_v8  ;;  %2562 = vmatprep.mubr.f32.mxu1 %v19681_v8 }
 0x24b   : > { %2764 = vmatprep.subr.mxu0 %v10947_v1  ;;  %2841 = vmatprep.subr.mxu1 %v2634_v59  ;;  %v14331_v61 = vpop.f32.mrf.mxu0  ;;  %v1948_v46 = vpop.f32.mrf.mxu1  ;;  %v2631_v1 = vld [vmem:[%s19591_s5 + $0x160] sm:$0xff] }
 0x24c   : > { %10878 = vmatmul.mubr.msk.f32.gmra.mxu0 %vm1356_vm1, %v12192_v62  ;;  %10896 = vmatmul.mubr.msk.f32.gmra.mxu1 %vm1356_vm1, %v12192_v62  ;;  %v10943_v46 = vld [vmem:[%s19591_s5 + $0x358] sm:$0xff] }
 0x24d   : > { %2765 = vmatpush2.msra.mxu0 %v10946_v44  ;;  %2842 = vmatpush2.msra.mxu1 %v2633_v47  ;;  %v14344_v59 = vpop.f32.mrf.mxu0  ;;  %v1949_v60 = vpop.f32.mrf.mxu1  ;;  %v2630_v62 = vld [vmem:[%s19591_s5 + $0x158] sm:$0xff]  ;;  %v10942_v44 = vld [vmem:[%s19591_s5 + $0x350] sm:$0xff] }
 0x24e   : > { %2766 = vmatprep.subr.mxu0 %v10945_v48  ;;  %2843 = vmatprep.subr.mxu1 %v2632_v34  ;;  %v2629_v47 = vld [vmem:[%s19591_s5 + $0x150] sm:$0xff]  ;;  %v2628_v48 = vld [vmem:[%s19591_s5 + $0x148] sm:$0xff]  ;;  %v10940_v60 = vld [vmem:[%s19591_s5 + $0x340] sm:$0xff] }
 0x24f   : > { %2767 = vmatpush2.msra.mxu0 %v10944_v12  ;;  %2844 = vmatpush2.msra.mxu1 %v2631_v1  ;;  %v1811_v33 = vpop.f32.mrf.mxu0  ;;  %v14352_v32 = vpop.f32.mrf.mxu1  ;;  %v12193_v1 = vld [vmem:[%s19589_s3 + $0x78] sm:$0xff] }
 0x250   : > { %2425 = vmatprep.mubr.f32.mxu0 %v19681_v8  ;;  %2566 = vmatprep.mubr.f32.mxu1 %v19681_v8  ;;  %v10941_v33 = vld [vmem:[%s19591_s5 + $0x348] sm:$0xff] }
 0x251   : > { %2768 = vmatprep.subr.mxu0 %v10943_v46  ;;  %2845 = vmatprep.subr.mxu1 %v2630_v62  ;;  %v1812_v34 = vpop.f32.mrf.mxu0  ;;  %v14368_v12 = vpop.f32.mrf.mxu1  ;;  %v2627_v46 = vld [vmem:[%s19591_s5 + $0x140] sm:$0xff] }
 0x252   : > { %10879 = vmatmul.mubr.msk.f32.gmra.mxu0 %vm1356_vm1, %v12193_v1  ;;  %10897 = vmatmul.mubr.msk.f32.gmra.mxu1 %vm1356_vm1, %v12193_v1  ;;  %v2626_v1 = vld [vmem:[%s19591_s5 + $0x138] sm:$0xff] }
 0x253   : > { %2769 = vmatpush2.msra.mxu0 %v10942_v44  ;;  %2846 = vmatpush2.msra.mxu1 %v2629_v47  ;;  %v1815_v62 = vpop.f32.mrf.mxu0  ;;  %v14381_v34 = vpop.f32.mrf.mxu1  ;;  %v10938_v44 = vld [vmem:[%s19591_s5 + $0x330] sm:$0xff] }
 0x254   : > { %2770 = vmatprep.subr.mxu0 %v10941_v33  ;;  %2847 = vmatprep.subr.mxu1 %v2628_v48  ;;  %v2625_v47 = vld [vmem:[%s19591_s5 + $0x130] sm:$0xff]  ;;  %v2624_v33 = vld [vmem:[%s19591_s5 + $0x128] sm:$0xff]  ;;  %v2623_v62 = vld [vmem:[%s19591_s5 + $0x120] sm:$0xff] }
 0x255   : > { %2771 = vmatpush2.msra.mxu0 %v10940_v60  ;;  %2848 = vmatpush2.msra.mxu1 %v2627_v46  ;;  %v1816_v29 = vpop.f32.mrf.mxu0  ;;  %v14389_v25 = vpop.f32.mrf.mxu1  ;;  %v12194_v46 = vld [vmem:[%s19589_s3 + $0x80] sm:$0xff] }
 0x256   : > { %2429 = vmatprep.mubr.f32.mxu0 %v19681_v8  ;;  %2570 = vmatprep.mubr.f32.mxu1 %v19681_v8  ;;  %v10937_v29 = vld [vmem:[%s19591_s5 + $0x328] sm:$0xff] }
 0x257   : > { %2772 = vmatprep.subr.mxu0 %v10939_v31  ;;  %2849 = vmatprep.subr.mxu1 %v2626_v1  ;;  %v14405_v48 = vpop.f32.mrf.mxu0  ;;  %v1964_v60 = vpop.f32.mrf.mxu1  ;;  %v10936_v31 = vld [vmem:[%s19591_s5 + $0x320] sm:$0xff] }
 0x258   : > { %10880 = vmatmul.mubr.msk.f32.gmra.mxu0 %vm1356_vm1, %v12194_v46  ;;  %10898 = vmatmul.mubr.msk.f32.gmra.mxu1 %vm1356_vm1, %v12194_v46  ;;  %v2622_v46 = vld [vmem:[%s19591_s5 + $0x118] sm:$0xff] }
 0x259   : > { %2773 = vmatpush2.msra.mxu0 %v10938_v44  ;;  %2850 = vmatpush2.msra.mxu1 %v2625_v47  ;;  %v14418_v1 = vpop.f32.mrf.mxu0  ;;  %v1965_v60 = vpop.f32.mrf.mxu1  ;;  %v10934_v44 = vld [vmem:[%s19591_s5 + $0x310] sm:$0xff] }
 0x25a   : > { %2774 = vmatprep.subr.mxu0 %v10937_v29  ;;  %2851 = vmatprep.subr.mxu1 %v2624_v33  ;;  %v2621_v47 = vld [vmem:[%s19591_s5 + $0x110] sm:$0xff]  ;;  %v10933_v29 = vld [vmem:[%s19591_s5 + $0x308] sm:$0xff]  ;;  %v2619_v60 = vld [vmem:[%s19591_s5 + $0x100] sm:$0xff] }
 0x25b   : > { %2775 = vmatpush2.msra.mxu0 %v10936_v31  ;;  %2852 = vmatpush2.msra.mxu1 %v2623_v62  ;;  %v14426_v14 = vpop.f32.mrf.mxu0  ;;  %v1968_v13 = vpop.f32.mrf.mxu1  ;;  %v12195_v31 = vld [vmem:[%s19589_s3 + $0x88] sm:$0xff]  ;;  %v10932_v62 = vld [vmem:[%s19591_s5 + $0x300] sm:$0xff] }
 0x25c   : > { %2433 = vmatprep.mubr.f32.mxu0 %v19681_v8  ;;  %2574 = vmatprep.mubr.f32.mxu1 %v19681_v8 }
 0x25d   : > { %2776 = vmatprep.subr.mxu0 %v10935_v15  ;;  %2853 = vmatprep.subr.mxu1 %v2622_v46  ;;  %v14439_v33 = vpop.f32.mrf.mxu0  ;;  %v1969_v13 = vpop.f32.mrf.mxu1  ;;  %v2620_v15 = vld [vmem:[%s19591_s5 + $0x108] sm:$0xff] }
 0x25e   : > { %10881 = vmatmul.mubr.msk.f32.gmra.mxu0 %vm1356_vm1, %v12195_v31  ;;  %10899 = vmatmul.mubr.msk.f32.gmra.mxu1 %vm1356_vm1, %v12195_v31  ;;  %v10995_v31 = vld [vmem:[%s19591_s5 + $0x4f8] sm:$0xff] }
 0x25f   : > { %2777 = vmatpush2.msra.mxu0 %v10934_v44  ;;  %2854 = vmatpush2.msra.mxu1 %v2621_v47  ;;  %v1831_v46 = vpop.f32.mrf.mxu0  ;;  %v1972_v13 = vpop.f32.mrf.mxu1  ;;  %v11059_v44 = vld [vmem:[%s19591_s5 + $0x6f8] sm:$0xff] }
 0x260   : > { %2778 = vmatprep.subr.mxu0 %v10933_v29  ;;  %2780 = vmatprep.mubr.f32.mxu0 %v13879_v28  ;;  %v10994_v29 = vld [vmem:[%s19591_s5 + $0x4f0] sm:$0xff] }
 0x261   : > { %2855 = vmatprep.subr.mxu1 %v2620_v15  ;;  %2857 = vmatprep.mubr.f32.mxu1 %v13853_v52  ;;  %v1832_v47 = vpop.f32.mrf.mxu0  ;;  %v1973_v54 = vpop.f32.mrf.mxu1  ;;  %v11058_v28 = vld [vmem:[%s19591_s5 + $0x6f0] sm:$0xff]  ;;  %v11057_v52 = vld [vmem:[%s19591_s5 + $0x6e8] sm:$0xff]  ;;  %v10992_v15 = vld [vmem:[%s19591_s5 + $0x4e0] sm:$0xff] }
 0x262   : > { %2779 = vmatpush2.msra.mxu0 %v10932_v62  ;;  %2856 = vmatpush2.msra.mxu1 %v2619_v60  ;;  %v10993_v54 = vld [vmem:[%s19591_s5 + $0x4e8] sm:$0xff]  ;;  %v10991_v60 = vld [vmem:[%s19591_s5 + $0x4d8] sm:$0xff] }
 0x263   : > { %2935 = vmatprep.subr.mxu0 %v10995_v31  ;;  %3081 = vmatprep.subr.mxu1 %v11059_v44  ;;  %v1835_v46 = vpop.f32.mrf.mxu0  ;;  %v1976_v13 = vpop.f32.mrf.mxu1  ;;  %v11055_v31 = vld [vmem:[%s19591_s5 + $0x6d8] sm:$0xff] }
 0x264   : > { %2781 = vmatmul.mubr.f32.vlgmr.msra.gmra.mxu0 %v13875_v26  ;;  %2858 = vmatmul.mubr.f32.vlgmr.msra.gmra.mxu1 %v13849_v50  ;;  %v11056_v26 = vld [vmem:[%s19591_s5 + $0x6e0] sm:$0xff]  ;;  %v11053_v13 = vld [vmem:[%s19591_s5 + $0x6c8] sm:$0xff] }
 0x265   : > { %2936 = vmatpush1.msra.mxu0 %v10994_v29  ;;  %3082 = vmatpush1.msra.mxu1 %v11058_v28  ;;  %v1836_v62 = vpop.f32.mrf.mxu0  ;;  %v1977_v50 = vpop.f32.mrf.mxu1  ;;  %v10989_v29 = vld [vmem:[%s19591_s5 + $0x4c8] sm:$0xff] }
 0x266   : > { %2786 = vmatprep.mubr.f32.mxu0 %v13889_v51  ;;  %2863 = vmatprep.mubr.f32.mxu1 %v13867_v10  ;;  %v10990_v51 = vld [vmem:[%s19591_s5 + $0x4d0] sm:$0xff] }
 0x267   : > { %2937 = vmatprep.subr.mxu0 %v10993_v54  ;;  %3083 = vmatprep.subr.mxu1 %v11057_v52  ;;  %v1839_v44 = vpop.f32.mrf.mxu0  ;;  %v1980_v47 = vpop.f32.mrf.mxu1  ;;  %v11054_v10 = vld [vmem:[%s19591_s5 + $0x6d0] sm:$0xff]  ;;  %v10988_v54 = vld [vmem:[%s19591_s5 + $0x4c0] sm:$0xff] }
 0x268   : > { %2938 = vmatpush1.msra.mxu0 %v10992_v15  ;;  %3084 = vmatpush1.msra.mxu1 %v11056_v26  ;;  %v11052_v52 = vld [vmem:[%s19591_s5 + $0x6c0] sm:$0xff]  ;;  %v10986_v62 = vld [vmem:[%s19591_s5 + $0x4b0] sm:$0xff] }
 0x269   : > { %2939 = vmatprep.subr.mxu0 %v10991_v60  ;;  %3085 = vmatprep.subr.mxu1 %v11055_v31  ;;  %v1840_v28 = vpop.f32.mrf.mxu0  ;;  %v1981_v46 = vpop.f32.mrf.mxu1  ;;  %v11050_v50 = vld [vmem:[%s19591_s5 + $0x6b0] sm:$0xff]  ;;  %v10985_v31 = vld [vmem:[%s19591_s5 + $0x4a8] sm:$0xff]  ;;  %v10984_v44 = vld [vmem:[%s19591_s5 + $0x4a0] sm:$0xff] }
 0x26a   : > { %2787 = vmatmul.mubr.f32.gmra.mxu0 %v13885_v49  ;;  %2864 = vmatmul.mubr.f32.gmra.mxu1 %v13859_v5  ;;  %v10987_v5 = vld [vmem:[%s19591_s5 + $0x4b8] sm:$0xff]  ;;  %v11048_v47 = vld [vmem:[%s19591_s5 + $0x6a0] sm:$0xff]  ;;  %v10982_v46 = vld [vmem:[%s19591_s5 + $0x490] sm:$0xff] }
 0x26b   : > { %2940 = vmatpush1.msra.mxu0 %v10990_v51  ;;  %3086 = vmatpush1.msra.mxu1 %v11054_v10  ;;  %v1843_v15 = vpop.f32.mrf.mxu0  ;;  %v1984_v26 = vpop.f32.mrf.mxu1  ;;  %v11051_v49 = vld [vmem:[%s19591_s5 + $0x6b8] sm:$0xff] }
 0x26c   : > { %2941 = vmatprep.subr.mxu0 %v10989_v29  ;;  %2999 = vmatprep.mubr.f32.mxu0 %v13899_v7  ;;  %v10983_v29 = vld [vmem:[%s19591_s5 + $0x498] sm:$0xff]  ;;  %v10981_v15 = vld [vmem:[%s19591_s5 + $0x488] sm:$0xff] }
 0x26d   : > { %3087 = vmatprep.subr.mxu1 %v11053_v13  ;;  %3145 = vmatprep.mubr.f32.mxu1 %v14315_v45  ;;  %v1844_v7 = vpop.f32.mrf.mxu0  ;;  %v1985_v60 = vpop.f32.mrf.mxu1  ;;  %v11049_v45 = vld [vmem:[%s19591_s5 + $0x6a8] sm:$0xff]  ;;  %v11047_v28 = vld [vmem:[%s19591_s5 + $0x698] sm:$0xff]  ;;  %v11046_v13 = vld [vmem:[%s19591_s5 + $0x690] sm:$0xff] }
 0x26e   : > { %2942 = vmatpush1.msra.mxu0 %v10988_v54  ;;  %3088 = vmatpush1.msra.mxu1 %v11052_v52  ;;  %v11045_v26 = vld [vmem:[%s19591_s5 + $0x688] sm:$0xff]  ;;  %v10979_v7 = vld [vmem:[%s19591_s5 + $0x478] sm:$0xff] }
 0x26f   : > { %2943 = vmatprep.subr.mxu0 %v10987_v5  ;;  %3089 = vmatprep.subr.mxu1 %v11051_v49  ;;  %v1847_v51 = vpop.f32.mrf.mxu0  ;;  %v1988_v10 = vpop.f32.mrf.mxu1  ;;  %v10980_v5 = vld [vmem:[%s19591_s5 + $0x480] sm:$0xff]  ;;  %v11043_v60 = vld [vmem:[%s19591_s5 + $0x678] sm:$0xff] }
 0x270   : > { %2944 = vmatpush1.msra.mxu0 %v10986_v62  ;;  %3090 = vmatpush1.msra.mxu1 %v11050_v50  ;;  %v11044_v49 = vld [vmem:[%s19591_s5 + $0x680] sm:$0xff]  ;;  %v10977_v51 = vld [vmem:[%s19591_s5 + $0x468] sm:$0xff] }
 0x271   : > { %2945 = vmatprep.subr.mxu0 %v10985_v31  ;;  %3091 = vmatprep.subr.mxu1 %v11049_v45  ;;  %v1848_v54 = vpop.f32.mrf.mxu0  ;;  %v1989_v52 = vpop.f32.mrf.mxu1  ;;  %v10978_v31 = vld [vmem:[%s19591_s5 + $0x470] sm:$0xff]  ;;  %v11041_v10 = vld [vmem:[%s19591_s5 + $0x668] sm:$0xff] }
 0x272   : > { %2946 = vmatpush1.msra.mxu0 %v10984_v44  ;;  %3092 = vmatpush1.msra.mxu1 %v11048_v47  ;;  %v11042_v45 = vld [vmem:[%s19591_s5 + $0x670] sm:$0xff]  ;;  %v10975_v54 = vld [vmem:[%s19591_s5 + $0x458] sm:$0xff] }
 0x273   : > { %2947 = vmatprep.subr.mxu0 %v10983_v29  ;;  %3093 = vmatprep.subr.mxu1 %v11047_v28  ;;  %v1851_v62 = vpop.f32.mrf.mxu0  ;;  %v1992_v50 = vpop.f32.mrf.mxu1  ;;  %v10976_v29 = vld [vmem:[%s19591_s5 + $0x460] sm:$0xff]  ;;  %v11039_v52 = vld [vmem:[%s19591_s5 + $0x658] sm:$0xff] }
 0x274   : > { %2948 = vmatpush1.msra.mxu0 %v10982_v46  ;;  %3094 = vmatpush1.msra.mxu1 %v11046_v13  ;;  %v11040_v28 = vld [vmem:[%s19591_s5 + $0x660] sm:$0xff]  ;;  %v10973_v62 = vld [vmem:[%s19591_s5 + $0x448] sm:$0xff] }
 0x275   : > { %2949 = vmatprep.subr.mxu0 %v10981_v15  ;;  %3095 = vmatprep.subr.mxu1 %v11045_v26  ;;  %v1852_v44 = vpop.f32.mrf.mxu0  ;;  %v1993_v47 = vpop.f32.mrf.mxu1  ;;  %v10974_v15 = vld [vmem:[%s19591_s5 + $0x450] sm:$0xff]  ;;  %v11037_v50 = vld [vmem:[%s19591_s5 + $0x648] sm:$0xff] }
 0x276   : > { %2950 = vmatpush1.msra.mxu0 %v10980_v5  ;;  %3096 = vmatpush1.msra.mxu1 %v11044_v49  ;;  %v11038_v26 = vld [vmem:[%s19591_s5 + $0x650] sm:$0xff] }
 0x277   : > { %2951 = vmatprep.subr.mxu0 %v10979_v7  ;;  %3097 = vmatprep.subr.mxu1 %v11043_v60  ;;  %v14585_v46 = vpop.f32.mrf.mxu0  ;;  %v2214_v13 = vpop.f32.mrf.mxu1  ;;  %v10972_v7 = vld [vmem:[%s19591_s5 + $0x440] sm:$0xff] }
 0x278   : > { %2952 = vmatpush1.msra.mxu0 %v10978_v31  ;;  %3098 = vmatpush1.msra.mxu1 %v11042_v45  ;;  %v11036_v60 = vld [vmem:[%s19591_s5 + $0x640] sm:$0xff]  ;;  %v10971_v31 = vld [vmem:[%s19591_s5 + $0x438] sm:$0xff] }
 0x279   : > { %2953 = vmatprep.subr.mxu0 %v10977_v51  ;;  %3099 = vmatprep.subr.mxu1 %v11041_v10  ;;  %v14599_v5 = vpop.f32.mrf.mxu0  ;;  %v2215_v49 = vpop.f32.mrf.mxu1  ;;  %v11035_v45 = vld [vmem:[%s19591_s5 + $0x638] sm:$0xff]  ;;  %v10970_v51 = vld [vmem:[%s19591_s5 + $0x430] sm:$0xff] }
 0x27a   : > { %2954 = vmatpush1.msra.mxu0 %v10976_v29  ;;  %3100 = vmatpush1.msra.mxu1 %v11040_v28  ;;  %v11034_v10 = vld [vmem:[%s19591_s5 + $0x630] sm:$0xff]  ;;  %v10969_v29 = vld [vmem:[%s19591_s5 + $0x428] sm:$0xff]  ;;  %v11031_v49 = vld [vmem:[%s19591_s5 + $0x618] sm:$0xff] }
 0x27b   : > { %2955 = vmatprep.subr.mxu0 %v10975_v54  ;;  %3101 = vmatprep.subr.mxu1 %v11039_v52  ;;  %v11033_v28 = vld [vmem:[%s19591_s5 + $0x628] sm:$0xff]  ;;  %v10968_v52 = vld [vmem:[%s19591_s5 + $0x420] sm:$0xff] }
 0x27c   : > { %2956 = vmatpush1.msra.mxu0 %v10974_v15  ;;  %3102 = vmatpush1.msra.mxu1 %v11038_v26  ;;  %v14619_v44 = vpop.f32.mrf.mxu0  ;;  %v2218_v47 = vpop.f32.mrf.mxu1  ;;  %v11032_v15 = vld [vmem:[%s19591_s5 + $0x620] sm:$0xff]  ;;  %v10967_v26 = vld [vmem:[%s19591_s5 + $0x418] sm:$0xff] }
 0x27d   : > { %2957 = vmatprep.subr.mxu0 %v10973_v62  ;;  %3103 = vmatprep.subr.mxu1 %v11037_v50 }
 0x27e   : > { %2958 = vmatpush1.msra.mxu0 %v10972_v7  ;;  %3104 = vmatpush1.msra.mxu1 %v11036_v60  ;;  %v14633_v13 = vpop.f32.mrf.mxu0  ;;  %v2219_v54 = vpop.f32.mrf.mxu1  ;;  %v10966_v7 = vld [vmem:[%s19591_s5 + $0x410] sm:$0xff] }
 0x27f   : > { %2959 = vmatprep.subr.mxu0 %v10971_v31  ;;  %3105 = vmatprep.subr.mxu1 %v11035_v45  ;;  %v11030_v60 = vld [vmem:[%s19591_s5 + $0x610] sm:$0xff]  ;;  %v10965_v31 = vld [vmem:[%s19591_s5 + $0x408] sm:$0xff]  ;;  %v11091_v54 = vld [vmem:[%s19591_s5 + $0x7f8] sm:$0xff] }
 0x280   : > { %2960 = vmatpush1.msra.mxu0 %v10970_v51  ;;  %3106 = vmatpush1.msra.mxu1 %v11034_v10  ;;  %v2073_v62 = vpop.f32.mrf.mxu0  ;;  %v14647_v50 = vpop.f32.mrf.mxu1  ;;  %v11029_v45 = vld [vmem:[%s19591_s5 + $0x608] sm:$0xff]  ;;  %v10964_v10 = vld [vmem:[%s19591_s5 + $0x400] sm:$0xff] }
 0x281   : > { %2961 = vmatprep.subr.mxu0 %v10969_v29  ;;  %3107 = vmatprep.subr.mxu1 %v11033_v28  ;;  %v11028_v29 = vld [vmem:[%s19591_s5 + $0x600] sm:$0xff]  ;;  %v11027_v28 = vld [vmem:[%s19591_s5 + $0x5f8] sm:$0xff]  ;;  %v11025_v62 = vld [vmem:[%s19591_s5 + $0x5e8] sm:$0xff] }
 0x282   : > { %2962 = vmatpush1.msra.mxu0 %v10968_v52  ;;  %3108 = vmatpush1.msra.mxu1 %v11032_v15  ;;  %v2074_v47 = vpop.f32.mrf.mxu0  ;;  %v14661_v51 = vpop.f32.mrf.mxu1 }
 0x283   : > { %2963 = vmatprep.subr.mxu0 %v10967_v26  ;;  %3109 = vmatprep.subr.mxu1 %v11031_v49  ;;  %v11026_v26 = vld [vmem:[%s19591_s5 + $0x5f0] sm:$0xff]  ;;  %v11088_v47 = vld [vmem:[%s19591_s5 + $0x7e0] sm:$0xff] }
 0x284   : > { %2964 = vmatpush1.msra.mxu0 %v10966_v7  ;;  %3110 = vmatpush1.msra.mxu1 %v11030_v60  ;;  %v2077_v52 = vpop.f32.mrf.mxu0  ;;  %v14675_v15 = vpop.f32.mrf.mxu1  ;;  %v11090_v49 = vld [vmem:[%s19591_s5 + $0x7f0] sm:$0xff]  ;;  %v11089_v7 = vld [vmem:[%s19591_s5 + $0x7e8] sm:$0xff] }
 0x285   : > { %2965 = vmatprep.subr.mxu0 %v10965_v31  ;;  %3111 = vmatprep.subr.mxu1 %v11029_v45  ;;  %v11024_v45 = vld [vmem:[%s19591_s5 + $0x5e0] sm:$0xff]  ;;  %v11022_v52 = vld [vmem:[%s19591_s5 + $0x5d0] sm:$0xff] }
 0x286   : > { %2966 = vmatpush1.msra.mxu0 %v10964_v10  ;;  %3112 = vmatpush1.msra.mxu1 %v11028_v29  ;;  %v2078_v60 = vpop.f32.mrf.mxu0  ;;  %v14689_v31 = vpop.f32.mrf.mxu1  ;;  %v11023_v10 = vld [vmem:[%s19591_s5 + $0x5d8] sm:$0xff] }
 0x287   : > { %2967 = vmatprep.subr.mxu0 %v11027_v28  ;;  %3113 = vmatprep.subr.mxu1 %v11091_v54  ;;  %v11087_v29 = vld [vmem:[%s19591_s5 + $0x7d8] sm:$0xff]  ;;  %v11085_v60 = vld [vmem:[%s19591_s5 + $0x7c8] sm:$0xff] }
 0x288   : > { %2968 = vmatpush2.msra.mxu0 %v11026_v26  ;;  %3114 = vmatpush2.msra.mxu1 %v11090_v49  ;;  %v14703_v28 = vpop.f32.mrf.mxu0  ;;  %v2234_v54 = vpop.f32.mrf.mxu1  ;;  %v11086_v26 = vld [vmem:[%s19591_s5 + $0x7d0] sm:$0xff]  ;;  %v11021_v49 = vld [vmem:[%s19591_s5 + $0x5c8] sm:$0xff] }
 0x289   : > { %2969 = vmatprep.subr.mxu0 %v11025_v62  ;;  %3115 = vmatprep.subr.mxu1 %v11089_v7  ;;  %v11020_v54 = vld [vmem:[%s19591_s5 + $0x5c0] sm:$0xff] }
 0x28a   : > { %2970 = vmatpush2.msra.mxu0 %v11024_v45  ;;  %3116 = vmatpush2.msra.mxu1 %v11088_v47  ;;  %v14717_v62 = vpop.f32.mrf.mxu0  ;;  %v2235_v7 = vpop.f32.mrf.mxu1  ;;  %v11084_v45 = vld [vmem:[%s19591_s5 + $0x7c0] sm:$0xff]  ;;  %v11019_v47 = vld [vmem:[%s19591_s5 + $0x5b8] sm:$0xff] }
 0x28b   : > { %2971 = vmatprep.subr.mxu0 %v11023_v10  ;;  %3117 = vmatprep.subr.mxu1 %v11087_v29  ;;  %v11083_v7 = vld [vmem:[%s19591_s5 + $0x7b8] sm:$0xff] }
 0x28c   : > { %2972 = vmatpush2.msra.mxu0 %v11022_v52  ;;  %3118 = vmatpush2.msra.mxu1 %v11086_v26  ;;  %v14731_v10 = vpop.f32.mrf.mxu0  ;;  %v2238_v29 = vpop.f32.mrf.mxu1  ;;  %v11082_v52 = vld [vmem:[%s19591_s5 + $0x7b0] sm:$0xff]  ;;  %v11017_v26 = vld [vmem:[%s19591_s5 + $0x5a8] sm:$0xff] }
 0x28d   : > { %2973 = vmatprep.subr.mxu0 %v11021_v49  ;;  %3119 = vmatprep.subr.mxu1 %v11085_v60  ;;  %v11081_v29 = vld [vmem:[%s19591_s5 + $0x7a8] sm:$0xff] }
 0x28e   : > { %2974 = vmatpush2.msra.mxu0 %v11020_v54  ;;  %3120 = vmatpush2.msra.mxu1 %v11084_v45  ;;  %v14745_v49 = vpop.f32.mrf.mxu0  ;;  %v2239_v60 = vpop.f32.mrf.mxu1  ;;  %v11080_v54 = vld [vmem:[%s19591_s5 + $0x7a0] sm:$0xff]  ;;  %v11015_v45 = vld [vmem:[%s19591_s5 + $0x598] sm:$0xff] }
 0x28f   : > { %2975 = vmatprep.subr.mxu0 %v11019_v47  ;;  %3121 = vmatprep.subr.mxu1 %v11083_v7  ;;  %v11079_v60 = vld [vmem:[%s19591_s5 + $0x798] sm:$0xff] }
 0x290   : > { %2976 = vmatpush2.msra.mxu0 %v11018_v53  ;;  %3122 = vmatpush2.msra.mxu1 %v11082_v52  ;;  %v2093_v47 = vpop.f32.mrf.mxu0  ;;  %v2242_v7 = vpop.f32.mrf.mxu1  ;;  %v11078_v53 = vld [vmem:[%s19591_s5 + $0x790] sm:$0xff]  ;;  %v11013_v52 = vld [vmem:[%s19591_s5 + $0x588] sm:$0xff] }
 0x291   : > { %2977 = vmatprep.subr.mxu0 %v11017_v26  ;;  %3123 = vmatprep.subr.mxu1 %v11081_v29  ;;  %v11077_v47 = vld [vmem:[%s19591_s5 + $0x788] sm:$0xff]  ;;  %v11012_v7 = vld [vmem:[%s19591_s5 + $0x580] sm:$0xff] }
 0x292   : > { %2978 = vmatpush2.msra.mxu0 %v11016_v42  ;;  %3124 = vmatpush2.msra.mxu1 %v11080_v54  ;;  %v2094_v26 = vpop.f32.mrf.mxu0  ;;  %v2243_v29 = vpop.f32.mrf.mxu1  ;;  %v11076_v42 = vld [vmem:[%s19591_s5 + $0x780] sm:$0xff]  ;;  %v11011_v54 = vld [vmem:[%s19591_s5 + $0x578] sm:$0xff] }
 0x293   : > { %2979 = vmatprep.subr.mxu0 %v11015_v45  ;;  %3125 = vmatprep.subr.mxu1 %v11079_v60  ;;  %v11075_v26 = vld [vmem:[%s19591_s5 + $0x778] sm:$0xff]  ;;  %v11010_v29 = vld [vmem:[%s19591_s5 + $0x570] sm:$0xff] }
 0x294   : > { %2980 = vmatpush2.msra.mxu0 %v11014_v41  ;;  %3126 = vmatpush2.msra.mxu1 %v11078_v53  ;;  %v2097_v45 = vpop.f32.mrf.mxu0  ;;  %v2246_v60 = vpop.f32.mrf.mxu1  ;;  %v11074_v41 = vld [vmem:[%s19591_s5 + $0x770] sm:$0xff]  ;;  %v11009_v53 = vld [vmem:[%s19591_s5 + $0x568] sm:$0xff] }
 0x295   : > { %2981 = vmatprep.subr.mxu0 %v11013_v52  ;;  %3127 = vmatprep.subr.mxu1 %v11077_v47  ;;  %v11073_v45 = vld [vmem:[%s19591_s5 + $0x768] sm:$0xff]  ;;  %v11008_v60 = vld [vmem:[%s19591_s5 + $0x560] sm:$0xff] }
 0x296   : > { %2982 = vmatpush2.msra.mxu0 %v11012_v7  ;;  %3128 = vmatpush2.msra.mxu1 %v11076_v42  ;;  %v2098_v52 = vpop.f32.mrf.mxu0  ;;  %v2247_v47 = vpop.f32.mrf.mxu1  ;;  %v11072_v7 = vld [vmem:[%s19591_s5 + $0x760] sm:$0xff]  ;;  %v11007_v42 = vld [vmem:[%s19591_s5 + $0x558] sm:$0xff] }
 0x297   : > { %2983 = vmatprep.subr.mxu0 %v11011_v54  ;;  %3129 = vmatprep.subr.mxu1 %v11075_v26  ;;  %v11071_v52 = vld [vmem:[%s19591_s5 + $0x758] sm:$0xff]  ;;  %v11006_v47 = vld [vmem:[%s19591_s5 + $0x550] sm:$0xff] }
 0x298   : > { %2984 = vmatpush2.msra.mxu0 %v11010_v29  ;;  %3130 = vmatpush2.msra.mxu1 %v11074_v41  ;;  %v2101_v54 = vpop.f32.mrf.mxu0  ;;  %v2250_v26 = vpop.f32.mrf.mxu1  ;;  %v11070_v29 = vld [vmem:[%s19591_s5 + $0x750] sm:$0xff]  ;;  %v11005_v41 = vld [vmem:[%s19591_s5 + $0x548] sm:$0xff] }
 0x299   : > { %2985 = vmatprep.subr.mxu0 %v11009_v53  ;;  %3131 = vmatprep.subr.mxu1 %v11073_v45  ;;  %v11069_v54 = vld [vmem:[%s19591_s5 + $0x748] sm:$0xff]  ;;  %v11004_v26 = vld [vmem:[%s19591_s5 + $0x540] sm:$0xff] }
 0x29a   : > { %2986 = vmatpush2.msra.mxu0 %v11008_v60  ;;  %3132 = vmatpush2.msra.mxu1 %v11072_v7  ;;  %v2102_v53 = vpop.f32.mrf.mxu0  ;;  %v2251_v45 = vpop.f32.mrf.mxu1  ;;  %v11068_v60 = vld [vmem:[%s19591_s5 + $0x740] sm:$0xff]  ;;  %v11003_v7 = vld [vmem:[%s19591_s5 + $0x538] sm:$0xff] }
 0x29b   : > { %2987 = vmatprep.subr.mxu0 %v11007_v42  ;;  %3133 = vmatprep.subr.mxu1 %v11071_v52  ;;  %v11067_v53 = vld [vmem:[%s19591_s5 + $0x738] sm:$0xff]  ;;  %v11002_v45 = vld [vmem:[%s19591_s5 + $0x530] sm:$0xff] }
 0x29c   : > { %2988 = vmatpush2.msra.mxu0 %v11006_v47  ;;  %3134 = vmatpush2.msra.mxu1 %v11070_v29  ;;  %v2105_v42 = vpop.f32.mrf.mxu0  ;;  %v2254_v52 = vpop.f32.mrf.mxu1  ;;  %v11066_v47 = vld [vmem:[%s19591_s5 + $0x730] sm:$0xff]  ;;  %v11001_v29 = vld [vmem:[%s19591_s5 + $0x528] sm:$0xff] }
 0x29d   : > { %2989 = vmatprep.subr.mxu0 %v11005_v41  ;;  %3135 = vmatprep.subr.mxu1 %v11069_v54  ;;  %v11065_v42 = vld [vmem:[%s19591_s5 + $0x728] sm:$0xff]  ;;  %v11000_v52 = vld [vmem:[%s19591_s5 + $0x520] sm:$0xff] }
 0x29e   : > { %2990 = vmatpush2.msra.mxu0 %v11004_v26  ;;  %3136 = vmatpush2.msra.mxu1 %v11068_v60  ;;  %v2106_v41 = vpop.f32.mrf.mxu0  ;;  %v2255_v54 = vpop.f32.mrf.mxu1  ;;  %v11064_v26 = vld [vmem:[%s19591_s5 + $0x720] sm:$0xff]  ;;  %v10999_v60 = vld [vmem:[%s19591_s5 + $0x518] sm:$0xff] }
 0x29f   : > { %2991 = vmatprep.subr.mxu0 %v11003_v7  ;;  %3137 = vmatprep.subr.mxu1 %v11067_v53  ;;  %v11063_v41 = vld [vmem:[%s19591_s5 + $0x718] sm:$0xff]  ;;  %v10998_v54 = vld [vmem:[%s19591_s5 + $0x510] sm:$0xff] }
 0x2a0   : > { %2992 = vmatpush2.msra.mxu0 %v11002_v45  ;;  %3138 = vmatpush2.msra.mxu1 %v11066_v47  ;;  %v2109_v7 = vpop.f32.mrf.mxu0  ;;  %v2258_v53 = vpop.f32.mrf.mxu1  ;;  %v11062_v45 = vld [vmem:[%s19591_s5 + $0x710] sm:$0xff]  ;;  %v10997_v47 = vld [vmem:[%s19591_s5 + $0x508] sm:$0xff] }
 0x2a1   : > { %2993 = vmatprep.subr.mxu0 %v11001_v29  ;;  %3139 = vmatprep.subr.mxu1 %v11065_v42  ;;  %v11061_v7 = vld [vmem:[%s19591_s5 + $0x708] sm:$0xff]  ;;  %v10996_v53 = vld [vmem:[%s19591_s5 + $0x500] sm:$0xff] }
 0x2a2   : > { %2994 = vmatpush2.msra.mxu0 %v11000_v52  ;;  %3140 = vmatpush2.msra.mxu1 %v11064_v26  ;;  %v2110_v29 = vpop.f32.mrf.mxu0  ;;  %v2259_v42 = vpop.f32.mrf.mxu1  ;;  %v11060_v52 = vld [vmem:[%s19591_s5 + $0x700] sm:$0xff] }
 0x2a3   : > { %2995 = vmatprep.subr.mxu0 %v10999_v60  ;;  %3141 = vmatprep.subr.mxu1 %v11063_v41  ;;  %v11123_v29 = vld [vmem:[%s19591_s5 + $0x8f8] sm:$0xff] }
 0x2a4   : > { %2996 = vmatpush2.msra.mxu0 %v10998_v54  ;;  %3142 = vmatpush2.msra.mxu1 %v11062_v45  ;;  %v2113_v26 = vpop.f32.mrf.mxu0  ;;  %v2262_v40 = vpop.f32.mrf.mxu1  ;;  %v11187_v60 = vld [vmem:[%s19591_s5 + $0xaf8] sm:$0xff]  ;;  %v11186_v54 = vld [vmem:[%s19591_s5 + $0xaf0] sm:$0xff]  ;;  %v11121_v45 = vld [vmem:[%s19591_s5 + $0x8e8] sm:$0xff] }
 0x2a5   : > { %2997 = vmatprep.subr.mxu0 %v10997_v47  ;;  %3143 = vmatprep.subr.mxu1 %v11061_v7  ;;  %v11122_v40 = vld [vmem:[%s19591_s5 + $0x8f0] sm:$0xff]  ;;  %v11120_v7 = vld [vmem:[%s19591_s5 + $0x8e0] sm:$0xff] }
 0x2a6   : > { %2998 = vmatpush2.msra.mxu0 %v10996_v53  ;;  %3144 = vmatpush2.msra.mxu1 %v11060_v52  ;;  %v2114_v41 = vpop.f32.mrf.mxu0  ;;  %v2263_v42 = vpop.f32.mrf.mxu1  ;;  %v11184_v53 = vld [vmem:[%s19591_s5 + $0xae0] sm:$0xff] }
 0x2a7   : > { %3000 = vmatmul.mubr.f32.vlgmr.msra.gmra.mxu0 %v13897_v2  ;;  %3146 = vmatmul.mubr.f32.vlgmr.msra.gmra.mxu1 %v14307_v56  ;;  %v11185_v2 = vld [vmem:[%s19591_s5 + $0xae8] sm:$0xff] }
 0x2a8   : > { %3227 = vmatprep.subr.mxu0 %v11123_v29  ;;  %3373 = vmatprep.subr.mxu1 %v11187_v60  ;;  %v14893_v47 = vpop.f32.mrf.mxu0  ;;  %v2266_v56 = vpop.f32.mrf.mxu1  ;;  %v11118_v29 = vld [vmem:[%s19591_s5 + $0x8d0] sm:$0xff] }
 0x2a9   : > { %19682 = vst [vmem:[#allocation36_spill] sm:$0xff] %v14893_v47  ;;  %3005 = vmatprep.mubr.f32.mxu0 %v13909_v63  ;;  %3151 = vmatprep.mubr.f32.mxu1 %v14344_v59  ;;  %v11119_v63 = vld [vmem:[%s19591_s5 + $0x8d8] sm:$0xff]  ;;  %v11182_v60 = vld [vmem:[%s19591_s5 + $0xad0] sm:$0xff] }
 0x2aa   : > { %3228 = vmatpush1.msra.mxu0 %v11122_v40  ;;  %3374 = vmatpush1.msra.mxu1 %v11186_v54  ;;  %v14903_v52 = vpop.f32.mrf.mxu0  ;;  %v2267_v26 = vpop.f32.mrf.mxu1  ;;  %v11183_v59 = vld [vmem:[%s19591_s5 + $0xad8] sm:$0xff]  ;;  %v11117_v40 = vld [vmem:[%s19591_s5 + $0x8c8] sm:$0xff] }
 0x2ab   : > { %19683 = vst [vmem:[#allocation37_spill] sm:$0xff] %v14903_v52  ;;  %3229 = vmatprep.subr.mxu0 %v11121_v45  ;;  %3375 = vmatprep.subr.mxu1 %v11185_v2  ;;  %v11181_v54 = vld [vmem:[%s19591_s5 + $0xac8] sm:$0xff]  ;;  %v11116_v45 = vld [vmem:[%s19591_s5 + $0x8c0] sm:$0xff] }
 0x2ac   : > { %3230 = vmatpush1.msra.mxu0 %v11120_v7  ;;  %3376 = vmatpush1.msra.mxu1 %v11184_v53  ;;  %v14917_v41 = vpop.f32.mrf.mxu0  ;;  %v2270_v42 = vpop.f32.mrf.mxu1  ;;  %v11179_v7 = vld [vmem:[%s19591_s5 + $0xab8] sm:$0xff] }
 0x2ad   : > { %19684 = vst [vmem:[#allocation38_spill] sm:$0xff] %v14917_v41  ;;  %3006 = vmatmul.mubr.f32.gmra.mxu0 %v13907_v3  ;;  %3152 = vmatmul.mubr.f32.gmra.mxu1 %v14331_v61  ;;  %v11180_v3 = vld [vmem:[%s19591_s5 + $0xac0] sm:$0xff]  ;;  %v11115_v61 = vld [vmem:[%s19591_s5 + $0x8b8] sm:$0xff] }
 0x2ae   : > { %3231 = vmatprep.subr.mxu0 %v11119_v63  ;;  %3377 = vmatprep.subr.mxu1 %v11183_v59  ;;  %v14930_v2 = vpop.f32.mrf.mxu0  ;;  %v2271_v56 = vpop.f32.mrf.mxu1  ;;  %v11114_v63 = vld [vmem:[%s19591_s5 + $0x8b0] sm:$0xff] }
 0x2af   : > { %19685 = vst [vmem:[#allocation39_spill] sm:$0xff] %v14930_v2  ;;  %3232 = vmatpush1.msra.mxu0 %v11118_v29  ;;  %3378 = vmatpush1.msra.mxu1 %v11182_v60  ;;  %v11178_v59 = vld [vmem:[%s19591_s5 + $0xab0] sm:$0xff]  ;;  %v11177_v29 = vld [vmem:[%s19591_s5 + $0xaa8] sm:$0xff]  ;;  %v11175_v56 = vld [vmem:[%s19591_s5 + $0xa98] sm:$0xff] }
 0x2b0   : > { %3437 = vmatprep.mubr.f32.mxu1 %v14418_v1  ;;  %3233 = vmatprep.subr.mxu0 %v11117_v40  ;;  %v2129_v53 = vpop.f32.mrf.mxu0  ;;  %v14942_v26 = vpop.f32.mrf.mxu1  ;;  %v11113_v1 = vld [vmem:[%s19591_s5 + $0x8a8] sm:$0xff]  ;;  %v11112_v40 = vld [vmem:[%s19591_s5 + $0x8a0] sm:$0xff] }
 0x2b1   : > { %19686 = vst [vmem:[#allocation40_spill] sm:$0xff] %v14942_v26  ;;  %3379 = vmatprep.subr.mxu1 %v11181_v54  ;;  %3234 = vmatpush1.msra.mxu0 %v11116_v45  ;;  %v11176_v54 = vld [vmem:[%s19591_s5 + $0xaa0] sm:$0xff]  ;;  %v11111_v45 = vld [vmem:[%s19591_s5 + $0x898] sm:$0xff]  ;;  %v11109_v53 = vld [vmem:[%s19591_s5 + $0x888] sm:$0xff] }
 0x2b2   : > { %3380 = vmatpush1.msra.mxu1 %v11180_v3  ;;  %3235 = vmatprep.subr.mxu0 %v11115_v61  ;;  %v2130_v60 = vpop.f32.mrf.mxu0  ;;  %v14956_v42 = vpop.f32.mrf.mxu1  ;;  %v11110_v61 = vld [vmem:[%s19591_s5 + $0x890] sm:$0xff] }
 0x2b3   : > { %19687 = vst [vmem:[#allocation41_spill] sm:$0xff] %v14956_v42  ;;  %3291 = vmatprep.mubr.f32.mxu0 %v14368_v12  ;;  %3381 = vmatprep.subr.mxu1 %v11179_v7  ;;  %v11174_v7 = vld [vmem:[%s19591_s5 + $0xa90] sm:$0xff]  ;;  %v11172_v60 = vld [vmem:[%s19591_s5 + $0xa80] sm:$0xff] }
 0x2b4   : > { %3236 = vmatpush1.msra.mxu0 %v11114_v63  ;;  %3382 = vmatpush1.msra.mxu1 %v11178_v59  ;;  %v2133_v12 = vpop.f32.mrf.mxu0  ;;  %v14971_v3 = vpop.f32.mrf.mxu1  ;;  %v11173_v63 = vld [vmem:[%s19591_s5 + $0xa88] sm:$0xff] }
 0x2b5   : > { %19688 = vst [vmem:[#allocation42_spill] sm:$0xff] %v14971_v3  ;;  %3237 = vmatprep.subr.mxu0 %v11113_v1  ;;  %3383 = vmatprep.subr.mxu1 %v11177_v29  ;;  %v11108_v29 = vld [vmem:[%s19591_s5 + $0x880] sm:$0xff]  ;;  %v11106_v12 = vld [vmem:[%s19591_s5 + $0x870] sm:$0xff] }
 0x2b6   : > { %3238 = vmatpush1.msra.mxu0 %v11112_v40  ;;  %3384 = vmatpush1.msra.mxu1 %v11176_v54  ;;  %v2134_v59 = vpop.f32.mrf.mxu0  ;;  %v14985_v1 = vpop.f32.mrf.mxu1  ;;  %v11107_v40 = vld [vmem:[%s19591_s5 + $0x878] sm:$0xff] }
 0x2b7   : > { %19689 = vst [vmem:[#allocation43_spill] sm:$0xff] %v14985_v1  ;;  %3239 = vmatprep.subr.mxu0 %v11111_v45  ;;  %3385 = vmatprep.subr.mxu1 %v11175_v56  ;;  %v11171_v54 = vld [vmem:[%s19591_s5 + $0xa78] sm:$0xff]  ;;  %v11169_v59 = vld [vmem:[%s19591_s5 + $0xa68] sm:$0xff] }
 0x2b8   : > { %3240 = vmatpush1.msra.mxu0 %v11110_v61  ;;  %3386 = vmatpush1.msra.mxu1 %v11174_v7  ;;  %v14999_v45 = vpop.f32.mrf.mxu0  ;;  %v2286_v56 = vpop.f32.mrf.mxu1  ;;  %v11170_v61 = vld [vmem:[%s19591_s5 + $0xa70] sm:$0xff]  ;;  %v11105_v7 = vld [vmem:[%s19591_s5 + $0x868] sm:$0xff] }
 0x2b9   : > { %19690 = vst [vmem:[#allocation44_spill] sm:$0xff] %v14999_v45  ;;  %3241 = vmatprep.subr.mxu0 %v11109_v53  ;;  %3387 = vmatprep.subr.mxu1 %v11173_v63  ;;  %v11104_v56 = vld [vmem:[%s19591_s5 + $0x860] sm:$0xff] }
 0x2ba   : > { %3242 = vmatpush1.msra.mxu0 %v11108_v29  ;;  %3388 = vmatpush1.msra.mxu1 %v11172_v60  ;;  %v15013_v53 = vpop.f32.mrf.mxu0  ;;  %v2287_v63 = vpop.f32.mrf.mxu1  ;;  %v11168_v29 = vld [vmem:[%s19591_s5 + $0xa60] sm:$0xff]  ;;  %v11103_v60 = vld [vmem:[%s19591_s5 + $0x858] sm:$0xff] }
 0x2bb   : > { %19691 = vst [vmem:[#allocation45_spill] sm:$0xff] %v15013_v53  ;;  %3243 = vmatprep.subr.mxu0 %v11107_v40  ;;  %3389 = vmatprep.subr.mxu1 %v11171_v54  ;;  %v11167_v63 = vld [vmem:[%s19591_s5 + $0xa58] sm:$0xff] }
 0x2bc   : > { %3244 = vmatpush1.msra.mxu0 %v11106_v12  ;;  %3390 = vmatpush1.msra.mxu1 %v11170_v61  ;;  %v15027_v40 = vpop.f32.mrf.mxu0  ;;  %v2290_v54 = vpop.f32.mrf.mxu1  ;;  %v11166_v12 = vld [vmem:[%s19591_s5 + $0xa50] sm:$0xff]  ;;  %v11101_v61 = vld [vmem:[%s19591_s5 + $0x848] sm:$0xff] }
 0x2bd   : > { %19692 = vst [vmem:[#allocation46_spill] sm:$0xff] %v15027_v40  ;;  %3245 = vmatprep.subr.mxu0 %v11105_v7  ;;  %3391 = vmatprep.subr.mxu1 %v11169_v59  ;;  %v11165_v54 = vld [vmem:[%s19591_s5 + $0xa48] sm:$0xff] }
 0x2be   : > { %3246 = vmatpush1.msra.mxu0 %v11104_v56  ;;  %3392 = vmatpush1.msra.mxu1 %v11168_v29  ;;  %v15041_v7 = vpop.f32.mrf.mxu0  ;;  %v2291_v59 = vpop.f32.mrf.mxu1  ;;  %v11164_v56 = vld [vmem:[%s19591_s5 + $0xa40] sm:$0xff]  ;;  %v11099_v29 = vld [vmem:[%s19591_s5 + $0x838] sm:$0xff] }
 0x2bf   : > { %19693 = vst [vmem:[#allocation47_spill] sm:$0xff] %v15041_v7  ;;  %3247 = vmatprep.subr.mxu0 %v11103_v60  ;;  %3393 = vmatprep.subr.mxu1 %v11167_v63  ;;  %v11163_v59 = vld [vmem:[%s19591_s5 + $0xa38] sm:$0xff] }
 0x2c0   : > { %3248 = vmatpush1.msra.mxu0 %v11102_v39  ;;  %3394 = vmatpush1.msra.mxu1 %v11166_v12  ;;  %v2359_v60 = vpop.f32.mrf.mxu0  ;;  %v2504_v63 = vpop.f32.mrf.mxu1  ;;  %v11162_v39 = vld [vmem:[%s19591_s5 + $0xa30] sm:$0xff]  ;;  %v11097_v12 = vld [vmem:[%s19591_s5 + $0x828] sm:$0xff] }
 0x2c1   : > { %3249 = vmatprep.subr.mxu0 %v11101_v61  ;;  %3395 = vmatprep.subr.mxu1 %v11165_v54  ;;  %v11161_v60 = vld [vmem:[%s19591_s5 + $0xa28] sm:$0xff]  ;;  %v11096_v63 = vld [vmem:[%s19591_s5 + $0x820] sm:$0xff] }
 0x2c2   : > { %3250 = vmatpush1.msra.mxu0 %v11100_v38  ;;  %3396 = vmatpush1.msra.mxu1 %v11164_v56  ;;  %v2360_v61 = vpop.f32.mrf.mxu0  ;;  %v2505_v54 = vpop.f32.mrf.mxu1  ;;  %v11160_v38 = vld [vmem:[%s19591_s5 + $0xa20] sm:$0xff]  ;;  %v11095_v56 = vld [vmem:[%s19591_s5 + $0x818] sm:$0xff] }
 0x2c3   : > { %3251 = vmatprep.subr.mxu0 %v11099_v29  ;;  %3397 = vmatprep.subr.mxu1 %v11163_v59  ;;  %v11159_v61 = vld [vmem:[%s19591_s5 + $0xa18] sm:$0xff]  ;;  %v11094_v54 = vld [vmem:[%s19591_s5 + $0x810] sm:$0xff] }
 0x2c4   : > { %3252 = vmatpush1.msra.mxu0 %v11098_v37  ;;  %3398 = vmatpush1.msra.mxu1 %v11162_v39  ;;  %v2363_v29 = vpop.f32.mrf.mxu0  ;;  %v2508_v59 = vpop.f32.mrf.mxu1  ;;  %v11158_v37 = vld [vmem:[%s19591_s5 + $0xa10] sm:$0xff]  ;;  %v11093_v39 = vld [vmem:[%s19591_s5 + $0x808] sm:$0xff] }
 0x2c5   : > { %3253 = vmatprep.subr.mxu0 %v11097_v12  ;;  %3399 = vmatprep.subr.mxu1 %v11161_v60  ;;  %v11157_v29 = vld [vmem:[%s19591_s5 + $0xa08] sm:$0xff]  ;;  %v11092_v59 = vld [vmem:[%s19591_s5 + $0x800] sm:$0xff] }
 0x2c6   : > { %3254 = vmatpush1.msra.mxu0 %v11096_v63  ;;  %3400 = vmatpush1.msra.mxu1 %v11160_v38  ;;  %v2364_v12 = vpop.f32.mrf.mxu0  ;;  %v2509_v60 = vpop.f32.mrf.mxu1  ;;  %v11156_v63 = vld [vmem:[%s19591_s5 + $0xa00] sm:$0xff]  ;;  %v11155_v38 = vld [vmem:[%s19591_s5 + $0x9f8] sm:$0xff] }
 0x2c7   : > { %3255 = vmatprep.subr.mxu0 %v11095_v56  ;;  %3401 = vmatprep.subr.mxu1 %v11159_v61  ;;  %v11219_v12 = vld [vmem:[%s19591_s5 + $0xbf8] sm:$0xff]  ;;  %v11154_v60 = vld [vmem:[%s19591_s5 + $0x9f0] sm:$0xff] }
 0x2c8   : > { %3256 = vmatpush1.msra.mxu0 %v11094_v54  ;;  %3402 = vmatpush1.msra.mxu1 %v11158_v37  ;;  %v2367_v56 = vpop.f32.mrf.mxu0  ;;  %v2512_v61 = vpop.f32.mrf.mxu1  ;;  %v11218_v54 = vld [vmem:[%s19591_s5 + $0xbf0] sm:$0xff]  ;;  %v11153_v37 = vld [vmem:[%s19591_s5 + $0x9e8] sm:$0xff] }
 0x2c9   : > { %3257 = vmatprep.subr.mxu0 %v11093_v39  ;;  %3403 = vmatprep.subr.mxu1 %v11157_v29  ;;  %v11217_v56 = vld [vmem:[%s19591_s5 + $0xbe8] sm:$0xff]  ;;  %v11152_v61 = vld [vmem:[%s19591_s5 + $0x9e0] sm:$0xff] }
 0x2ca   : > { %3258 = vmatpush1.msra.mxu0 %v11092_v59  ;;  %3404 = vmatpush1.msra.mxu1 %v11156_v63  ;;  %v2368_v39 = vpop.f32.mrf.mxu0  ;;  %v2513_v29 = vpop.f32.mrf.mxu1  ;;  %v11216_v59 = vld [vmem:[%s19591_s5 + $0xbe0] sm:$0xff]  ;;  %v11151_v63 = vld [vmem:[%s19591_s5 + $0x9d8] sm:$0xff] }
 0x2cb   : > { %3259 = vmatprep.subr.mxu0 %v11155_v38  ;;  %3405 = vmatprep.subr.mxu1 %v11219_v12  ;;  %v11215_v39 = vld [vmem:[%s19591_s5 + $0xbd8] sm:$0xff]  ;;  %v11150_v29 = vld [vmem:[%s19591_s5 + $0x9d0] sm:$0xff] }
 0x2cc   : > { %3260 = vmatpush2.msra.mxu0 %v11154_v60  ;;  %3406 = vmatpush2.msra.mxu1 %v11218_v54  ;;  %v2371_v38 = vpop.f32.mrf.mxu0  ;;  %v2516_v12 = vpop.f32.mrf.mxu1  ;;  %v11214_v60 = vld [vmem:[%s19591_s5 + $0xbd0] sm:$0xff]  ;;  %v11149_v54 = vld [vmem:[%s19591_s5 + $0x9c8] sm:$0xff] }
 0x2cd   : > { %3261 = vmatprep.subr.mxu0 %v11153_v37  ;;  %3407 = vmatprep.subr.mxu1 %v11217_v56  ;;  %v11213_v38 = vld [vmem:[%s19591_s5 + $0xbc8] sm:$0xff]  ;;  %v11148_v12 = vld [vmem:[%s19591_s5 + $0x9c0] sm:$0xff] }
 0x2ce   : > { %3262 = vmatpush2.msra.mxu0 %v11152_v61  ;;  %3408 = vmatpush2.msra.mxu1 %v11216_v59  ;;  %v2372_v37 = vpop.f32.mrf.mxu0  ;;  %v2517_v56 = vpop.f32.mrf.mxu1  ;;  %v11212_v61 = vld [vmem:[%s19591_s5 + $0xbc0] sm:$0xff]  ;;  %v11147_v59 = vld [vmem:[%s19591_s5 + $0x9b8] sm:$0xff] }
 0x2cf   : > { %3263 = vmatprep.subr.mxu0 %v11151_v63  ;;  %3409 = vmatprep.subr.mxu1 %v11215_v39  ;;  %v11211_v37 = vld [vmem:[%s19591_s5 + $0xbb8] sm:$0xff]  ;;  %v11146_v39 = vld [vmem:[%s19591_s5 + $0x9b0] sm:$0xff]  ;;  %v11145_v56 = vld [vmem:[%s19591_s5 + $0x9a8] sm:$0xff] }
 0x2d0   : > { %3264 = vmatpush2.msra.mxu0 %v11150_v29  ;;  %3410 = vmatpush2.msra.mxu1 %v11214_v60  ;;  %v2375_v63 = vpop.f32.mrf.mxu0  ;;  %v11210_v29 = vld [vmem:[%s19591_s5 + $0xbb0] sm:$0xff] }
 0x2d1   : > { %3265 = vmatprep.subr.mxu0 %v11149_v54  ;;  %3411 = vmatprep.subr.mxu1 %v11213_v38  ;;  %v2520_v60 = vpop.f32.mrf.mxu1  ;;  %v11209_v54 = vld [vmem:[%s19591_s5 + $0xba8] sm:$0xff]  ;;  %v11144_v63 = vld [vmem:[%s19591_s5 + $0x9a0] sm:$0xff] }
 0x2d2   : > { %3266 = vmatpush2.msra.mxu0 %v11148_v12  ;;  %3412 = vmatpush2.msra.mxu1 %v11212_v61  ;;  %v2376_v38 = vpop.f32.mrf.mxu0  ;;  %v11208_v12 = vld [vmem:[%s19591_s5 + $0xba0] sm:$0xff]  ;;  %v11143_v60 = vld [vmem:[%s19591_s5 + $0x998] sm:$0xff] }
 0x2d3   : > { %3267 = vmatprep.subr.mxu0 %v11147_v59  ;;  %3413 = vmatprep.subr.mxu1 %v11211_v37  ;;  %v2521_v61 = vpop.f32.mrf.mxu1  ;;  %v11207_v59 = vld [vmem:[%s19591_s5 + $0xb98] sm:$0xff]  ;;  %v11142_v37 = vld [vmem:[%s19591_s5 + $0x990] sm:$0xff] }
 0x2d4   : > { %3268 = vmatpush2.msra.mxu0 %v11146_v39  ;;  %3414 = vmatpush2.msra.mxu1 %v11210_v29  ;;  %v11206_v38 = vld [vmem:[%s19591_s5 + $0xb90] sm:$0xff]  ;;  %v11141_v39 = vld [vmem:[%s19591_s5 + $0x988] sm:$0xff]  ;;  %v11139_v61 = vld [vmem:[%s19591_s5 + $0x978] sm:$0xff] }
 0x2d5   : > { %3269 = vmatprep.subr.mxu0 %v11145_v56  ;;  %3415 = vmatprep.subr.mxu1 %v11209_v54  ;;  %v11205_v29 = vld [vmem:[%s19591_s5 + $0xb88] sm:$0xff]  ;;  %v11140_v54 = vld [vmem:[%s19591_s5 + $0x980] sm:$0xff] }
 0x2d6   : > { %3270 = vmatpush2.msra.mxu0 %v11144_v63  ;;  %3416 = vmatpush2.msra.mxu1 %v11208_v12  ;;  %v2379_v56 = vpop.f32.mrf.mxu0  ;;  %v11204_v63 = vld [vmem:[%s19591_s5 + $0xb80] sm:$0xff] }
 0x2d7   : > { %3271 = vmatprep.subr.mxu0 %v11143_v60  ;;  %3417 = vmatprep.subr.mxu1 %v11207_v59  ;;  %v2524_v12 = vpop.f32.mrf.mxu1  ;;  %v11203_v60 = vld [vmem:[%s19591_s5 + $0xb78] sm:$0xff]  ;;  %v11138_v56 = vld [vmem:[%s19591_s5 + $0x970] sm:$0xff] }
 0x2d8   : > { %3272 = vmatpush2.msra.mxu0 %v11142_v37  ;;  %3418 = vmatpush2.msra.mxu1 %v11206_v38  ;;  %v2380_v59 = vpop.f32.mrf.mxu0  ;;  %v11202_v37 = vld [vmem:[%s19591_s5 + $0xb70] sm:$0xff]  ;;  %v11137_v12 = vld [vmem:[%s19591_s5 + $0x968] sm:$0xff] }
 0x2d9   : > { %3273 = vmatprep.subr.mxu0 %v11141_v39  ;;  %3419 = vmatprep.subr.mxu1 %v11205_v29  ;;  %v2525_v38 = vpop.f32.mrf.mxu1  ;;  %v11201_v39 = vld [vmem:[%s19591_s5 + $0xb68] sm:$0xff]  ;;  %v11136_v29 = vld [vmem:[%s19591_s5 + $0x960] sm:$0xff] }
 0x2da   : > { %3274 = vmatpush2.msra.mxu0 %v11140_v54  ;;  %3420 = vmatpush2.msra.mxu1 %v11204_v63  ;;  %v11200_v59 = vld [vmem:[%s19591_s5 + $0xb60] sm:$0xff]  ;;  %v11135_v54 = vld [vmem:[%s19591_s5 + $0x958] sm:$0xff]  ;;  %v11133_v38 = vld [vmem:[%s19591_s5 + $0x948] sm:$0xff] }
 0x2db   : > { %3275 = vmatprep.subr.mxu0 %v11139_v61  ;;  %3421 = vmatprep.subr.mxu1 %v11203_v60  ;;  %v11199_v63 = vld [vmem:[%s19591_s5 + $0xb58] sm:$0xff]  ;;  %v11134_v60 = vld [vmem:[%s19591_s5 + $0x950] sm:$0xff] }
 0x2dc   : > { %3276 = vmatpush2.msra.mxu0 %v11138_v56  ;;  %3422 = vmatpush2.msra.mxu1 %v11202_v37  ;;  %v15223_v61 = vpop.f32.mrf.mxu0  ;;  %v11198_v56 = vld [vmem:[%s19591_s5 + $0xb50] sm:$0xff] }
 0x2dd   : > { %3277 = vmatprep.subr.mxu0 %v11137_v12  ;;  %3423 = vmatprep.subr.mxu1 %v11201_v39  ;;  %v2528_v37 = vpop.f32.mrf.mxu1  ;;  %v11197_v12 = vld [vmem:[%s19591_s5 + $0xb48] sm:$0xff] }
 0x2de   : > { %3278 = vmatpush2.msra.mxu0 %v11136_v29  ;;  %3424 = vmatpush2.msra.mxu1 %v11200_v59  ;;  %v15237_v39 = vpop.f32.mrf.mxu0  ;;  %v11196_v29 = vld [vmem:[%s19591_s5 + $0xb40] sm:$0xff]  ;;  %v11131_v37 = vld [vmem:[%s19591_s5 + $0x938] sm:$0xff] }
 0x2df   : > { %3279 = vmatprep.subr.mxu0 %v11135_v54  ;;  %3425 = vmatprep.subr.mxu1 %v11199_v63  ;;  %v2529_v59 = vpop.f32.mrf.mxu1  ;;  %v11195_v54 = vld [vmem:[%s19591_s5 + $0xb38] sm:$0xff]  ;;  %v11130_v63 = vld [vmem:[%s19591_s5 + $0x930] sm:$0xff] }
 0x2e0   : > { %3280 = vmatpush2.msra.mxu0 %v11134_v60  ;;  %3426 = vmatpush2.msra.mxu1 %v11198_v56  ;;  %v11194_v59 = vld [vmem:[%s19591_s5 + $0xb30] sm:$0xff]  ;;  %v11129_v60 = vld [vmem:[%s19591_s5 + $0x928] sm:$0xff] }
 0x2e1   : > { %3281 = vmatprep.subr.mxu0 %v11133_v38  ;;  %3427 = vmatprep.subr.mxu1 %v11197_v12  ;;  %v11193_v56 = vld [vmem:[%s19591_s5 + $0xb28] sm:$0xff] }
 0x2e2   : > { %3282 = vmatpush2.msra.mxu0 %v11132_v36  ;;  %3428 = vmatpush2.msra.mxu1 %v11196_v29  ;;  %v15263_v38 = vpop.f32.mrf.mxu0  ;;  %v2532_v12 = vpop.f32.mrf.mxu1  ;;  %v11192_v36 = vld [vmem:[%s19591_s5 + $0xb20] sm:$0xff]  ;;  %v11127_v29 = vld [vmem:[%s19591_s5 + $0x918] sm:$0xff] }
 0x2e3   : > { %3283 = vmatprep.subr.mxu0 %v11131_v37  ;;  %3429 = vmatprep.subr.mxu1 %v11195_v54  ;;  %v11191_v12 = vld [vmem:[%s19591_s5 + $0xb18] sm:$0xff] }
 0x2e4   : > { %3284 = vmatpush2.msra.mxu0 %v11130_v63  ;;  %3430 = vmatpush2.msra.mxu1 %v11194_v59  ;;  %v15277_v37 = vpop.f32.mrf.mxu0  ;;  %v2533_v54 = vpop.f32.mrf.mxu1  ;;  %v11190_v63 = vld [vmem:[%s19591_s5 + $0xb10] sm:$0xff]  ;;  %v11125_v59 = vld [vmem:[%s19591_s5 + $0x908] sm:$0xff] }
 0x2e5   : > { %3285 = vmatprep.subr.mxu0 %v11129_v60  ;;  %3431 = vmatprep.subr.mxu1 %v11193_v56  ;;  %v11189_v54 = vld [vmem:[%s19591_s5 + $0xb08] sm:$0xff]  ;;  %v11124_v60 = vld [vmem:[%s19591_s5 + $0x900] sm:$0xff] }
 0x2e6   : > { %3286 = vmatpush2.msra.mxu0 %v11128_v35  ;;  %3432 = vmatpush2.msra.mxu1 %v11192_v36  ;;  %v11188_v56 = vld [vmem:[%s19591_s5 + $0xb00] sm:$0xff] }
 0x2e7   : > { %3287 = vmatprep.subr.mxu0 %v11127_v29  ;;  %3433 = vmatprep.subr.mxu1 %v11191_v12  ;;  %v11251_v29 = vld [vmem:[%s19591_s5 + $0xcf8] sm:$0xff] }
 0x2e8   : > { %3288 = vmatpush2.msra.mxu0 %v11126_v24  ;;  %3434 = vmatpush2.msra.mxu1 %v11190_v63  ;;  %v2395_v35 = vpop.f32.mrf.mxu0  ;;  %v15297_v36 = vpop.f32.mrf.mxu1  ;;  %v11315_v12 = vld [vmem:[%s19591_s5 + $0xef8] sm:$0xff]  ;;  %v11250_v24 = vld [vmem:[%s19591_s5 + $0xcf0] sm:$0xff] }
 0x2e9   : > { %3289 = vmatprep.subr.mxu0 %v11125_v59  ;;  %3435 = vmatprep.subr.mxu1 %v11189_v54  ;;  %v11314_v63 = vld [vmem:[%s19591_s5 + $0xef0] sm:$0xff]  ;;  %v11312_v59 = vld [vmem:[%s19591_s5 + $0xee0] sm:$0xff] }
 0x2ea   : > { %3290 = vmatpush2.msra.mxu0 %v11124_v60  ;;  %3436 = vmatpush2.msra.mxu1 %v11188_v56  ;;  %v2396_v23 = vpop.f32.mrf.mxu0  ;;  %v15305_v22 = vpop.f32.mrf.mxu1  ;;  %v11246_v56 = vld [vmem:[%s19591_s5 + $0xcd0] sm:$0xff] }
 0x2eb   : > { %3292 = vmatmul.mubr.f32.vlgmr.msra.gmra.mxu0 %v14352_v32  ;;  %3438 = vmatmul.mubr.f32.vlgmr.msra.gmra.mxu1 %v14405_v48  ;;  %v11249_v23 = vld [vmem:[%s19591_s5 + $0xce8] sm:$0xff]  ;;  %v11248_v48 = vld [vmem:[%s19591_s5 + $0xce0] sm:$0xff] }
 0x2ec   : > { %3519 = vmatprep.subr.mxu0 %v11251_v29  ;;  %3665 = vmatprep.subr.mxu1 %v11315_v12  ;;  %v11313_v32 = vld [vmem:[%s19591_s5 + $0xee8] sm:$0xff]  ;;  %v11310_v12 = vld [vmem:[%s19591_s5 + $0xed0] sm:$0xff] }
 0x2ed   : > { %3297 = vmatprep.mubr.f32.mxu0 %v14389_v25  ;;  %3443 = vmatprep.mubr.f32.mxu1 %v14439_v33  ;;  %v11247_v25 = vld [vmem:[%s19591_s5 + $0xcd8] sm:$0xff] }
 0x2ee   : > { %3520 = vmatpush1.msra.mxu0 %v11250_v24  ;;  %3666 = vmatpush1.msra.mxu1 %v11314_v63  ;;  %v2399_v54 = vpop.f32.mrf.mxu0  ;;  %v15329_v60 = vpop.f32.mrf.mxu1  ;;  %v11311_v33 = vld [vmem:[%s19591_s5 + $0xed8] sm:$0xff]  ;;  %v11245_v24 = vld [vmem:[%s19591_s5 + $0xcc8] sm:$0xff] }
 0x2ef   : > { %19694 = vst [vmem:[#allocation48_spill] sm:$0xff] %v15329_v60  ;;  %3521 = vmatprep.subr.mxu0 %v11249_v23  ;;  %3667 = vmatprep.subr.mxu1 %v11313_v32  ;;  %v11309_v63 = vld [vmem:[%s19591_s5 + $0xec8] sm:$0xff]  ;;  %v11243_v23 = vld [vmem:[%s19591_s5 + $0xcb8] sm:$0xff] }
 0x2f0   : > { %3522 = vmatpush1.msra.mxu0 %v11248_v48  ;;  %3668 = vmatpush1.msra.mxu1 %v11312_v59  ;;  %v2400_v35 = vpop.f32.mrf.mxu0  ;;  %v15340_v29 = vpop.f32.mrf.mxu1  ;;  %v11307_v32 = vld [vmem:[%s19591_s5 + $0xeb8] sm:$0xff]  ;;  %v11242_v59 = vld [vmem:[%s19591_s5 + $0xcb0] sm:$0xff]  ;;  %v11241_v54 = vld [vmem:[%s19591_s5 + $0xca8] sm:$0xff] }
 0x2f1   : > { %19695 = vst [vmem:[#allocation49_spill] sm:$0xff] %v15340_v29  ;;  %3298 = vmatmul.mubr.f32.gmra.mxu0 %v14381_v34  ;;  %3444 = vmatmul.mubr.f32.gmra.mxu1 %v14426_v14  ;;  %v11244_v14 = vld [vmem:[%s19591_s5 + $0xcc0] sm:$0xff] }
 0x2f2   : > { %3523 = vmatprep.subr.mxu0 %v11247_v25  ;;  %3669 = vmatprep.subr.mxu1 %v11311_v33  ;;  %v11308_v34 = vld [vmem:[%s19591_s5 + $0xec0] sm:$0xff]  ;;  %v11305_v25 = vld [vmem:[%s19591_s5 + $0xea8] sm:$0xff] }
 0x2f3   : > { %3524 = vmatpush1.msra.mxu0 %v11246_v56  ;;  %3583 = vmatprep.mubr.f32.mxu0 %v14046_v6  ;;  %v11240_v35 = vld [vmem:[%s19591_s5 + $0xca0] sm:$0xff] }
 0x2f4   : > { %3670 = vmatpush1.msra.mxu1 %v11310_v12  ;;  %3729 = vmatprep.mubr.f32.mxu1 %v14088_v55  ;;  %v15367_v6 = vpop.f32.mrf.mxu0  ;;  %v2548_v48 = vpop.f32.mrf.mxu1  ;;  %v11306_v55 = vld [vmem:[%s19591_s5 + $0xeb0] sm:$0xff]  ;;  %v11304_v12 = vld [vmem:[%s19591_s5 + $0xea0] sm:$0xff] }
 0x2f5   : > { %3525 = vmatprep.subr.mxu0 %v11245_v24  ;;  %3671 = vmatprep.subr.mxu1 %v11309_v63  ;;  %v11239_v24 = vld [vmem:[%s19591_s5 + $0xc98] sm:$0xff] }
 0x2f6   : > { %3526 = vmatpush1.msra.mxu0 %v11244_v14  ;;  %3672 = vmatpush1.msra.mxu1 %v11308_v34  ;;  %v15381_v33 = vpop.f32.mrf.mxu0  ;;  %v2549_v56 = vpop.f32.mrf.mxu1  ;;  %v11303_v63 = vld [vmem:[%s19591_s5 + $0xe98] sm:$0xff]  ;;  %v11238_v14 = vld [vmem:[%s19591_s5 + $0xc90] sm:$0xff] }
 0x2f7   : > { %3527 = vmatprep.subr.mxu0 %v11243_v23  ;;  %3673 = vmatprep.subr.mxu1 %v11307_v32  ;;  %v11302_v34 = vld [vmem:[%s19591_s5 + $0xe90] sm:$0xff]  ;;  %v11237_v23 = vld [vmem:[%s19591_s5 + $0xc88] sm:$0xff]  ;;  %v11299_v56 = vld [vmem:[%s19591_s5 + $0xe78] sm:$0xff] }
 0x2f8   : > { %3528 = vmatpush1.msra.mxu0 %v11242_v59  ;;  %3674 = vmatpush1.msra.mxu1 %v11306_v55  ;;  %v11301_v32 = vld [vmem:[%s19591_s5 + $0xe88] sm:$0xff]  ;;  %v11236_v55 = vld [vmem:[%s19591_s5 + $0xc80] sm:$0xff] }
 0x2f9   : > { %3529 = vmatprep.subr.mxu0 %v11241_v54  ;;  %3675 = vmatprep.subr.mxu1 %v11305_v25  ;;  %v11300_v54 = vld [vmem:[%s19591_s5 + $0xe80] sm:$0xff]  ;;  %v11235_v25 = vld [vmem:[%s19591_s5 + $0xc78] sm:$0xff] }
 0x2fa   : > { %3530 = vmatpush1.msra.mxu0 %v11240_v35  ;;  %3676 = vmatpush1.msra.mxu1 %v11304_v12  ;;  %v15407_v48 = vpop.f32.mrf.mxu0  ;;  %v2552_v59 = vpop.f32.mrf.mxu1 }
 0x2fb   : > { %19696 = vst [vmem:[#allocation50_spill] sm:$0xff] %v15407_v48  ;;  %3531 = vmatprep.subr.mxu0 %v11239_v24  ;;  %3677 = vmatprep.subr.mxu1 %v11303_v63  ;;  %v11234_v24 = vld [vmem:[%s19591_s5 + $0xc70] sm:$0xff]  ;;  %v11231_v59 = vld [vmem:[%s19591_s5 + $0xc58] sm:$0xff] }
 0x2fc   : > { %3532 = vmatpush1.msra.mxu0 %v11238_v14  ;;  %3678 = vmatpush1.msra.mxu1 %v11302_v34  ;;  %v15421_v35 = vpop.f32.mrf.mxu0  ;;  %v2553_v12 = vpop.f32.mrf.mxu1  ;;  %v11298_v63 = vld [vmem:[%s19591_s5 + $0xe70] sm:$0xff]  ;;  %v11233_v14 = vld [vmem:[%s19591_s5 + $0xc68] sm:$0xff] }
 0x2fd   : > { %19697 = vst [vmem:[#allocation51_spill] sm:$0xff] %v15421_v35  ;;  %3533 = vmatprep.subr.mxu0 %v11237_v23  ;;  %3679 = vmatprep.subr.mxu1 %v11301_v32  ;;  %v11297_v34 = vld [vmem:[%s19591_s5 + $0xe68] sm:$0xff]  ;;  %v11232_v23 = vld [vmem:[%s19591_s5 + $0xc60] sm:$0xff]  ;;  %v11294_v12 = vld [vmem:[%s19591_s5 + $0xe50] sm:$0xff] }
 0x2fe   : > { %3534 = vmatpush1.msra.mxu0 %v11236_v55  ;;  %3680 = vmatpush1.msra.mxu1 %v11300_v54  ;;  %v11296_v32 = vld [vmem:[%s19591_s5 + $0xe60] sm:$0xff]  ;;  %v11295_v55 = vld [vmem:[%s19591_s5 + $0xe58] sm:$0xff] }
 0x2ff   : > { %3535 = vmatprep.subr.mxu0 %v11235_v25  ;;  %3681 = vmatprep.subr.mxu1 %v11299_v56  ;;  %v11230_v56 = vld [vmem:[%s19591_s5 + $0xc50] sm:$0xff] }
 0x300   : > { %3536 = vmatpush1.msra.mxu0 %v11234_v24  ;;  %3682 = vmatpush1.msra.mxu1 %v11298_v63  ;;  %v2415_v54 = vpop.f32.mrf.mxu0  ;;  %v2556_v25 = vpop.f32.mrf.mxu1  ;;  %v11229_v24 = vld [vmem:[%s19591_s5 + $0xc48] sm:$0xff] }
 0x301   : > { %3537 = vmatprep.subr.mxu0 %v11233_v14  ;;  %3683 = vmatprep.subr.mxu1 %v11297_v34  ;;  %v11293_v63 = vld [vmem:[%s19591_s5 + $0xe48] sm:$0xff]  ;;  %v11228_v54 = vld [vmem:[%s19591_s5 + $0xc40] sm:$0xff]  ;;  %v11291_v25 = vld [vmem:[%s19591_s5 + $0xe38] sm:$0xff] }
 0x302   : > { %3538 = vmatpush1.msra.mxu0 %v11232_v23  ;;  %3684 = vmatpush1.msra.mxu1 %v11296_v32  ;;  %v2416_v14 = vpop.f32.mrf.mxu0  ;;  %v2557_v34 = vpop.f32.mrf.mxu1  ;;  %v11292_v23 = vld [vmem:[%s19591_s5 + $0xe40] sm:$0xff]  ;;  %v11227_v32 = vld [vmem:[%s19591_s5 + $0xc38] sm:$0xff] }
 0x303   : > { %3539 = vmatprep.subr.mxu0 %v11231_v59  ;;  %3685 = vmatprep.subr.mxu1 %v11295_v55  ;;  %v11226_v59 = vld [vmem:[%s19591_s5 + $0xc30] sm:$0xff]  ;;  %v11224_v14 = vld [vmem:[%s19591_s5 + $0xc20] sm:$0xff] }
 0x304   : > { %3540 = vmatpush1.msra.mxu0 %v11230_v56  ;;  %3686 = vmatpush1.msra.mxu1 %v11294_v12  ;;  %v11290_v55 = vld [vmem:[%s19591_s5 + $0xe30] sm:$0xff]  ;;  %v11225_v56 = vld [vmem:[%s19591_s5 + $0xc28] sm:$0xff]  ;;  %v11288_v34 = vld [vmem:[%s19591_s5 + $0xe20] sm:$0xff] }
 0x305   : > { %3541 = vmatprep.subr.mxu0 %v11229_v24  ;;  %3687 = vmatprep.subr.mxu1 %v11293_v63  ;;  %v11289_v12 = vld [vmem:[%s19591_s5 + $0xe28] sm:$0xff] }
 0x306   : > { %3542 = vmatpush1.msra.mxu0 %v11228_v54  ;;  %3688 = vmatpush1.msra.mxu1 %v11292_v23  ;;  %v2419_v24 = vpop.f32.mrf.mxu0  ;;  %v2560_v63 = vpop.f32.mrf.mxu1  ;;  %v11223_v54 = vld [vmem:[%s19591_s5 + $0xc18] sm:$0xff] }
 0x307   : > { %3543 = vmatprep.subr.mxu0 %v11227_v32  ;;  %3689 = vmatprep.subr.mxu1 %v11291_v25  ;;  %v11287_v23 = vld [vmem:[%s19591_s5 + $0xe18] sm:$0xff]  ;;  %v11222_v24 = vld [vmem:[%s19591_s5 + $0xc10] sm:$0xff]  ;;  %v11285_v63 = vld [vmem:[%s19591_s5 + $0xe08] sm:$0xff] }
 0x308   : > { %3544 = vmatpush1.msra.mxu0 %v11226_v59  ;;  %3690 = vmatpush1.msra.mxu1 %v11290_v55  ;;  %v2420_v32 = vpop.f32.mrf.mxu0  ;;  %v2561_v25 = vpop.f32.mrf.mxu1  ;;  %v11286_v59 = vld [vmem:[%s19591_s5 + $0xe10] sm:$0xff]  ;;  %v11221_v55 = vld [vmem:[%s19591_s5 + $0xc08] sm:$0xff] }
 0x309   : > { %3545 = vmatprep.subr.mxu0 %v11225_v56  ;;  %3691 = vmatprep.subr.mxu1 %v11289_v12  ;;  %v11220_v56 = vld [vmem:[%s19591_s5 + $0xc00] sm:$0xff]  ;;  %v11282_v32 = vld [vmem:[%s19591_s5 + $0xdf0] sm:$0xff] }
 0x30a   : > { %3546 = vmatpush1.msra.mxu0 %v11224_v14  ;;  %3692 = vmatpush1.msra.mxu1 %v11288_v34  ;;  %v11284_v12 = vld [vmem:[%s19591_s5 + $0xe00] sm:$0xff]  ;;  %v11283_v14 = vld [vmem:[%s19591_s5 + $0xdf8] sm:$0xff]  ;;  %v11346_v25 = vld [vmem:[%s19591_s5 + $0xff0] sm:$0xff] }
 0x30b   : > { %3547 = vmatprep.subr.mxu0 %v11223_v54  ;;  %3693 = vmatprep.subr.mxu1 %v11287_v23  ;;  %v11347_v34 = vld [vmem:[%s19591_s5 + $0xff8] sm:$0xff] }
 0x30c   : > { %3548 = vmatpush1.msra.mxu0 %v11222_v24  ;;  %3694 = vmatpush1.msra.mxu1 %v11286_v59  ;;  %v2423_v54 = vpop.f32.mrf.mxu0  ;;  %v2564_v23 = vpop.f32.mrf.mxu1  ;;  %v11281_v24 = vld [vmem:[%s19591_s5 + $0xde8] sm:$0xff] }
 0x30d   : > { %3549 = vmatprep.subr.mxu0 %v11221_v55  ;;  %3695 = vmatprep.subr.mxu1 %v11285_v63  ;;  %v11345_v59 = vld [vmem:[%s19591_s5 + $0xfe8] sm:$0xff]  ;;  %v11280_v54 = vld [vmem:[%s19591_s5 + $0xde0] sm:$0xff]  ;;  %v11343_v23 = vld [vmem:[%s19591_s5 + $0xfd8] sm:$0xff] }
 0x30e   : > { %3550 = vmatpush1.msra.mxu0 %v11220_v56  ;;  %3696 = vmatpush1.msra.mxu1 %v11284_v12  ;;  %v2424_v55 = vpop.f32.mrf.mxu0  ;;  %v2565_v63 = vpop.f32.mrf.mxu1  ;;  %v11344_v56 = vld [vmem:[%s19591_s5 + $0xfe0] sm:$0xff]  ;;  %v11279_v12 = vld [vmem:[%s19591_s5 + $0xdd8] sm:$0xff] }
 0x30f   : > { %3551 = vmatprep.subr.mxu0 %v11283_v14  ;;  %3697 = vmatprep.subr.mxu1 %v11347_v34  ;;  %v11278_v14 = vld [vmem:[%s19591_s5 + $0xdd0] sm:$0xff]  ;;  %v11276_v55 = vld [vmem:[%s19591_s5 + $0xdc0] sm:$0xff] }
 0x310   : > { %3552 = vmatpush2.msra.mxu0 %v11282_v32  ;;  %3698 = vmatpush2.msra.mxu1 %v11346_v25  ;;  %v11342_v34 = vld [vmem:[%s19591_s5 + $0xfd0] sm:$0xff]  ;;  %v11277_v32 = vld [vmem:[%s19591_s5 + $0xdc8] sm:$0xff]  ;;  %v11340_v63 = vld [vmem:[%s19591_s5 + $0xfc0] sm:$0xff] }
 0x311   : > { %3553 = vmatprep.subr.mxu0 %v11281_v24  ;;  %3699 = vmatprep.subr.mxu1 %v11345_v59  ;;  %v11341_v25 = vld [vmem:[%s19591_s5 + $0xfc8] sm:$0xff] }
 0x312   : > { %3554 = vmatpush2.msra.mxu0 %v11280_v54  ;;  %3700 = vmatpush2.msra.mxu1 %v11344_v56  ;;  %v2427_v24 = vpop.f32.mrf.mxu0  ;;  %v2568_v59 = vpop.f32.mrf.mxu1  ;;  %v11275_v54 = vld [vmem:[%s19591_s5 + $0xdb8] sm:$0xff] }
 0x313   : > { %3555 = vmatprep.subr.mxu0 %v11279_v12  ;;  %3701 = vmatprep.subr.mxu1 %v11343_v23  ;;  %v11339_v56 = vld [vmem:[%s19591_s5 + $0xfb8] sm:$0xff]  ;;  %v11274_v24 = vld [vmem:[%s19591_s5 + $0xdb0] sm:$0xff]  ;;  %v11337_v59 = vld [vmem:[%s19591_s5 + $0xfa8] sm:$0xff] }
 0x314   : > { %3556 = vmatpush2.msra.mxu0 %v11278_v14  ;;  %3702 = vmatpush2.msra.mxu1 %v11342_v34  ;;  %v2428_v12 = vpop.f32.mrf.mxu0  ;;  %v2569_v23 = vpop.f32.mrf.mxu1  ;;  %v11338_v14 = vld [vmem:[%s19591_s5 + $0xfb0] sm:$0xff]  ;;  %v11273_v34 = vld [vmem:[%s19591_s5 + $0xda8] sm:$0xff] }
 0x315   : > { %3557 = vmatprep.subr.mxu0 %v11277_v32  ;;  %3703 = vmatprep.subr.mxu1 %v11341_v25  ;;  %v11272_v32 = vld [vmem:[%s19591_s5 + $0xda0] sm:$0xff]  ;;  %v11270_v12 = vld [vmem:[%s19591_s5 + $0xd90] sm:$0xff] }
 0x316   : > { %3558 = vmatpush2.msra.mxu0 %v11276_v55  ;;  %3704 = vmatpush2.msra.mxu1 %v11340_v63  ;;  %v11336_v25 = vld [vmem:[%s19591_s5 + $0xfa0] sm:$0xff]  ;;  %v11271_v55 = vld [vmem:[%s19591_s5 + $0xd98] sm:$0xff]  ;;  %v11334_v23 = vld [vmem:[%s19591_s5 + $0xf90] sm:$0xff] }
 0x317   : > { %3559 = vmatprep.subr.mxu0 %v11275_v54  ;;  %3705 = vmatprep.subr.mxu1 %v11339_v56  ;;  %v11335_v63 = vld [vmem:[%s19591_s5 + $0xf98] sm:$0xff] }
 0x318   : > { %3560 = vmatpush2.msra.mxu0 %v11274_v24  ;;  %3706 = vmatpush2.msra.mxu1 %v11338_v14  ;;  %v2431_v54 = vpop.f32.mrf.mxu0  ;;  %v2572_v56 = vpop.f32.mrf.mxu1  ;;  %v11269_v24 = vld [vmem:[%s19591_s5 + $0xd88] sm:$0xff] }
 0x319   : > { %3561 = vmatprep.subr.mxu0 %v11273_v34  ;;  %3707 = vmatprep.subr.mxu1 %v11337_v59  ;;  %v11333_v14 = vld [vmem:[%s19591_s5 + $0xf88] sm:$0xff]  ;;  %v11268_v54 = vld [vmem:[%s19591_s5 + $0xd80] sm:$0xff]  ;;  %v11331_v56 = vld [vmem:[%s19591_s5 + $0xf78] sm:$0xff] }
 0x31a   : > { %3562 = vmatpush2.msra.mxu0 %v11272_v32  ;;  %3708 = vmatpush2.msra.mxu1 %v11336_v25  ;;  %v2432_v34 = vpop.f32.mrf.mxu0  ;;  %v2573_v59 = vpop.f32.mrf.mxu1  ;;  %v11332_v32 = vld [vmem:[%s19591_s5 + $0xf80] sm:$0xff]  ;;  %v11267_v25 = vld [vmem:[%s19591_s5 + $0xd78] sm:$0xff] }
 0x31b   : > { %3563 = vmatprep.subr.mxu0 %v11271_v55  ;;  %3709 = vmatprep.subr.mxu1 %v11335_v63  ;;  %v11266_v55 = vld [vmem:[%s19591_s5 + $0xd70] sm:$0xff]  ;;  %v11264_v34 = vld [vmem:[%s19591_s5 + $0xd60] sm:$0xff] }
 0x31c   : > { %3564 = vmatpush2.msra.mxu0 %v11270_v12  ;;  %3710 = vmatpush2.msra.mxu1 %v11334_v23  ;;  %v11330_v63 = vld [vmem:[%s19591_s5 + $0xf70] sm:$0xff]  ;;  %v11265_v12 = vld [vmem:[%s19591_s5 + $0xd68] sm:$0xff]  ;;  %v11328_v59 = vld [vmem:[%s19591_s5 + $0xf60] sm:$0xff] }
 0x31d   : > { %3565 = vmatprep.subr.mxu0 %v11269_v24  ;;  %3711 = vmatprep.subr.mxu1 %v11333_v14  ;;  %v11329_v23 = vld [vmem:[%s19591_s5 + $0xf68] sm:$0xff] }
 0x31e   : > { %3566 = vmatpush2.msra.mxu0 %v11268_v54  ;;  %3712 = vmatpush2.msra.mxu1 %v11332_v32  ;;  %v2435_v24 = vpop.f32.mrf.mxu0  ;;  %v2576_v14 = vpop.f32.mrf.mxu1  ;;  %v11263_v54 = vld [vmem:[%s19591_s5 + $0xd58] sm:$0xff] }
 0x31f   : > { %3567 = vmatprep.subr.mxu0 %v11267_v25  ;;  %3713 = vmatprep.subr.mxu1 %v11331_v56  ;;  %v11327_v32 = vld [vmem:[%s19591_s5 + $0xf58] sm:$0xff]  ;;  %v11262_v24 = vld [vmem:[%s19591_s5 + $0xd50] sm:$0xff]  ;;  %v11325_v14 = vld [vmem:[%s19591_s5 + $0xf48] sm:$0xff] }
 0x320   : > { %3568 = vmatpush2.msra.mxu0 %v11266_v55  ;;  %3714 = vmatpush2.msra.mxu1 %v11330_v63  ;;  %v2436_v25 = vpop.f32.mrf.mxu0  ;;  %v2577_v56 = vpop.f32.mrf.mxu1  ;;  %v11326_v55 = vld [vmem:[%s19591_s5 + $0xf50] sm:$0xff]  ;;  %v11261_v63 = vld [vmem:[%s19591_s5 + $0xd48] sm:$0xff] }
 0x321   : > { %3569 = vmatprep.subr.mxu0 %v11265_v12  ;;  %3715 = vmatprep.subr.mxu1 %v11329_v23  ;;  %v11260_v12 = vld [vmem:[%s19591_s5 + $0xd40] sm:$0xff]  ;;  %v11257_v25 = vld [vmem:[%s19591_s5 + $0xd28] sm:$0xff] }
 0x322   : > { %3570 = vmatpush2.msra.mxu0 %v11264_v34  ;;  %3716 = vmatpush2.msra.mxu1 %v11328_v59  ;;  %v11324_v23 = vld [vmem:[%s19591_s5 + $0xf40] sm:$0xff]  ;;  %v11259_v34 = vld [vmem:[%s19591_s5 + $0xd38] sm:$0xff]  ;;  %v11321_v56 = vld [vmem:[%s19591_s5 + $0xf28] sm:$0xff] }
 0x323   : > { %3571 = vmatprep.subr.mxu0 %v11263_v54  ;;  %3717 = vmatprep.subr.mxu1 %v11327_v32  ;;  %v11323_v59 = vld [vmem:[%s19591_s5 + $0xf38] sm:$0xff]  ;;  %v11258_v54 = vld [vmem:[%s19591_s5 + $0xd30] sm:$0xff] }
 0x324   : > { %3572 = vmatpush2.msra.mxu0 %v11262_v24  ;;  %3718 = vmatpush2.msra.mxu1 %v11326_v55  ;;  %v11322_v32 = vld [vmem:[%s19591_s5 + $0xf30] sm:$0xff]  ;;  %v11256_v24 = vld [vmem:[%s19591_s5 + $0xd20] sm:$0xff] }
 0x325   : > { %3573 = vmatprep.subr.mxu0 %v11261_v63  ;;  %3719 = vmatprep.subr.mxu1 %v11325_v14  ;;  %v11320_v55 = vld [vmem:[%s19591_s5 + $0xf20] sm:$0xff]  ;;  %v11255_v63 = vld [vmem:[%s19591_s5 + $0xd18] sm:$0xff] }
 0x326   : > { %3574 = vmatpush2.msra.mxu0 %v11260_v12  ;;  %3720 = vmatpush2.msra.mxu1 %v11324_v23  ;;  %v11319_v14 = vld [vmem:[%s19591_s5 + $0xf18] sm:$0xff]  ;;  %v11254_v12 = vld [vmem:[%s19591_s5 + $0xd10] sm:$0xff] }
 0x327   : > { %3575 = vmatprep.subr.mxu0 %v11259_v34  ;;  %3721 = vmatprep.subr.mxu1 %v11323_v59  ;;  %v11318_v23 = vld [vmem:[%s19591_s5 + $0xf10] sm:$0xff]  ;;  %v11253_v34 = vld [vmem:[%s19591_s5 + $0xd08] sm:$0xff] }
 0x328   : > { %3576 = vmatpush2.msra.mxu0 %v11258_v54  ;;  %3722 = vmatpush2.msra.mxu1 %v11322_v32  ;;  %v11317_v59 = vld [vmem:[%s19591_s5 + $0xf08] sm:$0xff]  ;;  %v11252_v54 = vld [vmem:[%s19591_s5 + $0xd00] sm:$0xff] }
 0x329   : > { %3577 = vmatprep.subr.mxu0 %v11257_v25  ;;  %3723 = vmatprep.subr.mxu1 %v11321_v56  ;;  %v11316_v32 = vld [vmem:[%s19591_s5 + $0xf00] sm:$0xff]  ;;  %v11379_v25 = vld [vmem:[%s19591_s5 + $0x10f8] sm:$0xff]  ;;  %v11378_v56 = vld [vmem:[%s19591_s5 + $0x10f0] sm:$0xff] }
 0x32a   : > { %3578 = vmatpush2.msra.mxu0 %v11256_v24  ;;  %3724 = vmatpush2.msra.mxu1 %v11320_v55  ;;  %v11377_v24 = vld [vmem:[%s19591_s5 + $0x10e8] sm:$0xff] }
 0x32b   : > { %3579 = vmatprep.subr.mxu0 %v11255_v63  ;;  %3725 = vmatprep.subr.mxu1 %v11319_v14  ;;  %v3893_v55 = vld [vmem:[%s19590_s4 + $0x8] sm:$0xff]  ;;  %v11376_v63 = vld [vmem:[%s19591_s5 + $0x10e0] sm:$0xff] }
 0x32c   : > { %3580 = vmatpush2.msra.mxu0 %v11254_v12  ;;  %3726 = vmatpush2.msra.mxu1 %v11318_v23  ;;  %v3892_v14 = vld [vmem:[%s19590_s4] sm:$0xff]  ;;  %v11369_v12 = vld [vmem:[%s19591_s5 + $0x10a8] sm:$0xff]  ;;  %v11367_v23 = vld [vmem:[%s19591_s5 + $0x1098] sm:$0xff] }
 0x32d   : > { %3581 = vmatprep.subr.mxu0 %v11253_v34  ;;  %3727 = vmatprep.subr.mxu1 %v11317_v59  ;;  %v11366_v34 = vld [vmem:[%s19591_s5 + $0x1090] sm:$0xff]  ;;  %v11365_v59 = vld [vmem:[%s19591_s5 + $0x1088] sm:$0xff] }
 0x32e   : > { %3582 = vmatpush2.msra.mxu0 %v11252_v54  ;;  %3728 = vmatpush2.msra.mxu1 %v11316_v32  ;;  %v11364_v54 = vld [vmem:[%s19591_s5 + $0x1080] sm:$0xff]  ;;  %v11363_v32 = vld [vmem:[%s19591_s5 + $0x1078] sm:$0xff] }
 0x32f   : > { %3584 = vmatmul.mubr.f32.vlgmr.msra.gmra.mxu0 %v14031_v11  ;;  %3730 = vmatmul.mubr.f32.vlgmr.msra.gmra.mxu1 %v14079_v30  ;;  %v11375_v11 = vld [vmem:[%s19591_s5 + $0x10d8] sm:$0xff]  ;;  %v11374_v30 = vld [vmem:[%s19591_s5 + $0x10d0] sm:$0xff] }
 0x330   : > { %3811 = vmatprep.subr.mxu0 %v11379_v25  ;;  %3589 = vmatprep.mubr.f32.mxu0 %v14067_v27  ;;  %v11373_v27 = vld [vmem:[%s19591_s5 + $0x10c8] sm:$0xff]  ;;  %v11362_v25 = vld [vmem:[%s19591_s5 + $0x1070] sm:$0xff] }
 0x331   : > { %3735 = vmatprep.mubr.f32.mxu1 %v14115_v57  ;;  %3812 = vmatpush1.msra.mxu0 %v11378_v56  ;;  %v11372_v57 = vld [vmem:[%s19591_s5 + $0x10c0] sm:$0xff]  ;;  %v11361_v56 = vld [vmem:[%s19591_s5 + $0x1068] sm:$0xff] }
 0x332   : > { %3813 = vmatprep.subr.mxu0 %v11377_v24  ;;  %3901 = vperm.xlu1 %11933, %v3893_v55   ;;  %v11360_v24 = vld [vmem:[%s19591_s5 + $0x1060] sm:$0xff]  ;;  %v11359_v55 = vld [vmem:[%s19591_s5 + $0x1058] sm:$0xff] }
 0x333   : > { %3814 = vmatpush1.msra.mxu0 %v11376_v63  ;;  %3736 = vmatmul.mubr.f32.gmra.mxu1 %v14103_v16  ;;  %v11371_v16 = vld [vmem:[%s19591_s5 + $0x10b8] sm:$0xff]  ;;  %v11358_v63 = vld [vmem:[%s19591_s5 + $0x1050] sm:$0xff] }
 0x334   : > { %3590 = vmatmul.mubr.f32.gmra.mxu0 %v14054_v4  ;;  %3815 = vmatprep.subr.mxu0 %v11375_v11  ;;  %v11370_v4 = vld [vmem:[%s19591_s5 + $0x10b0] sm:$0xff]  ;;  %v11357_v11 = vld [vmem:[%s19591_s5 + $0x1048] sm:$0xff] }
 0x335   : > { %3816 = vmatpush1.msra.mxu0 %v11374_v30  ;;  %3875 = vmatprep.mubr.f32.mxu0 %v14139_v9  ;;  %v11368_v9 = vld [vmem:[%s19591_s5 + $0x10a0] sm:$0xff] }
 0x336   : > { %3817 = vmatprep.subr.mxu0 %v11373_v27  ;;  %3896 = vperm.xlu1 %11933, %v3892_v14   ;;  %v11356_v30 = vld [vmem:[%s19591_s5 + $0x1040] sm:$0xff]  ;;  %v11355_v27 = vld [vmem:[%s19591_s5 + $0x1038] sm:$0xff]  ;;  %v11353_v14 = vld [vmem:[%s19591_s5 + $0x1028] sm:$0xff] }
 0x337   : > { %3818 = vmatpush1.msra.mxu0 %v11372_v57  ;;  %v11354_v57 = vld [vmem:[%s19591_s5 + $0x1030] sm:$0xff] }
 0x338   : > { %3819 = vmatprep.subr.mxu0 %v11371_v16  ;;  %v11352_v16 = vld [vmem:[%s19591_s5 + $0x1020] sm:$0xff] }
 0x339   : > { %3820 = vmatpush1.msra.mxu0 %v11370_v4  ;;  %v11351_v4 = vld [vmem:[%s19591_s5 + $0x1018] sm:$0xff] }
 0x33a   : > { %3821 = vmatprep.subr.mxu0 %v11369_v12  ;;  %v11350_v12 = vld [vmem:[%s19591_s5 + $0x1010] sm:$0xff] }
 0x33b   : > { %3822 = vmatpush1.msra.mxu0 %v11368_v9  ;;  %v11349_v9 = vld [vmem:[%s19591_s5 + $0x1008] sm:$0xff] }
 0x33c   : > { %3823 = vmatprep.subr.mxu0 %v11367_v23  ;;  %v11348_v23 = vld [vmem:[%s19591_s5 + $0x1000] sm:$0xff] }
 0x33d   : > { %3824 = vmatpush1.msra.mxu0 %v11366_v34  ;;  %v11411_v34 = vld [vmem:[%s19591_s5 + $0x11f8] sm:$0xff] }
 0x33e   : > { %3825 = vmatprep.subr.mxu0 %v11365_v59  ;;  %v11410_v59 = vld [vmem:[%s19591_s5 + $0x11f0] sm:$0xff] }
 0x33f   : > { %3826 = vmatpush1.msra.mxu0 %v11364_v54  ;;  %v11409_v54 = vld [vmem:[%s19591_s5 + $0x11e8] sm:$0xff] }
 0x340   : > { %3827 = vmatprep.subr.mxu0 %v11363_v32  ;;  %v11408_v32 = vld [vmem:[%s19591_s5 + $0x11e0] sm:$0xff] }
 0x341   : > { %3828 = vmatpush1.msra.mxu0 %v11362_v25  ;;  %v11407_v25 = vld [vmem:[%s19591_s5 + $0x11d8] sm:$0xff] }
 0x342   : > { %3829 = vmatprep.subr.mxu0 %v11361_v56  ;;  %v11406_v56 = vld [vmem:[%s19591_s5 + $0x11d0] sm:$0xff] }
 0x343   : > { %3830 = vmatpush1.msra.mxu0 %v11360_v24  ;;  %v11405_v24 = vld [vmem:[%s19591_s5 + $0x11c8] sm:$0xff] }
 0x344   : > { %3831 = vmatprep.subr.mxu0 %v11359_v55  ;;  %v11404_v55 = vld [vmem:[%s19591_s5 + $0x11c0] sm:$0xff] }
 0x345   : > { %3832 = vmatpush1.msra.mxu0 %v11358_v63  ;;  %v11403_v63 = vld [vmem:[%s19591_s5 + $0x11b8] sm:$0xff] }
 0x346   : > { %3833 = vmatprep.subr.mxu0 %v11357_v11  ;;  %v11402_v11 = vld [vmem:[%s19591_s5 + $0x11b0] sm:$0xff] }
 0x347   : > { %3834 = vmatpush1.msra.mxu0 %v11356_v30  ;;  %v11401_v30 = vld [vmem:[%s19591_s5 + $0x11a8] sm:$0xff] }
 0x348   : > { %3835 = vmatprep.subr.mxu0 %v11355_v27  ;;  %v11400_v27 = vld [vmem:[%s19591_s5 + $0x11a0] sm:$0xff] }
 0x349   : > { %3836 = vmatpush1.msra.mxu0 %v11354_v57  ;;  %v11399_v57 = vld [vmem:[%s19591_s5 + $0x1198] sm:$0xff] }
 0x34a   : > { %3837 = vmatprep.subr.mxu0 %v11353_v14  ;;  %v11398_v14 = vld [vmem:[%s19591_s5 + $0x1190] sm:$0xff] }
 0x34b   : > { %3838 = vmatpush1.msra.mxu0 %v11352_v16  ;;  %v11397_v16 = vld [vmem:[%s19591_s5 + $0x1188] sm:$0xff] }
 0x34c   : > { %3839 = vmatprep.subr.mxu0 %v11351_v4  ;;  %v11396_v4 = vld [vmem:[%s19591_s5 + $0x1180] sm:$0xff] }
 0x34d   : > { %3840 = vmatpush1.msra.mxu0 %v11350_v12  ;;  %v11395_v12 = vld [vmem:[%s19591_s5 + $0x1178] sm:$0xff] }
 0x34e   : > { %3841 = vmatprep.subr.mxu0 %v11349_v9  ;;  %v11394_v9 = vld [vmem:[%s19591_s5 + $0x1170] sm:$0xff] }
 0x34f   : > { %3842 = vmatpush1.msra.mxu0 %v11348_v23  ;;  %v11393_v23 = vld [vmem:[%s19591_s5 + $0x1168] sm:$0xff] }
 0x350   : > { %3843 = vmatprep.subr.mxu0 %v11411_v34  ;;  %v11392_v34 = vld [vmem:[%s19591_s5 + $0x1160] sm:$0xff] }
 0x351   : > { %3844 = vmatpush2.msra.mxu0 %v11410_v59  ;;  %v11391_v59 = vld [vmem:[%s19591_s5 + $0x1158] sm:$0xff] }
 0x352   : > { %3845 = vmatprep.subr.mxu0 %v11409_v54  ;;  %v11390_v54 = vld [vmem:[%s19591_s5 + $0x1150] sm:$0xff] }
 0x353   : > { %3846 = vmatpush2.msra.mxu0 %v11408_v32  ;;  %v11389_v32 = vld [vmem:[%s19591_s5 + $0x1148] sm:$0xff] }
 0x354   : > { %3847 = vmatprep.subr.mxu0 %v11407_v25  ;;  %v11388_v25 = vld [vmem:[%s19591_s5 + $0x1140] sm:$0xff] }
 0x355   : > { %3848 = vmatpush2.msra.mxu0 %v11406_v56  ;;  %v11387_v56 = vld [vmem:[%s19591_s5 + $0x1138] sm:$0xff] }
 0x356   : > { %3849 = vmatprep.subr.mxu0 %v11405_v24  ;;  %v11386_v24 = vld [vmem:[%s19591_s5 + $0x1130] sm:$0xff] }
 0x357   : > { %3850 = vmatpush2.msra.mxu0 %v11404_v55  ;;  %v11385_v55 = vld [vmem:[%s19591_s5 + $0x1128] sm:$0xff] }
 0x358   : > { %3851 = vmatprep.subr.mxu0 %v11403_v63  ;;  %v11384_v63 = vld [vmem:[%s19591_s5 + $0x1120] sm:$0xff] }
 0x359   : > { %3852 = vmatpush2.msra.mxu0 %v11402_v11  ;;  %v11383_v11 = vld [vmem:[%s19591_s5 + $0x1118] sm:$0xff] }
 0x35a   : > { %3853 = vmatprep.subr.mxu0 %v11401_v30  ;;  %v11382_v30 = vld [vmem:[%s19591_s5 + $0x1110] sm:$0xff] }
 0x35b   : > { %3854 = vmatpush2.msra.mxu0 %v11400_v27  ;;  %v11381_v27 = vld [vmem:[%s19591_s5 + $0x1108] sm:$0xff] }
 0x35c   : > { %3855 = vmatprep.subr.mxu0 %v11399_v57  ;;  %v11380_v57 = vld [vmem:[%s19591_s5 + $0x1100] sm:$0xff] }
 0x35d   : > { %3856 = vmatpush2.msra.mxu0 %v11398_v14  ;;  %v3917_v14 = vlaneseq }
 0x35e   : > { %3857 = vmatprep.subr.mxu0 %v11397_v16 }
 0x35f   : > { %3858 = vmatpush2.msra.mxu0 %v11396_v4  ;;  %v15913_v16 = vshrl.u32 %v3917_v14, 7  ;;  %v4442_v4 = vand.u32 127, %v3917_v14 }
 0x360   : > { %3859 = vmatprep.subr.mxu0 %v11395_v12 }
 0x361   : > { %3860 = vmatpush2.msra.mxu0 %v11394_v9  ;;  %v15916_v12 = vsub.s32 %v4442_v4, %v15913_v16  ;;  %v4447_v9 = vadd.s32 4294967288, %v4442_v4 }
 0x362   : > { %3861 = vmatprep.subr.mxu0 %v11393_v23 }
 0x363   : > { %3862 = vmatpush2.msra.mxu0 %v11392_v34  ;;  %v15919_v23 = vsub.s32 %v4447_v9, %v15913_v16  ;;  %v2782_v34 = vpop.f32.mrf.mxu0 }
 0x364   : > { %3863 = vmatprep.subr.mxu0 %v11391_v59 }
 0x365   : > { %3864 = vmatpush2.msra.mxu0 %v11390_v54  ;;  %v2784_v59 = vpop.f32.mrf.mxu0  ;;  %v2859_v54 = vpop.f32.mrf.mxu1 }
 0x366   : > { %3865 = vmatprep.subr.mxu0 %v11389_v32  ;;  %v2860_v20 = vadd.f32 %v2859_v54, %v2782_v34 }
 0x367   : > { %3866 = vmatpush2.msra.mxu0 %v11388_v25  ;;  %v2788_v32 = vpop.f32.mrf.mxu0 }
 0x368   : > { %3867 = vmatprep.subr.mxu0 %v11387_v56 }
 0x369   : > { %3868 = vmatpush2.msra.mxu0 %v11386_v24  ;;  %v2790_v25 = vpop.f32.mrf.mxu0 }
 0x36a   : > { %3869 = vmatprep.subr.mxu0 %v11385_v55 }
 0x36b   : > { %3870 = vmatpush2.msra.mxu0 %v11384_v63 }
 0x36c   : > { %3871 = vmatprep.subr.mxu0 %v11383_v11 }
 0x36d   : > { %3872 = vmatpush2.msra.mxu0 %v11382_v30 }
 0x36e   : > { %3873 = vmatprep.subr.mxu0 %v11381_v27 }
 0x36f   : > { %3874 = vmatpush2.msra.mxu0 %v11380_v57 }
 0x370   : > { %3876 = vmatmul.mubr.f32.vlgmr.msra.gmra.mxu0 %v14123_v0  ;;  %v2861_v0 = vpop.f32.mrf.mxu1 }
 0x371   : > { %3881 = vmatprep.mubr.f32.mxu0 %v14159_v43  ;;  %v3001_v43 = vpop.f32.mrf.mxu0  ;;  %v2862_v19 = vadd.f32 %v2861_v0, %v2784_v59 }
 0x372   : > { %v2865_v56 = vpop.f32.mrf.mxu1  ;;  %v3012_v18 = vadd.f32 %v3001_v43, %v2860_v20 }
 0x373   : > { %v2866_v26 = vadd.f32 %v2865_v56, %v2788_v32 }
 0x374   : > { %3882 = vmatmul.mubr.f32.gmra.mxu0 %v14151_v58  ;;  %v3003_v58 = vpop.f32.mrf.mxu0  ;;  %v2867_v24 = vpop.f32.mrf.mxu1 }
 0x375   : > { %v3013_v7 = vadd.f32 %v3003_v58, %v2862_v19  ;;  %v2868_v3 = vadd.f32 %v2867_v24, %v2790_v25  ;;  %v12914_v58 = vmov 1966171168  }
 0x376   : > { %v3147_v55 = vpop.f32.mrf.mxu1  ;;  %v3007_v63 = vpop.f32.mrf.mxu0  ;;  %v3915_v25 = vunpack.c.l.s4 %v12914_v58 }
 0x377   : > { %v3158_v53 = vadd.f32 %v3147_v55, %v3012_v18  ;;  %v3014_v60 = vadd.f32 %v3007_v63, %v2866_v26 }
 0x378   : > { %v3149_v11 = vpop.f32.mrf.mxu1  ;;  %v3009_v30 = vpop.f32.mrf.mxu0 }
 0x379   : > { %v3159_v1 = vadd.f32 %v3149_v11, %v3013_v7  ;;  %v3015_v47 = vadd.f32 %v3009_v30, %v2868_v3 }
 0x37a   : > { %v3153_v57 = vpop.f32.mrf.mxu1 }
 0x37b   : > { %v3160_v0 = vadd.f32 %v3153_v57, %v3014_v60 }
 0x37c   : > { %v3155_v4 = vpop.f32.mrf.mxu1 }
 0x37d   : > { %v3161_v34 = vadd.f32 %v3155_v4, %v3015_v47  ;;  %v3916_v47 = vunpack.c.0.s8 %v3915_v25  ;;  %v15938_v4 = vld [vmem:[%s19592_s6 + $0x18] sm:$0x1] }
 0x37e   : > { %19698 = vst [vmem:[#allocation52_spill] sm:$0xff] %v15938_v4  ;;  %vm2586_vm3 = vcmp.gt.f32.partialorder %v15938_v4, 0.5 }
 0x3ab   : > { %v3293_v27 = vpop.f32.mrf.mxu0  ;;  %v3439_v9 = vpop.f32.mrf.mxu1 }
 0x3ac   : > { %v3304_v2 = vadd.f32 %v3293_v27, %v3158_v53 }
 0x3ad   : > { %v3295_v14 = vpop.f32.mrf.mxu0  ;;  %v3441_v17 = vpop.f32.mrf.mxu1 }
 0x3ae   : > { %v3305_v52 = vadd.f32 %v3295_v14, %v3159_v1  ;;  %v3450_v35 = vadd.f32 %v3439_v9, %v3304_v2  ;;  %v15921_v32 = vpop.permute.xlu1 %3901 }
 0x3b0   : > { %v3451_v20 = vadd.f32 %v3441_v17, %v3305_v52 }
 0x3b1   : > { %v3299_v21 = vpop.f32.mrf.mxu0  ;;  %v3445_v41 = vpop.f32.mrf.mxu1 }
 0x3b2   : > { %v3306_v7 = vadd.f32 %v3299_v21, %v3160_v0  ;;  %v15958_v0 = vld [vmem:[%s19592_s6 + $0x8] sm:$0xff] }
 0x3b3   : > { %v3301_v40 = vpop.f32.mrf.mxu0  ;;  %v3447_v48 = vpop.f32.mrf.mxu1  ;;  %19700 = vst [vmem:[#allocation54_spill] sm:$0xff] %v15958_v0  ;;  %vm2584_vm6 = vcmp.gt.f32.partialorder %v15958_v0, 0.5 }
 0x3b4   : > { %v3307_v19 = vadd.f32 %v3301_v40, %v3161_v34  ;;  %v3452_v55 = vadd.f32 %v3445_v41, %v3306_v7  ;;  %v15933_v41 = vld [vmem:[%s19592_s6 + $0x10] sm:$0x1] }
 0x3b5   : > { %vm2585_vm2 = vcmp.gt.f32.partialorder %v15933_v41, 0.5 }
 0x3b6   : > { %v3453_v1 = vadd.f32 %v3447_v48, %v3307_v19 }
 0x3ef   : > { %v3585_v45 = vpop.f32.mrf.mxu0  ;;  %v3731_v29 = vpop.f32.mrf.mxu1 }
 0x3f0   : > { %v3596_v54 = vadd.f32 %v3585_v45, %v3450_v35 }
 0x3f1   : > { %v3587_v42 = vpop.f32.mrf.mxu0  ;;  %v3733_v18 = vpop.f32.mrf.mxu1 }
 0x3f2   : > { %v3597_v43 = vadd.f32 %v3587_v42, %v3451_v20  ;;  %v3742_v3 = vadd.f32 %v3731_v29, %v3596_v54  ;;  %v15923_v42 = vpop.permute.xlu1 %3896  ;;  %v15928_v29 = vsub.s32 %v3916_v47, %v15913_v16  ;;  %v15948_v20 = vsub.s32 1, %v15913_v16  ;;  %v15953_v54 = vld [vmem:[%s19592_s6] sm:$0xff] }
 0x3f3   : > { %v3737_v2 = vpop.f32.mrf.mxu1  ;;  %19699 = vst [vmem:[#allocation53_spill] sm:$0xff] %v15953_v54  ;;  %vm2583_vm5 = vcmp.gt.f32.partialorder %v15953_v54, 0.5 }
 0x3f4   : > { %v3591_v59 = vpop.f32.mrf.mxu0  ;;  %v3743_v26 = vadd.f32 %v3733_v18, %v3597_v43 }
 0x3f5   : > { %v3598_v40 = vadd.f32 %v3591_v59, %v3452_v55  ;;  %v3739_v35 = vpop.f32.mrf.mxu1  ;;  %v15945_v59 = vsub.s32 0, %v15913_v16 }
 0x3f6   : > { %v3593_v53 = vpop.f32.mrf.mxu0 }
 0x3f7   : > { %v3599_v17 = vadd.f32 %v3593_v53, %v3453_v1  ;;  %v3744_v57 = vadd.f32 %v3737_v2, %v3598_v40 }
 0x3f9   : > { %v3745_v48 = vadd.f32 %v3739_v35, %v3599_v17 }
 0x430   : > { %v3877_v56 = vpop.f32.mrf.mxu0 }
 0x431   : > { %v3888_v24 = vadd.f32 %v3877_v56, %v3742_v3 }
 0x432   : > { %v3879_v52 = vpop.f32.mrf.mxu0 }
 0x433   : > { %v3889_v45 = vadd.f32 %v3879_v52, %v3743_v26  ;;  %v3904_v21 = vadd.f32 %v15923_v42, %v3888_v24 }
 0x434   : > { %v3883_v60 = vpop.f32.mrf.mxu0 }
 0x435   : > { %v3905_v63 = vadd.f32 %v15923_v42, %v3889_v45  ;;  %v3890_v19 = vadd.f32 %v3883_v60, %v3744_v57 }
 0x436   : > { %v3885_v11 = vpop.f32.mrf.mxu0 }
 0x437   : > { %v3912_v30 = vcombine.low %v3904_v21, %v3905_v63  ;;  %v3913_v27 = vcombine.high %v3904_v21, %v3905_v63  ;;  %v3891_v14 = vadd.f32 %v3885_v11, %v3745_v48  ;;  %v3906_v3 = vadd.f32 %v15921_v32, %v3890_v19 }
 0x439   : > { %v3920_v9 = vrot.slane %v3912_v30, %v15928_v29  ;;  %v15942_v34 = vrot.slane %v3913_v27, %v15928_v29  ;;  %v3907_v58 = vadd.f32 %v15921_v32, %v3891_v14 }
 0x43b   : > { %v3928_v43 = vcombine.high %v3920_v9, %v3920_v9  ;;  %v3936_v18 = vrot.slane %v3920_v9, %v15928_v29  ;;  %v3943_v16 = vrot.slane %v15942_v34, %v15928_v29  ;;  %v3929_v55 = vcombine.high %v15942_v34, %v15942_v34 }
 0x43c   : > { %v3962_v17 = vcombine.low %v3906_v3, %v3907_v58  ;;  %v3963_v52 = vcombine.high %v3906_v3, %v3907_v58 }
 0x43d   : > { %v4023_v25 = vrot.slane %v3936_v18, %v15945_v59  ;;  %v4027_v7 = vrot.slane %v3936_v18, %v15948_v20  ;;  %v4055_v53 = vrot.slane %v3943_v16, %v15945_v59  ;;  %v4059_v1 = vrot.slane %v3943_v16, %v15948_v20 }
 0x43e   : > { %v15974_v56 = vrot.slane %v3928_v43, %v15928_v29  ;;  %v3958_v45 = vcombine.high %v3936_v18, %v3936_v18  ;;  %v16002_v34 = vrot.slane %v3962_v17, %v15928_v29 }
 0x43f   : > { %v4182_v26 = vsel %vm2585_vm2, %v4023_v25, -inf  ;;  %v4183_v2 = vsel %vm2586_vm3, %v4027_v7, -inf  ;;  %v4180_v24 = vsel %vm2583_vm5, %v4023_v25, -inf  ;;  %v4181_v47 = vsel %vm2584_vm6, %v4027_v7, -inf }
 0x440   : > { %v4250_v40 = vsel %vm4249_vm4, %v4182_v26, -inf  ;;  %v4252_v60 = vsel %vm4251_vm7, %v4183_v2, -inf  ;;  %v4245_v35 = vsel %vm4244_vm8, %v4181_v47, -inf  ;;  %v4198_v21 = vsel %vm2585_vm2, %v4055_v53, -inf }
 0x441   : > { %v4253_v63 = vmax.f32 %v4250_v40, %v4252_v60  ;;  %v4246_v48 = vmax.f32 %v4180_v24, %v4245_v35  ;;  %v4199_v11 = vsel %vm2586_vm3, %v4059_v1, -inf  ;;  %v4287_v30 = vsel %vm4249_vm4, %v4198_v21, -inf }
 0x442   : > { %v4288_v27 = vsel %vm4251_vm7, %v4199_v11, -inf  ;;  %v4196_v57 = vsel %vm2583_vm5, %v4055_v53, -inf  ;;  %v4197_v14 = vsel %vm2584_vm6, %v4059_v1, -inf  ;;  %v4031_v9 = vrot.slane %v15974_v56, %v15945_v59 }
 0x443   : > { %4254 = vmax.xlane.f32.xlu0 %v4253_v63  ;;  %4247 = vmax.xlane.f32.xlu1 %v4246_v48  ;;  %v4283_v19 = vsel %vm4244_vm8, %v4197_v14, -inf  ;;  %v4035_v43 = vrot.slane %v15974_v56, %v15948_v20  ;;  %v4039_v18 = vrot.slane %v3958_v45, %v15945_v59  ;;  %v4289_v58 = vmax.f32 %v4287_v30, %v4288_v27 }
 0x444   : > { %v4284_v25 = vmax.f32 %v4196_v57, %v4283_v19  ;;  %v4186_v7 = vsel %vm2585_vm2, %v4031_v9, -inf  ;;  %v4043_v53 = vrot.slane %v3958_v45, %v15948_v20  ;;  %v4184_v1 = vsel %vm2583_vm5, %v4031_v9, -inf }
 0x445   : > { %v4187_v3 = vsel %vm2586_vm3, %v4035_v43, -inf  ;;  %v4185_v26 = vsel %vm2584_vm6, %v4035_v43, -inf  ;;  %v4190_v2 = vsel %vm2585_vm2, %v4039_v18, -inf  ;;  %v4260_v24 = vsel %vm4249_vm4, %v4186_v7, -inf }
 0x446   : > { %v4261_v47 = vsel %vm4251_vm7, %v4187_v3, -inf  ;;  %v4256_v17 = vsel %vm4244_vm8, %v4185_v26, -inf  ;;  %v4191_v45 = vsel %vm2586_vm3, %v4043_v53, -inf  ;;  %v16025_v40 = vrot.slane %v3963_v52, %v15928_v29 }
 0x447   : > { %v3986_v60 = vrot.slane %v16002_v34, %v15928_v29  ;;  %4290 = vmax.xlane.f32.xlu0 %v4289_v58  ;;  %4285 = vmax.xlane.f32.xlu1 %v4284_v25  ;;  %v4269_v35 = vsel %vm4249_vm4, %v4190_v2, -inf  ;;  %v4189_v21 = vsel %vm2584_vm6, %v4043_v53, -inf  ;;  %v16033_v63 = vrot.slane %v3929_v55, %v15928_v29 }
 0x448   : > { %v3959_v48 = vcombine.high %v3943_v16, %v3943_v16  ;;  %v4262_v11 = vmax.f32 %v4260_v24, %v4261_v47  ;;  %v4257_v30 = vmax.f32 %v4184_v1, %v4256_v17  ;;  %v4270_v27 = vsel %vm4251_vm7, %v4191_v45, -inf }
 0x449   : > { %v4188_v52 = vsel %vm2583_vm5, %v4039_v18, -inf  ;;  %v4265_v57 = vsel %vm4244_vm8, %v4189_v21, -inf  ;;  %v4063_v14 = vrot.slane %v16033_v63, %v15945_v59  ;;  %v4067_v9 = vrot.slane %v16033_v63, %v15948_v20 }
 0x44a   : > { %v4071_v19 = vrot.slane %v3959_v48, %v15945_v59  ;;  %v16046_v16 = vrot.slane %v16025_v40, %v15928_v29  ;;  %v4075_v55 = vrot.slane %v3959_v48, %v15948_v20  ;;  %v4087_v43 = vrot.slane %v3986_v60, %v15945_v59 }
 0x44b   : > { %4263 = vmax.xlane.f32.xlu0 %v4262_v11  ;;  %4258 = vmax.xlane.f32.xlu1 %v4257_v30  ;;  %v4202_v18 = vsel %vm2585_vm2, %v4063_v14, -inf  ;;  %v4203_v58 = vsel %vm2586_vm3, %v4067_v9, -inf  ;;  %v4201_v25 = vsel %vm2584_vm6, %v4067_v9, -inf  ;;  %v4091_v7 = vrot.slane %v3986_v60, %v15948_v20 }
 0x44c   : > { %v4271_v53 = vmax.f32 %v4269_v35, %v4270_v27  ;;  %v4266_v3 = vmax.f32 %v4188_v52, %v4265_v57  ;;  %v4296_v1 = vsel %vm4249_vm4, %v4202_v18, -inf  ;;  %v4200_v26 = vsel %vm2583_vm5, %v4063_v14, -inf }
 0x44d   : > { %v4297_v2 = vsel %vm4251_vm7, %v4203_v58, -inf  ;;  %v4292_v24 = vsel %vm4244_vm8, %v4201_v25, -inf  ;;  %v4206_v47 = vsel %vm2585_vm2, %v4071_v19, -inf  ;;  %v4207_v17 = vsel %vm2586_vm3, %v4075_v55, -inf }
 0x44e   : > { %v4205_v45 = vsel %vm2584_vm6, %v4075_v55, -inf  ;;  %v4214_v35 = vsel %vm2585_vm2, %v4087_v43, -inf  ;;  %v4215_v21 = vsel %vm2586_vm3, %v4091_v7, -inf  ;;  %v4298_v48 = vmax.f32 %v4296_v1, %v4297_v2 }
 0x44f   : > { %4272 = vmax.xlane.f32.xlu0 %v4271_v53  ;;  %4267 = vmax.xlane.f32.xlu1 %v4266_v3  ;;  %v4293_v11 = vmax.f32 %v4200_v26, %v4292_v24  ;;  %v4305_v30 = vsel %vm4249_vm4, %v4206_v47, -inf  ;;  %v4306_v27 = vsel %vm4251_vm7, %v4207_v17, -inf  ;;  %v4204_v52 = vsel %vm2583_vm5, %v4071_v19, -inf }
 0x450   : > { %v4301_v57 = vsel %vm4244_vm8, %v4205_v45, -inf  ;;  %v4123_v14 = vrot.slane %v16046_v16, %v15948_v20  ;;  %v3960_v9 = vcombine.high %v15974_v56, %v15974_v56  ;;  %v4213_v55 = vsel %vm2584_vm6, %v4091_v7, -inf }
 0x451   : > { %v4119_v18 = vrot.slane %v16046_v16, %v15945_v59  ;;  %v3978_v58 = vcombine.high %v16002_v34, %v16002_v34  ;;  %v4212_v19 = vsel %vm2583_vm5, %v4087_v43, -inf  ;;  %v4307_v25 = vmax.f32 %v4305_v30, %v4306_v27 }
 0x452   : > { %v4302_v53 = vmax.f32 %v4204_v52, %v4301_v57  ;;  %v4323_v3 = vsel %vm4249_vm4, %v4214_v35, -inf  ;;  %v4324_v56 = vsel %vm4251_vm7, %v4215_v21, -inf  ;;  %v4319_v1 = vsel %vm4244_vm8, %v4213_v55, -inf }
 0x453   : > { %4299 = vmax.xlane.f32.xlu0 %v4298_v48  ;;  %4294 = vmax.xlane.f32.xlu1 %v4293_v11  ;;  %v4229_v7 = vsel %vm2584_vm6, %v4123_v14, -inf  ;;  %v4051_v26 = vrot.slane %v3960_v9, %v15948_v20  ;;  %v4008_v2 = vcombine.high %v3986_v60, %v3986_v60  ;;  %v3979_v34 = vcombine.high %v16025_v40, %v16025_v40 }
 0x454   : > { %v4230_v43 = vsel %vm2585_vm2, %v4119_v18, -inf  ;;  %v4231_v24 = vsel %vm2586_vm3, %v4123_v14, -inf  ;;  %v4047_v47 = vrot.slane %v3960_v9, %v15945_v59  ;;  %v4000_v17 = vrot.slane %v3978_v58, %v15928_v29 }
 0x455   : > { %v4325_v45 = vmax.f32 %v4323_v3, %v4324_v56  ;;  %v4320_v35 = vmax.f32 %v4212_v19, %v4319_v1  ;;  %v4228_v60 = vsel %vm2583_vm5, %v4119_v18, -inf  ;;  %v4355_v21 = vsel %vm4244_vm8, %v4229_v7, -inf }
 0x456   : > { %v4359_v40 = vsel %vm4249_vm4, %v4230_v43, -inf  ;;  %v4360_v48 = vsel %vm4251_vm7, %v4231_v24, -inf  ;;  %v4193_v11 = vsel %vm2584_vm6, %v4051_v26, -inf  ;;  %v4107_v30 = vrot.slane %v4008_v2, %v15948_v20 }
 0x457   : > { %4308 = vmax.xlane.f32.xlu0 %v4307_v25  ;;  %4303 = vmax.xlane.f32.xlu1 %v4302_v53  ;;  %v4194_v27 = vsel %vm2585_vm2, %v4047_v47, -inf  ;;  %v4195_v52 = vsel %vm2586_vm3, %v4051_v26, -inf  ;;  %v4099_v57 = vrot.slane %v4000_v17, %v15948_v20  ;;  %v4007_v14 = vrot.slane %v3979_v34, %v15928_v29 }
 0x458   : > { %v4356_v9 = vmax.f32 %v4228_v60, %v4355_v21  ;;  %v4361_v55 = vmax.f32 %v4359_v40, %v4360_v48  ;;  %v4192_v18 = vsel %vm2583_vm5, %v4047_v47, -inf  ;;  %v4274_v58 = vsel %vm4244_vm8, %v4193_v11, -inf }
 0x459   : > { %v4103_v19 = vrot.slane %v4008_v2, %v15945_v59  ;;  %v4278_v25 = vsel %vm4249_vm4, %v4194_v27, -inf  ;;  %v4279_v53 = vsel %vm4251_vm7, %v4195_v52, -inf  ;;  %v4221_v3 = vsel %vm2584_vm6, %v4107_v30, -inf }
 0x45a   : > { %v4095_v56 = vrot.slane %v4000_v17, %v15945_v59  ;;  %v4217_v1 = vsel %vm2584_vm6, %v4099_v57, -inf  ;;  %v4131_v7 = vrot.slane %v4007_v14, %v15948_v20  ;;  %v4009_v26 = vcombine.high %v16046_v16, %v16046_v16 }
 0x45b   : > { %4326 = vmax.xlane.f32.xlu1 %v4325_v45  ;;  %4321 = vmax.xlane.f32.xlu0 %v4320_v35  ;;  %v4275_v2 = vmax.f32 %v4192_v18, %v4274_v58  ;;  %v4280_v34 = vmax.f32 %v4278_v25, %v4279_v53  ;;  %v4220_v43 = vsel %vm2583_vm5, %v4103_v19, -inf  ;;  %v4337_v24 = vsel %vm4244_vm8, %v4221_v3, -inf }
 0x45c   : > { %v4216_v47 = vsel %vm2583_vm5, %v4095_v56, -inf  ;;  %v4328_v45 = vsel %vm4244_vm8, %v4217_v1, -inf  ;;  %v4127_v35 = vrot.slane %v4007_v14, %v15945_v59  ;;  %v4218_v60 = vsel %vm2585_vm2, %v4095_v56, -inf }
 0x45d   : > { %v4233_v16 = vsel %vm2584_vm6, %v4131_v7, -inf  ;;  %v4219_v21 = vsel %vm2586_vm3, %v4099_v57, -inf  ;;  %v4139_v40 = vrot.slane %v4009_v26, %v15948_v20  ;;  %v4010_v48 = vcombine.high %v4000_v17, %v4000_v17 }
 0x45e   : > { %v4222_v11 = vsel %vm2585_vm2, %v4103_v19, -inf  ;;  %v4338_v27 = vmax.f32 %v4220_v43, %v4337_v24  ;;  %v4329_v52 = vmax.f32 %v4216_v47, %v4328_v45  ;;  %v4232_v18 = vsel %vm2583_vm5, %v4127_v35, -inf }
 0x45f   : > { %4357 = vmax.xlane.f32.xlu1 %v4356_v9  ;;  %4362 = vmax.xlane.f32.xlu0 %v4361_v55  ;;  %v4135_v9 = vrot.slane %v4009_v26, %v15945_v59  ;;  %v4223_v55 = vsel %vm2586_vm3, %v4107_v30, -inf  ;;  %v4364_v58 = vsel %vm4244_vm8, %v4233_v16, -inf  ;;  %v4332_v57 = vsel %vm4249_vm4, %v4218_v60, -inf }
 0x460   : > { %v4333_v25 = vsel %vm4251_vm7, %v4219_v21, -inf  ;;  %v4237_v17 = vsel %vm2584_vm6, %v4139_v40, -inf  ;;  %v4115_v19 = vrot.slane %v4010_v48, %v15948_v20  ;;  %v4011_v53 = vcombine.high %v4007_v14, %v4007_v14 }
 0x461   : > { %v4341_v3 = vsel %vm4249_vm4, %v4222_v11, -inf  ;;  %v4365_v30 = vmax.f32 %v4232_v18, %v4364_v58  ;;  %v4334_v56 = vmax.f32 %v4332_v57, %v4333_v25  ;;  %v4236_v1 = vsel %vm2583_vm5, %v4135_v9, -inf }
 0x462   : > { %v4342_v26 = vsel %vm4251_vm7, %v4223_v55, -inf  ;;  %v4235_v43 = vsel %vm2586_vm3, %v4131_v7, -inf  ;;  %v4111_v24 = vrot.slane %v4010_v48, %v15945_v59  ;;  %v4225_v14 = vsel %vm2584_vm6, %v4115_v19, -inf }
 0x463   : > { %4276 = vmax.xlane.f32.xlu1 %v4275_v2  ;;  %4281 = vmax.xlane.f32.xlu0 %v4280_v34  ;;  %v4373_v2 = vsel %vm4244_vm8, %v4237_v17, -inf  ;;  %v4234_v34 = vsel %vm2585_vm2, %v4127_v35, -inf  ;;  %v4147_v47 = vrot.slane %v4011_v53, %v15948_v20  ;;  %v3961_v45 = vcombine.high %v16033_v63, %v16033_v63 }
 0x464   : > { %v4374_v60 = vmax.f32 %v4236_v1, %v4373_v2  ;;  %v4343_v16 = vmax.f32 %v4341_v3, %v4342_v26  ;;  %v4368_v21 = vsel %vm4249_vm4, %v4234_v34, -inf  ;;  %v4369_v35 = vsel %vm4251_vm7, %v4235_v43, -inf }
 0x465   : > { %v4224_v7 = vsel %vm2583_vm5, %v4111_v24, -inf  ;;  %v4346_v48 = vsel %vm4244_vm8, %v4225_v14, -inf  ;;  %v4238_v11 = vsel %vm2585_vm2, %v4135_v9, -inf  ;;  %v4239_v63 = vsel %vm2586_vm3, %v4139_v40, -inf }
 0x466   : > { %v4083_v55 = vrot.slane %v3961_v45, %v15948_v20  ;;  %v4370_v18 = vmax.f32 %v4368_v21, %v4369_v35  ;;  %v4347_v58 = vmax.f32 %v4224_v7, %v4346_v48  ;;  %v4377_v57 = vsel %vm4249_vm4, %v4238_v11, -inf }
 0x467   : > { %4339 = vmax.xlane.f32.xlu1 %v4338_v27  ;;  %4330 = vmax.xlane.f32.xlu0 %v4329_v52  ;;  %v4143_v27 = vrot.slane %v4011_v53, %v15945_v59  ;;  %v4241_v52 = vsel %vm2584_vm6, %v4147_v47, -inf  ;;  %v4378_v25 = vsel %vm4251_vm7, %v4239_v63, -inf  ;;  %v4079_v53 = vrot.slane %v3961_v45, %v15945_v59  ;;  %v4391_v63 = vld [vmem:[%s19593_s7] sm:$0xff] }
 0x468   : > { %v4382_v17 = vsel %vm4244_vm8, %v4241_v52, -inf  ;;  %v4226_v40 = vsel %vm2585_vm2, %v4111_v24, -inf  ;;  %v4227_v3 = vsel %vm2586_vm3, %v4115_v19, -inf  ;;  %v4243_v19 = vsel %vm2586_vm3, %v4147_v47, -inf  ;;  %11721 = vmatprep.mubr.msk.f32.mxu1 %vm1356_vm1, %v4391_v63  ;;  %v5619_v52 = vld [vmem:[%s19594_s8 + $0x8] sm:$0xff] }
 0x469   : > { %v4240_v9 = vsel %vm2583_vm5, %v4143_v27, -inf  ;;  %v4350_v26 = vsel %vm4249_vm4, %v4226_v40, -inf  ;;  %v4351_v2 = vsel %vm4251_vm7, %v4227_v3, -inf  ;;  %v4208_v34 = vsel %vm2583_vm5, %v4079_v53, -inf }
 0x46a   : > { %v4383_v1 = vmax.f32 %v4240_v9, %v4382_v17  ;;  %v4242_v24 = vsel %vm2585_vm2, %v4143_v27, -inf  ;;  %v4352_v14 = vmax.f32 %v4350_v26, %v4351_v2  ;;  %v4210_v21 = vsel %vm2585_vm2, %v4079_v53, -inf  ;;  %v5618_v27 = vld [vmem:[%s19594_s8] sm:$0xff] }
 0x46b   : > { %4366 = vmax.xlane.f32.xlu1 %v4365_v30  ;;  %4335 = vmax.xlane.f32.xlu0 %v4334_v56  ;;  %v4209_v30 = vsel %vm2584_vm6, %v4083_v55, -inf  ;;  %v4379_v56 = vmax.f32 %v4377_v57, %v4378_v25  ;;  %v4211_v35 = vsel %vm2586_vm3, %v4083_v55, -inf  ;;  %v4314_v48 = vsel %vm4249_vm4, %v4210_v21, -inf }
 0x46c   : > { %v4310_v43 = vsel %vm4244_vm8, %v4209_v30, -inf  ;;  %v4315_v11 = vsel %vm4251_vm7, %v4211_v35, -inf }
 0x46d   : > { %v4311_v45 = vmax.f32 %v4208_v34, %v4310_v43  ;;  %v4316_v47 = vmax.f32 %v4314_v48, %v4315_v11 }
 0x46f   : > { %4375 = vmax.xlane.f32.xlu1 %v4374_v60  ;;  %4344 = vmax.xlane.f32.xlu0 %v4343_v16  ;;  %v4386_v60 = vsel %vm4249_vm4, %v4242_v24, -inf  ;;  %v4387_v16 = vsel %vm4251_vm7, %v4243_v19, -inf }
 0x470   : > { %v4388_v7 = vmax.f32 %v4386_v60, %v4387_v16 }
 0x473   : > { %4371 = vmax.xlane.f32.xlu0 %v4370_v18  ;;  %4348 = vmax.xlane.f32.xlu1 %v4347_v58 }
 0x477   : > { %4380 = vmax.xlane.f32.xlu0 %v4379_v56  ;;  %4384 = vmax.xlane.f32.xlu1 %v4383_v1 }
 0x47b   : > { %4353 = vmax.xlane.f32.xlu0 %v4352_v14  ;;  %4312 = vmax.xlane.f32.xlu1 %v4311_v45 }
 0x47f   : > { %4389 = vmax.xlane.f32.xlu0 %v4388_v7 }
 0x483   : > { %4317 = vmax.xlane.f32.xlu0 %v4316_v47 }
 0x48c   : > { %5622 = vperm.xlu1 %11933, %v5618_v27  }
 0x499   : > { %5627 = vperm.xlu0 %11932, %v5619_v52  }
 0x4cc   : > { %v4255_v55 = vpop.xlane.xlu0 %4254  ;;  %v4248_v18 = vpop.xlane.xlu1 %4247 }
 0x4cd   : > { %v4451_v27 = vrot.slane %v4255_v55, %v15919_v23  ;;  %v4446_v63 = vrot.slane %v4248_v18, %v15916_v12 }
 0x4d0   : > { %v16225_v58 = vpop.xlane.xlu0 %4290  ;;  %v16227_v57 = vpop.xlane.xlu1 %4285 }
 0x4d4   : > { %v4264_v25 = vpop.xlane.xlu0 %4263  ;;  %v4259_v9 = vpop.xlane.xlu1 %4258 }
 0x4d5   : > { %v4461_v35 = vrot.slane %v4264_v25, %v15919_v23  ;;  %v4457_v7 = vrot.slane %v4259_v9, %v15916_v12 }
 0x4d7   : > { %v4462_v25 = vsel %vm4452_vm9, %v4461_v35, %v4457_v7 }
 0x4d8   : > { %v4273_v17 = vpop.xlane.xlu0 %4272  ;;  %v4268_v53 = vpop.xlane.xlu1 %4267 }
 0x4d9   : > { %v4470_v48 = vrot.slane %v4273_v17, %v15919_v23  ;;  %v4466_v11 = vrot.slane %v4268_v53, %v15916_v12 }
 0x4db   : > { %v4471_v17 = vsel %vm4452_vm9, %v4470_v48, %v4466_v11 }
 0x4dc   : > { %v16229_v40 = vpop.xlane.xlu0 %4299  ;;  %v16231_v3 = vpop.xlane.xlu1 %4294 }
 0x4e0   : > { %v16233_v30 = vpop.xlane.xlu0 %4308  ;;  %v16235_v56 = vpop.xlane.xlu1 %4303 }
 0x4e4   : > { %v4327_v1 = vpop.xlane.xlu1 %4326  ;;  %v4322_v26 = vpop.xlane.xlu0 %4321 }
 0x4e5   : > { %v4524_v55 = vrot.slane %v4327_v1, %v15919_v23  ;;  %v4520_v53 = vrot.slane %v4322_v26, %v15916_v12 }
 0x4e8   : > { %v16237_v2 = vpop.xlane.xlu1 %4357  ;;  %v16239_v34 = vpop.xlane.xlu0 %4362 }
 0x4ec   : > { %v4277_v43 = vpop.xlane.xlu1 %4276  ;;  %v4282_v24 = vpop.xlane.xlu0 %4281 }
 0x4ed   : > { %v4475_v52 = vrot.slane %v4277_v43, %v15916_v12  ;;  %v4479_v0 = vrot.slane %v4282_v24, %v15919_v23  ;;  %v4453_v43 = vsel %vm4452_vm9, %v4451_v27, %v4446_v63  ;;  %v4488_v24 = vrot.slane %v16225_v58, %v15919_v23 }
 0x4ee   : > { %v4590_v7 = vsel %vm4589_vm10, %v4462_v25, %v4453_v43  ;;  %v4525_v58 = vsel %vm4452_vm9, %v4524_v55, %v4520_v53  ;;  %v4493_v55 = vrot.slane %v16231_v3, %v15916_v12 }
 0x4ef   : > { %v4480_v1 = vsel %vm4452_vm9, %v4479_v0, %v4475_v52 }
 0x4f0   : > { %v4340_v19 = vpop.xlane.xlu1 %4339  ;;  %v4331_v14 = vpop.xlane.xlu0 %4330 }
 0x4f1   : > { %v4529_v35 = vrot.slane %v4331_v14, %v15916_v12  ;;  %v4538_v26 = vrot.slane %v4340_v19, %v15916_v12  ;;  %v4556_v14 = vrot.slane %v16237_v2, %v15916_v12  ;;  %v4497_v2 = vrot.slane %v16229_v40, %v15919_v23 }
 0x4f4   : > { %v16241_v45 = vpop.xlane.xlu1 %4366  ;;  %v4336_v60 = vpop.xlane.xlu0 %4335 }
 0x4f5   : > { %v4533_v9 = vrot.slane %v4336_v60, %v15919_v23  ;;  %v4484_v60 = vrot.slane %v16227_v57, %v15916_v12  ;;  %v4560_v57 = vrot.slane %v16239_v34, %v15919_v23  ;;  %v4565_v53 = vrot.slane %v16241_v45, %v15916_v12 }
 0x4f7   : > { %v4534_v48 = vsel %vm4452_vm9, %v4533_v9, %v4529_v35  ;;  %v4489_v9 = vsel %vm4452_vm9, %v4488_v24, %v4484_v60 }
 0x4f8   : > { %v16243_v16 = vpop.xlane.xlu1 %4375  ;;  %v4345_v21 = vpop.xlane.xlu0 %4344 }
 0x4f9   : > { %v4542_v18 = vrot.slane %v4345_v21, %v15919_v23  ;;  %v4592_v21 = vsel %vm4591_vm11, %v4471_v17, %v4590_v7  ;;  %v4603_v17 = vsel %vm4589_vm10, %v4534_v48, %v4525_v58  ;;  %v4574_v43 = vrot.slane %v16243_v16, %v15916_v12 }
 0x4fa   : > { %v4594_v19 = vsel %vm4593_vm12, %v4480_v1, %v4592_v21  ;;  %v4506_v7 = vrot.slane %v16233_v30, %v15919_v23  ;;  %v4502_v1 = vrot.slane %v16235_v56, %v15916_v12  ;;  %v4498_v48 = vsel %vm4452_vm9, %v4497_v2, %v4493_v55  ;;  %v4393_v2 = vld [vmem:[%s19593_s7 + $0x10] sm:$0xff]  ;;  %v4395_v55 = vld [vmem:[%s19593_s7 + $0x20] sm:$0xff] }
 0x4fb   : > { %v4543_v11 = vsel %vm4452_vm9, %v4542_v18, %v4538_v26  ;;  %v4561_v18 = vsel %vm4452_vm9, %v4560_v57, %v4556_v14 }
 0x4fc   : > { %v4372_v47 = vpop.xlane.xlu0 %4371  ;;  %v4349_v54 = vpop.xlane.xlu1 %4348 }
 0x4fd   : > { %v4569_v63 = vrot.slane %v4372_v47, %v15919_v23  ;;  %v4547_v52 = vrot.slane %v4349_v54, %v15916_v12  ;;  %v4604_v47 = vsel %vm4591_vm11, %v4543_v11, %v4603_v17  ;;  %v11430_v17 = vld [vmem:[%s19595_s9 + $0x10] sm:$0xff] }
 0x4ff   : > { %v4570_v35 = vsel %vm4452_vm9, %v4569_v63, %v4565_v53  ;;  %v4396_v53 = vld [vmem:[%s19593_s7 + $0x28] sm:$0xff] }
 0x500   : > { %v4381_v4 = vpop.xlane.xlu0 %4380  ;;  %v4385_v27 = vpop.xlane.xlu1 %4384 }
 0x501   : > { %v4578_v34 = vrot.slane %v4381_v4, %v15919_v23  ;;  %v4596_v4 = vsel %vm4595_vm13, %v4489_v9, %v4594_v19  ;;  %v4583_v3 = vrot.slane %v4385_v27, %v15916_v12  ;;  %v11431_v9 = vld [vmem:[%s19595_s9 + $0x18] sm:$0x1] }
 0x502   : > { %v4598_v27 = vsel %vm4597_vm14, %v4498_v48, %v4596_v4  ;;  %v4403_v4 = vld [vmem:[%s19593_s7 + $0x60] sm:$0xff] }
 0x503   : > { %v4579_v16 = vsel %vm4452_vm9, %v4578_v34, %v4574_v43  ;;  %v4394_v34 = vld [vmem:[%s19593_s7 + $0x18] sm:$0xff]  ;;  %v4400_v43 = vld [vmem:[%s19593_s7 + $0x48] sm:$0xff] }
 0x504   : > { %v4354_v0 = vpop.xlane.xlu0 %4353  ;;  %v4313_v26 = vpop.xlane.xlu1 %4312 }
 0x505   : > { %v4551_v25 = vrot.slane %v4354_v0, %v15919_v23  ;;  %v4511_v30 = vrot.slane %v4313_v26, %v15916_v12  ;;  %v4507_v0 = vsel %vm4452_vm9, %v4506_v7, %v4502_v1  ;;  %v4408_v7 = vld [vmem:[%s19593_s7 + $0x88] sm:$0xff]  ;;  %v11463_v26 = vld [vmem:[%s19595_s9 + $0x70] sm:$0xff] }
 0x506   : > { %v4600_v63 = vsel %vm4599_vm15, %v4507_v0, %v4598_v27  ;;  %v4822_v1 = vld [vmem:[%s19595_s9 + $0x8] sm:$0x1] }
 0x507   : > { %v4552_v54 = vsel %vm4452_vm9, %v4551_v25, %v4547_v52  ;;  %v4392_v25 = vld [vmem:[%s19593_s7 + $0x8] sm:$0xff] }
 0x508   : > { %v4605_v40 = vsel %vm4593_vm12, %v4552_v54, %v4604_v47  ;;  %v4390_v24 = vpop.xlane.xlu0 %4389  ;;  %v4397_v47 = vld [vmem:[%s19593_s7 + $0x30] sm:$0xff]  ;;  %v4398_v54 = vld [vmem:[%s19593_s7 + $0x38] sm:$0xff]  ;;  %v11439_v27 = vld [vmem:[%s19595_s9 + $0x28] sm:$0x1] }
 0x509   : > { %v4587_v45 = vrot.slane %v4390_v24, %v15919_v23  ;;  %v4606_v60 = vsel %vm4595_vm13, %v4561_v18, %v4605_v40  ;;  %v4399_v18 = vld [vmem:[%s19593_s7 + $0x40] sm:$0xff]  ;;  %v4401_v40 = vld [vmem:[%s19593_s7 + $0x50] sm:$0xff]  ;;  %v4402_v24 = vld [vmem:[%s19593_s7 + $0x58] sm:$0xff] }
 0x50a   : > { %v4607_v21 = vsel %vm4597_vm14, %v4570_v35, %v4606_v60  ;;  %v4404_v35 = vld [vmem:[%s19593_s7 + $0x68] sm:$0xff]  ;;  %v4407_v60 = vld [vmem:[%s19593_s7 + $0x80] sm:$0xff] }
 0x50b   : > { %v4588_v58 = vsel %vm4452_vm9, %v4587_v45, %v4583_v3  ;;  %v4608_v14 = vsel %vm4599_vm15, %v4579_v16, %v4607_v21  ;;  %v4405_v3 = vld [vmem:[%s19593_s7 + $0x70] sm:$0xff]  ;;  %v4406_v45 = vld [vmem:[%s19593_s7 + $0x78] sm:$0xff] }
 0x50c   : > { %v4318_v57 = vpop.xlane.xlu0 %4317  ;;  %v4609_v11 = vsel %vm19643_vm0, %v4588_v58, %v4608_v14  ;;  %v11464_v16 = vld [vmem:[%s19595_s9 + $0x78] sm:$0x1] }
 0x50d   : > { %v4515_v56 = vrot.slane %v4318_v57, %v15919_v23  ;;  %11717 = vmatprep.subr.mxu1 %v4609_v11  ;;  %11797 = vmatprep.subr.msk.mxu0 %vm4249_vm4, %v11464_v16  ;;  %v4821_v57 = vld [vmem:[%s19595_s9] sm:$0xff] }
 0x50e   : > { %11718 = vmatpush3.msra.mxu1 %v4609_v11  ;;  %11798 = vmatpush3.msk.msra.mxu0 %vm4249_vm4, %v11464_v16  ;;  %v5640_v16 = vld [vmem:[%s19596_s10 + $0x40] sm:$0x1] }
 0x50f   : > { %v4516_v19 = vsel %vm4452_vm9, %v4515_v56, %v4511_v30  ;;  %11799 = vmatprep.subr.mxu0 %v11463_v26  ;;  %v11438_v56 = vld [vmem:[%s19595_s9 + $0x20] sm:$0xff] }
 0x510   : > { %v4602_v52 = vsel %vm19643_vm0, %v4516_v19, %v4600_v63  ;;  %11800 = vmatpush3.msra.mxu0 %v11463_v26  ;;  %vm4826_vm0 = vcmask 72704   ;;  %v11444_v19 = vld [vmem:[%s19595_s9 + $0x38] sm:$0x1]  ;;  %v5642_v26 = vld [vmem:[%s19596_s10 + $0x50] sm:$0x1] }
 0x511   : > { %11719 = vmatprep.subr.mxu1 %v4602_v52 }
 0x512   : > { %11720 = vmatpush3.msra.mxu1 %v4602_v52  ;;  %v11443_v52 = vld [vmem:[%s19595_s9 + $0x30] sm:$0xff] }
 0x513   : > { %11722 = vmatmul.mubr.msk.f32.vlgmr.msra.gmra.mxu1 %vm1356_vm1, %v4392_v25  ;;  %11748 = vmatprep.subr.msk.mxu1 %vm4249_vm4, %v11431_v9 }
 0x514   : > { %11724 = vmatprep.mubr.msk.f32.mxu1 %vm1356_vm1, %v4393_v2  ;;  %11749 = vmatpush3.msk.msra.mxu1 %vm4249_vm4, %v11431_v9  ;;  %v11449_v9 = vld [vmem:[%s19595_s9 + $0x48] sm:$0x1] }
 0x515   : > { %11750 = vmatprep.subr.mxu1 %v11430_v17 }
 0x516   : > { %11751 = vmatpush3.msra.mxu1 %v11430_v17  ;;  %v11448_v17 = vld [vmem:[%s19595_s9 + $0x40] sm:$0xff] }
 0x517   : > { %11725 = vmatmul.mubr.msk.f32.gmra.mxu1 %vm1356_vm1, %v4394_v34  ;;  %11755 = vmatprep.subr.msk.mxu1 %vm4249_vm4, %v4822_v1 }
 0x518   : > { %11727 = vmatprep.mubr.msk.f32.mxu1 %vm1356_vm1, %v4395_v55  ;;  %v11454_v55 = vld [vmem:[%s19595_s9 + $0x58] sm:$0x1] }
 0x51b   : > { %11728 = vmatmul.mubr.msk.f32.gmra.mxu1 %vm1356_vm1, %v4396_v53 }
 0x51c   : > { %11730 = vmatprep.mubr.msk.f32.mxu1 %vm1356_vm1, %v4397_v47  ;;  %v11453_v47 = vld [vmem:[%s19595_s9 + $0x50] sm:$0xff] }
 0x51f   : > { %11731 = vmatmul.mubr.msk.f32.gmra.mxu1 %vm1356_vm1, %v4398_v54 }
 0x520   : > { %11733 = vmatprep.mubr.msk.f32.mxu1 %vm1356_vm1, %v4399_v18  ;;  %v11459_v18 = vld [vmem:[%s19595_s9 + $0x68] sm:$0x1] }
 0x523   : > { %11734 = vmatmul.mubr.msk.f32.gmra.mxu1 %vm1356_vm1, %v4400_v43 }
 0x524   : > { %11736 = vmatprep.mubr.msk.f32.mxu1 %vm1356_vm1, %v4401_v40  ;;  %v11458_v40 = vld [vmem:[%s19595_s9 + $0x60] sm:$0xff] }
 0x527   : > { %11737 = vmatmul.mubr.msk.f32.gmra.mxu1 %vm1356_vm1, %v4402_v24 }
 0x528   : > { %11739 = vmatprep.mubr.msk.f32.mxu1 %vm1356_vm1, %v4403_v4 }
 0x52b   : > { %11740 = vmatmul.mubr.msk.f32.gmra.mxu1 %vm1356_vm1, %v4404_v35  ;;  %v11469_v35 = vld [vmem:[%s19595_s9 + $0x88] sm:$0x1] }
 0x52c   : > { %11742 = vmatprep.mubr.msk.f32.mxu1 %vm1356_vm1, %v4405_v3 }
 0x52f   : > { %11743 = vmatmul.mubr.msk.f32.gmra.mxu1 %vm1356_vm1, %v4406_v45  ;;  %v11468_v45 = vld [vmem:[%s19595_s9 + $0x80] sm:$0xff] }
 0x530   : > { %11745 = vmatprep.mubr.msk.f32.mxu1 %vm1356_vm1, %v4407_v60 }
 0x533   : > { %11746 = vmatmul.mubr.msk.f32.gmra.mxu1 %vm1356_vm1, %v4408_v7  ;;  %v5641_v7 = vld [vmem:[%s19596_s10 + $0x48] sm:$0x1] }
 0x534   : > { %11473 = vmatprep.subr.msk.mxu0 %vm4249_vm4, %v5641_v7 }
 0x5d3   : > { %v11723_v21 = vpop.f32.mrf.mxu1 }
 0x5d5   : > { %v4732_v48 = vpop.f32.mrf.mxu1 }
 0x5d7   : > { %v11726_v58 = vpop.f32.mrf.mxu1 }
 0x5d9   : > { %v4742_v14 = vpop.f32.mrf.mxu1 }
 0x5da   : > { %11752 = vmatprep.mubr.msk.f32.mxu1 %vm4826_vm0, %v4742_v14  ;;  %v5634_v14 = vld [vmem:[%s19596_s10 + $0x10] sm:$0xff] }
 0x5db   : > { %v11729_v11 = vpop.f32.mrf.mxu1  ;;  %11753 = vmatmul.mubr.msk.f32.vlgmr.msra.gmra.mxu1 %vm4826_vm0, %v11726_v58  ;;  %v5632_v58 = vld [vmem:[%s19596_s10] sm:$0xff] }
 0x5dc   : > { %11756 = vmatpush3.msk.msra.mxu1 %vm4249_vm4, %v4822_v1  ;;  %11759 = vmatprep.mubr.msk.f32.mxu1 %vm4826_vm0, %v4732_v48  ;;  %v5643_v1 = vld [vmem:[%s19596_s10 + $0x58] sm:$0x1] }
 0x5dd   : > { %v4752_v30 = vpop.f32.mrf.mxu1  ;;  %11757 = vmatprep.subr.mxu1 %v4821_v57  ;;  %v5635_v48 = vld [vmem:[%s19596_s10 + $0x18] sm:$0xff] }
 0x5de   : > { %11758 = vmatpush3.msra.mxu1 %v4821_v57  ;;  %v5645_v57 = vld [vmem:[%s19596_s10 + $0x68] sm:$0x1] }
 0x5df   : > { %v11732_v0 = vpop.f32.mrf.mxu1  ;;  %11760 = vmatmul.mubr.msk.f32.vlgmr.msra.gmra.mxu1 %vm4826_vm0, %v11723_v21  ;;  %11762 = vmatprep.subr.msk.mxu1 %vm4249_vm4, %v11439_v27  ;;  %v5633_v21 = vld [vmem:[%s19596_s10 + $0x8] sm:$0xff] }
 0x5e0   : > { %11763 = vmatpush3.msk.msra.mxu1 %vm4249_vm4, %v11439_v27  ;;  %11766 = vmatprep.mubr.msk.f32.mxu1 %vm4826_vm0, %v4752_v30 }
 0x5e1   : > { %v4762_v63 = vpop.f32.mrf.mxu1  ;;  %11764 = vmatprep.subr.mxu1 %v11438_v56 }
 0x5e2   : > { %11765 = vmatpush3.msra.mxu1 %v11438_v56 }
 0x5e3   : > { %v11735_v25 = vpop.f32.mrf.mxu1  ;;  %11767 = vmatmul.mubr.msk.f32.vlgmr.msra.gmra.mxu1 %vm4826_vm0, %v11729_v11  ;;  %11769 = vmatprep.subr.msk.mxu1 %vm4249_vm4, %v11444_v19  ;;  %v5647_v11 = vld [vmem:[%s19596_s10 + $0x78] sm:$0x1] }
 0x5e4   : > { %11770 = vmatpush3.msk.msra.mxu1 %vm4249_vm4, %v11444_v19  ;;  %11773 = vmatprep.mubr.msk.f32.mxu1 %vm4826_vm0, %v4762_v63 }
 0x5e5   : > { %v4772_v2 = vpop.f32.mrf.mxu1  ;;  %11771 = vmatprep.subr.mxu1 %v11443_v52 }
 0x5e6   : > { %11772 = vmatpush3.msra.mxu1 %v11443_v52 }
 0x5e7   : > { %v11738_v34 = vpop.f32.mrf.mxu1  ;;  %11774 = vmatmul.mubr.msk.f32.vlgmr.msra.gmra.mxu1 %vm4826_vm0, %v11732_v0  ;;  %11776 = vmatprep.subr.msk.mxu1 %vm4249_vm4, %v11449_v9 }
 0x5e8   : > { %11777 = vmatpush3.msk.msra.mxu1 %vm4249_vm4, %v11449_v9  ;;  %11780 = vmatprep.mubr.msk.f32.mxu1 %vm4826_vm0, %v4772_v2 }
 0x5e9   : > { %v4782_v53 = vpop.f32.mrf.mxu1  ;;  %11778 = vmatprep.subr.mxu1 %v11448_v17 }
 0x5ea   : > { %11779 = vmatpush3.msra.mxu1 %v11448_v17 }
 0x5eb   : > { %v11741_v54 = vpop.f32.mrf.mxu1  ;;  %11781 = vmatmul.mubr.msk.f32.vlgmr.msra.gmra.mxu1 %vm4826_vm0, %v11735_v25  ;;  %11783 = vmatprep.subr.msk.mxu1 %vm4249_vm4, %v11454_v55 }
 0x5ec   : > { %11784 = vmatpush3.msk.msra.mxu1 %vm4249_vm4, %v11454_v55  ;;  %11787 = vmatprep.mubr.msk.f32.mxu1 %vm4826_vm0, %v4782_v53 }
 0x5ed   : > { %v4792_v43 = vpop.f32.mrf.mxu1  ;;  %11785 = vmatprep.subr.mxu1 %v11453_v47 }
 0x5ee   : > { %11786 = vmatpush3.msra.mxu1 %v11453_v47 }
 0x5ef   : > { %v11744_v24 = vpop.f32.mrf.mxu1  ;;  %11788 = vmatmul.mubr.msk.f32.vlgmr.msra.gmra.mxu1 %vm4826_vm0, %v11738_v34  ;;  %11790 = vmatprep.subr.msk.mxu1 %vm4249_vm4, %v11459_v18 }
 0x5f0   : > { %11791 = vmatpush3.msk.msra.mxu1 %vm4249_vm4, %v11459_v18  ;;  %11794 = vmatprep.mubr.msk.f32.mxu1 %vm4826_vm0, %v4792_v43 }
 0x5f1   : > { %v4802_v4 = vpop.f32.mrf.mxu1  ;;  %11792 = vmatprep.subr.mxu1 %v11458_v40 }
 0x5f2   : > { %11793 = vmatpush3.msra.mxu1 %v11458_v40  ;;  %11801 = vmatprep.mubr.msk.f32.mxu0 %vm4826_vm0, %v4802_v4 }
 0x5f3   : > { %v11747_v3 = vpop.f32.mrf.mxu1  ;;  %11795 = vmatmul.mubr.msk.f32.vlgmr.msra.gmra.mxu1 %vm4826_vm0, %v11741_v54  ;;  %11802 = vmatmul.mubr.msk.f32.vlgmr.msra.gmra.mxu0 %vm4826_vm0, %v11744_v24 }
 0x5f4   : > { %11804 = vmatprep.subr.msk.mxu1 %vm4249_vm4, %v11469_v35  ;;  %5742 = vmatprep.mubr.f32.mxu0 %v19681_v8 }
 0x5f5   : > { %11805 = vmatpush3.msk.msra.mxu1 %vm4249_vm4, %v11469_v35  ;;  %v4812_v60 = vpop.f32.mrf.mxu1  ;;  %11474 = vmatpush1.msk.msra.mxu0 %vm4249_vm4, %v5640_v16 }
 0x5f6   : > { %11806 = vmatprep.subr.mxu1 %v11468_v45  ;;  %11808 = vmatprep.mubr.msk.f32.mxu1 %vm4826_vm0, %v4812_v60 }
 0x5f7   : > { %11807 = vmatpush3.msra.mxu1 %v11468_v45  ;;  %5708 = vmatprep.subr.mxu0 %v5633_v21 }
 0x5f8   : > { %11809 = vmatmul.mubr.msk.f32.vlgmr.msra.gmra.mxu1 %vm4826_vm0, %v11747_v3  ;;  %11477 = vmatprep.subr.msk.mxu1 %vm4249_vm4, %v5643_v1 }
 0x5f9   : > { %5819 = vmatprep.mubr.f32.mxu1 %v19681_v8  ;;  %11478 = vmatpush1.msk.msra.mxu1 %vm4249_vm4, %v5642_v26 }
 0x5fa   : > { %5785 = vmatprep.subr.mxu1 %v5635_v48  ;;  %5709 = vmatpush1.msra.mxu0 %v5632_v58 }
 0x5fb   : > { %5786 = vmatpush1.msra.mxu1 %v5634_v14  ;;  %11481 = vmatprep.subr.msk.mxu0 %vm4249_vm4, %v5645_v57  ;;  %v16513_v57 = vpop.permute.xlu1 %5622 }
 0x5fc   : > { %11485 = vmatprep.subr.msk.mxu1 %vm4249_vm4, %v5647_v11 }
 0x69b   : > { %v11754_v27 = vpop.f32.mrf.mxu1 }
 0x69d   : > { %v4902_v30 = vpop.f32.mrf.mxu1 }
 0x69f   : > { %v11761_v56 = vpop.f32.mrf.mxu1 }
 0x6a0   : > { %v4992_v9 = vadd.f32 %v11761_v56, %v11754_v27  ;;  %v5646_v56 = vld [vmem:[%s19596_s10 + $0x70] sm:$0x1] }
 0x6a1   : > { %v4986_v0 = vpop.f32.mrf.mxu1 }
 0x6a2   : > { %v4987_v17 = vadd.f32 %v4986_v0, %v4902_v30  ;;  %v5644_v30 = vld [vmem:[%s19596_s10 + $0x60] sm:$0x1]  ;;  %v5637_v0 = vld [vmem:[%s19596_s10 + $0x28] sm:$0xff] }
 0x6a3   : > { %v11768_v19 = vpop.f32.mrf.mxu1 }
 0x6a4   : > { %v5083_v34 = vadd.f32 %v11768_v19, %v4992_v9  ;;  %v5639_v19 = vld [vmem:[%s19596_s10 + $0x38] sm:$0xff]  ;;  %v5638_v9 = vld [vmem:[%s19596_s10 + $0x30] sm:$0xff] }
 0x6a5   : > { %v5073_v63 = vpop.f32.mrf.mxu1 }
 0x6a6   : > { %v5082_v53 = vadd.f32 %v5073_v63, %v4987_v17  ;;  %v16530_v63 = vpop.permute.xlu0 %5627  ;;  %v12197_v17 = vld [vmem:[%s19591_s5 + $0xf8] sm:$0xff] }
 0x6a7   : > { %v11775_v52 = vpop.f32.mrf.mxu1 }
 0x6a8   : > { %v5172_v47 = vadd.f32 %v11775_v52, %v5083_v34  ;;  %v12198_v34 = vld [vmem:[%s19591_s5 + $0x2f0] sm:$0xff] }
 0x6a9   : > { %v5162_v25 = vpop.f32.mrf.mxu1 }
 0x6aa   : > { %v5171_v18 = vadd.f32 %v5162_v25, %v5082_v53  ;;  %v5636_v25 = vld [vmem:[%s19596_s10 + $0x20] sm:$0xff]  ;;  %v12200_v53 = vld [vmem:[%s19591_s5 + $0x2e8] sm:$0xff] }
 0x6ab   : > { %v11782_v2 = vpop.f32.mrf.mxu1 }
 0x6ac   : > { %v5261_v43 = vadd.f32 %v11782_v2, %v5172_v47  ;;  %v12196_v2 = vld [vmem:[%s19591_s5 + $0x2f8] sm:$0xff]  ;;  %v12201_v47 = vld [vmem:[%s19591_s5 + $0xe8] sm:$0xff] }
 0x6ad   : > { %v5251_v55 = vpop.f32.mrf.mxu1 }
 0x6ae   : > { %v5260_v24 = vadd.f32 %v5251_v55, %v5171_v18  ;;  %v12199_v55 = vld [vmem:[%s19591_s5 + $0xf0] sm:$0xff]  ;;  %v12203_v18 = vld [vmem:[%s19591_s5 + $0xe0] sm:$0xff] }
 0x6af   : > { %v11789_v54 = vpop.f32.mrf.mxu1 }
 0x6b0   : > { %v5350_v4 = vadd.f32 %v11789_v54, %v5261_v43  ;;  %v12202_v54 = vld [vmem:[%s19591_s5 + $0x2e0] sm:$0xff]  ;;  %v12204_v43 = vld [vmem:[%s19591_s5 + $0x2d8] sm:$0xff] }
 0x6b1   : > { %v5340_v40 = vpop.f32.mrf.mxu1 }
 0x6b2   : > { %v5349_v45 = vadd.f32 %v5340_v40, %v5260_v24  ;;  %v12205_v40 = vld [vmem:[%s19591_s5 + $0xd8] sm:$0xff]  ;;  %v12206_v24 = vld [vmem:[%s19591_s5 + $0x2d0] sm:$0xff] }
 0x6b3   : > { %v11796_v35 = vpop.f32.mrf.mxu1  ;;  %v11803_v3 = vpop.f32.mrf.mxu0 }
 0x6b4   : > { %v5439_v60 = vadd.f32 %v11796_v35, %v5350_v4  ;;  %v12207_v4 = vld [vmem:[%s19591_s5 + $0xd0] sm:$0xff]  ;;  %v12208_v35 = vld [vmem:[%s19591_s5 + $0x2c8] sm:$0xff] }
 0x6b5   : > { %v5429_v7 = vpop.f32.mrf.mxu1  ;;  %v5518_v16 = vpop.f32.mrf.mxu0 }
 0x6b6   : > { %v5438_v1 = vadd.f32 %v5429_v7, %v5349_v45  ;;  %v5528_v48 = vadd.f32 %v11803_v3, %v5439_v60  ;;  %v12209_v3 = vld [vmem:[%s19591_s5 + $0xc8] sm:$0xff]  ;;  %v12210_v45 = vld [vmem:[%s19591_s5 + $0x2c0] sm:$0xff]  ;;  %v12213_v7 = vld [vmem:[%s19591_s5 + $0xb8] sm:$0xff] }
 0x6b7   : > { %v12211_v60 = vld [vmem:[%s19591_s5 + $0xc0] sm:$0xff] }
 0x6b8   : > { %v5527_v26 = vadd.f32 %v5518_v16, %v5438_v1  ;;  %v11810_v21 = vpop.f32.mrf.mxu1  ;;  %v12215_v1 = vld [vmem:[%s19591_s5 + $0xb0] sm:$0xff]  ;;  %v12216_v16 = vld [vmem:[%s19591_s5 + $0x2a8] sm:$0xff] }
 0x6b9   : > { %v5617_v11 = vadd.f32 %v11810_v21, %v5528_v48  ;;  %v12218_v21 = vld [vmem:[%s19591_s5 + $0x2a0] sm:$0xff] }
 0x6ba   : > { %v5607_v58 = vpop.f32.mrf.mxu1  ;;  %v12219_v48 = vld [vmem:[%s19591_s5 + $0xa0] sm:$0xff] }
 0x6bb   : > { %v5616_v14 = vadd.f32 %v5607_v58, %v5527_v26  ;;  %v5631_v52 = vadd.f32 %v16530_v63, %v5617_v11  ;;  %v12217_v26 = vld [vmem:[%s19591_s5 + $0xa8] sm:$0xff]  ;;  %v12220_v58 = vld [vmem:[%s19591_s5 + $0x298] sm:$0xff]  ;;  %v12222_v11 = vld [vmem:[%s19591_s5 + $0x290] sm:$0xff] }
 0x6bd   : > { %v5630_v27 = vadd.f32 %v16513_v57, %v5616_v14  ;;  %v12221_v14 = vld [vmem:[%s19591_s5 + $0x98] sm:$0xff] }
 0x6bf   : > { %11475 = vmatmul.mubr.msk.f32.vlgmr.msra.gmra.mxu0 %vm4826_vm0, %v5630_v27  ;;  %11479 = vmatmul.mubr.msk.f32.vlgmr.msra.gmra.mxu1 %vm4826_vm0, %v5630_v27 }
 0x6c0   : > { %5748 = vmatprep.mubr.f32.mxu0 %v19681_v8  ;;  %5825 = vmatprep.mubr.f32.mxu1 %v19681_v8 }
 0x6c1   : > { %11482 = vmatpush1.msk.msra.mxu0 %vm4249_vm4, %v5644_v30  ;;  %11486 = vmatpush1.msk.msra.mxu1 %vm4249_vm4, %v5646_v56  ;;  %v12224_v30 = vld [vmem:[%s19591_s5 + $0x288] sm:$0xff] }
 0x6c2   : > { %5862 = vmatprep.subr.mxu0 %v5637_v0  ;;  %5939 = vmatprep.subr.mxu1 %v5639_v19  ;;  %v12225_v56 = vld [vmem:[%s19591_s5 + $0x88] sm:$0xff]  ;;  %v12226_v0 = vld [vmem:[%s19591_s5 + $0x280] sm:$0xff] }
 0x6c3   : > { %11476 = vmatmul.mubr.msk.f32.gmra.mxu0 %vm4826_vm0, %v5631_v52  ;;  %11480 = vmatmul.mubr.msk.f32.gmra.mxu1 %vm4826_vm0, %v5631_v52  ;;  %v12227_v19 = vld [vmem:[%s19591_s5 + $0x80] sm:$0xff] }
 0x6c4   : > { %5863 = vmatpush1.msra.mxu0 %v5636_v25  ;;  %5940 = vmatpush1.msra.mxu1 %v5638_v9  ;;  %v12229_v25 = vld [vmem:[%s19591_s5 + $0x78] sm:$0xff]  ;;  %v12230_v9 = vld [vmem:[%s19591_s5 + $0x270] sm:$0xff] }
 0x6c5   : > { %5896 = vmatprep.mubr.f32.mxu0 %v19681_v8  ;;  %5973 = vmatprep.mubr.f32.mxu1 %v19681_v8 }
 0x6c6   : > { %5986 = vmatprep.subr.mxu0 %v12196_v2  ;;  %6063 = vmatprep.subr.mxu1 %v12197_v17  ;;  %v12231_v2 = vld [vmem:[%s19591_s5 + $0x70] sm:$0xff]  ;;  %v12232_v17 = vld [vmem:[%s19591_s5 + $0x268] sm:$0xff] }
 0x6c7   : > { %11483 = vmatmul.mubr.msk.f32.vlgmr.msra.gmra.mxu0 %vm4826_vm0, %v5630_v27  ;;  %11487 = vmatmul.mubr.msk.f32.vlgmr.msra.gmra.mxu1 %vm4826_vm0, %v5630_v27  ;;  %v12223_v27 = vld [vmem:[%s19591_s5 + $0x90] sm:$0xff] }
 0x6c8   : > { %5987 = vmatpush1.msra.mxu0 %v12198_v34  ;;  %6064 = vmatpush1.msra.mxu1 %v12199_v55  ;;  %v12233_v34 = vld [vmem:[%s19591_s5 + $0x68] sm:$0xff]  ;;  %v12234_v55 = vld [vmem:[%s19591_s5 + $0x260] sm:$0xff] }
 0x6c9   : > { %5988 = vmatprep.subr.mxu0 %v12200_v53  ;;  %6065 = vmatprep.subr.mxu1 %v12201_v47  ;;  %v12235_v53 = vld [vmem:[%s19591_s5 + $0x60] sm:$0xff]  ;;  %v12236_v47 = vld [vmem:[%s19591_s5 + $0x258] sm:$0xff] }
 0x6ca   : > { %5989 = vmatpush1.msra.mxu0 %v12202_v54  ;;  %6066 = vmatpush1.msra.mxu1 %v12203_v18  ;;  %v12237_v54 = vld [vmem:[%s19591_s5 + $0x58] sm:$0xff]  ;;  %v12238_v18 = vld [vmem:[%s19591_s5 + $0x250] sm:$0xff] }
 0x6cb   : > { %5902 = vmatprep.mubr.f32.mxu0 %v19681_v8  ;;  %5979 = vmatprep.mubr.f32.mxu1 %v19681_v8 }
 0x6cc   : > { %5990 = vmatprep.subr.mxu0 %v12204_v43  ;;  %6067 = vmatprep.subr.mxu1 %v12205_v40  ;;  %v12239_v43 = vld [vmem:[%s19591_s5 + $0x50] sm:$0xff]  ;;  %v12240_v40 = vld [vmem:[%s19591_s5 + $0x248] sm:$0xff] }
 0x6cd   : > { %11484 = vmatmul.mubr.msk.f32.gmra.mxu0 %vm4826_vm0, %v5631_v52  ;;  %11488 = vmatmul.mubr.msk.f32.gmra.mxu1 %vm4826_vm0, %v5631_v52  ;;  %v12228_v52 = vld [vmem:[%s19591_s5 + $0x278] sm:$0xff] }
 0x6ce   : > { %5991 = vmatpush1.msra.mxu0 %v12206_v24  ;;  %6068 = vmatpush1.msra.mxu1 %v12207_v4  ;;  %v12241_v24 = vld [vmem:[%s19591_s5 + $0x48] sm:$0xff]  ;;  %v12242_v4 = vld [vmem:[%s19591_s5 + $0x240] sm:$0xff] }
 0x6cf   : > { %5992 = vmatprep.subr.mxu0 %v12208_v35  ;;  %6050 = vmatprep.mubr.f32.mxu0 %v14661_v51  ;;  %v12212_v51 = vld [vmem:[%s19591_s5 + $0x2b8] sm:$0xff]  ;;  %v12243_v35 = vld [vmem:[%s19591_s5 + $0x40] sm:$0xff] }
 0x6d0   : > { %6069 = vmatprep.subr.mxu1 %v12209_v3  ;;  %6127 = vmatprep.mubr.f32.mxu1 %v14599_v5  ;;  %v12214_v5 = vld [vmem:[%s19591_s5 + $0x2b0] sm:$0xff]  ;;  %v12244_v3 = vld [vmem:[%s19591_s5 + $0x238] sm:$0xff] }
 0x6d1   : > { %5993 = vmatpush1.msra.mxu0 %v12210_v45  ;;  %6070 = vmatpush1.msra.mxu1 %v12211_v60  ;;  %v12245_v45 = vld [vmem:[%s19591_s5 + $0x38] sm:$0xff]  ;;  %v12246_v60 = vld [vmem:[%s19591_s5 + $0x230] sm:$0xff] }
 0x6d2   : > { %5994 = vmatprep.subr.mxu0 %v12212_v51  ;;  %6071 = vmatprep.subr.mxu1 %v12213_v7  ;;  %v12247_v51 = vld [vmem:[%s19591_s5 + $0x30] sm:$0xff]  ;;  %v12248_v7 = vld [vmem:[%s19591_s5 + $0x228] sm:$0xff] }
 0x6d3   : > { %5995 = vmatpush1.msra.mxu0 %v12214_v5  ;;  %6072 = vmatpush1.msra.mxu1 %v12215_v1  ;;  %v12249_v5 = vld [vmem:[%s19591_s5 + $0x28] sm:$0xff]  ;;  %v12250_v1 = vld [vmem:[%s19591_s5 + $0x220] sm:$0xff] }
 0x6d4   : > { %5996 = vmatprep.subr.mxu0 %v12216_v16  ;;  %6073 = vmatprep.subr.mxu1 %v12217_v26  ;;  %v12251_v16 = vld [vmem:[%s19591_s5 + $0x20] sm:$0xff]  ;;  %v12252_v26 = vld [vmem:[%s19591_s5 + $0x218] sm:$0xff] }
 0x6d5   : > { %5997 = vmatpush1.msra.mxu0 %v12218_v21  ;;  %6074 = vmatpush1.msra.mxu1 %v12219_v48  ;;  %v12253_v21 = vld [vmem:[%s19591_s5 + $0x18] sm:$0xff]  ;;  %v12254_v48 = vld [vmem:[%s19591_s5 + $0x210] sm:$0xff] }
 0x6d6   : > { %5998 = vmatprep.subr.mxu0 %v12220_v58  ;;  %6075 = vmatprep.subr.mxu1 %v12221_v14  ;;  %v12255_v58 = vld [vmem:[%s19591_s5 + $0x10] sm:$0xff]  ;;  %v12256_v14 = vld [vmem:[%s19591_s5 + $0x208] sm:$0xff] }
 0x6d7   : > { %5999 = vmatpush1.msra.mxu0 %v12222_v11  ;;  %6076 = vmatpush1.msra.mxu1 %v12223_v27  ;;  %v12257_v11 = vld [vmem:[%s19591_s5 + $0x8] sm:$0xff]  ;;  %v12258_v27 = vld [vmem:[%s19591_s5 + $0x200] sm:$0xff] }
 0x6d8   : > { %6000 = vmatprep.subr.mxu0 %v12224_v30  ;;  %6077 = vmatprep.subr.mxu1 %v12225_v56  ;;  %v12259_v30 = vld [vmem:[%s19591_s5] sm:$0xff]  ;;  %v12260_v56 = vld [vmem:[%s19591_s5 + $0x3f8] sm:$0xff] }
 0x6d9   : > { %6001 = vmatpush1.msra.mxu0 %v12226_v0  ;;  %6078 = vmatpush1.msra.mxu1 %v12227_v19  ;;  %v12261_v0 = vld [vmem:[%s19591_s5 + $0x1f8] sm:$0xff]  ;;  %v12262_v19 = vld [vmem:[%s19591_s5 + $0x3f0] sm:$0xff] }
 0x6da   : > { %6002 = vmatprep.subr.mxu0 %v12228_v52  ;;  %6079 = vmatprep.subr.mxu1 %v12229_v25  ;;  %v12263_v52 = vld [vmem:[%s19591_s5 + $0x1f0] sm:$0xff]  ;;  %v12264_v25 = vld [vmem:[%s19591_s5 + $0x3e8] sm:$0xff] }
 0x6db   : > { %6003 = vmatpush1.msra.mxu0 %v12230_v9  ;;  %6080 = vmatpush1.msra.mxu1 %v12231_v2  ;;  %v12265_v9 = vld [vmem:[%s19591_s5 + $0x1e8] sm:$0xff]  ;;  %v12266_v2 = vld [vmem:[%s19591_s5 + $0x3e0] sm:$0xff] }
 0x6dc   : > { %6004 = vmatprep.subr.mxu0 %v12232_v17  ;;  %6081 = vmatprep.subr.mxu1 %v12233_v34  ;;  %v12267_v17 = vld [vmem:[%s19591_s5 + $0x1e0] sm:$0xff]  ;;  %v12268_v34 = vld [vmem:[%s19591_s5 + $0x3d8] sm:$0xff] }
 0x6dd   : > { %6005 = vmatpush1.msra.mxu0 %v12234_v55  ;;  %6082 = vmatpush1.msra.mxu1 %v12235_v53  ;;  %v12269_v55 = vld [vmem:[%s19591_s5 + $0x1d8] sm:$0xff]  ;;  %v12270_v53 = vld [vmem:[%s19591_s5 + $0x3d0] sm:$0xff] }
 0x6de   : > { %6006 = vmatprep.subr.mxu0 %v12236_v47  ;;  %6083 = vmatprep.subr.mxu1 %v12237_v54  ;;  %v12271_v47 = vld [vmem:[%s19591_s5 + $0x1d0] sm:$0xff]  ;;  %v12272_v54 = vld [vmem:[%s19591_s5 + $0x3c8] sm:$0xff] }
 0x6df   : > { %6007 = vmatpush1.msra.mxu0 %v12238_v18  ;;  %6084 = vmatpush1.msra.mxu1 %v12239_v43  ;;  %v12273_v18 = vld [vmem:[%s19591_s5 + $0x1c8] sm:$0xff]  ;;  %v12274_v43 = vld [vmem:[%s19591_s5 + $0x3c0] sm:$0xff] }
 0x6e0   : > { %6008 = vmatprep.subr.mxu0 %v12240_v40  ;;  %6085 = vmatprep.subr.mxu1 %v12241_v24  ;;  %v12275_v40 = vld [vmem:[%s19591_s5 + $0x1c0] sm:$0xff]  ;;  %v12276_v24 = vld [vmem:[%s19591_s5 + $0x3b8] sm:$0xff] }
 0x6e1   : > { %6009 = vmatpush1.msra.mxu0 %v12242_v4  ;;  %6086 = vmatpush1.msra.mxu1 %v12243_v35  ;;  %v12277_v4 = vld [vmem:[%s19591_s5 + $0x1b8] sm:$0xff]  ;;  %v12278_v35 = vld [vmem:[%s19591_s5 + $0x3b0] sm:$0xff] }
 0x6e2   : > { %6010 = vmatprep.subr.mxu0 %v12244_v3  ;;  %6087 = vmatprep.subr.mxu1 %v12245_v45  ;;  %v12279_v3 = vld [vmem:[%s19591_s5 + $0x1b0] sm:$0xff]  ;;  %v12280_v45 = vld [vmem:[%s19591_s5 + $0x3a8] sm:$0xff] }
 0x6e3   : > { %6011 = vmatpush1.msra.mxu0 %v12246_v60  ;;  %6088 = vmatpush1.msra.mxu1 %v12247_v51  ;;  %v12281_v60 = vld [vmem:[%s19591_s5 + $0x1a8] sm:$0xff]  ;;  %v12282_v51 = vld [vmem:[%s19591_s5 + $0x3a0] sm:$0xff] }
 0x6e4   : > { %6012 = vmatprep.subr.mxu0 %v12248_v7  ;;  %6089 = vmatprep.subr.mxu1 %v12249_v5  ;;  %v12283_v7 = vld [vmem:[%s19591_s5 + $0x1a0] sm:$0xff]  ;;  %v12284_v5 = vld [vmem:[%s19591_s5 + $0x398] sm:$0xff] }
 0x6e5   : > { %6013 = vmatpush1.msra.mxu0 %v12250_v1  ;;  %6090 = vmatpush1.msra.mxu1 %v12251_v16  ;;  %v12285_v1 = vld [vmem:[%s19591_s5 + $0x198] sm:$0xff]  ;;  %v12286_v16 = vld [vmem:[%s19591_s5 + $0x390] sm:$0xff] }
 0x6e6   : > { %6014 = vmatprep.subr.mxu0 %v12252_v26  ;;  %6091 = vmatprep.subr.mxu1 %v12253_v21  ;;  %v12287_v26 = vld [vmem:[%s19591_s5 + $0x190] sm:$0xff]  ;;  %v12288_v21 = vld [vmem:[%s19591_s5 + $0x388] sm:$0xff] }
 0x6e7   : > { %6015 = vmatpush1.msra.mxu0 %v12254_v48  ;;  %6092 = vmatpush1.msra.mxu1 %v12255_v58  ;;  %v12289_v48 = vld [vmem:[%s19591_s5 + $0x188] sm:$0xff]  ;;  %v12290_v58 = vld [vmem:[%s19591_s5 + $0x380] sm:$0xff] }
 0x6e8   : > { %6016 = vmatprep.subr.mxu0 %v12256_v14  ;;  %6093 = vmatprep.subr.mxu1 %v12257_v11  ;;  %v12291_v14 = vld [vmem:[%s19591_s5 + $0x180] sm:$0xff]  ;;  %v12292_v11 = vld [vmem:[%s19591_s5 + $0x378] sm:$0xff] }
 0x6e9   : > { %6017 = vmatpush1.msra.mxu0 %v12258_v27  ;;  %6094 = vmatpush1.msra.mxu1 %v12259_v30  ;;  %v12293_v27 = vld [vmem:[%s19591_s5 + $0x178] sm:$0xff]  ;;  %v12294_v30 = vld [vmem:[%s19591_s5 + $0x370] sm:$0xff] }
 0x6ea   : > { %6018 = vmatprep.subr.mxu0 %v12260_v56  ;;  %6095 = vmatprep.subr.mxu1 %v12261_v0  ;;  %v12295_v56 = vld [vmem:[%s19591_s5 + $0x170] sm:$0xff]  ;;  %v12296_v0 = vld [vmem:[%s19591_s5 + $0x368] sm:$0xff] }
 0x6eb   : > { %6019 = vmatpush2.msra.mxu0 %v12262_v19  ;;  %6096 = vmatpush2.msra.mxu1 %v12263_v52  ;;  %v12297_v19 = vld [vmem:[%s19591_s5 + $0x168] sm:$0xff]  ;;  %v12298_v52 = vld [vmem:[%s19591_s5 + $0x360] sm:$0xff] }
 0x6ec   : > { %6020 = vmatprep.subr.mxu0 %v12264_v25  ;;  %6097 = vmatprep.subr.mxu1 %v12265_v9  ;;  %v12299_v25 = vld [vmem:[%s19591_s5 + $0x160] sm:$0xff]  ;;  %v12300_v9 = vld [vmem:[%s19591_s5 + $0x358] sm:$0xff] }
 0x6ed   : > { %6021 = vmatpush2.msra.mxu0 %v12266_v2  ;;  %6098 = vmatpush2.msra.mxu1 %v12267_v17  ;;  %v12301_v2 = vld [vmem:[%s19591_s5 + $0x158] sm:$0xff]  ;;  %v12302_v17 = vld [vmem:[%s19591_s5 + $0x350] sm:$0xff] }
 0x6ee   : > { %6022 = vmatprep.subr.mxu0 %v12268_v34  ;;  %6099 = vmatprep.subr.mxu1 %v12269_v55  ;;  %v12303_v34 = vld [vmem:[%s19591_s5 + $0x150] sm:$0xff]  ;;  %v12304_v55 = vld [vmem:[%s19591_s5 + $0x348] sm:$0xff] }
 0x6ef   : > { %6023 = vmatpush2.msra.mxu0 %v12270_v53  ;;  %6100 = vmatpush2.msra.mxu1 %v12271_v47  ;;  %v12305_v53 = vld [vmem:[%s19591_s5 + $0x148] sm:$0xff]  ;;  %v12306_v47 = vld [vmem:[%s19591_s5 + $0x340] sm:$0xff] }
 0x6f0   : > { %6024 = vmatprep.subr.mxu0 %v12272_v54  ;;  %6101 = vmatprep.subr.mxu1 %v12273_v18  ;;  %v12307_v54 = vld [vmem:[%s19591_s5 + $0x140] sm:$0xff]  ;;  %v12308_v18 = vld [vmem:[%s19591_s5 + $0x338] sm:$0xff] }
 0x6f1   : > { %6025 = vmatpush2.msra.mxu0 %v12274_v43  ;;  %6102 = vmatpush2.msra.mxu1 %v12275_v40  ;;  %v12309_v43 = vld [vmem:[%s19591_s5 + $0x138] sm:$0xff]  ;;  %v12310_v40 = vld [vmem:[%s19591_s5 + $0x330] sm:$0xff] }
 0x6f2   : > { %6026 = vmatprep.subr.mxu0 %v12276_v24  ;;  %6103 = vmatprep.subr.mxu1 %v12277_v4  ;;  %v12311_v24 = vld [vmem:[%s19591_s5 + $0x130] sm:$0xff]  ;;  %v12312_v4 = vld [vmem:[%s19591_s5 + $0x328] sm:$0xff] }
 0x6f3   : > { %6027 = vmatpush2.msra.mxu0 %v12278_v35  ;;  %6104 = vmatpush2.msra.mxu1 %v12279_v3  ;;  %v12313_v35 = vld [vmem:[%s19591_s5 + $0x128] sm:$0xff]  ;;  %v12314_v3 = vld [vmem:[%s19591_s5 + $0x320] sm:$0xff] }
 0x6f4   : > { %6028 = vmatprep.subr.mxu0 %v12280_v45  ;;  %6105 = vmatprep.subr.mxu1 %v12281_v60  ;;  %v12315_v45 = vld [vmem:[%s19591_s5 + $0x120] sm:$0xff]  ;;  %v12316_v60 = vld [vmem:[%s19591_s5 + $0x318] sm:$0xff] }
 0x6f5   : > { %6029 = vmatpush2.msra.mxu0 %v12282_v51  ;;  %6106 = vmatpush2.msra.mxu1 %v12283_v7  ;;  %v12317_v51 = vld [vmem:[%s19591_s5 + $0x118] sm:$0xff]  ;;  %v12318_v7 = vld [vmem:[%s19591_s5 + $0x310] sm:$0xff] }
 0x6f6   : > { %6030 = vmatprep.subr.mxu0 %v12284_v5  ;;  %6107 = vmatprep.subr.mxu1 %v12285_v1  ;;  %v12319_v5 = vld [vmem:[%s19591_s5 + $0x110] sm:$0xff]  ;;  %v12320_v1 = vld [vmem:[%s19591_s5 + $0x308] sm:$0xff] }
 0x6f7   : > { %6031 = vmatpush2.msra.mxu0 %v12286_v16  ;;  %6108 = vmatpush2.msra.mxu1 %v12287_v26  ;;  %v12321_v16 = vld [vmem:[%s19591_s5 + $0x108] sm:$0xff]  ;;  %v12322_v26 = vld [vmem:[%s19591_s5 + $0x300] sm:$0xff] }
 0x6f8   : > { %6032 = vmatprep.subr.mxu0 %v12288_v21  ;;  %6109 = vmatprep.subr.mxu1 %v12289_v48  ;;  %v12323_v21 = vld [vmem:[%s19591_s5 + $0x100] sm:$0xff]  ;;  %v12324_v48 = vld [vmem:[%s19591_s5 + $0x4f8] sm:$0xff] }
 0x6f9   : > { %6033 = vmatpush2.msra.mxu0 %v12290_v58  ;;  %6110 = vmatpush2.msra.mxu1 %v12291_v14  ;;  %v12325_v58 = vld [vmem:[%s19591_s5 + $0x6f8] sm:$0xff]  ;;  %v12328_v14 = vld [vmem:[%s19591_s5 + $0x4e8] sm:$0xff] }
 0x6fa   : > { %6034 = vmatprep.subr.mxu0 %v12292_v11  ;;  %6111 = vmatprep.subr.mxu1 %v12293_v27  ;;  %v12331_v11 = vld [vmem:[%s19591_s5 + $0x6e0] sm:$0xff]  ;;  %v12332_v27 = vld [vmem:[%s19591_s5 + $0x4d8] sm:$0xff] }
 0x6fb   : > { %6035 = vmatpush2.msra.mxu0 %v12294_v30  ;;  %6112 = vmatpush2.msra.mxu1 %v12295_v56  ;;  %v12333_v30 = vld [vmem:[%s19591_s5 + $0x6d8] sm:$0xff]  ;;  %v12334_v56 = vld [vmem:[%s19591_s5 + $0x4d0] sm:$0xff] }
 0x6fc   : > { %6036 = vmatprep.subr.mxu0 %v12296_v0  ;;  %6113 = vmatprep.subr.mxu1 %v12297_v19  ;;  %v12337_v0 = vld [vmem:[%s19591_s5 + $0x6c8] sm:$0xff]  ;;  %v12339_v19 = vld [vmem:[%s19591_s5 + $0x6c0] sm:$0xff] }
 0x6fd   : > { %6037 = vmatpush2.msra.mxu0 %v12298_v52  ;;  %6114 = vmatpush2.msra.mxu1 %v12299_v25  ;;  %v12341_v52 = vld [vmem:[%s19591_s5 + $0x6b8] sm:$0xff]  ;;  %v12342_v25 = vld [vmem:[%s19591_s5 + $0x4b0] sm:$0xff] }
 0x6fe   : > { %6038 = vmatprep.subr.mxu0 %v12300_v9  ;;  %6115 = vmatprep.subr.mxu1 %v12301_v2  ;;  %v12343_v9 = vld [vmem:[%s19591_s5 + $0x6b0] sm:$0xff]  ;;  %v12344_v2 = vld [vmem:[%s19591_s5 + $0x4a8] sm:$0xff] }
 0x6ff   : > { %6039 = vmatpush2.msra.mxu0 %v12302_v17  ;;  %6116 = vmatpush2.msra.mxu1 %v12303_v34  ;;  %v12345_v17 = vld [vmem:[%s19591_s5 + $0x6a8] sm:$0xff]  ;;  %v12346_v34 = vld [vmem:[%s19591_s5 + $0x4a0] sm:$0xff] }
 0x700   : > { %6040 = vmatprep.subr.mxu0 %v12304_v55  ;;  %6117 = vmatprep.subr.mxu1 %v12305_v53  ;;  %v12347_v55 = vld [vmem:[%s19591_s5 + $0x6a0] sm:$0xff]  ;;  %v12348_v53 = vld [vmem:[%s19591_s5 + $0x498] sm:$0xff] }
 0x701   : > { %6041 = vmatpush2.msra.mxu0 %v12306_v47  ;;  %6118 = vmatpush2.msra.mxu1 %v12307_v54  ;;  %v12349_v47 = vld [vmem:[%s19591_s5 + $0x698] sm:$0xff]  ;;  %v12350_v54 = vld [vmem:[%s19591_s5 + $0x490] sm:$0xff] }
 0x702   : > { %6042 = vmatprep.subr.mxu0 %v12308_v18  ;;  %6119 = vmatprep.subr.mxu1 %v12309_v43  ;;  %v12351_v18 = vld [vmem:[%s19591_s5 + $0x690] sm:$0xff]  ;;  %v12352_v43 = vld [vmem:[%s19591_s5 + $0x488] sm:$0xff] }
 0x703   : > { %6043 = vmatpush2.msra.mxu0 %v12310_v40  ;;  %6120 = vmatpush2.msra.mxu1 %v12311_v24  ;;  %v12353_v40 = vld [vmem:[%s19591_s5 + $0x688] sm:$0xff]  ;;  %v12354_v24 = vld [vmem:[%s19591_s5 + $0x480] sm:$0xff] }
 0x704   : > { %6044 = vmatprep.subr.mxu0 %v12312_v4  ;;  %6121 = vmatprep.subr.mxu1 %v12313_v35  ;;  %v12355_v4 = vld [vmem:[%s19591_s5 + $0x680] sm:$0xff]  ;;  %v12356_v35 = vld [vmem:[%s19591_s5 + $0x478] sm:$0xff] }
 0x705   : > { %6045 = vmatpush2.msra.mxu0 %v12314_v3  ;;  %6122 = vmatpush2.msra.mxu1 %v12315_v45  ;;  %v12357_v3 = vld [vmem:[%s19591_s5 + $0x678] sm:$0xff]  ;;  %v12358_v45 = vld [vmem:[%s19591_s5 + $0x470] sm:$0xff] }
 0x706   : > { %6046 = vmatprep.subr.mxu0 %v12316_v60  ;;  %6123 = vmatprep.subr.mxu1 %v12317_v51  ;;  %v12359_v60 = vld [vmem:[%s19591_s5 + $0x670] sm:$0xff]  ;;  %v12360_v51 = vld [vmem:[%s19591_s5 + $0x468] sm:$0xff] }
 0x707   : > { %6047 = vmatpush2.msra.mxu0 %v12318_v7  ;;  %6124 = vmatpush2.msra.mxu1 %v12319_v5  ;;  %v12361_v7 = vld [vmem:[%s19591_s5 + $0x668] sm:$0xff]  ;;  %v12362_v5 = vld [vmem:[%s19591_s5 + $0x460] sm:$0xff] }
 0x708   : > { %6048 = vmatprep.subr.mxu0 %v12320_v1  ;;  %6125 = vmatprep.subr.mxu1 %v12321_v16  ;;  %v12363_v1 = vld [vmem:[%s19591_s5 + $0x660] sm:$0xff]  ;;  %v12364_v16 = vld [vmem:[%s19591_s5 + $0x458] sm:$0xff] }
 0x709   : > { %6049 = vmatpush2.msra.mxu0 %v12322_v26  ;;  %6126 = vmatpush2.msra.mxu1 %v12323_v21  ;;  %v12365_v26 = vld [vmem:[%s19591_s5 + $0x658] sm:$0xff]  ;;  %v12366_v21 = vld [vmem:[%s19591_s5 + $0x450] sm:$0xff] }
 0x70a   : > { %6051 = vmatmul.mubr.f32.vlgmr.msra.gmra.mxu0 %v14647_v50  ;;  %6128 = vmatmul.mubr.f32.vlgmr.msra.gmra.mxu1 %v14585_v46  ;;  %v12326_v50 = vld [vmem:[%s19591_s5 + $0x4f0] sm:$0xff] }
 0x70b   : > { %6140 = vmatprep.subr.mxu0 %v12324_v48  ;;  %6221 = vmatprep.subr.mxu1 %v12325_v58  ;;  %v12327_v46 = vld [vmem:[%s19591_s5 + $0x6f0] sm:$0xff]  ;;  %v12368_v58 = vld [vmem:[%s19591_s5 + $0x448] sm:$0xff] }
 0x70c   : > { %6056 = vmatprep.mubr.f32.mxu0 %v14689_v31  ;;  %6133 = vmatprep.mubr.f32.mxu1 %v14633_v13  ;;  %v12329_v31 = vld [vmem:[%s19591_s5 + $0x6e8] sm:$0xff]  ;;  %v12330_v13 = vld [vmem:[%s19591_s5 + $0x4e0] sm:$0xff]  ;;  %v12367_v48 = vld [vmem:[%s19591_s5 + $0x650] sm:$0xff] }
 0x70d   : > { %6141 = vmatpush1.msra.mxu0 %v12326_v50  ;;  %6222 = vmatpush1.msra.mxu1 %v12327_v46  ;;  %v12369_v50 = vld [vmem:[%s19591_s5 + $0x648] sm:$0xff]  ;;  %v12370_v46 = vld [vmem:[%s19591_s5 + $0x440] sm:$0xff] }
 0x70e   : > { %6142 = vmatprep.subr.mxu0 %v12328_v14  ;;  %6223 = vmatprep.subr.mxu1 %v12329_v31  ;;  %v12371_v14 = vld [vmem:[%s19591_s5 + $0x640] sm:$0xff]  ;;  %v12372_v31 = vld [vmem:[%s19591_s5 + $0x438] sm:$0xff] }
 0x70f   : > { %6143 = vmatpush1.msra.mxu0 %v12330_v13  ;;  %6224 = vmatpush1.msra.mxu1 %v12331_v11  ;;  %v12373_v13 = vld [vmem:[%s19591_s5 + $0x638] sm:$0xff]  ;;  %v12374_v11 = vld [vmem:[%s19591_s5 + $0x430] sm:$0xff] }
 0x710   : > { %6057 = vmatmul.mubr.f32.gmra.mxu0 %v14675_v15  ;;  %6134 = vmatmul.mubr.f32.gmra.mxu1 %v14619_v44  ;;  %v12335_v44 = vld [vmem:[%s19591_s5 + $0x6d0] sm:$0xff]  ;;  %v12336_v15 = vld [vmem:[%s19591_s5 + $0x4c8] sm:$0xff] }
 0x711   : > { %6144 = vmatprep.subr.mxu0 %v12332_v27  ;;  %6225 = vmatprep.subr.mxu1 %v12333_v30  ;;  %v12375_v27 = vld [vmem:[%s19591_s5 + $0x630] sm:$0xff]  ;;  %v12376_v30 = vld [vmem:[%s19591_s5 + $0x428] sm:$0xff] }
 0x712   : > { %6145 = vmatpush1.msra.mxu0 %v12334_v56  ;;  %6204 = vmatprep.mubr.f32.mxu0 %v14717_v62  ;;  %v12338_v62 = vld [vmem:[%s19591_s5 + $0x4c0] sm:$0xff]  ;;  %v12377_v56 = vld [vmem:[%s19591_s5 + $0x628] sm:$0xff] }
 0x713   : > { %6226 = vmatpush1.msra.mxu1 %v12335_v44  ;;  %6285 = vmatprep.mubr.f32.mxu1 %v15237_v39  ;;  %v12340_v39 = vld [vmem:[%s19591_s5 + $0x4b8] sm:$0xff]  ;;  %v12378_v44 = vld [vmem:[%s19591_s5 + $0x420] sm:$0xff] }
 0x714   : > { %6146 = vmatprep.subr.mxu0 %v12336_v15  ;;  %6227 = vmatprep.subr.mxu1 %v12337_v0  ;;  %v12379_v15 = vld [vmem:[%s19591_s5 + $0x620] sm:$0xff]  ;;  %v12380_v0 = vld [vmem:[%s19591_s5 + $0x418] sm:$0xff] }
 0x715   : > { %6147 = vmatpush1.msra.mxu0 %v12338_v62  ;;  %6228 = vmatpush1.msra.mxu1 %v12339_v19  ;;  %v12381_v62 = vld [vmem:[%s19591_s5 + $0x618] sm:$0xff]  ;;  %v12382_v19 = vld [vmem:[%s19591_s5 + $0x410] sm:$0xff] }
 0x716   : > { %6148 = vmatprep.subr.mxu0 %v12340_v39  ;;  %6229 = vmatprep.subr.mxu1 %v12341_v52  ;;  %v12383_v39 = vld [vmem:[%s19591_s5 + $0x610] sm:$0xff]  ;;  %v12384_v52 = vld [vmem:[%s19591_s5 + $0x408] sm:$0xff] }
 0x717   : > { %6149 = vmatpush1.msra.mxu0 %v12342_v25  ;;  %6230 = vmatpush1.msra.mxu1 %v12343_v9  ;;  %v12385_v25 = vld [vmem:[%s19591_s5 + $0x608] sm:$0xff]  ;;  %v12386_v9 = vld [vmem:[%s19591_s5 + $0x400] sm:$0xff] }
 0x718   : > { %6150 = vmatprep.subr.mxu0 %v12344_v2  ;;  %6231 = vmatprep.subr.mxu1 %v12345_v17  ;;  %v12387_v2 = vld [vmem:[%s19591_s5 + $0x600] sm:$0xff]  ;;  %v12388_v17 = vld [vmem:[%s19591_s5 + $0x5f8] sm:$0xff] }
 0x719   : > { %6151 = vmatpush1.msra.mxu0 %v12346_v34  ;;  %6232 = vmatpush1.msra.mxu1 %v12347_v55  ;;  %v12389_v34 = vld [vmem:[%s19591_s5 + $0x7f8] sm:$0xff]  ;;  %v12390_v55 = vld [vmem:[%s19591_s5 + $0x5f0] sm:$0xff] }
 0x71a   : > { %6152 = vmatprep.subr.mxu0 %v12348_v53  ;;  %6233 = vmatprep.subr.mxu1 %v12349_v47  ;;  %v12391_v53 = vld [vmem:[%s19591_s5 + $0x7f0] sm:$0xff]  ;;  %v12392_v47 = vld [vmem:[%s19591_s5 + $0x5e8] sm:$0xff] }
 0x71b   : > { %6153 = vmatpush1.msra.mxu0 %v12350_v54  ;;  %6234 = vmatpush1.msra.mxu1 %v12351_v18  ;;  %v12393_v54 = vld [vmem:[%s19591_s5 + $0x7e8] sm:$0xff]  ;;  %v12394_v18 = vld [vmem:[%s19591_s5 + $0x5e0] sm:$0xff] }
 0x71c   : > { %6154 = vmatprep.subr.mxu0 %v12352_v43  ;;  %6235 = vmatprep.subr.mxu1 %v12353_v40  ;;  %v12395_v43 = vld [vmem:[%s19591_s5 + $0x7e0] sm:$0xff]  ;;  %v12396_v40 = vld [vmem:[%s19591_s5 + $0x5d8] sm:$0xff] }
 0x71d   : > { %6155 = vmatpush1.msra.mxu0 %v12354_v24  ;;  %6236 = vmatpush1.msra.mxu1 %v12355_v4  ;;  %v12397_v24 = vld [vmem:[%s19591_s5 + $0x7d8] sm:$0xff]  ;;  %v12398_v4 = vld [vmem:[%s19591_s5 + $0x5d0] sm:$0xff] }
 0x71e   : > { %6156 = vmatprep.subr.mxu0 %v12356_v35  ;;  %6237 = vmatprep.subr.mxu1 %v12357_v3  ;;  %v12399_v35 = vld [vmem:[%s19591_s5 + $0x7d0] sm:$0xff]  ;;  %v12400_v3 = vld [vmem:[%s19591_s5 + $0x5c8] sm:$0xff] }
 0x71f   : > { %6157 = vmatpush1.msra.mxu0 %v12358_v45  ;;  %6238 = vmatpush1.msra.mxu1 %v12359_v60  ;;  %v12401_v45 = vld [vmem:[%s19591_s5 + $0x7c8] sm:$0xff]  ;;  %v12402_v60 = vld [vmem:[%s19591_s5 + $0x5c0] sm:$0xff] }
 0x720   : > { %6158 = vmatprep.subr.mxu0 %v12360_v51  ;;  %6239 = vmatprep.subr.mxu1 %v12361_v7  ;;  %v12403_v51 = vld [vmem:[%s19591_s5 + $0x7c0] sm:$0xff]  ;;  %v12404_v7 = vld [vmem:[%s19591_s5 + $0x5b8] sm:$0xff] }
 0x721   : > { %6159 = vmatpush1.msra.mxu0 %v12362_v5  ;;  %6240 = vmatpush1.msra.mxu1 %v12363_v1  ;;  %v12405_v5 = vld [vmem:[%s19591_s5 + $0x7b8] sm:$0xff]  ;;  %v12406_v1 = vld [vmem:[%s19591_s5 + $0x5b0] sm:$0xff] }
 0x722   : > { %6160 = vmatprep.subr.mxu0 %v12364_v16  ;;  %6241 = vmatprep.subr.mxu1 %v12365_v26  ;;  %v12407_v16 = vld [vmem:[%s19591_s5 + $0x7b0] sm:$0xff]  ;;  %v12408_v26 = vld [vmem:[%s19591_s5 + $0x5a8] sm:$0xff] }
 0x723   : > { %6161 = vmatpush1.msra.mxu0 %v12366_v21  ;;  %6242 = vmatpush1.msra.mxu1 %v12367_v48  ;;  %v12409_v21 = vld [vmem:[%s19591_s5 + $0x7a8] sm:$0xff]  ;;  %v12410_v48 = vld [vmem:[%s19591_s5 + $0x5a0] sm:$0xff] }
 0x724   : > { %6162 = vmatprep.subr.mxu0 %v12368_v58  ;;  %6243 = vmatprep.subr.mxu1 %v12369_v50  ;;  %v12411_v58 = vld [vmem:[%s19591_s5 + $0x7a0] sm:$0xff]  ;;  %v12412_v50 = vld [vmem:[%s19591_s5 + $0x598] sm:$0xff] }
 0x725   : > { %6163 = vmatpush1.msra.mxu0 %v12370_v46  ;;  %6244 = vmatpush1.msra.mxu1 %v12371_v14  ;;  %v12413_v46 = vld [vmem:[%s19591_s5 + $0x798] sm:$0xff]  ;;  %v12414_v14 = vld [vmem:[%s19591_s5 + $0x590] sm:$0xff] }
 0x726   : > { %6164 = vmatprep.subr.mxu0 %v12372_v31  ;;  %6245 = vmatprep.subr.mxu1 %v12373_v13  ;;  %v12415_v31 = vld [vmem:[%s19591_s5 + $0x790] sm:$0xff]  ;;  %v12416_v13 = vld [vmem:[%s19591_s5 + $0x588] sm:$0xff] }
 0x727   : > { %6165 = vmatpush1.msra.mxu0 %v12374_v11  ;;  %6246 = vmatpush1.msra.mxu1 %v12375_v27  ;;  %v12417_v11 = vld [vmem:[%s19591_s5 + $0x788] sm:$0xff]  ;;  %v12418_v27 = vld [vmem:[%s19591_s5 + $0x580] sm:$0xff] }
 0x728   : > { %6166 = vmatprep.subr.mxu0 %v12376_v30  ;;  %6247 = vmatprep.subr.mxu1 %v12377_v56  ;;  %v12419_v30 = vld [vmem:[%s19591_s5 + $0x780] sm:$0xff]  ;;  %v12420_v56 = vld [vmem:[%s19591_s5 + $0x578] sm:$0xff] }
 0x729   : > { %6167 = vmatpush1.msra.mxu0 %v12378_v44  ;;  %6248 = vmatpush1.msra.mxu1 %v12379_v15  ;;  %v12421_v44 = vld [vmem:[%s19591_s5 + $0x778] sm:$0xff]  ;;  %v12422_v15 = vld [vmem:[%s19591_s5 + $0x570] sm:$0xff] }
 0x72a   : > { %6168 = vmatprep.subr.mxu0 %v12380_v0  ;;  %6249 = vmatprep.subr.mxu1 %v12381_v62  ;;  %v12423_v0 = vld [vmem:[%s19591_s5 + $0x770] sm:$0xff]  ;;  %v12424_v62 = vld [vmem:[%s19591_s5 + $0x568] sm:$0xff] }
 0x72b   : > { %6169 = vmatpush1.msra.mxu0 %v12382_v19  ;;  %6250 = vmatpush1.msra.mxu1 %v12383_v39  ;;  %v12425_v19 = vld [vmem:[%s19591_s5 + $0x768] sm:$0xff]  ;;  %v12426_v39 = vld [vmem:[%s19591_s5 + $0x560] sm:$0xff] }
 0x72c   : > { %6170 = vmatprep.subr.mxu0 %v12384_v52  ;;  %6251 = vmatprep.subr.mxu1 %v12385_v25  ;;  %v12427_v52 = vld [vmem:[%s19591_s5 + $0x760] sm:$0xff]  ;;  %v12428_v25 = vld [vmem:[%s19591_s5 + $0x558] sm:$0xff] }
 0x72d   : > { %6171 = vmatpush1.msra.mxu0 %v12386_v9  ;;  %6252 = vmatpush1.msra.mxu1 %v12387_v2  ;;  %v12429_v9 = vld [vmem:[%s19591_s5 + $0x758] sm:$0xff]  ;;  %v12430_v2 = vld [vmem:[%s19591_s5 + $0x550] sm:$0xff] }
 0x72e   : > { %6172 = vmatprep.subr.mxu0 %v12388_v17  ;;  %6253 = vmatprep.subr.mxu1 %v12389_v34  ;;  %v12431_v17 = vld [vmem:[%s19591_s5 + $0x750] sm:$0xff]  ;;  %v12432_v34 = vld [vmem:[%s19591_s5 + $0x548] sm:$0xff] }
 0x72f   : > { %6173 = vmatpush2.msra.mxu0 %v12390_v55  ;;  %6254 = vmatpush2.msra.mxu1 %v12391_v53  ;;  %v12433_v55 = vld [vmem:[%s19591_s5 + $0x748] sm:$0xff]  ;;  %v12434_v53 = vld [vmem:[%s19591_s5 + $0x540] sm:$0xff] }
 0x730   : > { %6174 = vmatprep.subr.mxu0 %v12392_v47  ;;  %6255 = vmatprep.subr.mxu1 %v12393_v54  ;;  %v12435_v47 = vld [vmem:[%s19591_s5 + $0x740] sm:$0xff]  ;;  %v12436_v54 = vld [vmem:[%s19591_s5 + $0x538] sm:$0xff] }
 0x731   : > { %6175 = vmatpush2.msra.mxu0 %v12394_v18  ;;  %6256 = vmatpush2.msra.mxu1 %v12395_v43  ;;  %v12437_v18 = vld [vmem:[%s19591_s5 + $0x738] sm:$0xff]  ;;  %v12438_v43 = vld [vmem:[%s19591_s5 + $0x530] sm:$0xff] }
 0x732   : > { %6176 = vmatprep.subr.mxu0 %v12396_v40  ;;  %6257 = vmatprep.subr.mxu1 %v12397_v24  ;;  %v12439_v40 = vld [vmem:[%s19591_s5 + $0x730] sm:$0xff]  ;;  %v12440_v24 = vld [vmem:[%s19591_s5 + $0x528] sm:$0xff] }
 0x733   : > { %6177 = vmatpush2.msra.mxu0 %v12398_v4  ;;  %6258 = vmatpush2.msra.mxu1 %v12399_v35  ;;  %v12441_v4 = vld [vmem:[%s19591_s5 + $0x728] sm:$0xff]  ;;  %v12442_v35 = vld [vmem:[%s19591_s5 + $0x520] sm:$0xff] }
 0x734   : > { %6178 = vmatprep.subr.mxu0 %v12400_v3  ;;  %6259 = vmatprep.subr.mxu1 %v12401_v45  ;;  %v12443_v3 = vld [vmem:[%s19591_s5 + $0x720] sm:$0xff]  ;;  %v12444_v45 = vld [vmem:[%s19591_s5 + $0x518] sm:$0xff] }
 0x735   : > { %6179 = vmatpush2.msra.mxu0 %v12402_v60  ;;  %6260 = vmatpush2.msra.mxu1 %v12403_v51  ;;  %v12445_v60 = vld [vmem:[%s19591_s5 + $0x718] sm:$0xff]  ;;  %v12446_v51 = vld [vmem:[%s19591_s5 + $0x510] sm:$0xff] }
 0x736   : > { %6180 = vmatprep.subr.mxu0 %v12404_v7  ;;  %6261 = vmatprep.subr.mxu1 %v12405_v5  ;;  %v12447_v7 = vld [vmem:[%s19591_s5 + $0x710] sm:$0xff]  ;;  %v12448_v5 = vld [vmem:[%s19591_s5 + $0x508] sm:$0xff] }
 0x737   : > { %6181 = vmatpush2.msra.mxu0 %v12406_v1  ;;  %6262 = vmatpush2.msra.mxu1 %v12407_v16  ;;  %v12449_v1 = vld [vmem:[%s19591_s5 + $0x708] sm:$0xff]  ;;  %v12450_v16 = vld [vmem:[%s19591_s5 + $0x500] sm:$0xff] }
 0x738   : > { %6182 = vmatprep.subr.mxu0 %v12408_v26  ;;  %6263 = vmatprep.subr.mxu1 %v12409_v21  ;;  %v12451_v26 = vld [vmem:[%s19591_s5 + $0x700] sm:$0xff]  ;;  %v12452_v21 = vld [vmem:[%s19591_s5 + $0x8f8] sm:$0xff] }
 0x739   : > { %6183 = vmatpush2.msra.mxu0 %v12410_v48  ;;  %6264 = vmatpush2.msra.mxu1 %v12411_v58  ;;  %v12453_v48 = vld [vmem:[%s19591_s5 + $0xaf8] sm:$0xff]  ;;  %v12456_v58 = vld [vmem:[%s19591_s5 + $0x8e8] sm:$0xff] }
 0x73a   : > { %6184 = vmatprep.subr.mxu0 %v12412_v50  ;;  %6265 = vmatprep.subr.mxu1 %v12413_v46  ;;  %v12459_v50 = vld [vmem:[%s19591_s5 + $0xae0] sm:$0xff]  ;;  %v12460_v46 = vld [vmem:[%s19591_s5 + $0x8d8] sm:$0xff] }
 0x73b   : > { %6185 = vmatpush2.msra.mxu0 %v12414_v14  ;;  %6266 = vmatpush2.msra.mxu1 %v12415_v31  ;;  %v12461_v14 = vld [vmem:[%s19591_s5 + $0xad8] sm:$0xff]  ;;  %v12462_v31 = vld [vmem:[%s19591_s5 + $0x8d0] sm:$0xff] }
 0x73c   : > { %6186 = vmatprep.subr.mxu0 %v12416_v13  ;;  %6267 = vmatprep.subr.mxu1 %v12417_v11  ;;  %v12465_v13 = vld [vmem:[%s19591_s5 + $0xac8] sm:$0xff]  ;;  %v12467_v11 = vld [vmem:[%s19591_s5 + $0xac0] sm:$0xff] }
 0x73d   : > { %6187 = vmatpush2.msra.mxu0 %v12418_v27  ;;  %6268 = vmatpush2.msra.mxu1 %v12419_v30  ;;  %v12469_v27 = vld [vmem:[%s19591_s5 + $0xab8] sm:$0xff]  ;;  %v12470_v30 = vld [vmem:[%s19591_s5 + $0x8b0] sm:$0xff] }
 0x73e   : > { %6188 = vmatprep.subr.mxu0 %v12420_v56  ;;  %6269 = vmatprep.subr.mxu1 %v12421_v44  ;;  %v12471_v56 = vld [vmem:[%s19591_s5 + $0xab0] sm:$0xff]  ;;  %v12472_v44 = vld [vmem:[%s19591_s5 + $0x8a8] sm:$0xff] }
 0x73f   : > { %6189 = vmatpush2.msra.mxu0 %v12422_v15  ;;  %6270 = vmatpush2.msra.mxu1 %v12423_v0  ;;  %v12473_v15 = vld [vmem:[%s19591_s5 + $0xaa8] sm:$0xff]  ;;  %v12474_v0 = vld [vmem:[%s19591_s5 + $0x8a0] sm:$0xff] }
 0x740   : > { %6190 = vmatprep.subr.mxu0 %v12424_v62  ;;  %6271 = vmatprep.subr.mxu1 %v12425_v19  ;;  %v12475_v62 = vld [vmem:[%s19591_s5 + $0xaa0] sm:$0xff]  ;;  %v12476_v19 = vld [vmem:[%s19591_s5 + $0x898] sm:$0xff] }
 0x741   : > { %6191 = vmatpush2.msra.mxu0 %v12426_v39  ;;  %6272 = vmatpush2.msra.mxu1 %v12427_v52  ;;  %v12477_v39 = vld [vmem:[%s19591_s5 + $0xa98] sm:$0xff]  ;;  %v12478_v52 = vld [vmem:[%s19591_s5 + $0x890] sm:$0xff] }
 0x742   : > { %6192 = vmatprep.subr.mxu0 %v12428_v25  ;;  %6273 = vmatprep.subr.mxu1 %v12429_v9  ;;  %v12479_v25 = vld [vmem:[%s19591_s5 + $0xa90] sm:$0xff]  ;;  %v12480_v9 = vld [vmem:[%s19591_s5 + $0x888] sm:$0xff] }
 0x743   : > { %6193 = vmatpush2.msra.mxu0 %v12430_v2  ;;  %6274 = vmatpush2.msra.mxu1 %v12431_v17  ;;  %v12481_v2 = vld [vmem:[%s19591_s5 + $0xa88] sm:$0xff]  ;;  %v12482_v17 = vld [vmem:[%s19591_s5 + $0x880] sm:$0xff] }
 0x744   : > { %6194 = vmatprep.subr.mxu0 %v12432_v34  ;;  %6275 = vmatprep.subr.mxu1 %v12433_v55  ;;  %v12483_v34 = vld [vmem:[%s19591_s5 + $0xa80] sm:$0xff]  ;;  %v12484_v55 = vld [vmem:[%s19591_s5 + $0x878] sm:$0xff] }
 0x745   : > { %6195 = vmatpush2.msra.mxu0 %v12434_v53  ;;  %6276 = vmatpush2.msra.mxu1 %v12435_v47  ;;  %v12485_v53 = vld [vmem:[%s19591_s5 + $0xa78] sm:$0xff]  ;;  %v12486_v47 = vld [vmem:[%s19591_s5 + $0x870] sm:$0xff] }
 0x746   : > { %6196 = vmatprep.subr.mxu0 %v12436_v54  ;;  %6277 = vmatprep.subr.mxu1 %v12437_v18  ;;  %v12487_v54 = vld [vmem:[%s19591_s5 + $0xa70] sm:$0xff]  ;;  %v12488_v18 = vld [vmem:[%s19591_s5 + $0x868] sm:$0xff] }
 0x747   : > { %6197 = vmatpush2.msra.mxu0 %v12438_v43  ;;  %6278 = vmatpush2.msra.mxu1 %v12439_v40  ;;  %v12489_v43 = vld [vmem:[%s19591_s5 + $0xa68] sm:$0xff]  ;;  %v12490_v40 = vld [vmem:[%s19591_s5 + $0x860] sm:$0xff] }
 0x748   : > { %6198 = vmatprep.subr.mxu0 %v12440_v24  ;;  %6279 = vmatprep.subr.mxu1 %v12441_v4  ;;  %v12491_v24 = vld [vmem:[%s19591_s5 + $0xa60] sm:$0xff]  ;;  %v12492_v4 = vld [vmem:[%s19591_s5 + $0x858] sm:$0xff] }
 0x749   : > { %6199 = vmatpush2.msra.mxu0 %v12442_v35  ;;  %6280 = vmatpush2.msra.mxu1 %v12443_v3  ;;  %v12493_v35 = vld [vmem:[%s19591_s5 + $0xa58] sm:$0xff]  ;;  %v12494_v3 = vld [vmem:[%s19591_s5 + $0x850] sm:$0xff] }
 0x74a   : > { %6200 = vmatprep.subr.mxu0 %v12444_v45  ;;  %6281 = vmatprep.subr.mxu1 %v12445_v60  ;;  %v12495_v45 = vld [vmem:[%s19591_s5 + $0xa50] sm:$0xff]  ;;  %v12496_v60 = vld [vmem:[%s19591_s5 + $0x848] sm:$0xff] }
 0x74b   : > { %6201 = vmatpush2.msra.mxu0 %v12446_v51  ;;  %6282 = vmatpush2.msra.mxu1 %v12447_v7  ;;  %v12497_v51 = vld [vmem:[%s19591_s5 + $0xa48] sm:$0xff]  ;;  %v12498_v7 = vld [vmem:[%s19591_s5 + $0x840] sm:$0xff] }
 0x74c   : > { %6202 = vmatprep.subr.mxu0 %v12448_v5  ;;  %6283 = vmatprep.subr.mxu1 %v12449_v1  ;;  %v12499_v5 = vld [vmem:[%s19591_s5 + $0xa40] sm:$0xff]  ;;  %v12500_v1 = vld [vmem:[%s19591_s5 + $0x838] sm:$0xff] }
 0x74d   : > { %6203 = vmatpush2.msra.mxu0 %v12450_v16  ;;  %6284 = vmatpush2.msra.mxu1 %v12451_v26  ;;  %v12501_v16 = vld [vmem:[%s19591_s5 + $0xa38] sm:$0xff]  ;;  %v12502_v26 = vld [vmem:[%s19591_s5 + $0x830] sm:$0xff] }
 0x74e   : > { %6205 = vmatmul.mubr.f32.vlgmr.msra.gmra.mxu0 %v14703_v28  ;;  %6286 = vmatmul.mubr.f32.vlgmr.msra.gmra.mxu1 %v15223_v61  ;;  %v12454_v28 = vld [vmem:[%s19591_s5 + $0x8f0] sm:$0xff] }
 0x74f   : > { %6302 = vmatprep.subr.mxu0 %v12452_v21  ;;  %6383 = vmatprep.subr.mxu1 %v12453_v48  ;;  %v12455_v61 = vld [vmem:[%s19591_s5 + $0xaf0] sm:$0xff]  ;;  %v12504_v48 = vld [vmem:[%s19591_s5 + $0x828] sm:$0xff] }
 0x750   : > { %6210 = vmatprep.mubr.f32.mxu0 %v14745_v49  ;;  %6291 = vmatprep.mubr.f32.mxu1 %v15277_v37  ;;  %v12457_v49 = vld [vmem:[%s19591_s5 + $0xae8] sm:$0xff]  ;;  %v12458_v37 = vld [vmem:[%s19591_s5 + $0x8e0] sm:$0xff]  ;;  %v12503_v21 = vld [vmem:[%s19591_s5 + $0xa30] sm:$0xff] }
 0x751   : > { %6303 = vmatpush1.msra.mxu0 %v12454_v28  ;;  %6384 = vmatpush1.msra.mxu1 %v12455_v61  ;;  %v12505_v28 = vld [vmem:[%s19591_s5 + $0xa28] sm:$0xff]  ;;  %v12506_v61 = vld [vmem:[%s19591_s5 + $0x820] sm:$0xff] }
 0x752   : > { %6304 = vmatprep.subr.mxu0 %v12456_v58  ;;  %6385 = vmatprep.subr.mxu1 %v12457_v49  ;;  %v12507_v58 = vld [vmem:[%s19591_s5 + $0xa20] sm:$0xff]  ;;  %v12508_v49 = vld [vmem:[%s19591_s5 + $0x818] sm:$0xff] }
 0x753   : > { %6305 = vmatpush1.msra.mxu0 %v12458_v37  ;;  %6386 = vmatpush1.msra.mxu1 %v12459_v50  ;;  %v12509_v37 = vld [vmem:[%s19591_s5 + $0xa18] sm:$0xff]  ;;  %v12510_v50 = vld [vmem:[%s19591_s5 + $0x810] sm:$0xff] }
 0x754   : > { %6211 = vmatmul.mubr.f32.gmra.mxu0 %v14731_v10  ;;  %6292 = vmatmul.mubr.f32.gmra.mxu1 %v15263_v38  ;;  %v12463_v10 = vld [vmem:[%s19591_s5 + $0xad0] sm:$0xff]  ;;  %v12464_v38 = vld [vmem:[%s19591_s5 + $0x8c8] sm:$0xff] }
 0x755   : > { %6306 = vmatprep.subr.mxu0 %v12460_v46  ;;  %6387 = vmatprep.subr.mxu1 %v12461_v14  ;;  %v12511_v46 = vld [vmem:[%s19591_s5 + $0xa10] sm:$0xff]  ;;  %v12512_v14 = vld [vmem:[%s19591_s5 + $0x808] sm:$0xff] }
 0x756   : > { %6307 = vmatpush1.msra.mxu0 %v12462_v31  ;;  %6366 = vmatprep.mubr.f32.mxu0 %v15305_v22  ;;  %v12466_v22 = vld [vmem:[%s19591_s5 + $0x8c0] sm:$0xff]  ;;  %v12513_v31 = vld [vmem:[%s19591_s5 + $0xa08] sm:$0xff] }
 0x757   : > { %6388 = vmatpush1.msra.mxu1 %v12463_v10  ;;  %6447 = vmatprep.mubr.f32.mxu1 %v15381_v33  ;;  %v12468_v33 = vld [vmem:[%s19591_s5 + $0x8b8] sm:$0xff]  ;;  %v12514_v10 = vld [vmem:[%s19591_s5 + $0x800] sm:$0xff] }
 0x758   : > { %6308 = vmatprep.subr.mxu0 %v12464_v38  ;;  %6389 = vmatprep.subr.mxu1 %v12465_v13  ;;  %v12515_v38 = vld [vmem:[%s19591_s5 + $0xa00] sm:$0xff]  ;;  %v12516_v13 = vld [vmem:[%s19591_s5 + $0x9f8] sm:$0xff] }
 0x759   : > { %6309 = vmatpush1.msra.mxu0 %v12466_v22  ;;  %6390 = vmatpush1.msra.mxu1 %v12467_v11  ;;  %v12517_v22 = vld [vmem:[%s19591_s5 + $0xbf8] sm:$0xff]  ;;  %v12518_v11 = vld [vmem:[%s19591_s5 + $0x9f0] sm:$0xff] }
 0x75a   : > { %6310 = vmatprep.subr.mxu0 %v12468_v33  ;;  %6391 = vmatprep.subr.mxu1 %v12469_v27  ;;  %v12519_v33 = vld [vmem:[%s19591_s5 + $0xbf0] sm:$0xff]  ;;  %v12520_v27 = vld [vmem:[%s19591_s5 + $0x9e8] sm:$0xff] }
 0x75b   : > { %6311 = vmatpush1.msra.mxu0 %v12470_v30  ;;  %6392 = vmatpush1.msra.mxu1 %v12471_v56  ;;  %v12521_v30 = vld [vmem:[%s19591_s5 + $0xbe8] sm:$0xff]  ;;  %v12522_v56 = vld [vmem:[%s19591_s5 + $0x9e0] sm:$0xff] }
 0x75c   : > { %6312 = vmatprep.subr.mxu0 %v12472_v44  ;;  %6393 = vmatprep.subr.mxu1 %v12473_v15  ;;  %v12523_v44 = vld [vmem:[%s19591_s5 + $0xbe0] sm:$0xff]  ;;  %v12524_v15 = vld [vmem:[%s19591_s5 + $0x9d8] sm:$0xff] }
 0x75d   : > { %6313 = vmatpush1.msra.mxu0 %v12474_v0  ;;  %6394 = vmatpush1.msra.mxu1 %v12475_v62  ;;  %v12525_v0 = vld [vmem:[%s19591_s5 + $0xbd8] sm:$0xff]  ;;  %v12526_v62 = vld [vmem:[%s19591_s5 + $0x9d0] sm:$0xff] }
 0x75e   : > { %6314 = vmatprep.subr.mxu0 %v12476_v19  ;;  %6395 = vmatprep.subr.mxu1 %v12477_v39  ;;  %v12527_v19 = vld [vmem:[%s19591_s5 + $0xbd0] sm:$0xff]  ;;  %v12528_v39 = vld [vmem:[%s19591_s5 + $0x9c8] sm:$0xff] }
 0x75f   : > { %6315 = vmatpush1.msra.mxu0 %v12478_v52  ;;  %6396 = vmatpush1.msra.mxu1 %v12479_v25  ;;  %v12529_v52 = vld [vmem:[%s19591_s5 + $0xbc8] sm:$0xff]  ;;  %v12530_v25 = vld [vmem:[%s19591_s5 + $0x9c0] sm:$0xff] }
 0x760   : > { %6316 = vmatprep.subr.mxu0 %v12480_v9  ;;  %6397 = vmatprep.subr.mxu1 %v12481_v2  ;;  %v12531_v9 = vld [vmem:[%s19591_s5 + $0xbc0] sm:$0xff]  ;;  %v12532_v2 = vld [vmem:[%s19591_s5 + $0x9b8] sm:$0xff] }
 0x761   : > { %6317 = vmatpush1.msra.mxu0 %v12482_v17  ;;  %6398 = vmatpush1.msra.mxu1 %v12483_v34  ;;  %v12533_v17 = vld [vmem:[%s19591_s5 + $0xbb8] sm:$0xff]  ;;  %v12534_v34 = vld [vmem:[%s19591_s5 + $0x9b0] sm:$0xff] }
 0x762   : > { %6318 = vmatprep.subr.mxu0 %v12484_v55  ;;  %6399 = vmatprep.subr.mxu1 %v12485_v53  ;;  %v12535_v55 = vld [vmem:[%s19591_s5 + $0xbb0] sm:$0xff]  ;;  %v12536_v53 = vld [vmem:[%s19591_s5 + $0x9a8] sm:$0xff] }
 0x763   : > { %6319 = vmatpush1.msra.mxu0 %v12486_v47  ;;  %6400 = vmatpush1.msra.mxu1 %v12487_v54  ;;  %v12537_v47 = vld [vmem:[%s19591_s5 + $0xba8] sm:$0xff]  ;;  %v12538_v54 = vld [vmem:[%s19591_s5 + $0x9a0] sm:$0xff] }
 0x764   : > { %6320 = vmatprep.subr.mxu0 %v12488_v18  ;;  %6401 = vmatprep.subr.mxu1 %v12489_v43  ;;  %v12539_v18 = vld [vmem:[%s19591_s5 + $0xba0] sm:$0xff]  ;;  %v12540_v43 = vld [vmem:[%s19591_s5 + $0x998] sm:$0xff] }
 0x765   : > { %6321 = vmatpush1.msra.mxu0 %v12490_v40  ;;  %6402 = vmatpush1.msra.mxu1 %v12491_v24  ;;  %v12541_v40 = vld [vmem:[%s19591_s5 + $0xb98] sm:$0xff]  ;;  %v12542_v24 = vld [vmem:[%s19591_s5 + $0x990] sm:$0xff] }
 0x766   : > { %6322 = vmatprep.subr.mxu0 %v12492_v4  ;;  %6403 = vmatprep.subr.mxu1 %v12493_v35  ;;  %v12543_v4 = vld [vmem:[%s19591_s5 + $0xb90] sm:$0xff]  ;;  %v12544_v35 = vld [vmem:[%s19591_s5 + $0x988] sm:$0xff] }
 0x767   : > { %6323 = vmatpush1.msra.mxu0 %v12494_v3  ;;  %6404 = vmatpush1.msra.mxu1 %v12495_v45  ;;  %v12545_v3 = vld [vmem:[%s19591_s5 + $0xb88] sm:$0xff]  ;;  %v12546_v45 = vld [vmem:[%s19591_s5 + $0x980] sm:$0xff] }
 0x768   : > { %6324 = vmatprep.subr.mxu0 %v12496_v60  ;;  %6405 = vmatprep.subr.mxu1 %v12497_v51  ;;  %v12547_v60 = vld [vmem:[%s19591_s5 + $0xb80] sm:$0xff]  ;;  %v12548_v51 = vld [vmem:[%s19591_s5 + $0x978] sm:$0xff] }
 0x769   : > { %6325 = vmatpush1.msra.mxu0 %v12498_v7  ;;  %6406 = vmatpush1.msra.mxu1 %v12499_v5  ;;  %v12549_v7 = vld [vmem:[%s19591_s5 + $0xb78] sm:$0xff]  ;;  %v12550_v5 = vld [vmem:[%s19591_s5 + $0x970] sm:$0xff] }
 0x76a   : > { %6326 = vmatprep.subr.mxu0 %v12500_v1  ;;  %6407 = vmatprep.subr.mxu1 %v12501_v16  ;;  %v12551_v1 = vld [vmem:[%s19591_s5 + $0xb70] sm:$0xff]  ;;  %v12552_v16 = vld [vmem:[%s19591_s5 + $0x968] sm:$0xff] }
 0x76b   : > { %6327 = vmatpush1.msra.mxu0 %v12502_v26  ;;  %6408 = vmatpush1.msra.mxu1 %v12503_v21  ;;  %v12553_v26 = vld [vmem:[%s19591_s5 + $0xb68] sm:$0xff]  ;;  %v12554_v21 = vld [vmem:[%s19591_s5 + $0x960] sm:$0xff] }
 0x76c   : > { %6328 = vmatprep.subr.mxu0 %v12504_v48  ;;  %6409 = vmatprep.subr.mxu1 %v12505_v28  ;;  %v12555_v48 = vld [vmem:[%s19591_s5 + $0xb60] sm:$0xff]  ;;  %v12556_v28 = vld [vmem:[%s19591_s5 + $0x958] sm:$0xff] }
 0x76d   : > { %6329 = vmatpush1.msra.mxu0 %v12506_v61  ;;  %6410 = vmatpush1.msra.mxu1 %v12507_v58  ;;  %v12557_v61 = vld [vmem:[%s19591_s5 + $0xb58] sm:$0xff]  ;;  %v12558_v58 = vld [vmem:[%s19591_s5 + $0x950] sm:$0xff] }
 0x76e   : > { %6330 = vmatprep.subr.mxu0 %v12508_v49  ;;  %6411 = vmatprep.subr.mxu1 %v12509_v37  ;;  %v12559_v49 = vld [vmem:[%s19591_s5 + $0xb50] sm:$0xff]  ;;  %v12560_v37 = vld [vmem:[%s19591_s5 + $0x948] sm:$0xff] }
 0x76f   : > { %6331 = vmatpush1.msra.mxu0 %v12510_v50  ;;  %6412 = vmatpush1.msra.mxu1 %v12511_v46  ;;  %v12561_v50 = vld [vmem:[%s19591_s5 + $0xb48] sm:$0xff]  ;;  %v12562_v46 = vld [vmem:[%s19591_s5 + $0x940] sm:$0xff] }
 0x770   : > { %6332 = vmatprep.subr.mxu0 %v12512_v14  ;;  %6413 = vmatprep.subr.mxu1 %v12513_v31  ;;  %v12563_v14 = vld [vmem:[%s19591_s5 + $0xb40] sm:$0xff]  ;;  %v12564_v31 = vld [vmem:[%s19591_s5 + $0x938] sm:$0xff] }
 0x771   : > { %6333 = vmatpush1.msra.mxu0 %v12514_v10  ;;  %6414 = vmatpush1.msra.mxu1 %v12515_v38  ;;  %v12565_v10 = vld [vmem:[%s19591_s5 + $0xb38] sm:$0xff]  ;;  %v12566_v38 = vld [vmem:[%s19591_s5 + $0x930] sm:$0xff] }
 0x772   : > { %6334 = vmatprep.subr.mxu0 %v12516_v13  ;;  %6415 = vmatprep.subr.mxu1 %v12517_v22  ;;  %v12567_v13 = vld [vmem:[%s19591_s5 + $0xb30] sm:$0xff]  ;;  %v12568_v22 = vld [vmem:[%s19591_s5 + $0x928] sm:$0xff] }
 0x773   : > { %6335 = vmatpush2.msra.mxu0 %v12518_v11  ;;  %6416 = vmatpush2.msra.mxu1 %v12519_v33  ;;  %v12569_v11 = vld [vmem:[%s19591_s5 + $0xb28] sm:$0xff]  ;;  %v12570_v33 = vld [vmem:[%s19591_s5 + $0x920] sm:$0xff] }
 0x774   : > { %6336 = vmatprep.subr.mxu0 %v12520_v27  ;;  %6417 = vmatprep.subr.mxu1 %v12521_v30  ;;  %v12571_v27 = vld [vmem:[%s19591_s5 + $0xb20] sm:$0xff]  ;;  %v12572_v30 = vld [vmem:[%s19591_s5 + $0x918] sm:$0xff] }
 0x775   : > { %6337 = vmatpush2.msra.mxu0 %v12522_v56  ;;  %6418 = vmatpush2.msra.mxu1 %v12523_v44  ;;  %v12573_v56 = vld [vmem:[%s19591_s5 + $0xb18] sm:$0xff]  ;;  %v12574_v44 = vld [vmem:[%s19591_s5 + $0x910] sm:$0xff] }
 0x776   : > { %6338 = vmatprep.subr.mxu0 %v12524_v15  ;;  %6419 = vmatprep.subr.mxu1 %v12525_v0  ;;  %v12575_v15 = vld [vmem:[%s19591_s5 + $0xb10] sm:$0xff]  ;;  %v12576_v0 = vld [vmem:[%s19591_s5 + $0x908] sm:$0xff] }
 0x777   : > { %6339 = vmatpush2.msra.mxu0 %v12526_v62  ;;  %6420 = vmatpush2.msra.mxu1 %v12527_v19  ;;  %v12577_v62 = vld [vmem:[%s19591_s5 + $0xb08] sm:$0xff]  ;;  %v12578_v19 = vld [vmem:[%s19591_s5 + $0x900] sm:$0xff] }
 0x778   : > { %6340 = vmatprep.subr.mxu0 %v12528_v39  ;;  %6421 = vmatprep.subr.mxu1 %v12529_v52  ;;  %v12579_v39 = vld [vmem:[%s19591_s5 + $0xb00] sm:$0xff]  ;;  %v12580_v52 = vld [vmem:[%s19591_s5 + $0xcf8] sm:$0xff] }
 0x779   : > { %6341 = vmatpush2.msra.mxu0 %v12530_v25  ;;  %6422 = vmatpush2.msra.mxu1 %v12531_v9  ;;  %v12581_v25 = vld [vmem:[%s19591_s5 + $0xef8] sm:$0xff]  ;;  %v19701_v9 = vld [vmem:[#allocation49_spill] sm:$0xff] }
 0x77a   : > { %6342 = vmatprep.subr.mxu0 %v12532_v2  ;;  %6423 = vmatprep.subr.mxu1 %v12533_v17  ;;  %v19702_v2 = vld [vmem:[#allocation51_spill] sm:$0xff]  ;;  %v12584_v17 = vld [vmem:[%s19591_s5 + $0xce8] sm:$0xff] }
 0x77b   : > { %6343 = vmatpush2.msra.mxu0 %v12534_v34  ;;  %6424 = vmatpush2.msra.mxu1 %v12535_v55  ;;  %v12585_v34 = vld [vmem:[%s19591_s5 + $0xee8] sm:$0xff]  ;;  %v12586_v55 = vld [vmem:[%s19591_s5 + $0xce0] sm:$0xff] }
 0x77c   : > { %6344 = vmatprep.subr.mxu0 %v12536_v53  ;;  %6425 = vmatprep.subr.mxu1 %v12537_v47  ;;  %v12587_v53 = vld [vmem:[%s19591_s5 + $0xee0] sm:$0xff] }
 0x77d   : > { %6345 = vmatpush2.msra.mxu0 %v12538_v54  ;;  %6426 = vmatpush2.msra.mxu1 %v12539_v18  ;;  %v19703_v47 = vld [vmem:[#allocation48_spill] sm:$0xff]  ;;  %v19704_v54 = vld [vmem:[#allocation50_spill] sm:$0xff]  ;;  %v12588_v18 = vld [vmem:[%s19591_s5 + $0xcd8] sm:$0xff] }
 0x77e   : > { %6346 = vmatprep.subr.mxu0 %v12540_v43  ;;  %6427 = vmatprep.subr.mxu1 %v12541_v40  ;;  %v12589_v43 = vld [vmem:[%s19591_s5 + $0xed8] sm:$0xff]  ;;  %v12590_v40 = vld [vmem:[%s19591_s5 + $0xcd0] sm:$0xff] }
 0x77f   : > { %6347 = vmatpush2.msra.mxu0 %v12542_v24  ;;  %6428 = vmatpush2.msra.mxu1 %v12543_v4  ;;  %v19705_v24 = vld [vmem:[#allocation37_spill] sm:$0xff]  ;;  %v12591_v4 = vld [vmem:[%s19591_s5 + $0xed0] sm:$0xff] }
 0x780   : > { %6348 = vmatprep.subr.mxu0 %v12544_v35  ;;  %6429 = vmatprep.subr.mxu1 %v12545_v3  ;;  %v19706_v35 = vld [vmem:[#allocation41_spill] sm:$0xff] }
 0x781   : > { %6349 = vmatpush2.msra.mxu0 %v12546_v45  ;;  %6430 = vmatpush2.msra.mxu1 %v12547_v60  ;;  %v12592_v3 = vld [vmem:[%s19591_s5 + $0xcc8] sm:$0xff]  ;;  %v12594_v60 = vld [vmem:[%s19591_s5 + $0xcc0] sm:$0xff] }
 0x782   : > { %6350 = vmatprep.subr.mxu0 %v12548_v51  ;;  %6431 = vmatprep.subr.mxu1 %v12549_v7  ;;  %v12593_v45 = vld [vmem:[%s19591_s5 + $0xec8] sm:$0xff]  ;;  %v12595_v51 = vld [vmem:[%s19591_s5 + $0xec0] sm:$0xff]  ;;  %v12596_v7 = vld [vmem:[%s19591_s5 + $0xcb8] sm:$0xff] }
 0x783   : > { %6351 = vmatpush2.msra.mxu0 %v12550_v5  ;;  %6432 = vmatpush2.msra.mxu1 %v12551_v1  ;;  %v12597_v5 = vld [vmem:[%s19591_s5 + $0xeb8] sm:$0xff]  ;;  %v12598_v1 = vld [vmem:[%s19591_s5 + $0xcb0] sm:$0xff] }
 0x784   : > { %6352 = vmatprep.subr.mxu0 %v12552_v16  ;;  %6433 = vmatprep.subr.mxu1 %v12553_v26  ;;  %v12599_v16 = vld [vmem:[%s19591_s5 + $0xeb0] sm:$0xff]  ;;  %v12600_v26 = vld [vmem:[%s19591_s5 + $0xca8] sm:$0xff] }
 0x785   : > { %6353 = vmatpush2.msra.mxu0 %v12554_v21  ;;  %6434 = vmatpush2.msra.mxu1 %v12555_v48  ;;  %v12601_v21 = vld [vmem:[%s19591_s5 + $0xea8] sm:$0xff]  ;;  %v12602_v48 = vld [vmem:[%s19591_s5 + $0xca0] sm:$0xff] }
 0x786   : > { %6354 = vmatprep.subr.mxu0 %v12556_v28  ;;  %6435 = vmatprep.subr.mxu1 %v12557_v61  ;;  %v12603_v28 = vld [vmem:[%s19591_s5 + $0xea0] sm:$0xff]  ;;  %v12604_v61 = vld [vmem:[%s19591_s5 + $0xc98] sm:$0xff] }
 0x787   : > { %6355 = vmatpush2.msra.mxu0 %v12558_v58  ;;  %6436 = vmatpush2.msra.mxu1 %v12559_v49  ;;  %v12605_v58 = vld [vmem:[%s19591_s5 + $0xe98] sm:$0xff]  ;;  %v12606_v49 = vld [vmem:[%s19591_s5 + $0xc90] sm:$0xff] }
 0x788   : > { %6356 = vmatprep.subr.mxu0 %v12560_v37  ;;  %6437 = vmatprep.subr.mxu1 %v12561_v50  ;;  %v12607_v37 = vld [vmem:[%s19591_s5 + $0xe90] sm:$0xff]  ;;  %v12608_v50 = vld [vmem:[%s19591_s5 + $0xc88] sm:$0xff] }
 0x789   : > { %6357 = vmatpush2.msra.mxu0 %v12562_v46  ;;  %6438 = vmatpush2.msra.mxu1 %v12563_v14  ;;  %v12609_v46 = vld [vmem:[%s19591_s5 + $0xe88] sm:$0xff]  ;;  %v12610_v14 = vld [vmem:[%s19591_s5 + $0xc80] sm:$0xff] }
 0x78a   : > { %6358 = vmatprep.subr.mxu0 %v12564_v31  ;;  %6439 = vmatprep.subr.mxu1 %v12565_v10  ;;  %v12611_v31 = vld [vmem:[%s19591_s5 + $0xe80] sm:$0xff]  ;;  %v12612_v10 = vld [vmem:[%s19591_s5 + $0xc78] sm:$0xff] }
 0x78b   : > { %6359 = vmatpush2.msra.mxu0 %v12566_v38  ;;  %6440 = vmatpush2.msra.mxu1 %v12567_v13  ;;  %v12613_v38 = vld [vmem:[%s19591_s5 + $0xe78] sm:$0xff]  ;;  %v12614_v13 = vld [vmem:[%s19591_s5 + $0xc70] sm:$0xff] }
 0x78c   : > { %6360 = vmatprep.subr.mxu0 %v12568_v22  ;;  %6441 = vmatprep.subr.mxu1 %v12569_v11  ;;  %v12615_v22 = vld [vmem:[%s19591_s5 + $0xe70] sm:$0xff]  ;;  %v12616_v11 = vld [vmem:[%s19591_s5 + $0xc68] sm:$0xff] }
 0x78d   : > { %6361 = vmatpush2.msra.mxu0 %v12570_v33  ;;  %6442 = vmatpush2.msra.mxu1 %v12571_v27  ;;  %v12617_v33 = vld [vmem:[%s19591_s5 + $0xe68] sm:$0xff]  ;;  %v12618_v27 = vld [vmem:[%s19591_s5 + $0xc60] sm:$0xff] }
 0x78e   : > { %6362 = vmatprep.subr.mxu0 %v12572_v30  ;;  %6443 = vmatprep.subr.mxu1 %v12573_v56  ;;  %v12619_v30 = vld [vmem:[%s19591_s5 + $0xe60] sm:$0xff]  ;;  %v12620_v56 = vld [vmem:[%s19591_s5 + $0xc58] sm:$0xff] }
 0x78f   : > { %6363 = vmatpush2.msra.mxu0 %v12574_v44  ;;  %6444 = vmatpush2.msra.mxu1 %v12575_v15  ;;  %v12621_v44 = vld [vmem:[%s19591_s5 + $0xe58] sm:$0xff]  ;;  %v12622_v15 = vld [vmem:[%s19591_s5 + $0xc50] sm:$0xff] }
 0x790   : > { %6364 = vmatprep.subr.mxu0 %v12576_v0  ;;  %6445 = vmatprep.subr.mxu1 %v12577_v62  ;;  %v12623_v0 = vld [vmem:[%s19591_s5 + $0xe50] sm:$0xff]  ;;  %v12624_v62 = vld [vmem:[%s19591_s5 + $0xc48] sm:$0xff] }
 0x791   : > { %6365 = vmatpush2.msra.mxu0 %v12578_v19  ;;  %6446 = vmatpush2.msra.mxu1 %v12579_v39  ;;  %v12625_v19 = vld [vmem:[%s19591_s5 + $0xe48] sm:$0xff]  ;;  %v12626_v39 = vld [vmem:[%s19591_s5 + $0xc40] sm:$0xff] }
 0x792   : > { %6367 = vmatmul.mubr.f32.vlgmr.msra.gmra.mxu0 %v15297_v36  ;;  %6448 = vmatmul.mubr.f32.vlgmr.msra.gmra.mxu1 %v15367_v6  ;;  %v12582_v36 = vld [vmem:[%s19591_s5 + $0xcf0] sm:$0xff] }
 0x793   : > { %6464 = vmatprep.subr.mxu0 %v12580_v52  ;;  %6545 = vmatprep.subr.mxu1 %v12581_v25  ;;  %v12583_v6 = vld [vmem:[%s19591_s5 + $0xef0] sm:$0xff]  ;;  %v12627_v52 = vld [vmem:[%s19591_s5 + $0xe40] sm:$0xff]  ;;  %v12628_v25 = vld [vmem:[%s19591_s5 + $0xc38] sm:$0xff] }
 0x794   : > { %6372 = vmatprep.mubr.f32.mxu0 %v19701_v9  ;;  %6453 = vmatprep.mubr.f32.mxu1 %v19702_v2  ;;  %v12629_v9 = vld [vmem:[%s19591_s5 + $0xe38] sm:$0xff]  ;;  %v12630_v2 = vld [vmem:[%s19591_s5 + $0xc30] sm:$0xff] }
 0x795   : > { %6465 = vmatpush1.msra.mxu0 %v12582_v36  ;;  %6546 = vmatpush1.msra.mxu1 %v12583_v6  ;;  %v12631_v36 = vld [vmem:[%s19591_s5 + $0xe30] sm:$0xff]  ;;  %v12632_v6 = vld [vmem:[%s19591_s5 + $0xc28] sm:$0xff] }
 0x796   : > { %6466 = vmatprep.subr.mxu0 %v12584_v17  ;;  %6547 = vmatprep.subr.mxu1 %v12585_v34  ;;  %v12633_v17 = vld [vmem:[%s19591_s5 + $0xe28] sm:$0xff]  ;;  %v12634_v34 = vld [vmem:[%s19591_s5 + $0xc20] sm:$0xff] }
 0x797   : > { %6467 = vmatpush1.msra.mxu0 %v12586_v55  ;;  %6548 = vmatpush1.msra.mxu1 %v12587_v53  ;;  %v12635_v55 = vld [vmem:[%s19591_s5 + $0xe20] sm:$0xff]  ;;  %v12636_v53 = vld [vmem:[%s19591_s5 + $0xc18] sm:$0xff] }
 0x798   : > { %6373 = vmatmul.mubr.f32.gmra.mxu0 %v19703_v47  ;;  %6454 = vmatmul.mubr.f32.gmra.mxu1 %v19704_v54  ;;  %v12637_v47 = vld [vmem:[%s19591_s5 + $0xe18] sm:$0xff]  ;;  %v12638_v54 = vld [vmem:[%s19591_s5 + $0xc10] sm:$0xff] }
 0x799   : > { %6468 = vmatprep.subr.mxu0 %v12588_v18  ;;  %6549 = vmatprep.subr.mxu1 %v12589_v43  ;;  %v12639_v18 = vld [vmem:[%s19591_s5 + $0xe10] sm:$0xff]  ;;  %v12640_v43 = vld [vmem:[%s19591_s5 + $0xc08] sm:$0xff] }
 0x79a   : > { %6469 = vmatpush1.msra.mxu0 %v12590_v40  ;;  %6528 = vmatprep.mubr.f32.mxu0 %v19705_v24  ;;  %v12641_v40 = vld [vmem:[%s19591_s5 + $0xe08] sm:$0xff]  ;;  %v12642_v24 = vld [vmem:[%s19591_s5 + $0xc00] sm:$0xff] }
 0x79b   : > { %6550 = vmatpush1.msra.mxu1 %v12591_v4  ;;  %6609 = vmatprep.mubr.f32.mxu1 %v19706_v35  ;;  %v12643_v4 = vld [vmem:[%s19591_s5 + $0xe00] sm:$0xff]  ;;  %v12644_v35 = vld [vmem:[%s19591_s5 + $0xdf8] sm:$0xff] }
 0x79c   : > { %6470 = vmatprep.subr.mxu0 %v12592_v3  ;;  %6551 = vmatprep.subr.mxu1 %v12593_v45  ;;  %v12645_v3 = vld [vmem:[%s19591_s5 + $0xff8] sm:$0xff]  ;;  %v12646_v45 = vld [vmem:[%s19591_s5 + $0xdf0] sm:$0xff] }
 0x79d   : > { %6471 = vmatpush1.msra.mxu0 %v12594_v60  ;;  %6552 = vmatpush1.msra.mxu1 %v12595_v51  ;;  %v12647_v60 = vld [vmem:[%s19591_s5 + $0xff0] sm:$0xff]  ;;  %v12648_v51 = vld [vmem:[%s19591_s5 + $0xde8] sm:$0xff] }
 0x79e   : > { %6472 = vmatprep.subr.mxu0 %v12596_v7  ;;  %6553 = vmatprep.subr.mxu1 %v12597_v5  ;;  %v12649_v7 = vld [vmem:[%s19591_s5 + $0xfe8] sm:$0xff]  ;;  %v12650_v5 = vld [vmem:[%s19591_s5 + $0xde0] sm:$0xff] }
 0x79f   : > { %6473 = vmatpush1.msra.mxu0 %v12598_v1  ;;  %6554 = vmatpush1.msra.mxu1 %v12599_v16  ;;  %v12651_v1 = vld [vmem:[%s19591_s5 + $0xfe0] sm:$0xff]  ;;  %v12652_v16 = vld [vmem:[%s19591_s5 + $0xdd8] sm:$0xff] }
 0x7a0   : > { %6474 = vmatprep.subr.mxu0 %v12600_v26  ;;  %6555 = vmatprep.subr.mxu1 %v12601_v21  ;;  %v12653_v26 = vld [vmem:[%s19591_s5 + $0xfd8] sm:$0xff]  ;;  %v12654_v21 = vld [vmem:[%s19591_s5 + $0xdd0] sm:$0xff] }
 0x7a1   : > { %6475 = vmatpush1.msra.mxu0 %v12602_v48  ;;  %6556 = vmatpush1.msra.mxu1 %v12603_v28  ;;  %v12655_v48 = vld [vmem:[%s19591_s5 + $0xfd0] sm:$0xff]  ;;  %v12656_v28 = vld [vmem:[%s19591_s5 + $0xdc8] sm:$0xff] }
 0x7a2   : > { %6476 = vmatprep.subr.mxu0 %v12604_v61  ;;  %6557 = vmatprep.subr.mxu1 %v12605_v58  ;;  %v12657_v61 = vld [vmem:[%s19591_s5 + $0xfc8] sm:$0xff]  ;;  %v12658_v58 = vld [vmem:[%s19591_s5 + $0xdc0] sm:$0xff] }
 0x7a3   : > { %6477 = vmatpush1.msra.mxu0 %v12606_v49  ;;  %6558 = vmatpush1.msra.mxu1 %v12607_v37  ;;  %v12659_v49 = vld [vmem:[%s19591_s5 + $0xfc0] sm:$0xff]  ;;  %v12660_v37 = vld [vmem:[%s19591_s5 + $0xdb8] sm:$0xff] }
 0x7a4   : > { %6478 = vmatprep.subr.mxu0 %v12608_v50  ;;  %6559 = vmatprep.subr.mxu1 %v12609_v46  ;;  %v12661_v50 = vld [vmem:[%s19591_s5 + $0xfb8] sm:$0xff]  ;;  %v12662_v46 = vld [vmem:[%s19591_s5 + $0xdb0] sm:$0xff] }
 0x7a5   : > { %6479 = vmatpush1.msra.mxu0 %v12610_v14  ;;  %6560 = vmatpush1.msra.mxu1 %v12611_v31  ;;  %v12663_v14 = vld [vmem:[%s19591_s5 + $0xfb0] sm:$0xff]  ;;  %v12664_v31 = vld [vmem:[%s19591_s5 + $0xda8] sm:$0xff] }
 0x7a6   : > { %6480 = vmatprep.subr.mxu0 %v12612_v10  ;;  %6561 = vmatprep.subr.mxu1 %v12613_v38  ;;  %v12665_v10 = vld [vmem:[%s19591_s5 + $0xfa8] sm:$0xff]  ;;  %v12666_v38 = vld [vmem:[%s19591_s5 + $0xda0] sm:$0xff] }
 0x7a7   : > { %6481 = vmatpush1.msra.mxu0 %v12614_v13  ;;  %6562 = vmatpush1.msra.mxu1 %v12615_v22  ;;  %v12667_v13 = vld [vmem:[%s19591_s5 + $0xfa0] sm:$0xff]  ;;  %v12668_v22 = vld [vmem:[%s19591_s5 + $0xd98] sm:$0xff] }
 0x7a8   : > { %6482 = vmatprep.subr.mxu0 %v12616_v11  ;;  %6563 = vmatprep.subr.mxu1 %v12617_v33  ;;  %v12669_v11 = vld [vmem:[%s19591_s5 + $0xf98] sm:$0xff]  ;;  %v12670_v33 = vld [vmem:[%s19591_s5 + $0xd90] sm:$0xff] }
 0x7a9   : > { %6483 = vmatpush1.msra.mxu0 %v12618_v27  ;;  %6564 = vmatpush1.msra.mxu1 %v12619_v30  ;;  %v12671_v27 = vld [vmem:[%s19591_s5 + $0xf90] sm:$0xff]  ;;  %v12672_v30 = vld [vmem:[%s19591_s5 + $0xd88] sm:$0xff] }
 0x7aa   : > { %6484 = vmatprep.subr.mxu0 %v12620_v56  ;;  %6565 = vmatprep.subr.mxu1 %v12621_v44  ;;  %v12673_v56 = vld [vmem:[%s19591_s5 + $0xf88] sm:$0xff]  ;;  %v12674_v44 = vld [vmem:[%s19591_s5 + $0xd80] sm:$0xff] }
 0x7ab   : > { %6485 = vmatpush1.msra.mxu0 %v12622_v15  ;;  %6566 = vmatpush1.msra.mxu1 %v12623_v0  ;;  %v12675_v15 = vld [vmem:[%s19591_s5 + $0xf80] sm:$0xff]  ;;  %v12676_v0 = vld [vmem:[%s19591_s5 + $0xd78] sm:$0xff] }
 0x7ac   : > { %6486 = vmatprep.subr.mxu0 %v12624_v62  ;;  %6567 = vmatprep.subr.mxu1 %v12625_v19  ;;  %v12677_v62 = vld [vmem:[%s19591_s5 + $0xf78] sm:$0xff]  ;;  %v12678_v19 = vld [vmem:[%s19591_s5 + $0xd70] sm:$0xff] }
 0x7ad   : > { %6487 = vmatpush1.msra.mxu0 %v12626_v39  ;;  %6568 = vmatpush1.msra.mxu1 %v12627_v52  ;;  %v12679_v39 = vld [vmem:[%s19591_s5 + $0xf70] sm:$0xff]  ;;  %v12680_v52 = vld [vmem:[%s19591_s5 + $0xd68] sm:$0xff] }
 0x7ae   : > { %6488 = vmatprep.subr.mxu0 %v12628_v25  ;;  %6569 = vmatprep.subr.mxu1 %v12629_v9  ;;  %v12681_v25 = vld [vmem:[%s19591_s5 + $0xf68] sm:$0xff]  ;;  %v12682_v9 = vld [vmem:[%s19591_s5 + $0xd60] sm:$0xff] }
 0x7af   : > { %6489 = vmatpush1.msra.mxu0 %v12630_v2  ;;  %6570 = vmatpush1.msra.mxu1 %v12631_v36  ;;  %v12683_v2 = vld [vmem:[%s19591_s5 + $0xf60] sm:$0xff]  ;;  %v12684_v36 = vld [vmem:[%s19591_s5 + $0xd58] sm:$0xff] }
 0x7b0   : > { %6490 = vmatprep.subr.mxu0 %v12632_v6  ;;  %6571 = vmatprep.subr.mxu1 %v12633_v17  ;;  %v12685_v6 = vld [vmem:[%s19591_s5 + $0xf58] sm:$0xff]  ;;  %v12686_v17 = vld [vmem:[%s19591_s5 + $0xd50] sm:$0xff] }
 0x7b1   : > { %6491 = vmatpush1.msra.mxu0 %v12634_v34  ;;  %6572 = vmatpush1.msra.mxu1 %v12635_v55  ;;  %v12687_v34 = vld [vmem:[%s19591_s5 + $0xf50] sm:$0xff]  ;;  %v12688_v55 = vld [vmem:[%s19591_s5 + $0xd48] sm:$0xff] }
 0x7b2   : > { %6492 = vmatprep.subr.mxu0 %v12636_v53  ;;  %6573 = vmatprep.subr.mxu1 %v12637_v47  ;;  %v12689_v53 = vld [vmem:[%s19591_s5 + $0xf48] sm:$0xff]  ;;  %v12690_v47 = vld [vmem:[%s19591_s5 + $0xd40] sm:$0xff] }
 0x7b3   : > { %6493 = vmatpush1.msra.mxu0 %v12638_v54  ;;  %6574 = vmatpush1.msra.mxu1 %v12639_v18  ;;  %v12691_v54 = vld [vmem:[%s19591_s5 + $0xf40] sm:$0xff]  ;;  %v12692_v18 = vld [vmem:[%s19591_s5 + $0xd38] sm:$0xff] }
 0x7b4   : > { %6494 = vmatprep.subr.mxu0 %v12640_v43  ;;  %6575 = vmatprep.subr.mxu1 %v12641_v40  ;;  %v12693_v43 = vld [vmem:[%s19591_s5 + $0xf38] sm:$0xff]  ;;  %v12694_v40 = vld [vmem:[%s19591_s5 + $0xd30] sm:$0xff] }
 0x7b5   : > { %6495 = vmatpush1.msra.mxu0 %v12642_v24  ;;  %6576 = vmatpush1.msra.mxu1 %v12643_v4  ;;  %v12695_v24 = vld [vmem:[%s19591_s5 + $0xf30] sm:$0xff]  ;;  %v12696_v4 = vld [vmem:[%s19591_s5 + $0xd28] sm:$0xff] }
 0x7b6   : > { %6496 = vmatprep.subr.mxu0 %v12644_v35  ;;  %6577 = vmatprep.subr.mxu1 %v12645_v3  ;;  %v12697_v35 = vld [vmem:[%s19591_s5 + $0xf28] sm:$0xff]  ;;  %v12698_v3 = vld [vmem:[%s19591_s5 + $0xd20] sm:$0xff] }
 0x7b7   : > { %6497 = vmatpush2.msra.mxu0 %v12646_v45  ;;  %6578 = vmatpush2.msra.mxu1 %v12647_v60  ;;  %v12699_v45 = vld [vmem:[%s19591_s5 + $0xf20] sm:$0xff]  ;;  %v12700_v60 = vld [vmem:[%s19591_s5 + $0xd18] sm:$0xff] }
 0x7b8   : > { %6498 = vmatprep.subr.mxu0 %v12648_v51  ;;  %6579 = vmatprep.subr.mxu1 %v12649_v7  ;;  %v12701_v51 = vld [vmem:[%s19591_s5 + $0xf18] sm:$0xff]  ;;  %v12702_v7 = vld [vmem:[%s19591_s5 + $0xd10] sm:$0xff] }
 0x7b9   : > { %6499 = vmatpush2.msra.mxu0 %v12650_v5  ;;  %6580 = vmatpush2.msra.mxu1 %v12651_v1  ;;  %v12703_v5 = vld [vmem:[%s19591_s5 + $0xf10] sm:$0xff]  ;;  %v12704_v1 = vld [vmem:[%s19591_s5 + $0xd08] sm:$0xff] }
 0x7ba   : > { %6500 = vmatprep.subr.mxu0 %v12652_v16  ;;  %6581 = vmatprep.subr.mxu1 %v12653_v26  ;;  %v12705_v16 = vld [vmem:[%s19591_s5 + $0xf08] sm:$0xff]  ;;  %v12706_v26 = vld [vmem:[%s19591_s5 + $0xd00] sm:$0xff] }
 0x7bb   : > { %6501 = vmatpush2.msra.mxu0 %v12654_v21  ;;  %6582 = vmatpush2.msra.mxu1 %v12655_v48  ;;  %v12707_v21 = vld [vmem:[%s19591_s5 + $0xf00] sm:$0xff] }
 0x7bc   : > { %6502 = vmatprep.subr.mxu0 %v12656_v28  ;;  %6583 = vmatprep.subr.mxu1 %v12657_v61  ;;  %v19707_v48 = vld [vmem:[#allocation36_spill] sm:$0xff]  ;;  %v12708_v61 = vld [vmem:[%s19591_s5 + $0x10f8] sm:$0xff] }
 0x7bd   : > { %6503 = vmatpush2.msra.mxu0 %v12658_v58  ;;  %6584 = vmatpush2.msra.mxu1 %v12659_v49  ;;  %v19708_v28 = vld [vmem:[#allocation40_spill] sm:$0xff]  ;;  %v19709_v58 = vld [vmem:[#allocation39_spill] sm:$0xff] }
 0x7be   : > { %6504 = vmatprep.subr.mxu0 %v12660_v37  ;;  %6585 = vmatprep.subr.mxu1 %v12661_v50  ;;  %v19710_v49 = vld [vmem:[#allocation43_spill] sm:$0xff]  ;;  %v12709_v37 = vld [vmem:[%s19591_s5 + $0x10f0] sm:$0xff]  ;;  %v12710_v50 = vld [vmem:[%s19591_s5 + $0x10e8] sm:$0xff] }
 0x7bf   : > { %6505 = vmatpush2.msra.mxu0 %v12662_v46  ;;  %6586 = vmatpush2.msra.mxu1 %v12663_v14  ;;  %v12711_v46 = vld [vmem:[%s19591_s5 + $0x10e0] sm:$0xff]  ;;  %v19711_v14 = vld [vmem:[#allocation42_spill] sm:$0xff] }
 0x7c0   : > { %6506 = vmatprep.subr.mxu0 %v12664_v31  ;;  %6587 = vmatprep.subr.mxu1 %v12665_v10  ;;  %v19712_v31 = vld [vmem:[#allocation38_spill] sm:$0xff]  ;;  %v12712_v10 = vld [vmem:[%s19591_s5 + $0x10d8] sm:$0xff] }
 0x7c1   : > { %6507 = vmatpush2.msra.mxu0 %v12666_v38  ;;  %6588 = vmatpush2.msra.mxu1 %v12667_v13  ;;  %v12713_v38 = vld [vmem:[%s19591_s5 + $0x10d0] sm:$0xff]  ;;  %v19713_v13 = vld [vmem:[#allocation45_spill] sm:$0xff] }
 0x7c2   : > { %6508 = vmatprep.subr.mxu0 %v12668_v22  ;;  %6589 = vmatprep.subr.mxu1 %v12669_v11  ;;  %v12714_v22 = vld [vmem:[%s19591_s5 + $0x10c8] sm:$0xff]  ;;  %v12715_v11 = vld [vmem:[%s19593_s7] sm:$0xff] }
 0x7c3   : > { %6509 = vmatpush2.msra.mxu0 %v12670_v33  ;;  %6590 = vmatpush2.msra.mxu1 %v12671_v27  ;;  %v12716_v33 = vld [vmem:[%s19591_s5 + $0x10c0] sm:$0xff]  ;;  %v12717_v27 = vld [vmem:[%s19591_s5 + $0x10b8] sm:$0xff] }
 0x7c4   : > { %6510 = vmatprep.subr.mxu0 %v12672_v30  ;;  %6591 = vmatprep.subr.mxu1 %v12673_v56  ;;  %v12718_v30 = vld [vmem:[%s19591_s5 + $0x10b0] sm:$0xff]  ;;  %v12719_v56 = vld [vmem:[%s19591_s5 + $0x10a8] sm:$0xff] }
 0x7c5   : > { %6511 = vmatpush2.msra.mxu0 %v12674_v44  ;;  %6592 = vmatpush2.msra.mxu1 %v12675_v15  ;;  %v12720_v44 = vld [vmem:[%s19591_s5 + $0x10a0] sm:$0xff]  ;;  %v12721_v15 = vld [vmem:[%s19591_s5 + $0x1098] sm:$0xff] }
 0x7c6   : > { %6512 = vmatprep.subr.mxu0 %v12676_v0  ;;  %6593 = vmatprep.subr.mxu1 %v12677_v62  ;;  %v12722_v0 = vld [vmem:[%s19591_s5 + $0x1090] sm:$0xff]  ;;  %v12723_v62 = vld [vmem:[%s19591_s5 + $0x1088] sm:$0xff] }
 0x7c7   : > { %6513 = vmatpush2.msra.mxu0 %v12678_v19  ;;  %6594 = vmatpush2.msra.mxu1 %v12679_v39  ;;  %v12724_v19 = vld [vmem:[%s19591_s5 + $0x1080] sm:$0xff]  ;;  %v12725_v39 = vld [vmem:[%s19591_s5 + $0x1078] sm:$0xff] }
 0x7c8   : > { %6514 = vmatprep.subr.mxu0 %v12680_v52  ;;  %6595 = vmatprep.subr.mxu1 %v12681_v25  ;;  %v12726_v52 = vld [vmem:[%s19591_s5 + $0x1070] sm:$0xff]  ;;  %v12727_v25 = vld [vmem:[%s19591_s5 + $0x1068] sm:$0xff] }
 0x7c9   : > { %6515 = vmatpush2.msra.mxu0 %v12682_v9  ;;  %6596 = vmatpush2.msra.mxu1 %v12683_v2  ;;  %v12728_v9 = vld [vmem:[%s19591_s5 + $0x1060] sm:$0xff]  ;;  %v12729_v2 = vld [vmem:[%s19591_s5 + $0x1058] sm:$0xff] }
 0x7ca   : > { %6516 = vmatprep.subr.mxu0 %v12684_v36  ;;  %6597 = vmatprep.subr.mxu1 %v12685_v6  ;;  %v12730_v36 = vld [vmem:[%s19591_s5 + $0x1050] sm:$0xff]  ;;  %v12731_v6 = vld [vmem:[%s19591_s5 + $0x1048] sm:$0xff] }
 0x7cb   : > { %6517 = vmatpush2.msra.mxu0 %v12686_v17  ;;  %6598 = vmatpush2.msra.mxu1 %v12687_v34  ;;  %v12732_v17 = vld [vmem:[%s19591_s5 + $0x1040] sm:$0xff]  ;;  %v12733_v34 = vld [vmem:[%s19591_s5 + $0x1038] sm:$0xff] }
 0x7cc   : > { %6518 = vmatprep.subr.mxu0 %v12688_v55  ;;  %6599 = vmatprep.subr.mxu1 %v12689_v53  ;;  %v12734_v55 = vld [vmem:[%s19591_s5 + $0x1030] sm:$0xff]  ;;  %v12735_v53 = vld [vmem:[%s19591_s5 + $0x1028] sm:$0xff] }
 0x7cd   : > { %6519 = vmatpush2.msra.mxu0 %v12690_v47  ;;  %6600 = vmatpush2.msra.mxu1 %v12691_v54  ;;  %v12736_v47 = vld [vmem:[%s19591_s5 + $0x1020] sm:$0xff]  ;;  %v12737_v54 = vld [vmem:[%s19591_s5 + $0x1018] sm:$0xff] }
 0x7ce   : > { %6520 = vmatprep.subr.mxu0 %v12692_v18  ;;  %6601 = vmatprep.subr.mxu1 %v12693_v43  ;;  %v12738_v18 = vld [vmem:[%s19591_s5 + $0x1010] sm:$0xff]  ;;  %v12739_v43 = vld [vmem:[%s19591_s5 + $0x1008] sm:$0xff] }
 0x7cf   : > { %6521 = vmatpush2.msra.mxu0 %v12694_v40  ;;  %6602 = vmatpush2.msra.mxu1 %v12695_v24  ;;  %v12740_v40 = vld [vmem:[%s19591_s5 + $0x1000] sm:$0xff]  ;;  %v12741_v24 = vld [vmem:[%s19591_s5 + $0x11f8] sm:$0xff] }
 0x7d0   : > { %6522 = vmatprep.subr.mxu0 %v12696_v4  ;;  %6603 = vmatprep.subr.mxu1 %v12697_v35  ;;  %v12742_v4 = vld [vmem:[%s19591_s5 + $0x11f0] sm:$0xff]  ;;  %v12743_v35 = vld [vmem:[%s19591_s5 + $0x11e8] sm:$0xff] }
 0x7d1   : > { %6523 = vmatpush2.msra.mxu0 %v12698_v3  ;;  %6604 = vmatpush2.msra.mxu1 %v12699_v45  ;;  %v12744_v3 = vld [vmem:[%s19591_s5 + $0x11e0] sm:$0xff]  ;;  %v12745_v45 = vld [vmem:[%s19591_s5 + $0x11d8] sm:$0xff] }
 0x7d2   : > { %6524 = vmatprep.subr.mxu0 %v12700_v60  ;;  %6605 = vmatprep.subr.mxu1 %v12701_v51  ;;  %v12746_v60 = vld [vmem:[%s19591_s5 + $0x11d0] sm:$0xff]  ;;  %v12747_v51 = vld [vmem:[%s19591_s5 + $0x11c8] sm:$0xff] }
 0x7d3   : > { %6525 = vmatpush2.msra.mxu0 %v12702_v7  ;;  %6606 = vmatpush2.msra.mxu1 %v12703_v5  ;;  %v12748_v7 = vld [vmem:[%s19591_s5 + $0x11c0] sm:$0xff]  ;;  %v12749_v5 = vld [vmem:[%s19591_s5 + $0x11b8] sm:$0xff] }
 0x7d4   : > { %6526 = vmatprep.subr.mxu0 %v12704_v1  ;;  %6607 = vmatprep.subr.mxu1 %v12705_v16  ;;  %v12750_v1 = vld [vmem:[%s19591_s5 + $0x11b0] sm:$0xff]  ;;  %v12751_v16 = vld [vmem:[%s19591_s5 + $0x11a8] sm:$0xff] }
 0x7d5   : > { %6527 = vmatpush2.msra.mxu0 %v12706_v26  ;;  %6608 = vmatpush2.msra.mxu1 %v12707_v21  ;;  %v12752_v26 = vld [vmem:[%s19591_s5 + $0x11a0] sm:$0xff]  ;;  %v12753_v21 = vld [vmem:[%s19591_s5 + $0x1198] sm:$0xff] }
 0x7d6   : > { %6529 = vmatmul.mubr.f32.vlgmr.msra.gmra.mxu0 %v19707_v48  ;;  %6610 = vmatmul.mubr.f32.vlgmr.msra.gmra.mxu1 %v19708_v28  ;;  %v12754_v48 = vld [vmem:[%s19591_s5 + $0x1190] sm:$0xff]  ;;  %v12755_v28 = vld [vmem:[%s19591_s5 + $0x1188] sm:$0xff] }
 0x7d7   : > { %6626 = vmatprep.subr.mxu0 %v12708_v61  ;;  %6534 = vmatprep.mubr.f32.mxu0 %v19709_v58  ;;  %v12756_v61 = vld [vmem:[%s19591_s5 + $0x1180] sm:$0xff]  ;;  %v12757_v58 = vld [vmem:[%s19591_s5 + $0x1178] sm:$0xff] }
 0x7d8   : > { %6615 = vmatprep.mubr.f32.mxu1 %v19710_v49  ;;  %6627 = vmatpush1.msra.mxu0 %v12709_v37  ;;  %v12758_v49 = vld [vmem:[%s19591_s5 + $0x1170] sm:$0xff]  ;;  %v12759_v37 = vld [vmem:[%s19591_s5 + $0x1168] sm:$0xff] }
 0x7d9   : > { %6628 = vmatprep.subr.mxu0 %v12710_v50  ;;  %v12760_v50 = vld [vmem:[%s19591_s5 + $0x1160] sm:$0xff] }
 0x7da   : > { %6629 = vmatpush1.msra.mxu0 %v12711_v46  ;;  %6616 = vmatmul.mubr.f32.gmra.mxu1 %v19711_v14  ;;  %v12761_v46 = vld [vmem:[%s19591_s5 + $0x1158] sm:$0xff]  ;;  %v12762_v14 = vld [vmem:[%s19591_s5 + $0x1150] sm:$0xff] }
 0x7db   : > { %6535 = vmatmul.mubr.f32.gmra.mxu0 %v19712_v31  ;;  %6630 = vmatprep.subr.mxu0 %v12712_v10  ;;  %v12763_v31 = vld [vmem:[%s19591_s5 + $0x1148] sm:$0xff]  ;;  %v12764_v10 = vld [vmem:[%s19591_s5 + $0x1140] sm:$0xff] }
 0x7dc   : > { %6631 = vmatpush1.msra.mxu0 %v12713_v38  ;;  %6690 = vmatprep.mubr.f32.mxu0 %v19713_v13  ;;  %v12765_v38 = vld [vmem:[%s19591_s5 + $0x1138] sm:$0xff]  ;;  %v12766_v13 = vld [vmem:[%s19591_s5 + $0x1130] sm:$0xff] }
 0x7dd   : > { %6632 = vmatprep.subr.mxu0 %v12714_v22  ;;  %11815 = vmatprep.mubr.msk.f32.mxu1 %vm1356_vm1, %v12715_v11  ;;  %v12767_v22 = vld [vmem:[%s19591_s5 + $0x1128] sm:$0xff]  ;;  %v12768_v11 = vld [vmem:[%s19591_s5 + $0x1120] sm:$0xff] }
 0x7de   : > { %6633 = vmatpush1.msra.mxu0 %v12716_v33  ;;  %v12769_v33 = vld [vmem:[%s19591_s5 + $0x1118] sm:$0xff] }
 0x7df   : > { %6634 = vmatprep.subr.mxu0 %v12717_v27  ;;  %v12770_v27 = vld [vmem:[%s19591_s5 + $0x1110] sm:$0xff] }
 0x7e0   : > { %6635 = vmatpush1.msra.mxu0 %v12718_v30  ;;  %v12771_v30 = vld [vmem:[%s19591_s5 + $0x1108] sm:$0xff] }
 0x7e1   : > { %6636 = vmatprep.subr.mxu0 %v12719_v56  ;;  %v12772_v56 = vld [vmem:[%s19591_s5 + $0x1100] sm:$0xff] }
 0x7e2   : > { %6637 = vmatpush1.msra.mxu0 %v12720_v44  ;;  %v19714_v44 = vld [vmem:[#allocation44_spill] sm:$0xff] }
 0x7e3   : > { %6638 = vmatprep.subr.mxu0 %v12721_v15  ;;  %v12773_v15 = vld [vmem:[%s19595_s9 + $0x78] sm:$0x1] }
 0x7e4   : > { %6639 = vmatpush1.msra.mxu0 %v12722_v0  ;;  %v19715_v0 = vld [vmem:[#allocation47_spill] sm:$0xff] }
 0x7e5   : > { %6640 = vmatprep.subr.mxu0 %v12723_v62  ;;  %v12774_v62 = vld [vmem:[%s19595_s9 + $0x70] sm:$0xff] }
 0x7e6   : > { %6641 = vmatpush1.msra.mxu0 %v12724_v19  ;;  %v19716_v19 = vld [vmem:[#allocation46_spill] sm:$0xff] }
 0x7e7   : > { %6642 = vmatprep.subr.mxu0 %v12725_v39  ;;  %v12775_v39 = vld [vmem:[%s19596_s10 + $0x48] sm:$0x1] }
 0x7e8   : > { %6643 = vmatpush1.msra.mxu0 %v12726_v52  ;;  %v18333_v52 = vpop.f32.mrf.mxu0 }
 0x7e9   : > { %6644 = vmatprep.subr.mxu0 %v12727_v25 }
 0x7ea   : > { %6645 = vmatpush1.msra.mxu0 %v12728_v9  ;;  %v18335_v25 = vpop.f32.mrf.mxu0  ;;  %v18337_v9 = vpop.f32.mrf.mxu1 }
 0x7eb   : > { %6646 = vmatprep.subr.mxu0 %v12729_v2 }
 0x7ec   : > { %6647 = vmatpush1.msra.mxu0 %v12730_v36  ;;  %v18339_v2 = vpop.f32.mrf.mxu0  ;;  %v18341_v36 = vpop.f32.mrf.mxu1 }
 0x7ed   : > { %6648 = vmatprep.subr.mxu0 %v12731_v6 }
 0x7ee   : > { %6649 = vmatpush1.msra.mxu0 %v12732_v17  ;;  %v18343_v6 = vpop.f32.mrf.mxu0  ;;  %v18345_v17 = vpop.f32.mrf.mxu1 }
 0x7ef   : > { %6650 = vmatprep.subr.mxu0 %v12733_v34 }
 0x7f0   : > { %6651 = vmatpush1.msra.mxu0 %v12734_v55  ;;  %v18347_v34 = vpop.f32.mrf.mxu0  ;;  %v18349_v55 = vpop.f32.mrf.mxu1 }
 0x7f1   : > { %6652 = vmatprep.subr.mxu0 %v12735_v53  ;;  %19717 = vst [vmem:[#allocation49_spill] sm:$0xff] %v18347_v34 }
 0x7f2   : > { %6653 = vmatpush1.msra.mxu0 %v12736_v47  ;;  %v18351_v53 = vpop.f32.mrf.mxu0  ;;  %v18353_v47 = vpop.f32.mrf.mxu1 }
 0x7f3   : > { %6654 = vmatprep.subr.mxu0 %v12737_v54  ;;  %19718 = vst [vmem:[#allocation51_spill] sm:$0xff] %v18353_v47 }
 0x7f4   : > { %6655 = vmatpush1.msra.mxu0 %v12738_v18  ;;  %v18355_v54 = vpop.f32.mrf.mxu0  ;;  %v18357_v18 = vpop.f32.mrf.mxu1 }
 0x7f5   : > { %6656 = vmatprep.subr.mxu0 %v12739_v43  ;;  %19719 = vst [vmem:[#allocation48_spill] sm:$0xff] %v18357_v18 }
 0x7f6   : > { %6657 = vmatpush1.msra.mxu0 %v12740_v40  ;;  %v18359_v43 = vpop.f32.mrf.mxu0 }
 0x7f7   : > { %6658 = vmatprep.subr.mxu0 %v12741_v24  ;;  %v18361_v24 = vpop.f32.mrf.mxu1 }
 0x7f8   : > { %6659 = vmatpush2.msra.mxu0 %v12742_v4  ;;  %v6052_v40 = vpop.f32.mrf.mxu0 }
 0x7f9   : > { %6660 = vmatprep.subr.mxu0 %v12743_v35  ;;  %v18363_v35 = vpop.f32.mrf.mxu1 }
 0x7fa   : > { %6661 = vmatpush2.msra.mxu0 %v12744_v3  ;;  %v6054_v4 = vpop.f32.mrf.mxu0 }
 0x7fb   : > { %6662 = vmatprep.subr.mxu0 %v12745_v45  ;;  %v6129_v3 = vpop.f32.mrf.mxu1 }
 0x7fc   : > { %6663 = vmatpush2.msra.mxu0 %v12746_v60  ;;  %v6058_v45 = vpop.f32.mrf.mxu0 }
 0x7fd   : > { %6664 = vmatprep.subr.mxu0 %v12747_v51  ;;  %v6131_v60 = vpop.f32.mrf.mxu1 }
 0x7fe   : > { %6665 = vmatpush2.msra.mxu0 %v12748_v7  ;;  %v6060_v51 = vpop.f32.mrf.mxu0 }
 0x7ff   : > { %6666 = vmatprep.subr.mxu0 %v12749_v5  ;;  %v6135_v5 = vpop.f32.mrf.mxu1 }
 0x800   : > { %6667 = vmatpush2.msra.mxu0 %v12750_v1 }
 0x801   : > { %6668 = vmatprep.subr.mxu0 %v12751_v16  ;;  %v6137_v16 = vpop.f32.mrf.mxu1 }
 0x802   : > { %6669 = vmatpush2.msra.mxu0 %v12752_v26 }
 0x803   : > { %6670 = vmatprep.subr.mxu0 %v12753_v21 }
 0x804   : > { %6671 = vmatpush2.msra.mxu0 %v12754_v48 }
 0x805   : > { %6672 = vmatprep.subr.mxu0 %v12755_v28 }
 0x806   : > { %6673 = vmatpush2.msra.mxu0 %v12756_v61 }
 0x807   : > { %6674 = vmatprep.subr.mxu0 %v12757_v58 }
 0x808   : > { %6675 = vmatpush2.msra.mxu0 %v12758_v49 }
 0x809   : > { %6676 = vmatprep.subr.mxu0 %v12759_v37 }
 0x80a   : > { %6677 = vmatpush2.msra.mxu0 %v12760_v50 }
 0x80b   : > { %6678 = vmatprep.subr.mxu0 %v12761_v46 }
 0x80c   : > { %6679 = vmatpush2.msra.mxu0 %v12762_v14  ;;  %v6130_v14 = vadd.f32 %v6129_v3, %v6052_v40 }
 0x80d   : > { %6680 = vmatprep.subr.mxu0 %v12763_v31  ;;  %v6132_v31 = vadd.f32 %v6131_v60, %v6054_v4 }
 0x80e   : > { %6681 = vmatpush2.msra.mxu0 %v12764_v10  ;;  %v6206_v7 = vpop.f32.mrf.mxu0  ;;  %v6287_v26 = vpop.f32.mrf.mxu1 }
 0x80f   : > { %6682 = vmatprep.subr.mxu0 %v12765_v38  ;;  %v6217_v10 = vadd.f32 %v6206_v7, %v6130_v14 }
 0x810   : > { %6683 = vmatpush2.msra.mxu0 %v12766_v13  ;;  %v6208_v1 = vpop.f32.mrf.mxu0  ;;  %v6289_v48 = vpop.f32.mrf.mxu1 }
 0x811   : > { %6684 = vmatprep.subr.mxu0 %v12767_v22  ;;  %v6218_v22 = vadd.f32 %v6208_v1, %v6132_v31 }
 0x812   : > { %6685 = vmatpush2.msra.mxu0 %v12768_v11 }
 0x813   : > { %6686 = vmatprep.subr.mxu0 %v12769_v33  ;;  %v6298_v33 = vadd.f32 %v6287_v26, %v6217_v10 }
 0x814   : > { %6687 = vmatpush2.msra.mxu0 %v12770_v27  ;;  %v6212_v21 = vpop.f32.mrf.mxu0  ;;  %v6293_v58 = vpop.f32.mrf.mxu1 }
 0x815   : > { %6688 = vmatprep.subr.mxu0 %v12771_v30  ;;  %v6138_v30 = vadd.f32 %v6137_v16, %v6060_v51 }
 0x816   : > { %6689 = vmatpush2.msra.mxu0 %v12772_v56  ;;  %v6214_v28 = vpop.f32.mrf.mxu0  ;;  %v6295_v37 = vpop.f32.mrf.mxu1  ;;  %v6299_v56 = vadd.f32 %v6289_v48, %v6218_v22 }
 0x817   : > { %6691 = vmatmul.mubr.f32.vlgmr.msra.gmra.mxu0 %v19714_v44  ;;  %11891 = vmatprep.subr.msk.mxu0 %vm4249_vm4, %v12773_v15 }
 0x818   : > { %6696 = vmatprep.mubr.f32.mxu0 %v19715_v0  ;;  %11892 = vmatpush3.msk.msra.mxu0 %vm4249_vm4, %v12773_v15  ;;  %v6136_v15 = vadd.f32 %v6135_v5, %v6058_v45  ;;  %v6220_v0 = vadd.f32 %v6214_v28, %v6138_v30 }
 0x819   : > { %11893 = vmatprep.subr.mxu0 %v12774_v62 }
 0x81a   : > { %11894 = vmatpush3.msra.mxu0 %v12774_v62  ;;  %v6219_v47 = vadd.f32 %v6212_v21, %v6136_v15  ;;  %v6301_v40 = vadd.f32 %v6295_v37, %v6220_v0 }
 0x81b   : > { %6697 = vmatmul.mubr.f32.gmra.mxu0 %v19716_v19  ;;  %11534 = vmatprep.subr.msk.mxu0 %vm4249_vm4, %v12775_v39 }
 0x81c   : > { %v6300_v7 = vadd.f32 %v6293_v58, %v6219_v47 }
 0x852   : > { %v6368_v61 = vpop.f32.mrf.mxu0  ;;  %v6449_v50 = vpop.f32.mrf.mxu1 }
 0x853   : > { %v6379_v44 = vadd.f32 %v6368_v61, %v6298_v33 }
 0x854   : > { %v6370_v49 = vpop.f32.mrf.mxu0  ;;  %v6451_v38 = vpop.f32.mrf.mxu1 }
 0x855   : > { %v6380_v19 = vadd.f32 %v6370_v49, %v6299_v56  ;;  %v6460_v34 = vadd.f32 %v6449_v50, %v6379_v44 }
 0x857   : > { %v6461_v3 = vadd.f32 %v6451_v38, %v6380_v19 }
 0x858   : > { %v6374_v46 = vpop.f32.mrf.mxu0  ;;  %v6455_v27 = vpop.f32.mrf.mxu1 }
 0x859   : > { %v6381_v31 = vadd.f32 %v6374_v46, %v6300_v7  ;;  %v8592_v7 = vld [vmem:[%s19598_s12 + $0x8] sm:$0xff] }
 0x85a   : > { %v6376_v13 = vpop.f32.mrf.mxu0  ;;  %v6457_v39 = vpop.f32.mrf.mxu1 }
 0x85b   : > { %v6382_v1 = vadd.f32 %v6376_v13, %v6301_v40  ;;  %v6462_v49 = vadd.f32 %v6455_v27, %v6381_v31  ;;  %v9261_v31 = vld [vmem:[%s19600_s14] sm:$0xff] }
 0x85d   : > { %v6463_v48 = vadd.f32 %v6457_v39, %v6382_v1 }
 0x896   : > { %v6530_v11 = vpop.f32.mrf.mxu0  ;;  %v6611_v18 = vpop.f32.mrf.mxu1 }
 0x897   : > { %v6541_v60 = vadd.f32 %v6530_v11, %v6460_v34 }
 0x898   : > { %v6532_v62 = vpop.f32.mrf.mxu0  ;;  %v6613_v26 = vpop.f32.mrf.mxu1 }
 0x899   : > { %v6542_v14 = vadd.f32 %v6532_v62, %v6461_v3  ;;  %v6622_v16 = vadd.f32 %v6611_v18, %v6541_v60 }
 0x89a   : > { %v6617_v28 = vpop.f32.mrf.mxu1 }
 0x89b   : > { %v6536_v4 = vpop.f32.mrf.mxu0  ;;  %v6623_v5 = vadd.f32 %v6613_v26, %v6542_v14  ;;  %v8591_v14 = vld [vmem:[%s19598_s12] sm:$0xff] }
 0x89c   : > { %v6543_v37 = vadd.f32 %v6536_v4, %v6462_v49  ;;  %v6619_v38 = vpop.f32.mrf.mxu1 }
 0x89d   : > { %v6538_v51 = vpop.f32.mrf.mxu0 }
 0x89e   : > { %v6544_v21 = vadd.f32 %v6538_v51, %v6463_v48  ;;  %v6624_v11 = vadd.f32 %v6617_v28, %v6543_v37 }
 0x8a0   : > { %v6625_v58 = vadd.f32 %v6619_v38, %v6544_v21 }
 0x8d7   : > { %v6692_v45 = vpop.f32.mrf.mxu0 }
 0x8d8   : > { %v6703_v61 = vadd.f32 %v6692_v45, %v6622_v16 }
 0x8d9   : > { %v6694_v50 = vpop.f32.mrf.mxu0 }
 0x8da   : > { %v6704_v10 = vadd.f32 %v6694_v50, %v6623_v5  ;;  %v6707_v34 = vadd.f32 %v6703_v61, %v15923_v42 }
 0x8db   : > { %v6698_v22 = vpop.f32.mrf.mxu0 }
 0x8dc   : > { %v6708_v47 = vadd.f32 %v6704_v10, %v15923_v42  ;;  %v6705_v56 = vadd.f32 %v6698_v22, %v6624_v11 }
 0x8dd   : > { %v6700_v46 = vpop.f32.mrf.mxu0 }
 0x8de   : > { %v6715_v13 = vcombine.low %v6707_v34, %v6708_v47  ;;  %v6716_v18 = vcombine.high %v6707_v34, %v6708_v47  ;;  %v6706_v33 = vadd.f32 %v6700_v46, %v6625_v58  ;;  %v6709_v40 = vadd.f32 %v6705_v56, %v15921_v32 }
 0x8e0   : > { %v6723_v30 = vrot.slane %v6715_v13, %v15928_v29  ;;  %v6730_v27 = vrot.slane %v6716_v18, %v15928_v29  ;;  %v6710_v62 = vadd.f32 %v6706_v33, %v15921_v32 }
 0x8e2   : > { %v6731_v44 = vcombine.high %v6723_v30, %v6723_v30  ;;  %v6739_v15 = vrot.slane %v6723_v30, %v15928_v29  ;;  %v6746_v0 = vrot.slane %v6730_v27, %v15928_v29  ;;  %v6732_v16 = vcombine.high %v6730_v27, %v6730_v27 }
 0x8e3   : > { %v6765_v48 = vcombine.low %v6709_v40, %v6710_v62  ;;  %v6766_v32 = vcombine.high %v6709_v40, %v6710_v62 }
 0x8e4   : > { %v6818_v42 = vrot.slane %v6739_v15, %v15945_v59  ;;  %v6822_v19 = vrot.slane %v6739_v15, %v15948_v20  ;;  %v6850_v39 = vrot.slane %v6746_v0, %v15945_v59  ;;  %v6854_v4 = vrot.slane %v6746_v0, %v15948_v20 }
 0x8e5   : > { %v18378_v3 = vrot.slane %v6731_v44, %v15928_v29  ;;  %v6761_v45 = vcombine.high %v6739_v15, %v6739_v15  ;;  %v18404_v58 = vrot.slane %v6765_v48, %v15928_v29  ;;  %v6762_v48 = vcombine.high %v6746_v0, %v6746_v0 }
 0x8e6   : > { %v6977_v60 = vsel %vm2585_vm2, %v6818_v42, -inf  ;;  %v6978_v1 = vsel %vm2586_vm3, %v6822_v19, -inf  ;;  %v6975_v26 = vsel %vm2583_vm5, %v6818_v42, -inf  ;;  %v6976_v51 = vsel %vm2584_vm6, %v6822_v19, -inf }
 0x8e7   : > { %v7043_v5 = vsel %vm4249_vm4, %v6977_v60, -inf  ;;  %v7044_v28 = vsel %vm4251_vm7, %v6978_v1, -inf  ;;  %v7039_v61 = vsel %vm4244_vm8, %v6976_v51, -inf  ;;  %v6993_v49 = vsel %vm2585_vm2, %v6850_v39, -inf }
 0x8e8   : > { %v7045_v21 = vmax.f32 %v7043_v5, %v7044_v28  ;;  %v7040_v50 = vmax.f32 %v6975_v26, %v7039_v61  ;;  %v6994_v10 = vsel %vm2586_vm3, %v6854_v4, -inf  ;;  %v7079_v37 = vsel %vm4249_vm4, %v6993_v49, -inf }
 0x8e9   : > { %v7080_v22 = vsel %vm4251_vm7, %v6994_v10, -inf  ;;  %v6991_v38 = vsel %vm2583_vm5, %v6850_v39, -inf  ;;  %v6992_v34 = vsel %vm2584_vm6, %v6854_v4, -inf  ;;  %v6826_v47 = vrot.slane %v18378_v3, %v15945_v59 }
 0x8ea   : > { %7046 = vmax.xlane.f32.xlu0 %v7045_v21  ;;  %7041 = vmax.xlane.f32.xlu1 %v7040_v50  ;;  %v7075_v46 = vsel %vm4244_vm8, %v6992_v34, -inf  ;;  %v6830_v13 = vrot.slane %v18378_v3, %v15948_v20  ;;  %v6834_v18 = vrot.slane %v6761_v45, %v15945_v59  ;;  %v7081_v11 = vmax.f32 %v7079_v37, %v7080_v22 }
 0x8eb   : > { %v7076_v33 = vmax.f32 %v6991_v38, %v7075_v46  ;;  %v6981_v30 = vsel %vm2585_vm2, %v6826_v47, -inf  ;;  %v6838_v27 = vrot.slane %v6761_v45, %v15948_v20  ;;  %v6979_v44 = vsel %vm2583_vm5, %v6826_v47, -inf }
 0x8ec   : > { %v6982_v56 = vsel %vm2586_vm3, %v6830_v13, -inf  ;;  %v6980_v15 = vsel %vm2584_vm6, %v6830_v13, -inf  ;;  %v6985_v62 = vsel %vm2585_vm2, %v6834_v18, -inf  ;;  %v7052_v42 = vsel %vm4249_vm4, %v6981_v30, -inf }
 0x8ed   : > { %v7053_v19 = vsel %vm4251_vm7, %v6982_v56, -inf  ;;  %v7048_v39 = vsel %vm4244_vm8, %v6980_v15, -inf  ;;  %v6986_v40 = vsel %vm2586_vm3, %v6838_v27, -inf  ;;  %v18427_v4 = vrot.slane %v6766_v32, %v15928_v29 }
 0x8ee   : > { %v18431_v60 = vrot.slane %v18404_v58, %v15928_v29  ;;  %7082 = vmax.xlane.f32.xlu0 %v7081_v11  ;;  %7077 = vmax.xlane.f32.xlu1 %v7076_v33  ;;  %v7061_v1 = vsel %vm4249_vm4, %v6985_v62, -inf  ;;  %v6984_v26 = vsel %vm2584_vm6, %v6838_v27, -inf  ;;  %v18437_v51 = vrot.slane %v6732_v16, %v15928_v29 }
 0x8ef   : > { %v7054_v45 = vmax.f32 %v7052_v42, %v7053_v19  ;;  %v7049_v5 = vmax.f32 %v6979_v44, %v7048_v39  ;;  %v7062_v32 = vsel %vm4251_vm7, %v6986_v40, -inf  ;;  %v6983_v28 = vsel %vm2583_vm5, %v6834_v18, -inf }
 0x8f0   : > { %v7057_v61 = vsel %vm4244_vm8, %v6984_v26, -inf  ;;  %v6858_v49 = vrot.slane %v18437_v51, %v15945_v59  ;;  %v6862_v21 = vrot.slane %v18437_v51, %v15948_v20  ;;  %v6866_v50 = vrot.slane %v6762_v48, %v15945_v59 }
 0x8f1   : > { %v18450_v0 = vrot.slane %v18427_v4, %v15928_v29  ;;  %v6870_v16 = vrot.slane %v6762_v48, %v15948_v20  ;;  %v6882_v10 = vrot.slane %v18431_v60, %v15945_v59  ;;  %v6886_v34 = vrot.slane %v18431_v60, %v15948_v20 }
 0x8f2   : > { %7055 = vmax.xlane.f32.xlu0 %v7054_v45  ;;  %7050 = vmax.xlane.f32.xlu1 %v7049_v5  ;;  %v6997_v37 = vsel %vm2585_vm2, %v6858_v49, -inf  ;;  %v6998_v22 = vsel %vm2586_vm3, %v6862_v21, -inf  ;;  %v6996_v38 = vsel %vm2584_vm6, %v6862_v21, -inf  ;;  %v7063_v47 = vmax.f32 %v7061_v1, %v7062_v32 }
 0x8f3   : > { %v7058_v46 = vmax.f32 %v6983_v28, %v7057_v61  ;;  %v7088_v13 = vsel %vm4249_vm4, %v6997_v37, -inf  ;;  %v7089_v18 = vsel %vm4251_vm7, %v6998_v22, -inf  ;;  %v6995_v11 = vsel %vm2583_vm5, %v6858_v49, -inf }
 0x8f4   : > { %v7084_v33 = vsel %vm4244_vm8, %v6996_v38, -inf  ;;  %v7001_v30 = vsel %vm2585_vm2, %v6866_v50, -inf  ;;  %v7002_v27 = vsel %vm2586_vm3, %v6870_v16, -inf  ;;  %v6781_v56 = vcombine.high %v18404_v58, %v18404_v58 }
 0x8f5   : > { %v7000_v44 = vsel %vm2584_vm6, %v6870_v16, -inf  ;;  %v7090_v15 = vmax.f32 %v7088_v13, %v7089_v18  ;;  %v7009_v62 = vsel %vm2585_vm2, %v6882_v10, -inf  ;;  %v7010_v42 = vsel %vm2586_vm3, %v6886_v34, -inf }
 0x8f6   : > { %7064 = vmax.xlane.f32.xlu0 %v7063_v47  ;;  %7059 = vmax.xlane.f32.xlu1 %v7058_v46  ;;  %v6914_v19 = vrot.slane %v18450_v0, %v15945_v59  ;;  %v7085_v39 = vmax.f32 %v6995_v11, %v7084_v33  ;;  %v7097_v40 = vsel %vm4249_vm4, %v7001_v30, -inf  ;;  %v7098_v58 = vsel %vm4251_vm7, %v7002_v27, -inf }
 0x8f7   : > { %v6999_v1 = vsel %vm2583_vm5, %v6866_v50, -inf  ;;  %v7093_v26 = vsel %vm4244_vm8, %v7000_v44, -inf  ;;  %v7008_v48 = vsel %vm2584_vm6, %v6886_v34, -inf  ;;  %v6918_v45 = vrot.slane %v18450_v0, %v15948_v20 }
 0x8f8   : > { %v6763_v5 = vcombine.high %v18378_v3, %v18378_v3  ;;  %v7099_v32 = vmax.f32 %v7097_v40, %v7098_v58  ;;  %v7115_v28 = vsel %vm4249_vm4, %v7009_v62, -inf  ;;  %v7116_v61 = vsel %vm4251_vm7, %v7010_v42, -inf }
 0x8f9   : > { %v7007_v49 = vsel %vm2583_vm5, %v6882_v10, -inf  ;;  %v7094_v21 = vmax.f32 %v6999_v1, %v7093_v26  ;;  %v7111_v50 = vsel %vm4244_vm8, %v7008_v48, -inf  ;;  %v7025_v16 = vsel %vm2585_vm2, %v6914_v19, -inf }
 0x8fa   : > { %7091 = vmax.xlane.f32.xlu0 %v7090_v15  ;;  %7086 = vmax.xlane.f32.xlu1 %v7085_v39  ;;  %v18501_v37 = vrot.slane %v6781_v56, %v15928_v29  ;;  %v7026_v3 = vsel %vm2586_vm3, %v6918_v45, -inf  ;;  %v7024_v22 = vsel %vm2584_vm6, %v6918_v45, -inf  ;;  %v6842_v38 = vrot.slane %v6763_v5, %v15945_v59 }
 0x8fb   : > { %v6846_v34 = vrot.slane %v6763_v5, %v15948_v20  ;;  %v6782_v10 = vcombine.high %v18427_v4, %v18427_v4  ;;  %v7117_v47 = vmax.f32 %v7115_v28, %v7116_v61  ;;  %v7112_v46 = vmax.f32 %v7007_v49, %v7111_v50 }
 0x8fc   : > { %v7151_v13 = vsel %vm4249_vm4, %v7025_v16, -inf  ;;  %v7023_v18 = vsel %vm2583_vm5, %v6914_v19, -inf  ;;  %v7152_v11 = vsel %vm4251_vm7, %v7026_v3, -inf  ;;  %v7147_v33 = vsel %vm4244_vm8, %v7024_v22, -inf }
 0x8fd   : > { %v6890_v30 = vrot.slane %v18501_v37, %v15945_v59  ;;  %v6894_v27 = vrot.slane %v18501_v37, %v15948_v20  ;;  %v6989_v4 = vsel %vm2585_vm2, %v6842_v38, -inf  ;;  %v6990_v56 = vsel %vm2586_vm3, %v6846_v34, -inf }
 0x8fe   : > { %7100 = vmax.xlane.f32.xlu0 %v7099_v32  ;;  %7095 = vmax.xlane.f32.xlu1 %v7094_v21  ;;  %v6988_v44 = vsel %vm2584_vm6, %v6846_v34, -inf  ;;  %v6811_v15 = vcombine.high %v18431_v60, %v18431_v60  ;;  %v7153_v62 = vmax.f32 %v7151_v13, %v7152_v11  ;;  %v7148_v42 = vmax.f32 %v7023_v18, %v7147_v33 }
 0x8ff   : > { %v7070_v19 = vsel %vm4249_vm4, %v6989_v4, -inf  ;;  %v7071_v39 = vsel %vm4251_vm7, %v6990_v56, -inf  ;;  %v6987_v40 = vsel %vm2583_vm5, %v6842_v38, -inf  ;;  %v7066_v58 = vsel %vm4244_vm8, %v6988_v44, -inf }
 0x900   : > { %v7013_v1 = vsel %vm2585_vm2, %v6890_v30, -inf  ;;  %v7014_v26 = vsel %vm2586_vm3, %v6894_v27, -inf  ;;  %v6898_v60 = vrot.slane %v6811_v15, %v15945_v59  ;;  %v6810_v48 = vrot.slane %v6782_v10, %v15928_v29 }
 0x901   : > { %v7012_v45 = vsel %vm2584_vm6, %v6894_v27, -inf  ;;  %v6902_v5 = vrot.slane %v6811_v15, %v15948_v20  ;;  %v7072_v32 = vmax.f32 %v7070_v19, %v7071_v39  ;;  %v7067_v28 = vmax.f32 %v6987_v40, %v7066_v58 }
 0x902   : > { %7118 = vmax.xlane.f32.xlu0 %v7117_v47  ;;  %7113 = vmax.xlane.f32.xlu1 %v7112_v46  ;;  %v7124_v61 = vsel %vm4249_vm4, %v7013_v1, -inf  ;;  %v7125_v49 = vsel %vm4251_vm7, %v7014_v26, -inf  ;;  %v7011_v21 = vsel %vm2583_vm5, %v6890_v30, -inf  ;;  %v6812_v50 = vcombine.high %v18450_v0, %v18450_v0 }
 0x903   : > { %v7120_v29 = vsel %vm4244_vm8, %v7012_v45, -inf  ;;  %v7017_v16 = vsel %vm2585_vm2, %v6898_v60, -inf  ;;  %v6922_v3 = vrot.slane %v6810_v48, %v15945_v59  ;;  %v6926_v22 = vrot.slane %v6810_v48, %v15948_v20 }
 0x904   : > { %v7018_v38 = vsel %vm2586_vm3, %v6902_v5, -inf  ;;  %v7016_v34 = vsel %vm2584_vm6, %v6902_v5, -inf  ;;  %v7126_v10 = vmax.f32 %v7124_v61, %v7125_v49  ;;  %v7121_v47 = vmax.f32 %v7011_v21, %v7120_v29 }
 0x905   : > { %v7133_v0 = vsel %vm4249_vm4, %v7017_v16, -inf  ;;  %v7015_v46 = vsel %vm2583_vm5, %v6898_v60, -inf  ;;  %v6930_v13 = vrot.slane %v6812_v50, %v15945_v59  ;;  %v7134_v18 = vsel %vm4251_vm7, %v7018_v38, -inf }
 0x906   : > { %7154 = vmax.xlane.f32.xlu0 %v7153_v62  ;;  %7149 = vmax.xlane.f32.xlu1 %v7148_v42  ;;  %v7129_v11 = vsel %vm4244_vm8, %v7016_v34, -inf  ;;  %v7029_v33 = vsel %vm2585_vm2, %v6922_v3, -inf  ;;  %v7030_v30 = vsel %vm2586_vm3, %v6926_v22, -inf  ;;  %v7028_v27 = vsel %vm2584_vm6, %v6926_v22, -inf }
 0x907   : > { %v6934_v4 = vrot.slane %v6812_v50, %v15948_v20  ;;  %v6813_v56 = vcombine.high %v18501_v37, %v18501_v37  ;;  %v7135_v44 = vmax.f32 %v7133_v0, %v7134_v18  ;;  %v7130_v15 = vmax.f32 %v7015_v46, %v7129_v11 }
 0x908   : > { %v7160_v62 = vsel %vm4249_vm4, %v7029_v33, -inf  ;;  %v7161_v42 = vsel %vm4251_vm7, %v7030_v30, -inf  ;;  %v7027_v19 = vsel %vm2583_vm5, %v6922_v3, -inf  ;;  %v7156_v39 = vsel %vm4244_vm8, %v7028_v27, -inf }
 0x909   : > { %v7033_v40 = vsel %vm2585_vm2, %v6930_v13, -inf  ;;  %v6814_v58 = vcombine.high %v6810_v48, %v6810_v48  ;;  %v7034_v37 = vsel %vm2586_vm3, %v6934_v4, -inf  ;;  %v7032_v1 = vsel %vm2584_vm6, %v6934_v4, -inf }
 0x90a   : > { %7073 = vmax.xlane.f32.xlu0 %v7072_v32  ;;  %7068 = vmax.xlane.f32.xlu1 %v7067_v28  ;;  %v6906_v26 = vrot.slane %v6813_v56, %v15945_v59  ;;  %v6910_v60 = vrot.slane %v6813_v56, %v15948_v20  ;;  %v7162_v45 = vmax.f32 %v7160_v62, %v7161_v42  ;;  %v7169_v32 = vsel %vm4249_vm4, %v7033_v40, -inf }
 0x90b   : > { %v7157_v5 = vmax.f32 %v7027_v19, %v7156_v39  ;;  %v6764_v28 = vcombine.high %v18437_v51, %v18437_v51  ;;  %v7170_v48 = vsel %vm4251_vm7, %v7034_v37, -inf  ;;  %v7031_v61 = vsel %vm2583_vm5, %v6930_v13, -inf }
 0x90c   : > { %v7165_v49 = vsel %vm4244_vm8, %v7032_v1, -inf  ;;  %v6938_v21 = vrot.slane %v6814_v58, %v15945_v59  ;;  %v7021_v50 = vsel %vm2585_vm2, %v6906_v26, -inf  ;;  %v7022_v29 = vsel %vm2586_vm3, %v6910_v60, -inf  ;;  %v9262_v1 = vld [vmem:[%s19600_s14 + $0x8] sm:$0xff] }
 0x90d   : > { %v7020_v51 = vsel %vm2584_vm6, %v6910_v60, -inf  ;;  %v6942_v16 = vrot.slane %v6814_v58, %v15948_v20  ;;  %v7171_v3 = vmax.f32 %v7169_v32, %v7170_v48  ;;  %v7166_v22 = vmax.f32 %v7031_v61, %v7165_v49  ;;  %v9264_v60 = vld [vmem:[%s19600_s14 + $0x18] sm:$0xff] }
 0x90e   : > { %7127 = vmax.xlane.f32.xlu0 %v7126_v10  ;;  %7122 = vmax.xlane.f32.xlu1 %v7121_v47  ;;  %v6874_v38 = vrot.slane %v6764_v28, %v15945_v59  ;;  %v7142_v34 = vsel %vm4249_vm4, %v7021_v50, -inf  ;;  %v7143_v10 = vsel %vm4251_vm7, %v7022_v29, -inf  ;;  %v7019_v47 = vsel %vm2583_vm5, %v6906_v26, -inf  ;;  %v9263_v26 = vld [vmem:[%s19600_s14 + $0x10] sm:$0xff] }
 0x90f   : > { %v7138_v0 = vsel %vm4244_vm8, %v7020_v51, -inf  ;;  %v7037_v46 = vsel %vm2585_vm2, %v6938_v21, -inf  ;;  %v7038_v13 = vsel %vm2586_vm3, %v6942_v16, -inf  ;;  %v7036_v59 = vsel %vm2584_vm6, %v6942_v16, -inf }
 0x910   : > { %v6878_v18 = vrot.slane %v6764_v28, %v15948_v20  ;;  %v7144_v11 = vmax.f32 %v7142_v34, %v7143_v10  ;;  %v7139_v33 = vmax.f32 %v7019_v47, %v7138_v0  ;;  %v7178_v30 = vsel %vm4249_vm4, %v7037_v46, -inf }
 0x911   : > { %v7179_v27 = vsel %vm4251_vm7, %v7038_v13, -inf  ;;  %v7035_v4 = vsel %vm2583_vm5, %v6938_v21, -inf  ;;  %v7174_v56 = vsel %vm4244_vm8, %v7036_v59, -inf  ;;  %v7003_v40 = vsel %vm2583_vm5, %v6874_v38, -inf }
 0x912   : > { %7136 = vmax.xlane.f32.xlu0 %v7135_v44  ;;  %7131 = vmax.xlane.f32.xlu1 %v7130_v15  ;;  %v7005_v44 = vsel %vm2585_vm2, %v6874_v38, -inf  ;;  %v7006_v15 = vsel %vm2586_vm3, %v6878_v18, -inf  ;;  %v7004_v20 = vsel %vm2584_vm6, %v6878_v18, -inf  ;;  %v7180_v62 = vmax.f32 %v7178_v30, %v7179_v27 }
 0x913   : > { %v7175_v42 = vmax.f32 %v7035_v4, %v7174_v56  ;;  %v7106_v19 = vsel %vm4249_vm4, %v7005_v44, -inf  ;;  %v7107_v39 = vsel %vm4251_vm7, %v7006_v15, -inf  ;;  %v7102_v58 = vsel %vm4244_vm8, %v7004_v20, -inf }
 0x914   : > { %v7108_v41 = vmax.f32 %v7106_v19, %v7107_v39  ;;  %v7103_v37 = vmax.f32 %v7003_v40, %v7102_v58  ;;  %vm19723_vm2 = vcmask 1047559  }
 0x915   : > { %vm19724_vm3 = vmmov %vm19723_vm2 }
 0x916   : > { %7163 = vmax.xlane.f32.xlu0 %v7162_v45  ;;  %7158 = vmax.xlane.f32.xlu1 %v7157_v5 }
 0x91a   : > { %7172 = vmax.xlane.f32.xlu0 %v7171_v3  ;;  %7167 = vmax.xlane.f32.xlu1 %v7166_v22 }
 0x91e   : > { %7145 = vmax.xlane.f32.xlu0 %v7144_v11  ;;  %7140 = vmax.xlane.f32.xlu1 %v7139_v33 }
 0x922   : > { %7181 = vmax.xlane.f32.xlu0 %v7180_v62  ;;  %7176 = vmax.xlane.f32.xlu1 %v7175_v42 }
 0x926   : > { %7109 = vmax.xlane.f32.xlu0 %v7108_v41  ;;  %7104 = vmax.xlane.f32.xlu1 %v7103_v37 }
 0x937   : > { %8600 = vperm.xlu1 %11933, %v8592_v7  }
 0x93b   : > { %9267 = vperm.xlu1 %11933, %v9261_v31  }
 0x93c   : > { %8595 = vperm.xlu0 %11932, %v8591_v14  }
 0x93f   : > { %9272 = vperm.xlu1 %11933, %v9262_v1  }
 0x940   : > { %9277 = vperm.xlu0 %11932, %v9263_v26  }
 0x943   : > { %9282 = vperm.xlu1 %11933, %v9264_v60  }
 0x973   : > { %v7047_v45 = vpop.xlane.xlu0 %7046  ;;  %v7042_v5 = vpop.xlane.xlu1 %7041 }
 0x974   : > { %v7222_v56 = vrot.slane %v7047_v45, %v15919_v23  ;;  %v7218_v44 = vrot.slane %v7042_v5, %v15916_v12 }
 0x976   : > { %v7223_v14 = vsel %vm4452_vm9, %v7222_v56, %v7218_v44 }
 0x977   : > { %v7083_v32 = vpop.xlane.xlu0 %7082  ;;  %v7078_v28 = vpop.xlane.xlu1 %7077 }
 0x978   : > { %v7258_v26 = vrot.slane %v7083_v32, %v15919_v23  ;;  %v7254_v60 = vrot.slane %v7078_v28, %v15916_v12 }
 0x97b   : > { %v7056_v48 = vpop.xlane.xlu0 %7055  ;;  %v7051_v61 = vpop.xlane.xlu1 %7050 }
 0x97c   : > { %v7231_v18 = vrot.slane %v7056_v48, %v15919_v23  ;;  %v7227_v11 = vrot.slane %v7051_v61, %v15916_v12 }
 0x97e   : > { %v7232_v62 = vsel %vm4452_vm9, %v7231_v18, %v7227_v11 }
 0x97f   : > { %v7065_v49 = vpop.xlane.xlu0 %7064  ;;  %v7060_v21 = vpop.xlane.xlu1 %7059  ;;  %v7359_v45 = vsel %vm4589_vm10, %v7232_v62, %v7223_v14 }
 0x980   : > { %v7240_v33 = vrot.slane %v7065_v49, %v15919_v23  ;;  %v7236_v30 = vrot.slane %v7060_v21, %v15916_v12 }
 0x982   : > { %v7241_v58 = vsel %vm4452_vm9, %v7240_v33, %v7236_v30 }
 0x983   : > { %v18647_v50 = vpop.xlane.xlu0 %7091  ;;  %v18649_v29 = vpop.xlane.xlu1 %7086  ;;  %v7360_v5 = vsel %vm4591_vm11, %v7241_v58, %v7359_v45 }
 0x984   : > { %v7267_v18 = vrot.slane %v18647_v50, %v15919_v23  ;;  %v7263_v11 = vrot.slane %v18649_v29, %v15916_v12 }
 0x986   : > { %v7268_v58 = vsel %vm4452_vm9, %v7267_v18, %v7263_v11  ;;  %v12794_v18 = vld [vmem:[%s19593_s7 + $0x80] sm:$0xff]  ;;  %v12795_v11 = vld [vmem:[%s19593_s7 + $0x88] sm:$0xff] }
 0x987   : > { %v18651_v51 = vpop.xlane.xlu0 %7100  ;;  %v18653_v16 = vpop.xlane.xlu1 %7095 }
 0x98b   : > { %v7119_v3 = vpop.xlane.xlu0 %7118  ;;  %v7114_v22 = vpop.xlane.xlu1 %7113 }
 0x98c   : > { %v7294_v42 = vrot.slane %v7119_v3, %v15919_v23  ;;  %v7290_v19 = vrot.slane %v7114_v22, %v15916_v12 }
 0x98e   : > { %v7295_v48 = vsel %vm4452_vm9, %v7294_v42, %v7290_v19  ;;  %v7276_v42 = vrot.slane %v18651_v51, %v15919_v23  ;;  %v7272_v19 = vrot.slane %v18653_v16, %v15916_v12 }
 0x98f   : > { %v7155_v38 = vpop.xlane.xlu0 %7154  ;;  %v7150_v34 = vpop.xlane.xlu1 %7149 }
 0x990   : > { %v7330_v49 = vrot.slane %v7155_v38, %v15919_v23  ;;  %v7326_v21 = vrot.slane %v7150_v34, %v15916_v12 }
 0x993   : > { %v7074_v10 = vpop.xlane.xlu0 %7073  ;;  %v7069_v47 = vpop.xlane.xlu1 %7068 }
 0x994   : > { %v7249_v15 = vrot.slane %v7074_v10, %v15919_v23  ;;  %v7245_v20 = vrot.slane %v7069_v47, %v15916_v12 }
 0x996   : > { %v7250_v1 = vsel %vm4452_vm9, %v7249_v15, %v7245_v20 }
 0x997   : > { %v7128_v0 = vpop.xlane.xlu0 %7127  ;;  %v7123_v46 = vpop.xlane.xlu1 %7122  ;;  %v7361_v3 = vsel %vm4593_vm12, %v7250_v1, %v7360_v5 }
 0x998   : > { %v7303_v39 = vrot.slane %v7128_v0, %v15919_v23  ;;  %v7299_v40 = vrot.slane %v7123_v46, %v15916_v12 }
 0x99a   : > { %v7304_v61 = vsel %vm4452_vm9, %v7303_v39, %v7299_v40 }
 0x99b   : > { %v7137_v13 = vpop.xlane.xlu0 %7136  ;;  %v7132_v59 = vpop.xlane.xlu1 %7131  ;;  %v7366_v38 = vsel %vm4589_vm10, %v7304_v61, %v7295_v48  ;;  %v12776_v48 = vld [vmem:[%s19593_s7 + $0x8] sm:$0xff]  ;;  %v12779_v61 = vld [vmem:[%s19595_s9 + $0x10] sm:$0xff] }
 0x99c   : > { %v7312_v41 = vrot.slane %v7137_v13, %v15919_v23  ;;  %v7308_v37 = vrot.slane %v7132_v59, %v15916_v12  ;;  %v7259_v13 = vsel %vm4452_vm9, %v7258_v26, %v7254_v60  ;;  %v7277_v26 = vsel %vm4452_vm9, %v7276_v42, %v7272_v19  ;;  %v12799_v19 = vld [vmem:[%s19595_s9 + $0x38] sm:$0x1] }
 0x99d   : > { %v7362_v15 = vsel %vm4595_vm13, %v7259_v13, %v7361_v3  ;;  %v12782_v3 = vld [vmem:[%s19593_s7 + $0x20] sm:$0xff] }
 0x99e   : > { %v7313_v22 = vsel %vm4452_vm9, %v7312_v41, %v7308_v37  ;;  %v7363_v1 = vsel %vm4597_vm14, %v7268_v58, %v7362_v15  ;;  %v12790_v13 = vld [vmem:[%s19593_s7 + $0x60] sm:$0xff] }
 0x99f   : > { %v7164_v27 = vpop.xlane.xlu0 %7163  ;;  %v7159_v4 = vpop.xlane.xlu1 %7158  ;;  %v7367_v33 = vsel %vm4591_vm11, %v7313_v22, %v7366_v38  ;;  %v7364_v45 = vsel %vm4599_vm15, %v7277_v26, %v7363_v1  ;;  %v12783_v22 = vld [vmem:[%s19593_s7 + $0x28] sm:$0xff]  ;;  %v12796_v15 = vld [vmem:[%s19595_s9] sm:$0xff] }
 0x9a0   : > { %v7339_v28 = vrot.slane %v7164_v27, %v15919_v23  ;;  %v7335_v47 = vrot.slane %v7159_v4, %v15916_v12  ;;  %v7331_v27 = vsel %vm4452_vm9, %v7330_v49, %v7326_v21  ;;  %v12780_v49 = vld [vmem:[%s19593_s7 + $0x18] sm:$0xff]  ;;  %v12781_v21 = vld [vmem:[%s19595_s9 + $0x8] sm:$0x1] }
 0x9a1   : > { %v12791_v38 = vld [vmem:[%s19593_s7 + $0x68] sm:$0xff] }
 0x9a2   : > { %v7340_v20 = vsel %vm4452_vm9, %v7339_v28, %v7335_v47  ;;  %v12786_v28 = vld [vmem:[%s19593_s7 + $0x40] sm:$0xff]  ;;  %v12787_v47 = vld [vmem:[%s19593_s7 + $0x48] sm:$0xff] }
 0x9a3   : > { %v7173_v7 = vpop.xlane.xlu0 %7172  ;;  %v7168_v31 = vpop.xlane.xlu1 %7167  ;;  %v12805_v26 = vld [vmem:[%s19595_s9 + $0x68] sm:$0x1] }
 0x9a4   : > { %v7348_v34 = vrot.slane %v7173_v7, %v15919_v23  ;;  %v7344_v59 = vrot.slane %v7168_v31, %v15916_v12 }
 0x9a6   : > { %v7349_v39 = vsel %vm4452_vm9, %v7348_v34, %v7344_v59  ;;  %v12792_v34 = vld [vmem:[%s19593_s7 + $0x70] sm:$0xff]  ;;  %v12793_v59 = vld [vmem:[%s19593_s7 + $0x78] sm:$0xff] }
 0x9a7   : > { %v7146_v10 = vpop.xlane.xlu0 %7145  ;;  %v7141_v32 = vpop.xlane.xlu1 %7140 }
 0x9a8   : > { %v7321_v0 = vrot.slane %v7146_v10, %v15919_v23  ;;  %v7317_v46 = vrot.slane %v7141_v32, %v15916_v12  ;;  %v12784_v10 = vld [vmem:[%s19593_s7 + $0x30] sm:$0xff]  ;;  %v12785_v32 = vld [vmem:[%s19593_s7 + $0x38] sm:$0xff] }
 0x9aa   : > { %v7322_v30 = vsel %vm4452_vm9, %v7321_v0, %v7317_v46  ;;  %v12788_v0 = vld [vmem:[%s19593_s7 + $0x50] sm:$0xff]  ;;  %v12789_v46 = vld [vmem:[%s19593_s7 + $0x58] sm:$0xff] }
 0x9ab   : > { %v7368_v4 = vsel %vm4593_vm12, %v7322_v30, %v7367_v33  ;;  %v7182_v56 = vpop.xlane.xlu0 %7181  ;;  %v7177_v44 = vpop.xlane.xlu1 %7176 }
 0x9ac   : > { %v7357_v62 = vrot.slane %v7182_v56, %v15919_v23  ;;  %v7353_v50 = vrot.slane %v7177_v44, %v15916_v12  ;;  %v7369_v29 = vsel %vm4595_vm13, %v7331_v27, %v7368_v4 }
 0x9ad   : > { %v7370_v40 = vsel %vm4597_vm14, %v7340_v20, %v7369_v29  ;;  %v12798_v29 = vld [vmem:[%s19595_s9 + $0x20] sm:$0xff] }
 0x9ae   : > { %v7358_v41 = vsel %vm4452_vm9, %v7357_v62, %v7353_v50  ;;  %v7371_v37 = vsel %vm4599_vm15, %v7349_v39, %v7370_v40  ;;  %v12797_v62 = vld [vmem:[%s19595_s9 + $0x28] sm:$0x1]  ;;  %v12800_v40 = vld [vmem:[%s19595_s9 + $0x30] sm:$0xff] }
 0x9af   : > { %v7110_v7 = vpop.xlane.xlu0 %7109  ;;  %v7105_v31 = vpop.xlane.xlu1 %7104  ;;  %v7372_v14 = vsel %vm19723_vm2, %v7358_v41, %v7371_v37  ;;  %v12801_v41 = vld [vmem:[%s19595_s9 + $0x48] sm:$0x1] }
 0x9b0   : > { %v7285_v51 = vrot.slane %v7110_v7, %v15919_v23  ;;  %v7281_v16 = vrot.slane %v7105_v31, %v15916_v12  ;;  %11811 = vmatprep.subr.mxu1 %v7372_v14  ;;  %v12777_v12 = vld [vmem:[%s19595_s9 + $0x18] sm:$0x1]  ;;  %v12778_v23 = vld [vmem:[%s19593_s7 + $0x10] sm:$0xff]  ;;  %v12802_v7 = vld [vmem:[%s19595_s9 + $0x40] sm:$0xff] }
 0x9b1   : > { %11812 = vmatpush3.msra.mxu1 %v7372_v14  ;;  %v12803_v14 = vld [vmem:[%s19595_s9 + $0x58] sm:$0x1] }
 0x9b2   : > { %v7286_v60 = vsel %vm4452_vm9, %v7285_v51, %v7281_v16  ;;  %v12804_v51 = vld [vmem:[%s19595_s9 + $0x50] sm:$0xff] }
 0x9b3   : > { %v7365_v5 = vsel %vm19724_vm3, %v7286_v60, %v7364_v45  ;;  %v12806_v45 = vld [vmem:[%s19595_s9 + $0x60] sm:$0xff] }
 0x9b4   : > { %11813 = vmatprep.subr.mxu1 %v7365_v5 }
 0x9b5   : > { %11814 = vmatpush3.msra.mxu1 %v7365_v5 }
 0x9b6   : > { %11816 = vmatmul.mubr.msk.f32.vlgmr.msra.gmra.mxu1 %vm1356_vm1, %v12776_v48  ;;  %11842 = vmatprep.subr.msk.mxu1 %vm4249_vm4, %v12777_v12  ;;  %v12807_v48 = vld [vmem:[%s19595_s9 + $0x88] sm:$0x1] }
 0x9b7   : > { %11818 = vmatprep.mubr.msk.f32.mxu1 %vm1356_vm1, %v12778_v23  ;;  %11843 = vmatpush3.msk.msra.mxu1 %vm4249_vm4, %v12777_v12  ;;  %v12808_v12 = vld [vmem:[%s19596_s10 + $0x40] sm:$0x1] }
 0x9b8   : > { %11844 = vmatprep.subr.mxu1 %v12779_v61 }
 0x9b9   : > { %11845 = vmatpush3.msra.mxu1 %v12779_v61  ;;  %v12809_v61 = vld [vmem:[%s19596_s10 + $0x8] sm:$0xff] }
 0x9ba   : > { %11819 = vmatmul.mubr.msk.f32.gmra.mxu1 %vm1356_vm1, %v12780_v49  ;;  %11849 = vmatprep.subr.msk.mxu1 %vm4249_vm4, %v12781_v21  ;;  %v12810_v49 = vld [vmem:[%s19595_s9 + $0x80] sm:$0xff] }
 0x9bb   : > { %11821 = vmatprep.mubr.msk.f32.mxu1 %vm1356_vm1, %v12782_v3  ;;  %v12812_v3 = vld [vmem:[%s19596_s10 + $0x58] sm:$0x1] }
 0x9be   : > { %11822 = vmatmul.mubr.msk.f32.gmra.mxu1 %vm1356_vm1, %v12783_v22  ;;  %v12813_v22 = vld [vmem:[%s19596_s10 + $0x50] sm:$0x1] }
 0x9bf   : > { %11824 = vmatprep.mubr.msk.f32.mxu1 %vm1356_vm1, %v12784_v10  ;;  %v12814_v10 = vld [vmem:[%s19596_s10 + $0x18] sm:$0xff] }
 0x9c2   : > { %11825 = vmatmul.mubr.msk.f32.gmra.mxu1 %vm1356_vm1, %v12785_v32  ;;  %v12815_v32 = vld [vmem:[%s19596_s10 + $0x10] sm:$0xff] }
 0x9c3   : > { %11827 = vmatprep.mubr.msk.f32.mxu1 %vm1356_vm1, %v12786_v28  ;;  %v12816_v28 = vld [vmem:[%s19596_s10 + $0x68] sm:$0x1] }
 0x9c6   : > { %11828 = vmatmul.mubr.msk.f32.gmra.mxu1 %vm1356_vm1, %v12787_v47  ;;  %v12817_v47 = vld [vmem:[%s19596_s10 + $0x78] sm:$0x1] }
 0x9c7   : > { %11830 = vmatprep.mubr.msk.f32.mxu1 %vm1356_vm1, %v12788_v0 }
 0x9ca   : > { %11831 = vmatmul.mubr.msk.f32.gmra.mxu1 %vm1356_vm1, %v12789_v46 }
 0x9cb   : > { %11833 = vmatprep.mubr.msk.f32.mxu1 %vm1356_vm1, %v12790_v13 }
 0x9ce   : > { %11834 = vmatmul.mubr.msk.f32.gmra.mxu1 %vm1356_vm1, %v12791_v38 }
 0x9cf   : > { %11836 = vmatprep.mubr.msk.f32.mxu1 %vm1356_vm1, %v12792_v34 }
 0x9d2   : > { %11837 = vmatmul.mubr.msk.f32.gmra.mxu1 %vm1356_vm1, %v12793_v59 }
 0x9d3   : > { %11839 = vmatprep.mubr.msk.f32.mxu1 %vm1356_vm1, %v12794_v18 }
 0x9d6   : > { %11840 = vmatmul.mubr.msk.f32.gmra.mxu1 %vm1356_vm1, %v12795_v11 }
 0xa76   : > { %v11817_v33 = vpop.f32.mrf.mxu1 }
 0xa78   : > { %v7441_v30 = vpop.f32.mrf.mxu1 }
 0xa7a   : > { %v11820_v27 = vpop.f32.mrf.mxu1 }
 0xa7c   : > { %v7451_v4 = vpop.f32.mrf.mxu1 }
 0xa7d   : > { %11846 = vmatprep.mubr.msk.f32.mxu1 %vm4826_vm0, %v7451_v4 }
 0xa7e   : > { %v11823_v56 = vpop.f32.mrf.mxu1  ;;  %11847 = vmatmul.mubr.msk.f32.vlgmr.msra.gmra.mxu1 %vm4826_vm0, %v11820_v27 }
 0xa7f   : > { %11850 = vmatpush3.msk.msra.mxu1 %vm4249_vm4, %v12781_v21  ;;  %11853 = vmatprep.mubr.msk.f32.mxu1 %vm4826_vm0, %v7441_v30  ;;  %v12811_v21 = vld [vmem:[%s19596_s10] sm:$0xff] }
 0xa80   : > { %v7461_v44 = vpop.f32.mrf.mxu1  ;;  %11851 = vmatprep.subr.mxu1 %v12796_v15 }
 0xa81   : > { %11852 = vmatpush3.msra.mxu1 %v12796_v15 }
 0xa82   : > { %v11826_v20 = vpop.f32.mrf.mxu1  ;;  %11854 = vmatmul.mubr.msk.f32.vlgmr.msra.gmra.mxu1 %vm4826_vm0, %v11817_v33  ;;  %11856 = vmatprep.subr.msk.mxu1 %vm4249_vm4, %v12797_v62 }
 0xa83   : > { %11857 = vmatpush3.msk.msra.mxu1 %vm4249_vm4, %v12797_v62  ;;  %11860 = vmatprep.mubr.msk.f32.mxu1 %vm4826_vm0, %v7461_v44 }
 0xa84   : > { %v7471_v50 = vpop.f32.mrf.mxu1  ;;  %11858 = vmatprep.subr.mxu1 %v12798_v29 }
 0xa85   : > { %11859 = vmatpush3.msra.mxu1 %v12798_v29 }
 0xa86   : > { %v11829_v42 = vpop.f32.mrf.mxu1  ;;  %11861 = vmatmul.mubr.msk.f32.vlgmr.msra.gmra.mxu1 %vm4826_vm0, %v11823_v56  ;;  %11863 = vmatprep.subr.msk.mxu1 %vm4249_vm4, %v12799_v19 }
 0xa87   : > { %11864 = vmatpush3.msk.msra.mxu1 %vm4249_vm4, %v12799_v19  ;;  %11867 = vmatprep.mubr.msk.f32.mxu1 %vm4826_vm0, %v7471_v50 }
 0xa88   : > { %v7481_v39 = vpop.f32.mrf.mxu1  ;;  %11865 = vmatprep.subr.mxu1 %v12800_v40 }
 0xa89   : > { %11866 = vmatpush3.msra.mxu1 %v12800_v40 }
 0xa8a   : > { %v11832_v58 = vpop.f32.mrf.mxu1  ;;  %11868 = vmatmul.mubr.msk.f32.vlgmr.msra.gmra.mxu1 %vm4826_vm0, %v11826_v20  ;;  %11870 = vmatprep.subr.msk.mxu1 %vm4249_vm4, %v12801_v41 }
 0xa8b   : > { %11871 = vmatpush3.msk.msra.mxu1 %vm4249_vm4, %v12801_v41  ;;  %11874 = vmatprep.mubr.msk.f32.mxu1 %vm4826_vm0, %v7481_v39 }
 0xa8c   : > { %v7491_v37 = vpop.f32.mrf.mxu1  ;;  %11872 = vmatprep.subr.mxu1 %v12802_v7 }
 0xa8d   : > { %11873 = vmatpush3.msra.mxu1 %v12802_v7 }
 0xa8e   : > { %v11835_v31 = vpop.f32.mrf.mxu1  ;;  %11875 = vmatmul.mubr.msk.f32.vlgmr.msra.gmra.mxu1 %vm4826_vm0, %v11829_v42  ;;  %11877 = vmatprep.subr.msk.mxu1 %vm4249_vm4, %v12803_v14 }
 0xa8f   : > { %11878 = vmatpush3.msk.msra.mxu1 %vm4249_vm4, %v12803_v14  ;;  %11881 = vmatprep.mubr.msk.f32.mxu1 %vm4826_vm0, %v7491_v37 }
 0xa90   : > { %v7501_v1 = vpop.f32.mrf.mxu1  ;;  %11879 = vmatprep.subr.mxu1 %v12804_v51 }
 0xa91   : > { %11880 = vmatpush3.msra.mxu1 %v12804_v51 }
 0xa92   : > { %v11838_v16 = vpop.f32.mrf.mxu1  ;;  %11882 = vmatmul.mubr.msk.f32.vlgmr.msra.gmra.mxu1 %vm4826_vm0, %v11832_v58  ;;  %11884 = vmatprep.subr.msk.mxu1 %vm4249_vm4, %v12805_v26 }
 0xa93   : > { %11885 = vmatpush3.msk.msra.mxu1 %vm4249_vm4, %v12805_v26  ;;  %11888 = vmatprep.mubr.msk.f32.mxu1 %vm4826_vm0, %v7501_v1 }
 0xa94   : > { %v7511_v60 = vpop.f32.mrf.mxu1  ;;  %11886 = vmatprep.subr.mxu1 %v12806_v45 }
 0xa95   : > { %11887 = vmatpush3.msra.mxu1 %v12806_v45  ;;  %11895 = vmatprep.mubr.msk.f32.mxu0 %vm4826_vm0, %v7511_v60 }
 0xa96   : > { %v11841_v5 = vpop.f32.mrf.mxu1  ;;  %11889 = vmatmul.mubr.msk.f32.vlgmr.msra.gmra.mxu1 %vm4826_vm0, %v11835_v31  ;;  %11896 = vmatmul.mubr.msk.f32.vlgmr.msra.gmra.mxu0 %vm4826_vm0, %v11838_v16 }
 0xa97   : > { %11898 = vmatprep.subr.msk.mxu1 %vm4249_vm4, %v12807_v48  ;;  %11535 = vmatpush1.msk.msra.mxu0 %vm4249_vm4, %v12808_v12  ;;  %v12821_v12 = vld [vmem:[%s19596_s10 + $0x38] sm:$0xff] }
 0xa98   : > { %11899 = vmatpush3.msk.msra.mxu1 %vm4249_vm4, %v12807_v48  ;;  %v7521_v23 = vpop.f32.mrf.mxu1  ;;  %8311 = vmatprep.subr.mxu0 %v12809_v61  ;;  %v12819_v48 = vld [vmem:[%s19596_s10 + $0x70] sm:$0x1] }
 0xa99   : > { %11900 = vmatprep.subr.mxu1 %v12810_v49  ;;  %11902 = vmatprep.mubr.msk.f32.mxu1 %vm4826_vm0, %v7521_v23  ;;  %v12822_v23 = vld [vmem:[%s19596_s10 + $0x20] sm:$0xff]  ;;  %v12823_v61 = vld [vmem:[%s19596_s10 + $0x30] sm:$0xff] }
 0xa9a   : > { %11901 = vmatpush3.msra.mxu1 %v12810_v49  ;;  %8312 = vmatpush1.msra.mxu0 %v12811_v21  ;;  %v19725_v21 = vld [vmem:[#allocation4_spill] sm:$0xff] }
 0xa9b   : > { %11903 = vmatmul.mubr.msk.f32.vlgmr.msra.gmra.mxu1 %vm4826_vm0, %v11841_v5  ;;  %11538 = vmatprep.subr.msk.mxu1 %vm4249_vm4, %v12812_v3  ;;  %v12818_v5 = vld [vmem:[%s19596_s10 + $0x60] sm:$0x1]  ;;  %v19726_v3 = vld [vmem:[#allocation5_spill] sm:$0xff] }
 0xa9c   : > { %11539 = vmatpush1.msk.msra.mxu1 %vm4249_vm4, %v12813_v22  ;;  %8345 = vmatprep.mubr.f32.mxu0 %v19681_v8  ;;  %v19728_v22 = vld [vmem:[#allocation7_spill] sm:$0xff] }
 0xa9d   : > { %8388 = vmatprep.subr.mxu1 %v12814_v10  ;;  %8422 = vmatprep.mubr.f32.mxu1 %v19681_v8  ;;  %v19729_v10 = vld [vmem:[#allocation8_spill] sm:$0xff] }
 0xa9e   : > { %8389 = vmatpush1.msra.mxu1 %v12815_v32  ;;  %11542 = vmatprep.subr.msk.mxu0 %vm4249_vm4, %v12816_v28  ;;  %v19730_v32 = vld [vmem:[#allocation9_spill] sm:$0xff]  ;;  %v19731_v28 = vld [vmem:[#allocation10_spill] sm:$0xff] }
 0xa9f   : > { %11546 = vmatprep.subr.msk.mxu1 %vm4249_vm4, %v12817_v47  ;;  %v19732_v47 = vld [vmem:[#allocation11_spill] sm:$0xff] }
 0xb3e   : > { %v11848_v0 = vpop.f32.mrf.mxu1 }
 0xb40   : > { %v7602_v46 = vpop.f32.mrf.mxu1 }
 0xb42   : > { %v11855_v13 = vpop.f32.mrf.mxu1 }
 0xb43   : > { %v7689_v27 = vadd.f32 %v11855_v13, %v11848_v0  ;;  %v19733_v0 = vld [vmem:[#allocation12_spill] sm:$0xff] }
 0xb44   : > { %v7683_v38 = vpop.f32.mrf.mxu1  ;;  %v8589_v13 = vld [vmem:[%s19597_s11] sm:$0xff] }
 0xb45   : > { %v7684_v30 = vadd.f32 %v7683_v38, %v7602_v46  ;;  %v19734_v46 = vld [vmem:[#allocation13_spill] sm:$0xff]  ;;  %v19735_v38 = vld [vmem:[#allocation14_spill] sm:$0xff] }
 0xb46   : > { %v11862_v34 = vpop.f32.mrf.mxu1 }
 0xb47   : > { %v7774_v44 = vadd.f32 %v11862_v34, %v7689_v27  ;;  %v19736_v34 = vld [vmem:[#allocation15_spill] sm:$0xff]  ;;  %v19741_v27 = vld [vmem:[#allocation20_spill] sm:$0xff] }
 0xb48   : > { %v7764_v59 = vpop.f32.mrf.mxu1 }
 0xb49   : > { %v7773_v56 = vadd.f32 %v7764_v59, %v7684_v30  ;;  %v19737_v59 = vld [vmem:[#allocation16_spill] sm:$0xff]  ;;  %v8590_v30 = vld [vmem:[%s19597_s11 + $0x8] sm:$0xff] }
 0xb4a   : > { %v11869_v18 = vpop.f32.mrf.mxu1 }
 0xb4b   : > { %v7857_v62 = vadd.f32 %v11869_v18, %v7774_v44  ;;  %v19738_v18 = vld [vmem:[#allocation17_spill] sm:$0xff]  ;;  %v19744_v44 = vld [vmem:[#allocation23_spill] sm:$0xff] }
 0xb4c   : > { %v7847_v11 = vpop.f32.mrf.mxu1 }
 0xb4d   : > { %v7856_v20 = vadd.f32 %v7847_v11, %v7773_v56  ;;  %v19739_v11 = vld [vmem:[#allocation18_spill] sm:$0xff] }
 0xb4e   : > { %v11876_v33 = vpop.f32.mrf.mxu1  ;;  %v19743_v56 = vld [vmem:[#allocation22_spill] sm:$0xff] }
 0xb4f   : > { %v7940_v42 = vadd.f32 %v11876_v33, %v7857_v62  ;;  %v19740_v33 = vld [vmem:[#allocation19_spill] sm:$0xff]  ;;  %v19747_v62 = vld [vmem:[#allocation26_spill] sm:$0xff] }
 0xb50   : > { %v7930_v4 = vpop.f32.mrf.mxu1 }
 0xb51   : > { %v7939_v29 = vadd.f32 %v7930_v4, %v7856_v20  ;;  %v19742_v4 = vld [vmem:[#allocation21_spill] sm:$0xff] }
 0xb52   : > { %v11883_v15 = vpop.f32.mrf.mxu1  ;;  %v19746_v20 = vld [vmem:[#allocation25_spill] sm:$0xff] }
 0xb53   : > { %v8023_v58 = vadd.f32 %v11883_v15, %v7940_v42  ;;  %v19745_v15 = vld [vmem:[#allocation24_spill] sm:$0xff]  ;;  %v19750_v42 = vld [vmem:[#allocation29_spill] sm:$0xff] }
 0xb54   : > { %v8013_v50 = vpop.f32.mrf.mxu1 }
 0xb55   : > { %v8022_v40 = vadd.f32 %v8013_v50, %v7939_v29  ;;  %v19748_v50 = vld [vmem:[#allocation27_spill] sm:$0xff]  ;;  %v19749_v29 = vld [vmem:[#allocation28_spill] sm:$0xff] }
 0xb56   : > { %v11890_v19 = vpop.f32.mrf.mxu1  ;;  %v11897_v39 = vpop.f32.mrf.mxu0 }
 0xb57   : > { %v8106_v7 = vadd.f32 %v11890_v19, %v8023_v58  ;;  %v19751_v19 = vld [vmem:[#allocation30_spill] sm:$0xff]  ;;  %v19754_v58 = vld [vmem:[#allocation33_spill] sm:$0xff] }
 0xb58   : > { %v8096_v41 = vpop.f32.mrf.mxu1  ;;  %v8179_v31 = vpop.f32.mrf.mxu0 }
 0xb59   : > { %v8105_v37 = vadd.f32 %v8096_v41, %v8022_v40  ;;  %v8189_v16 = vadd.f32 %v11897_v39, %v8106_v7  ;;  %v19752_v39 = vld [vmem:[#allocation31_spill] sm:$0xff]  ;;  %v19753_v40 = vld [vmem:[#allocation32_spill] sm:$0xff]  ;;  %v19755_v41 = vld [vmem:[#allocation34_spill] sm:$0xff] }
 0xb5b   : > { %v8188_v14 = vadd.f32 %v8179_v31, %v8105_v37  ;;  %v11904_v1 = vpop.f32.mrf.mxu1  ;;  %v19756_v37 = vld [vmem:[#allocation35_spill] sm:$0xff] }
 0xb5c   : > { %v8272_v45 = vadd.f32 %v11904_v1, %v8189_v16 }
 0xb5d   : > { %v8262_v51 = vpop.f32.mrf.mxu1 }
 0xb5e   : > { %v8271_v26 = vadd.f32 %v8262_v51, %v8188_v14  ;;  %v8274_v49 = vadd.f32 %v8272_v45, %v16530_v63  ;;  %v19727_v63 = vld [vmem:[#allocation6_spill] sm:$0xff] }
 0xb60   : > { %v8273_v60 = vadd.f32 %v8271_v26, %v16513_v57  ;;  %v12820_v57 = vld [vmem:[%s19596_s10 + $0x28] sm:$0xff] }
 0xb62   : > { %11536 = vmatmul.mubr.msk.f32.vlgmr.msra.gmra.mxu0 %vm4826_vm0, %v8273_v60  ;;  %11540 = vmatmul.mubr.msk.f32.vlgmr.msra.gmra.mxu1 %vm4826_vm0, %v8273_v60 }
 0xb63   : > { %11543 = vmatpush1.msk.msra.mxu0 %vm4249_vm4, %v12818_v5  ;;  %11547 = vmatpush1.msk.msra.mxu1 %vm4249_vm4, %v12819_v48 }
 0xb64   : > { %8465 = vmatprep.subr.mxu0 %v12820_v57  ;;  %8542 = vmatprep.subr.mxu1 %v12821_v12 }
 0xb65   : > { %8466 = vmatpush1.msra.mxu0 %v12822_v23  ;;  %8543 = vmatpush1.msra.mxu1 %v12823_v61 }
 0xb66   : > { %8351 = vmatprep.mubr.f32.mxu0 %v19681_v8  ;;  %8428 = vmatprep.mubr.f32.mxu1 %v19681_v8 }
 0xb67   : > { %8637 = vmatprep.subr.mxu0 %v19725_v21  ;;  %8714 = vmatprep.subr.mxu1 %v19726_v3 }
 0xb68   : > { %11537 = vmatmul.mubr.msk.f32.gmra.mxu0 %vm4826_vm0, %v8274_v49  ;;  %11541 = vmatmul.mubr.msk.f32.gmra.mxu1 %vm4826_vm0, %v8274_v49 }
 0xb69   : > { %8499 = vmatprep.mubr.f32.mxu0 %v19681_v8  ;;  %8576 = vmatprep.mubr.f32.mxu1 %v19681_v8 }
 0xb6c   : > { %11544 = vmatmul.mubr.msk.f32.vlgmr.msra.gmra.mxu0 %vm4826_vm0, %v8273_v60  ;;  %11548 = vmatmul.mubr.msk.f32.vlgmr.msra.gmra.mxu1 %vm4826_vm0, %v8273_v60 }
 0xb6d   : > { %8638 = vmatpush1.msra.mxu0 %v19727_v63  ;;  %8715 = vmatpush1.msra.mxu1 %v19728_v22 }
 0xb6e   : > { %8639 = vmatprep.subr.mxu0 %v19729_v10  ;;  %8716 = vmatprep.subr.mxu1 %v19730_v32 }
 0xb6f   : > { %8640 = vmatpush1.msra.mxu0 %v19731_v28  ;;  %8717 = vmatpush1.msra.mxu1 %v19732_v47  ;;  %v19045_v28 = vpop.permute.xlu1 %8600  ;;  %v19047_v47 = vpop.permute.xlu0 %8595 }
 0xb70   : > { %8505 = vmatprep.mubr.f32.mxu0 %v19681_v8  ;;  %8582 = vmatprep.mubr.f32.mxu1 %v19681_v8 }
 0xb71   : > { %8791 = vmatprep.subr.mxu0 %v19733_v0  ;;  %8868 = vmatprep.subr.mxu1 %v19734_v46 }
 0xb72   : > { %11545 = vmatmul.mubr.msk.f32.gmra.mxu0 %vm4826_vm0, %v8274_v49  ;;  %11549 = vmatmul.mubr.msk.f32.gmra.mxu1 %vm4826_vm0, %v8274_v49 }
 0xb73   : > { %8673 = vmatprep.mubr.f32.mxu0 %v19681_v8  ;;  %8750 = vmatprep.mubr.f32.mxu1 %v19681_v8 }
 0xb76   : > { %11550 = vmatmul.mubr.msk.f32.vlgmr.msra.gmra.mxu0 %vm1356_vm1, %v8589_v13  ;;  %11552 = vmatmul.mubr.msk.f32.vlgmr.msra.gmra.mxu1 %vm1356_vm1, %v8589_v13 }
 0xb77   : > { %8792 = vmatpush1.msra.mxu0 %v19735_v38  ;;  %8869 = vmatpush1.msra.mxu1 %v19736_v34 }
 0xb78   : > { %8793 = vmatprep.subr.mxu0 %v19737_v59  ;;  %8870 = vmatprep.subr.mxu1 %v19738_v18 }
 0xb79   : > { %8794 = vmatpush1.msra.mxu0 %v19739_v11  ;;  %8871 = vmatpush1.msra.mxu1 %v19740_v33 }
 0xb7a   : > { %8679 = vmatprep.mubr.f32.mxu0 %v19681_v8  ;;  %8756 = vmatprep.mubr.f32.mxu1 %v19681_v8 }
 0xb7b   : > { %8945 = vmatprep.subr.mxu0 %v19741_v27  ;;  %9022 = vmatprep.subr.mxu1 %v19742_v4 }
 0xb7c   : > { %11551 = vmatmul.mubr.msk.f32.gmra.mxu0 %vm1356_vm1, %v8590_v30  ;;  %11553 = vmatmul.mubr.msk.f32.gmra.mxu1 %vm1356_vm1, %v8590_v30 }
 0xb7d   : > { %8827 = vmatprep.mubr.f32.mxu0 %v19681_v8  ;;  %8904 = vmatprep.mubr.f32.mxu1 %v19681_v8 }
 0xb80   : > { %11554 = vmatmul.mubr.msk.f32.vlgmr.msra.gmra.mxu0 %vm1356_vm1, %v8589_v13  ;;  %11556 = vmatmul.mubr.msk.f32.vlgmr.msra.gmra.mxu1 %vm1356_vm1, %v8589_v13 }
 0xb81   : > { %8946 = vmatpush1.msra.mxu0 %v19743_v56  ;;  %9023 = vmatpush1.msra.mxu1 %v19744_v44 }
 0xb82   : > { %8947 = vmatprep.subr.mxu0 %v19745_v15  ;;  %9024 = vmatprep.subr.mxu1 %v19746_v20 }
 0xb83   : > { %8948 = vmatpush1.msra.mxu0 %v19747_v62  ;;  %9025 = vmatpush1.msra.mxu1 %v19748_v50 }
 0xb84   : > { %8833 = vmatprep.mubr.f32.mxu0 %v19681_v8  ;;  %8910 = vmatprep.mubr.f32.mxu1 %v19681_v8 }
 0xb85   : > { %9099 = vmatprep.subr.mxu0 %v19749_v29  ;;  %9176 = vmatprep.subr.mxu1 %v19750_v42 }
 0xb86   : > { %11555 = vmatmul.mubr.msk.f32.gmra.mxu0 %vm1356_vm1, %v8590_v30  ;;  %11557 = vmatmul.mubr.msk.f32.gmra.mxu1 %vm1356_vm1, %v8590_v30 }
 0xb87   : > { %8981 = vmatprep.mubr.f32.mxu0 %v19681_v8  ;;  %9058 = vmatprep.mubr.f32.mxu1 %v19681_v8 }
 0xb8a   : > { %11558 = vmatmul.mubr.msk.f32.vlgmr.msra.gmra.mxu0 %vm1356_vm1, %v8589_v13  ;;  %11560 = vmatmul.mubr.msk.f32.vlgmr.msra.gmra.mxu1 %vm1356_vm1, %v8589_v13 }
 0xb8b   : > { %9100 = vmatpush1.msra.mxu0 %v19751_v19  ;;  %9177 = vmatpush1.msra.mxu1 %v19752_v39 }
 0xb8c   : > { %9101 = vmatprep.subr.mxu0 %v19753_v40  ;;  %9178 = vmatprep.subr.mxu1 %v19754_v58 }
 0xb8d   : > { %9102 = vmatpush1.msra.mxu0 %v19755_v41  ;;  %9179 = vmatpush1.msra.mxu1 %v19756_v37 }
 0xb8e   : > { %8987 = vmatprep.mubr.f32.mxu0 %v19681_v8  ;;  %9064 = vmatprep.mubr.f32.mxu1 %v19681_v8 }
 0xb8f   : > { %11559 = vmatmul.mubr.msk.f32.gmra.mxu0 %vm1356_vm1, %v8590_v30  ;;  %11561 = vmatmul.mubr.msk.f32.gmra.mxu1 %vm1356_vm1, %v8590_v30 }
 0xb90   : > { %9135 = vmatprep.mubr.f32.mxu0 %v19681_v8  ;;  %9212 = vmatprep.mubr.f32.mxu1 %v19681_v8 }
 0xb93   : > { %11562 = vmatmul.mubr.msk.f32.vlgmr.msra.gmra.mxu0 %vm1356_vm1, %v8589_v13  ;;  %11564 = vmatmul.mubr.msk.f32.vlgmr.msra.gmra.mxu1 %vm1356_vm1, %v8589_v13 }
 0xb94   : > { %9141 = vmatprep.mubr.f32.mxu0 %v19681_v8  ;;  %9218 = vmatprep.mubr.f32.mxu1 %v19681_v8 }
 0xb97   : > { %11563 = vmatmul.mubr.msk.f32.gmra.mxu0 %vm1356_vm1, %v8590_v30  ;;  %11565 = vmatmul.mubr.msk.f32.gmra.mxu1 %vm1356_vm1, %v8590_v30 }
 0xb98   : > { %9361 = vmatprep.mubr.f32.mxu0 %v19681_v8  ;;  %9450 = vmatprep.mubr.f32.mxu1 %v19681_v8 }
 0xc22   : > { %v19013_v7 = vpop.f32.mrf.mxu0  ;;  %v19015_v31 = vpop.f32.mrf.mxu1 }
 0xc24   : > { %v19017_v14 = vpop.f32.mrf.mxu0  ;;  %v19019_v1 = vpop.f32.mrf.mxu1 }
 0xc28   : > { %v19021_v51 = vpop.f32.mrf.mxu0  ;;  %v19023_v16 = vpop.f32.mrf.mxu1 }
 0xc2a   : > { %v19025_v26 = vpop.f32.mrf.mxu0  ;;  %v19027_v60 = vpop.f32.mrf.mxu1 }
 0xc2c   : > { %v19029_v45 = vpop.f32.mrf.mxu0  ;;  %v19031_v5 = vpop.f32.mrf.mxu1 }
 0xc2e   : > { %v19033_v48 = vpop.f32.mrf.mxu0  ;;  %v19035_v57 = vpop.f32.mrf.mxu1 }
 0xc32   : > { %v19037_v12 = vpop.f32.mrf.mxu0  ;;  %v19039_v23 = vpop.f32.mrf.mxu1 }
 0xc34   : > { %v19041_v61 = vpop.f32.mrf.mxu0  ;;  %v19043_v49 = vpop.f32.mrf.mxu1 }
 0xc36   : > { %v8675_v21 = vpop.f32.mrf.mxu0  ;;  %v8752_v3 = vpop.f32.mrf.mxu1 }
 0xc37   : > { %v8676_v11 = vadd.f32 %v8675_v21, %v19047_v47  ;;  %v8753_v4 = vadd.f32 %v8752_v3, %v19047_v47 }
 0xc38   : > { %v8677_v63 = vpop.f32.mrf.mxu0  ;;  %v8754_v22 = vpop.f32.mrf.mxu1 }
 0xc39   : > { %v8678_v38 = vadd.f32 %v8677_v63, %v19047_v47  ;;  %v8755_v33 = vadd.f32 %v8754_v22, %v19047_v47  ;;  %v9229_v42 = vadd.f32 %v8676_v11, %v18333_v52  ;;  %v19759_v11 = vld [vmem:[#allocation51_spill] sm:$0xff] }
 0xc3b   : > { %v9230_v50 = vadd.f32 %v8678_v38, %v18335_v25  ;;  %v9232_v19 = vadd.f32 %v8755_v33, %v18341_v36 }
 0xc3c   : > { %v8681_v10 = vpop.f32.mrf.mxu0  ;;  %v8758_v32 = vpop.f32.mrf.mxu1 }
 0xc3d   : > { %v8682_v0 = vadd.f32 %v8681_v10, %v19045_v28  ;;  %v8759_v34 = vadd.f32 %v8758_v32, %v19045_v28 }
 0xc3e   : > { %v8683_v46 = vpop.f32.mrf.mxu0  ;;  %v8760_v13 = vpop.f32.mrf.mxu1 }
 0xc3f   : > { %v8684_v59 = vadd.f32 %v8683_v46, %v19045_v28  ;;  %v8761_v18 = vadd.f32 %v8760_v13, %v19045_v28  ;;  %v9245_v15 = vadd.f32 %v8682_v0, %v18339_v2  ;;  %v9247_v29 = vadd.f32 %v8759_v34, %v18345_v17 }
 0xc40   : > { %v8829_v30 = vpop.f32.mrf.mxu0  ;;  %v8906_v27 = vpop.f32.mrf.mxu1  ;;  %v9231_v2 = vadd.f32 %v8753_v4, %v18337_v9  ;;  %v19079_v9 = vld [vmem:[%s19599_s13 + $0x8] sm:$0xff] }
 0xc41   : > { %v9246_v56 = vadd.f32 %v8684_v59, %v18343_v6  ;;  %v9248_v44 = vadd.f32 %v8761_v18, %v18349_v55  ;;  %v19067_v6 = vld [vmem:[%s19599_s13] sm:$0xff]  ;;  %v8830_v63 = vadd.f32 %v8829_v30, %v19047_v47  ;;  %v8907_v22 = vadd.f32 %v8906_v27, %v19047_v47  ;;  %v19105_v27 = vld [vmem:[%s19599_s13 + $0x10] sm:$0xff] }
 0xc42   : > { %v8831_v20 = vpop.f32.mrf.mxu0  ;;  %v8908_v62 = vpop.f32.mrf.mxu1 }
 0xc43   : > { %9325 = vmatprep.subr.mxu0 %v9246_v56  ;;  %9414 = vmatprep.subr.mxu1 %v9248_v44  ;;  %v8832_v39 = vadd.f32 %v8831_v20, %v19047_v47  ;;  %v8909_v37 = vadd.f32 %v8908_v62, %v19047_v47  ;;  %v19118_v20 = vld [vmem:[%s19599_s13 + $0x18] sm:$0xff] }
 0xc44   : > { %9326 = vmatpush1.msra.mxu0 %v9245_v15  ;;  %9415 = vmatpush1.msra.mxu1 %v9247_v29 }
 0xc45   : > { %9327 = vmatprep.subr.mxu0 %v9230_v50  ;;  %9416 = vmatprep.subr.mxu1 %v9232_v19  ;;  %v9234_v38 = vadd.f32 %v8832_v39, %v18351_v53 }
 0xc46   : > { %v8835_v55 = vpop.f32.mrf.mxu0  ;;  %v8912_v25 = vpop.f32.mrf.mxu1  ;;  %9328 = vmatpush1.msra.mxu0 %v9229_v42  ;;  %9417 = vmatpush1.msra.mxu1 %v9231_v2 }
 0xc47   : > { %11566 = vmatmul.mubr.msk.f32.vlgmr.msra.gmra.mxu0 %vm1356_vm1, %v19067_v6  ;;  %v8836_v52 = vadd.f32 %v8835_v55, %v19045_v28  ;;  %11570 = vmatmul.mubr.msk.f32.vlgmr.msra.gmra.mxu1 %vm1356_vm1, %v19067_v6  ;;  %v8913_v40 = vadd.f32 %v8912_v25, %v19045_v28 }
 0xc48   : > { %v8837_v36 = vpop.f32.mrf.mxu0  ;;  %v8914_v17 = vpop.f32.mrf.mxu1  ;;  %9367 = vmatprep.mubr.f32.mxu0 %v19681_v8  ;;  %9456 = vmatprep.mubr.f32.mxu1 %v19681_v8 }
 0xc49   : > { %v8838_v58 = vadd.f32 %v8837_v36, %v19045_v28  ;;  %v8915_v41 = vadd.f32 %v8914_v17, %v19045_v28  ;;  %v9249_v0 = vadd.f32 %v8836_v52, %v18355_v54  ;;  %v9251_v34 = vadd.f32 %v8913_v40, %v18361_v24 }
 0xc4a   : > { %v8983_v21 = vpop.f32.mrf.mxu0  ;;  %v9060_v3 = vpop.f32.mrf.mxu1  ;;  %v9235_v54 = vadd.f32 %v8907_v22, %v19759_v11 }
 0xc4b   : > { %v9250_v10 = vadd.f32 %v8838_v58, %v18359_v43  ;;  %v9252_v32 = vadd.f32 %v8915_v41, %v18363_v35  ;;  %11567 = vmatmul.mubr.msk.f32.gmra.mxu0 %vm1356_vm1, %v19079_v9  ;;  %11571 = vmatmul.mubr.msk.f32.gmra.mxu1 %vm1356_vm1, %v19079_v9  ;;  %v19757_v43 = vld [vmem:[#allocation48_spill] sm:$0xff]  ;;  %v19758_v35 = vld [vmem:[#allocation49_spill] sm:$0xff]  ;;  %v8984_v25 = vadd.f32 %v8983_v21, %v19047_v47 }
 0xc4c   : > { %v8985_v46 = vpop.f32.mrf.mxu0  ;;  %v9062_v13 = vpop.f32.mrf.mxu1  ;;  %9373 = vmatprep.mubr.f32.mxu0 %v19681_v8  ;;  %v9236_v59 = vadd.f32 %v8909_v37, %v19757_v43  ;;  %v9233_v18 = vadd.f32 %v8830_v63, %v19758_v35  ;;  %9462 = vmatprep.mubr.f32.mxu1 %v19681_v8  ;;  %v9061_v36 = vadd.f32 %v9060_v3, %v19047_v47 }
 0xc4d   : > { %9503 = vmatprep.subr.mxu0 %v9250_v10  ;;  %9592 = vmatprep.subr.mxu1 %v9252_v32  ;;  %v8986_v2 = vadd.f32 %v8985_v46, %v19047_v47  ;;  %v9063_v52 = vadd.f32 %v9062_v13, %v19047_v47  ;;  %v9237_v3 = vadd.f32 %v8984_v25, %v19013_v7 }
 0xc4e   : > { %9504 = vmatpush1.msra.mxu0 %v9249_v0  ;;  %9593 = vmatpush1.msra.mxu1 %v9251_v34  ;;  %v9239_v63 = vadd.f32 %v9061_v36, %v19015_v31 }
 0xc4f   : > { %v8989_v33 = vpop.f32.mrf.mxu0  ;;  %v9066_v30 = vpop.f32.mrf.mxu1  ;;  %9505 = vmatprep.subr.mxu0 %v9234_v38  ;;  %9594 = vmatprep.subr.mxu1 %v9236_v59  ;;  %v9238_v58 = vadd.f32 %v8986_v2, %v19017_v14 }
 0xc50   : > { %9506 = vmatpush1.msra.mxu0 %v9233_v18  ;;  %9595 = vmatpush1.msra.mxu1 %v9235_v54  ;;  %v8990_v29 = vadd.f32 %v8989_v33, %v19045_v28  ;;  %v9067_v55 = vadd.f32 %v9066_v30, %v19045_v28 }
 0xc51   : > { %v8991_v53 = vpop.f32.mrf.mxu0  ;;  %v9068_v24 = vpop.f32.mrf.mxu1  ;;  %11568 = vmatmul.mubr.msk.f32.gmra.mxu0 %vm1356_vm1, %v19105_v27  ;;  %11572 = vmatmul.mubr.msk.f32.gmra.mxu1 %vm1356_vm1, %v19105_v27 }
 0xc52   : > { %v8992_v4 = vadd.f32 %v8991_v53, %v19045_v28  ;;  %v9069_v56 = vadd.f32 %v9068_v24, %v19045_v28  ;;  %9379 = vmatprep.mubr.f32.mxu0 %v19681_v8  ;;  %9468 = vmatprep.mubr.f32.mxu1 %v19681_v8  ;;  %v9253_v17 = vadd.f32 %v8990_v29, %v19021_v51 }
 0xc53   : > { %v9137_v44 = vpop.f32.mrf.mxu0  ;;  %v9214_v15 = vpop.f32.mrf.mxu1  ;;  %v9255_v41 = vadd.f32 %v9067_v55, %v19023_v16  ;;  %v9240_v51 = vadd.f32 %v9063_v52, %v19019_v1 }
 0xc54   : > { %v9254_v62 = vadd.f32 %v8992_v4, %v19025_v26  ;;  %v9256_v50 = vadd.f32 %v9069_v56, %v19027_v60  ;;  %v9215_v22 = vadd.f32 %v9214_v15, %v19047_v47 }
 0xc55   : > { %v9139_v42 = vpop.f32.mrf.mxu0  ;;  %v9216_v19 = vpop.f32.mrf.mxu1  ;;  %11569 = vmatmul.mubr.msk.f32.gmra.mxu0 %vm1356_vm1, %v19118_v20  ;;  %11573 = vmatmul.mubr.msk.f32.gmra.mxu1 %vm1356_vm1, %v19118_v20 }
 0xc56   : > { %9681 = vmatprep.subr.mxu0 %v9254_v62  ;;  %9770 = vmatprep.subr.mxu1 %v9256_v50  ;;  %v9140_v31 = vadd.f32 %v9139_v42, %v19047_v47 }
 0xc57   : > { %v9143_v26 = vpop.f32.mrf.mxu0  ;;  %v9220_v60 = vpop.f32.mrf.mxu1  ;;  %9539 = vmatprep.mubr.f32.mxu0 %v19681_v8  ;;  %9628 = vmatprep.mubr.f32.mxu1 %v19681_v8 }
 0xc58   : > { %v9144_v7 = vadd.f32 %v9143_v26, %v19045_v28  ;;  %v9221_v1 = vadd.f32 %v9220_v60, %v19045_v28 }
 0xc59   : > { %v9145_v39 = vpop.f32.mrf.mxu0  ;;  %v9222_v40 = vpop.f32.mrf.mxu1  ;;  %11574 = vmatmul.mubr.msk.f32.vlgmr.msra.gmra.mxu0 %vm1356_vm1, %v19067_v6  ;;  %11578 = vmatmul.mubr.msk.f32.vlgmr.msra.gmra.mxu1 %vm1356_vm1, %v19067_v6 }
 0xc5a   : > { %v9146_v37 = vadd.f32 %v9145_v39, %v19045_v28  ;;  %v9223_v21 = vadd.f32 %v9222_v40, %v19045_v28  ;;  %9682 = vmatpush1.msra.mxu0 %v9253_v17  ;;  %9771 = vmatpush1.msra.mxu1 %v9255_v41  ;;  %v9257_v10 = vadd.f32 %v9144_v7, %v19037_v12 }
 0xc5b   : > { %9683 = vmatprep.subr.mxu0 %v9238_v58  ;;  %9772 = vmatprep.subr.mxu1 %v9240_v51  ;;  %v9242_v28 = vadd.f32 %v9140_v31, %v19033_v48  ;;  %v9259_v32 = vadd.f32 %v9221_v1, %v19039_v23 }
 0xc5c   : > { %v9258_v14 = vadd.f32 %v9146_v37, %v19041_v61  ;;  %v9260_v16 = vadd.f32 %v9223_v21, %v19043_v49  ;;  %9684 = vmatpush1.msra.mxu0 %v9237_v3  ;;  %9773 = vmatpush1.msra.mxu1 %v9239_v63  ;;  %v9138_v61 = vadd.f32 %v9137_v44, %v19047_v47 }
 0xc5d   : > { %9545 = vmatprep.mubr.f32.mxu0 %v19681_v8  ;;  %9634 = vmatprep.mubr.f32.mxu1 %v19681_v8  ;;  %v9217_v49 = vadd.f32 %v9216_v19, %v19047_v47  ;;  %v9243_v47 = vadd.f32 %v9215_v22, %v19031_v5  ;;  %v19239_v19 = vpop.permute.xlu0 %9277 }
 0xc5e   : > { %11575 = vmatmul.mubr.msk.f32.gmra.mxu0 %vm1356_vm1, %v19079_v9  ;;  %11579 = vmatmul.mubr.msk.f32.gmra.mxu1 %vm1356_vm1, %v19079_v9  ;;  %v9241_v0 = vadd.f32 %v9138_v61, %v19029_v45  ;;  %v19227_v45 = vpop.permute.xlu1 %9267 }
 0xc5f   : > { %9859 = vmatprep.subr.mxu0 %v9258_v14  ;;  %9948 = vmatprep.subr.mxu1 %v9260_v16  ;;  %v9244_v46 = vadd.f32 %v9217_v49, %v19035_v57 }
 0xc60   : > { %9551 = vmatprep.mubr.f32.mxu0 %v19681_v8  ;;  %9640 = vmatprep.mubr.f32.mxu1 %v19681_v8 }
 0xc62   : > { %11576 = vmatmul.mubr.msk.f32.gmra.mxu0 %vm1356_vm1, %v19105_v27  ;;  %11580 = vmatmul.mubr.msk.f32.gmra.mxu1 %vm1356_vm1, %v19105_v27 }
 0xc63   : > { %9557 = vmatprep.mubr.f32.mxu0 %v19681_v8  ;;  %9646 = vmatprep.mubr.f32.mxu1 %v19681_v8 }
 0xc66   : > { %11577 = vmatmul.mubr.msk.f32.gmra.mxu0 %vm1356_vm1, %v19118_v20  ;;  %11581 = vmatmul.mubr.msk.f32.gmra.mxu1 %vm1356_vm1, %v19118_v20 }
 0xc67   : > { %9717 = vmatprep.mubr.f32.mxu0 %v19681_v8  ;;  %9806 = vmatprep.mubr.f32.mxu1 %v19681_v8 }
 0xc6a   : > { %11582 = vmatmul.mubr.msk.f32.vlgmr.msra.gmra.mxu0 %vm1356_vm1, %v19067_v6  ;;  %11586 = vmatmul.mubr.msk.f32.vlgmr.msra.gmra.mxu1 %vm1356_vm1, %v19067_v6 }
 0xc6b   : > { %9860 = vmatpush1.msra.mxu0 %v9257_v10  ;;  %9949 = vmatpush1.msra.mxu1 %v9259_v32 }
 0xc6c   : > { %9861 = vmatprep.subr.mxu0 %v9242_v28  ;;  %9950 = vmatprep.subr.mxu1 %v9244_v46 }
 0xc6d   : > { %9862 = vmatpush1.msra.mxu0 %v9241_v0  ;;  %9951 = vmatpush1.msra.mxu1 %v9243_v47 }
 0xc6e   : > { %9723 = vmatprep.mubr.f32.mxu0 %v19681_v8  ;;  %9812 = vmatprep.mubr.f32.mxu1 %v19681_v8 }
 0xc6f   : > { %11583 = vmatmul.mubr.msk.f32.gmra.mxu0 %vm1356_vm1, %v19079_v9  ;;  %11587 = vmatmul.mubr.msk.f32.gmra.mxu1 %vm1356_vm1, %v19079_v9 }
 0xc70   : > { %9729 = vmatprep.mubr.f32.mxu0 %v19681_v8  ;;  %9818 = vmatprep.mubr.f32.mxu1 %v19681_v8 }
 0xc73   : > { %11584 = vmatmul.mubr.msk.f32.gmra.mxu0 %vm1356_vm1, %v19105_v27  ;;  %11588 = vmatmul.mubr.msk.f32.gmra.mxu1 %vm1356_vm1, %v19105_v27 }
 0xc74   : > { %9735 = vmatprep.mubr.f32.mxu0 %v19681_v8  ;;  %9824 = vmatprep.mubr.f32.mxu1 %v19681_v8 }
 0xc77   : > { %11585 = vmatmul.mubr.msk.f32.gmra.mxu0 %vm1356_vm1, %v19118_v20  ;;  %11589 = vmatmul.mubr.msk.f32.gmra.mxu1 %vm1356_vm1, %v19118_v20 }
 0xc78   : > { %9895 = vmatprep.mubr.f32.mxu0 %v19681_v8  ;;  %9984 = vmatprep.mubr.f32.mxu1 %v19681_v8 }
 0xc7b   : > { %11590 = vmatmul.mubr.msk.f32.vlgmr.msra.gmra.mxu0 %vm1356_vm1, %v19067_v6  ;;  %11594 = vmatmul.mubr.msk.f32.vlgmr.msra.gmra.mxu1 %vm1356_vm1, %v19067_v6 }
 0xc7c   : > { %9901 = vmatprep.mubr.f32.mxu0 %v19681_v8  ;;  %9990 = vmatprep.mubr.f32.mxu1 %v19681_v8 }
 0xc7f   : > { %11591 = vmatmul.mubr.msk.f32.gmra.mxu0 %vm1356_vm1, %v19079_v9  ;;  %11595 = vmatmul.mubr.msk.f32.gmra.mxu1 %vm1356_vm1, %v19079_v9 }
 0xc80   : > { %9907 = vmatprep.mubr.f32.mxu0 %v19681_v8  ;;  %9996 = vmatprep.mubr.f32.mxu1 %v19681_v8 }
 0xc83   : > { %11592 = vmatmul.mubr.msk.f32.gmra.mxu0 %vm1356_vm1, %v19105_v27  ;;  %11596 = vmatmul.mubr.msk.f32.gmra.mxu1 %vm1356_vm1, %v19105_v27 }
 0xc84   : > { %9913 = vmatprep.mubr.f32.mxu0 %v19681_v8  ;;  %10002 = vmatprep.mubr.f32.mxu1 %v19681_v8  ;;  %v19232_v8 = vpop.permute.xlu1 %9272 }
 0xc87   : > { %11593 = vmatmul.mubr.msk.f32.gmra.mxu0 %vm1356_vm1, %v19118_v20  ;;  %11597 = vmatmul.mubr.msk.f32.gmra.mxu1 %vm1356_vm1, %v19118_v20 }
 0xc88   : > { %v19244_v58 = vpop.permute.xlu1 %9282 }
 0xd07   : > { %v9363_v5 = vpop.f32.mrf.mxu0  ;;  %v9452_v57 = vpop.f32.mrf.mxu1 }
 0xd08   : > { %v9364_v48 = vadd.f32 %v9363_v5, %v19227_v45  ;;  %v9453_v12 = vadd.f32 %v9452_v57, %v19227_v45 }
 0xd09   : > { %v9365_v23 = vpop.f32.mrf.mxu0  ;;  %v9454_v13 = vpop.f32.mrf.mxu1 }
 0xd0a   : > { %v10009_v6 = vsub.f32 0.0, %v9364_v48  ;;  %v9366_v9 = vadd.f32 %v9365_v23, %v19227_v45  ;;  %v10011_v38 = vsub.f32 0.0, %v9453_v12  ;;  %v9455_v34 = vadd.f32 %v9454_v13, %v19227_v45 }
 0xd0b   : > { %v9369_v43 = vpop.f32.mrf.mxu0  ;;  %v9458_v11 = vpop.f32.mrf.mxu1 }
 0xd0c   : > { %v10073_v59 = vmul.f32 1.442695, %v10009_v6  ;;  %v10010_v35 = vsub.f32 0.0, %v9366_v9  ;;  %v9370_v18 = vadd.f32 %v9369_v43, %v19232_v8  ;;  %v10077_v54 = vmul.f32 1.442695, %v10011_v38 }
 0xd0d   : > { %v10012_v33 = vsub.f32 0.0, %v9455_v34  ;;  %v9459_v30 = vadd.f32 %v9458_v11, %v19232_v8  ;;  %v9371_v27 = vpop.f32.mrf.mxu0  ;;  %v9460_v56 = vpop.f32.mrf.mxu1 }
 0xd0e   : > { %11934 = vpow2.f32 %v10073_v59  ;;  %v10075_v53 = vmul.f32 1.442695, %v10010_v35  ;;  %v10025_v24 = vsub.f32 0.0, %v9370_v18  ;;  %v9372_v4 = vadd.f32 %v9371_v27, %v19232_v8 }
 0xd0f   : > { %11936 = vpow2.f32 %v10077_v54  ;;  %v10079_v44 = vmul.f32 1.442695, %v10012_v33  ;;  %v10027_v15 = vsub.f32 0.0, %v9459_v30  ;;  %v9461_v20 = vadd.f32 %v9460_v56, %v19232_v8 }
 0xd10   : > { %11938 = vpow2.f32 %v10075_v53  ;;  %v10105_v62 = vmul.f32 1.442695, %v10025_v24  ;;  %v10026_v50 = vsub.f32 0.0, %v9372_v4 }
 0xd11   : > { %11940 = vpow2.f32 %v10079_v44  ;;  %v10109_v29 = vmul.f32 1.442695, %v10027_v15  ;;  %v10028_v42 = vsub.f32 0.0, %v9461_v20  ;;  %v9375_v55 = vpop.f32.mrf.mxu0  ;;  %v9464_v26 = vpop.f32.mrf.mxu1 }
 0xd12   : > { %11942 = vpow2.f32 %v10105_v62  ;;  %v10107_v2 = vmul.f32 1.442695, %v10026_v50  ;;  %v9376_v52 = vadd.f32 %v9375_v55, %v19239_v19  ;;  %v9465_v60 = vadd.f32 %v9464_v26, %v19239_v19 }
 0xd13   : > { %11944 = vpow2.f32 %v10109_v29  ;;  %v10111_v25 = vmul.f32 1.442695, %v10028_v42  ;;  %v9377_v36 = vpop.f32.mrf.mxu0  ;;  %v9466_v40 = vpop.f32.mrf.mxu1 }
 0xd14   : > { %11946 = vpow2.f32 %v10107_v2  ;;  %v10041_v17 = vsub.f32 0.0, %v9376_v52  ;;  %v9378_v39 = vadd.f32 %v9377_v36, %v19239_v19  ;;  %v10043_v41 = vsub.f32 0.0, %v9465_v60 }
 0xd15   : > { %11948 = vpow2.f32 %v10111_v25  ;;  %v9467_v37 = vadd.f32 %v9466_v40, %v19239_v19  ;;  %v9381_v21 = vpop.f32.mrf.mxu0  ;;  %v9470_v14 = vpop.f32.mrf.mxu1 }
 0xd16   : > { %v10137_v3 = vmul.f32 1.442695, %v10041_v17  ;;  %v10042_v51 = vsub.f32 0.0, %v9378_v39  ;;  %v9382_v63 = vadd.f32 %v9381_v21, %v19244_v58  ;;  %v10141_v16 = vmul.f32 1.442695, %v10043_v41 }
 0xd17   : > { %v10044_v7 = vsub.f32 0.0, %v9467_v37  ;;  %v9383_v31 = vpop.f32.mrf.mxu0  ;;  %v9471_v49 = vadd.f32 %v9470_v14, %v19244_v58  ;;  %v9472_v22 = vpop.f32.mrf.mxu1 }
 0xd18   : > { %11950 = vpow2.f32 %v10137_v3  ;;  %v10139_v1 = vmul.f32 1.442695, %v10042_v51  ;;  %v10057_v61 = vsub.f32 0.0, %v9382_v63  ;;  %v9384_v46 = vadd.f32 %v9383_v31, %v19244_v58 }
 0xd19   : > { %11952 = vpow2.f32 %v10141_v16  ;;  %v10143_v10 = vmul.f32 1.442695, %v10044_v7  ;;  %v9541_v28 = vpop.f32.mrf.mxu0  ;;  %v9630_v47 = vpop.f32.mrf.mxu1  ;;  %v9473_v57 = vadd.f32 %v9472_v22, %v19244_v58  ;;  %v10059_v9 = vsub.f32 0.0, %v9471_v49 }
 0xd1a   : > { %11954 = vpow2.f32 %v10139_v1  ;;  %v10169_v0 = vmul.f32 1.442695, %v10057_v61  ;;  %v9542_v43 = vadd.f32 %v9541_v28, %v19227_v45  ;;  %v10058_v18 = vsub.f32 0.0, %v9384_v46 }
 0xd1b   : > { %v11935_v32 = vpop.eup %11934  ;;  %11956 = vpow2.f32 %v10143_v10  ;;  %v9543_v12 = vpop.f32.mrf.mxu0  ;;  %v10060_v30 = vsub.f32 0.0, %v9473_v57  ;;  %v10173_v24 = vmul.f32 1.442695, %v10059_v9  ;;  %v9631_v20 = vadd.f32 %v9630_v47, %v19227_v45  ;;  %v12825_v9 = vld [vmem:[%s13178_s30 + $0x10] sm:$0xff] }
 0xd1c   : > { %v11937_v5 = vpop.eup %11936  ;;  %v10201_v48 = vadd.f32 1.0, %v11935_v32  ;;  %11958 = vpow2.f32 %v10169_v0  ;;  %v9632_v13 = vpop.f32.mrf.mxu1  ;;  %v10013_v15 = vsub.f32 0.0, %v9542_v43  ;;  %v10171_v29 = vmul.f32 1.442695, %v10058_v18 }
 0xd1d   : > { %v11939_v23 = vpop.eup %11938  ;;  %v10203_v6 = vadd.f32 1.0, %v11937_v5  ;;  %v9544_v42 = vadd.f32 %v9543_v12, %v19227_v45  ;;  %v10175_v2 = vmul.f32 1.442695, %v10060_v30  ;;  %v9633_v55 = vadd.f32 %v9632_v13, %v19227_v45 }
 0xd1e   : > { %v11941_v38 = vpop.eup %11940  ;;  %11960 = vrcp.f32 %v10201_v48  ;;  %v10202_v34 = vadd.f32 1.0, %v11939_v23  ;;  %v9547_v11 = vpop.f32.mrf.mxu0  ;;  %v10081_v60 = vmul.f32 1.442695, %v10013_v15  ;;  %v10015_v36 = vsub.f32 0.0, %v9631_v20  ;;  %v12824_v48 = vld [vmem:[%s13178_s30] sm:$0xff] }
 0xd1f   : > { %v11943_v59 = vpop.eup %11942  ;;  %11962 = vrcp.f32 %v10203_v6  ;;  %v10204_v35 = vadd.f32 1.0, %v11941_v38  ;;  %v9636_v4 = vpop.f32.mrf.mxu1  ;;  %v9548_v25 = vadd.f32 %v9547_v11, %v19232_v8  ;;  %v10014_v41 = vsub.f32 0.0, %v9544_v42 }
 0xd20   : > { %v11945_v54 = vpop.eup %11944  ;;  %11964 = vrcp.f32 %v10202_v34  ;;  %v10217_v33 = vadd.f32 1.0, %v11943_v59  ;;  %v9549_v62 = vpop.f32.mrf.mxu0  ;;  %v9637_v37 = vadd.f32 %v9636_v4, %v19232_v8  ;;  %v10016_v51 = vsub.f32 0.0, %v9633_v55 }
 0xd21   : > { %v11947_v27 = vpop.eup %11946  ;;  %11966 = vrcp.f32 %v10204_v35  ;;  %v10219_v53 = vadd.f32 1.0, %v11945_v54  ;;  %v9638_v52 = vpop.f32.mrf.mxu1  ;;  %v9550_v63 = vadd.f32 %v9549_v62, %v19232_v8  ;;  %v10029_v7 = vsub.f32 0.0, %v9548_v25  ;;  %v12826_v35 = vld [vmem:[%s13178_s30 + $0x8] sm:$0xff] }
 0xd22   : > { %v11949_v56 = vpop.eup %11948  ;;  %11968 = vrcp.f32 %v10217_v33  ;;  %v10218_v44 = vadd.f32 1.0, %v11947_v27  ;;  %v9553_v17 = vpop.f32.mrf.mxu0  ;;  %v9639_v31 = vadd.f32 %v9638_v52, %v19232_v8  ;;  %v10085_v22 = vmul.f32 1.442695, %v10015_v36  ;;  %v12827_v27 = vld [vmem:[%s13178_s30 + $0x18] sm:$0xff] }
 0xd23   : > { %11970 = vrcp.f32 %v10219_v53  ;;  %v10220_v50 = vadd.f32 1.0, %v11949_v56  ;;  %v9642_v1 = vpop.f32.mrf.mxu1  ;;  %v19260_v10 = vadd.f32 %v9553_v17, %v19239_v19  ;;  %v10083_v46 = vmul.f32 1.442695, %v10014_v41 }
 0xd24   : > { %11972 = vrcp.f32 %v10218_v44  ;;  %v9555_v28 = vpop.f32.mrf.mxu0  ;;  %v10031_v47 = vsub.f32 0.0, %v9637_v37  ;;  %v10087_v12 = vmul.f32 1.442695, %v10016_v51  ;;  %v10030_v23 = vsub.f32 0.0, %v9550_v63  ;;  %v12828_v44 = vld [vmem:[%s13178_s30 + $0x80] sm:$0xff] }
 0xd25   : > { %11974 = vrcp.f32 %v10220_v50  ;;  %v11951_v26 = vpop.eup %11950  ;;  %v10113_v38 = vmul.f32 1.442695, %v10029_v7  ;;  %v10032_v34 = vsub.f32 0.0, %v9639_v31  ;;  %v9644_v43 = vpop.f32.mrf.mxu1  ;;  %v10045_v11 = vsub.f32 0.0, %v19260_v10 }
 0xd26   : > { %11976 = vpow2.f32 %v10173_v24  ;;  %v11953_v39 = vpop.eup %11952  ;;  %v10233_v40 = vadd.f32 1.0, %v11951_v26  ;;  %v9643_v54 = vadd.f32 %v9642_v1, %v19239_v19  ;;  %v9559_v33 = vpop.f32.mrf.mxu0  ;;  %v10117_v24 = vmul.f32 1.442695, %v10031_v47  ;;  %v12830_v26 = vld [vmem:[%s13178_s30 + $0x88] sm:$0xff]  ;;  %v12833_v47 = vld [vmem:[%s13178_s30 + $0x110] sm:$0xff] }
 0xd27   : > { %11978 = vpow2.f32 %v10171_v29  ;;  %v11955_v21 = vpop.eup %11954  ;;  %v10235_v3 = vadd.f32 1.0, %v11953_v39  ;;  %v9556_v4 = vadd.f32 %v9555_v28, %v19239_v19  ;;  %v10115_v20 = vmul.f32 1.442695, %v10030_v23  ;;  %v12829_v29 = vld [vmem:[%s13178_s30 + $0x90] sm:$0xff]  ;;  %v9648_v25 = vpop.f32.mrf.mxu1  ;;  %v12832_v28 = vld [vmem:[%s13178_s30 + $0x100] sm:$0xff] }
 0xd28   : > { %11980 = vpow2.f32 %v10175_v2  ;;  %v11957_v14 = vpop.eup %11956  ;;  %v10234_v16 = vadd.f32 1.0, %v11955_v21  ;;  %v9645_v62 = vadd.f32 %v9644_v43, %v19239_v19  ;;  %v10119_v2 = vmul.f32 1.442695, %v10032_v34  ;;  %v9561_v17 = vpop.f32.mrf.mxu0  ;;  %v12835_v34 = vld [vmem:[%s13178_s30 + $0x118] sm:$0xff] }
 0xd29   : > { %11982 = vrcp.f32 %v10233_v40  ;;  %v11959_v61 = vpop.eup %11958  ;;  %v10236_v49 = vadd.f32 1.0, %v11957_v14  ;;  %v9560_v55 = vadd.f32 %v9559_v33, %v19244_v58  ;;  %v10047_v36 = vsub.f32 0.0, %v9643_v54  ;;  %v12831_v40 = vld [vmem:[%s13178_s30 + $0x98] sm:$0xff]  ;;  %v9650_v31 = vpop.f32.mrf.mxu1 }
 0xd2a   : > { %11984 = vrcp.f32 %v10235_v3  ;;  %v10249_v0 = vadd.f32 1.0, %v11959_v61  ;;  %v10046_v37 = vsub.f32 0.0, %v9556_v4  ;;  %v10048_v51 = vsub.f32 0.0, %v9645_v62 }
 0xd2b   : > { %v11961_v32 = vpop.eup %11960  ;;  %11986 = vrcp.f32 %v10234_v16  ;;  %v10145_v16 = vmul.f32 1.442695, %v10045_v11  ;;  %v10061_v7 = vsub.f32 0.0, %v9560_v55  ;;  %v9562_v54 = vadd.f32 %v9561_v17, %v19244_v58 }
 0xd2c   : > { %v11963_v5 = vpop.eup %11962  ;;  %v10393_v57 = vmul.f32 %v12824_v48, %v11961_v32  ;;  %11988 = vrcp.f32 %v10236_v49  ;;  %v10149_v49 = vmul.f32 1.442695, %v10047_v36  ;;  %v10151_v48 = vmul.f32 1.442695, %v10048_v51 }
 0xd2d   : > { %v11965_v6 = vpop.eup %11964  ;;  %v10395_v13 = vmul.f32 %v12825_v9, %v11963_v5  ;;  %11990 = vrcp.f32 %v10249_v0  ;;  %v10147_v0 = vmul.f32 1.442695, %v10046_v37  ;;  %v9649_v9 = vadd.f32 %v9648_v25, %v19244_v58 }
 0xd2e   : > { %v11967_v59 = vpop.eup %11966  ;;  %10457 = vst [vmem:[%s19265_s24] sm:$0xff] %v10393_v57  ;;  %v10394_v18 = vmul.f32 %v12826_v35, %v11965_v6  ;;  %11992 = vpow2.f32 %v10081_v60  ;;  %v10177_v6 = vmul.f32 1.442695, %v10061_v7 }
 0xd2f   : > { %v11969_v30 = vpop.eup %11968  ;;  %10459 = vst [vmem:[%s19265_s24 + $0x10] sm:$0xff] %v10395_v13  ;;  %v10396_v53 = vmul.f32 %v12827_v27, %v11967_v59  ;;  %11994 = vpow2.f32 %v10085_v22  ;;  %v9719_v22 = vpop.f32.mrf.mxu0  ;;  %v9651_v27 = vadd.f32 %v9650_v31, %v19244_v58  ;;  %v10063_v4 = vsub.f32 0.0, %v9649_v9 }
 0xd30   : > { %v11971_v56 = vpop.eup %11970  ;;  %10458 = vst [vmem:[%s19265_s24 + $0x8] sm:$0xff] %v10394_v18  ;;  %v10409_v15 = vmul.f32 %v12828_v44, %v11969_v30  ;;  %11996 = vpow2.f32 %v10083_v46  ;;  %v9808_v13 = vpop.f32.mrf.mxu1  ;;  %v12836_v18 = vld [vmem:[%s13178_s30 + $0x180] sm:$0xff] }
 0xd31   : > { %v11973_v50 = vpop.eup %11972  ;;  %10460 = vst [vmem:[%s19265_s24 + $0x18] sm:$0xff] %v10396_v53  ;;  %v10411_v42 = vmul.f32 %v12829_v29, %v11971_v56  ;;  %11998 = vpow2.f32 %v10087_v12  ;;  %v12834_v12 = vld [vmem:[%s13178_s30 + $0x108] sm:$0xff]  ;;  %v9721_v59 = vpop.f32.mrf.mxu0  ;;  %v10064_v25 = vsub.f32 0.0, %v9651_v27 }
 0xd32   : > { %v11975_v52 = vpop.eup %11974  ;;  %10473 = vst [vmem:[%s19265_s24 + $0x80] sm:$0xff] %v10409_v15  ;;  %v10410_v60 = vmul.f32 %v12830_v26, %v11973_v50  ;;  %12000 = vpow2.f32 %v10113_v38  ;;  %v9810_v56 = vpop.f32.mrf.mxu1 }
 0xd33   : > { %v11977_v39 = vpop.eup %11976  ;;  %10475 = vst [vmem:[%s19265_s24 + $0x90] sm:$0xff] %v10411_v42  ;;  %v10412_v41 = vmul.f32 %v12831_v40, %v11975_v52  ;;  %12002 = vpow2.f32 %v10117_v24  ;;  %v9725_v62 = vpop.f32.mrf.mxu0  ;;  %v10062_v42 = vsub.f32 0.0, %v9562_v54  ;;  %v10183_v31 = vmul.f32 1.442695, %v10064_v25 }
 0xd34   : > { %v11979_v21 = vpop.eup %11978  ;;  %10474 = vst [vmem:[%s19265_s24 + $0x88] sm:$0xff] %v10410_v60  ;;  %v10251_v3 = vadd.f32 1.0, %v11977_v39  ;;  %12004 = vpow2.f32 %v10115_v20  ;;  %v9720_v20 = vadd.f32 %v9719_v22, %v19227_v45  ;;  %v10181_v60 = vmul.f32 1.442695, %v10063_v4  ;;  %v9814_v36 = vpop.f32.mrf.mxu1 }
 0xd35   : > { %v11981_v63 = vpop.eup %11980  ;;  %10476 = vst [vmem:[%s19265_s24 + $0x98] sm:$0xff] %v10412_v41  ;;  %v10250_v14 = vadd.f32 1.0, %v11979_v21  ;;  %12006 = vpow2.f32 %v10119_v2  ;;  %v9809_v41 = vadd.f32 %v9808_v13, %v19227_v45  ;;  %v9727_v37 = vpop.f32.mrf.mxu0  ;;  %v10179_v51 = vmul.f32 1.442695, %v10062_v42 }
 0xd36   : > { %v11983_v1 = vpop.eup %11982  ;;  %12008 = vrcp.f32 %v10251_v3  ;;  %v10252_v61 = vadd.f32 1.0, %v11981_v63  ;;  %v10017_v40 = vsub.f32 0.0, %v9720_v20  ;;  %v9722_v63 = vadd.f32 %v9721_v59, %v19227_v45  ;;  %v12840_v20 = vld [vmem:[%s13178_s30 + $0x20] sm:$0xff] }
 0xd37   : > { %v11985_v10 = vpop.eup %11984  ;;  %v10425_v32 = vmul.f32 %v12832_v28, %v11983_v1  ;;  %12010 = vrcp.f32 %v10250_v14  ;;  %v9811_v1 = vadd.f32 %v9810_v56, %v19227_v45  ;;  %v9816_v28 = vpop.f32.mrf.mxu1 }
 0xd38   : > { %v11987_v46 = vpop.eup %11986  ;;  %v10427_v5 = vmul.f32 %v12833_v47, %v11985_v10  ;;  %12012 = vrcp.f32 %v10252_v61  ;;  %v9726_v10 = vadd.f32 %v9725_v62, %v19232_v8  ;;  %v10019_v47 = vsub.f32 0.0, %v9809_v41 }
 0xd39   : > { %v11989_v57 = vpop.eup %11988  ;;  %10489 = vst [vmem:[%s19265_s24 + $0x100] sm:$0xff] %v10425_v32  ;;  %v10426_v23 = vmul.f32 %v12834_v12, %v11987_v46  ;;  %12014 = vpow2.f32 %v10145_v16  ;;  %v12837_v16 = vld [vmem:[%s13178_s30 + $0x190] sm:$0xff] }
 0xd3a   : > { %v11991_v38 = vpop.eup %11990  ;;  %10491 = vst [vmem:[%s19265_s24 + $0x110] sm:$0xff] %v10427_v5  ;;  %v10428_v43 = vmul.f32 %v12835_v34, %v11989_v57  ;;  %12016 = vpow2.f32 %v10149_v49  ;;  %v12838_v49 = vld [vmem:[%s13178_s30 + $0x188] sm:$0xff]  ;;  %v9815_v5 = vadd.f32 %v9814_v36, %v19232_v8  ;;  %v9728_v34 = vadd.f32 %v9727_v37, %v19232_v8 }
 0xd3b   : > { %v11993_v35 = vpop.eup %11992  ;;  %10490 = vst [vmem:[%s19265_s24 + $0x108] sm:$0xff] %v10426_v23  ;;  %v10441_v11 = vmul.f32 %v12836_v18, %v11991_v38  ;;  %12018 = vpow2.f32 %v10147_v0  ;;  %v12839_v0 = vld [vmem:[%s13178_s30 + $0x198] sm:$0xff]  ;;  %v10089_v23 = vmul.f32 1.442695, %v10017_v40  ;;  %v10020_v38 = vsub.f32 0.0, %v9811_v1  ;;  %v12842_v36 = vld [vmem:[%s13178_s30 + $0x28] sm:$0xff] }
 0xd3c   : > { %v11995_v33 = vpop.eup %11994  ;;  %10492 = vst [vmem:[%s19265_s24 + $0x118] sm:$0xff] %v10428_v43  ;;  %v10205_v30 = vadd.f32 1.0, %v11993_v35  ;;  %12020 = vpow2.f32 %v10151_v48  ;;  %v9731_v48 = vpop.f32.mrf.mxu0  ;;  %v10033_v35 = vsub.f32 0.0, %v9726_v10  ;;  %v9817_v18 = vadd.f32 %v9816_v28, %v19232_v8 }
 0xd3d   : > { %v11997_v53 = vpop.eup %11996  ;;  %10505 = vst [vmem:[%s19265_s24 + $0x180] sm:$0xff] %v10441_v11  ;;  %v10207_v24 = vadd.f32 1.0, %v11995_v33  ;;  %12022 = vpow2.f32 %v10177_v6  ;;  %v10018_v6 = vsub.f32 0.0, %v9722_v63  ;;  %v9820_v11 = vpop.f32.mrf.mxu1  ;;  %v10035_v27 = vsub.f32 0.0, %v9815_v5 }
 0xd3e   : > { %v11999_v44 = vpop.eup %11998  ;;  %12024 = vrcp.f32 %v10205_v30  ;;  %v10206_v15 = vadd.f32 1.0, %v11997_v53  ;;  %v10093_v30 = vmul.f32 1.442695, %v10019_v47  ;;  %v9733_v53 = vpop.f32.mrf.mxu0  ;;  %v10121_v25 = vmul.f32 1.442695, %v10033_v35 }
 0xd3f   : > { %v12001_v50 = vpop.eup %12000  ;;  %12026 = vrcp.f32 %v10207_v24  ;;  %v10208_v29 = vadd.f32 1.0, %v11999_v44  ;;  %v10091_v56 = vmul.f32 1.442695, %v10018_v6  ;;  %v19314_v44 = vadd.f32 %v9731_v48, %v19239_v19 }
 0xd40   : > { %v12003_v2 = vpop.eup %12002  ;;  %12028 = vrcp.f32 %v10206_v15  ;;  %v10221_v55 = vadd.f32 1.0, %v12001_v50  ;;  %v10095_v50 = vmul.f32 1.442695, %v10020_v38  ;;  %v9821_v40 = vadd.f32 %v9820_v11, %v19239_v19  ;;  %v9737_v41 = vpop.f32.mrf.mxu0 }
 0xd41   : > { %v12005_v52 = vpop.eup %12004  ;;  %12030 = vrcp.f32 %v10208_v29  ;;  %v10223_v26 = vadd.f32 1.0, %v12003_v2  ;;  %v10034_v29 = vsub.f32 0.0, %v9728_v34  ;;  %v12841_v2 = vld [vmem:[%s13178_s30 + $0x30] sm:$0xff]  ;;  %v9734_v63 = vadd.f32 %v9733_v53, %v19239_v19  ;;  %v12848_v53 = vld [vmem:[%s13178_s30 + $0x120] sm:$0xff] }
 0xd42   : > { %v12007_v17 = vpop.eup %12006  ;;  %12032 = vrcp.f32 %v10221_v55  ;;  %v10222_v39 = vadd.f32 1.0, %v12005_v52  ;;  %v10036_v52 = vsub.f32 0.0, %v9817_v18  ;;  %v9738_v28 = vadd.f32 %v9737_v41, %v19244_v58  ;;  %v9739_v48 = vpop.f32.mrf.mxu0 }
 0xd43   : > { %v12009_v21 = vpop.eup %12008  ;;  %12034 = vrcp.f32 %v10223_v26  ;;  %v10224_v3 = vadd.f32 1.0, %v12007_v17  ;;  %v9822_v26 = vpop.f32.mrf.mxu1  ;;  %v10051_v5 = vsub.f32 0.0, %v9821_v40  ;;  %v10050_v6 = vsub.f32 0.0, %v9734_v63 }
 0xd44   : > { %v12011_v14 = vpop.eup %12010  ;;  %v10443_v7 = vmul.f32 %v12837_v16, %v12009_v21  ;;  %12036 = vrcp.f32 %v10222_v39  ;;  %v10125_v39 = vmul.f32 1.442695, %v10035_v27  ;;  %v12843_v21 = vld [vmem:[%s13178_s30 + $0x38] sm:$0xff]  ;;  %v12844_v16 = vld [vmem:[%s13178_s30 + $0xa0] sm:$0xff]  ;;  %v9823_v1 = vadd.f32 %v9822_v26, %v19239_v19 }
 0xd45   : > { %v12013_v61 = vpop.eup %12012  ;;  %v10442_v22 = vmul.f32 %v12838_v49, %v12011_v14  ;;  %12038 = vrcp.f32 %v10224_v3  ;;  %v12845_v49 = vld [vmem:[%s13178_s30 + $0xb0] sm:$0xff]  ;;  %v10127_v10 = vmul.f32 1.442695, %v10036_v52  ;;  %v10065_v35 = vsub.f32 0.0, %v9738_v28  ;;  %v12851_v52 = vld [vmem:[%s13178_s30 + $0x138] sm:$0xff] }
 0xd46   : > { %v12015_v32 = vpop.eup %12014  ;;  %10507 = vst [vmem:[%s19265_s24 + $0x190] sm:$0xff] %v10443_v7  ;;  %v10444_v46 = vmul.f32 %v12839_v0, %v12013_v61  ;;  %12040 = vpow2.f32 %v10181_v60  ;;  %v10052_v38 = vsub.f32 0.0, %v9823_v1  ;;  %v9740_v40 = vadd.f32 %v9739_v48, %v19244_v58 }
 0xd47   : > { %v12017_v57 = vpop.eup %12016  ;;  %10506 = vst [vmem:[%s19265_s24 + $0x188] sm:$0xff] %v10442_v22  ;;  %v10237_v12 = vadd.f32 1.0, %v12015_v32  ;;  %12042 = vpow2.f32 %v10179_v51  ;;  %v10049_v51 = vsub.f32 0.0, %v19314_v44  ;;  %v9826_v32 = vpop.f32.mrf.mxu1  ;;  %v12849_v44 = vld [vmem:[%s13178_s30 + $0x130] sm:$0xff] }
 0xd48   : > { %v12019_v9 = vpop.eup %12018  ;;  %10508 = vst [vmem:[%s19265_s24 + $0x198] sm:$0xff] %v10444_v46  ;;  %v10239_v13 = vadd.f32 1.0, %v12017_v57  ;;  %12044 = vpow2.f32 %v10183_v31  ;;  %v10123_v31 = vmul.f32 1.442695, %v10034_v29  ;;  %v12846_v46 = vld [vmem:[%s13178_s30 + $0xa8] sm:$0xff] }
 0xd49   : > { %v12021_v43 = vpop.eup %12020  ;;  %12046 = vrcp.f32 %v10237_v12  ;;  %v10238_v59 = vadd.f32 1.0, %v12019_v9  ;;  %v12847_v12 = vld [vmem:[%s13178_s30 + $0xb8] sm:$0xff]  ;;  %v9828_v18 = vpop.f32.mrf.mxu1 }
 0xd4a   : > { %v12023_v54 = vpop.eup %12022  ;;  %12048 = vrcp.f32 %v10239_v13  ;;  %v10240_v33 = vadd.f32 1.0, %v12021_v43 }
 0xd4b   : > { %v12025_v24 = vpop.eup %12024  ;;  %12050 = vrcp.f32 %v10238_v59  ;;  %v10253_v4 = vadd.f32 1.0, %v12023_v54  ;;  %v10153_v59 = vmul.f32 1.442695, %v10049_v51 }
 0xd4c   : > { %v12027_v15 = vpop.eup %12026  ;;  %v10397_v62 = vmul.f32 %v12840_v20, %v12025_v24  ;;  %12052 = vrcp.f32 %v10240_v33  ;;  %v10157_v33 = vmul.f32 1.442695, %v10051_v5  ;;  %v10159_v20 = vmul.f32 1.442695, %v10052_v38 }
 0xd4d   : > { %v12029_v42 = vpop.eup %12028  ;;  %v10399_v55 = vmul.f32 %v12841_v2, %v12027_v15  ;;  %12054 = vrcp.f32 %v10253_v4  ;;  %v10155_v4 = vmul.f32 1.442695, %v10050_v6  ;;  %v9827_v2 = vadd.f32 %v9826_v32, %v19244_v58 }
 0xd4e   : > { %v12031_v60 = vpop.eup %12030  ;;  %10461 = vst [vmem:[%s19265_s24 + $0x20] sm:$0xff] %v10397_v62  ;;  %v10398_v17 = vmul.f32 %v12842_v36, %v12029_v42  ;;  %12056 = vpow2.f32 %v10089_v23  ;;  %v10185_v42 = vmul.f32 1.442695, %v10065_v35 }
 0xd4f   : > { %v12033_v37 = vpop.eup %12032  ;;  %10463 = vst [vmem:[%s19265_s24 + $0x30] sm:$0xff] %v10399_v55  ;;  %v10400_v3 = vmul.f32 %v12843_v21, %v12031_v60  ;;  %12058 = vpow2.f32 %v10093_v30  ;;  %v9897_v30 = vpop.f32.mrf.mxu0  ;;  %v9829_v21 = vadd.f32 %v9828_v18, %v19244_v58  ;;  %v10067_v63 = vsub.f32 0.0, %v9827_v2 }
 0xd50   : > { %v12035_v14 = vpop.eup %12034  ;;  %10462 = vst [vmem:[%s19265_s24 + $0x28] sm:$0xff] %v10398_v17  ;;  %v10413_v7 = vmul.f32 %v12844_v16, %v12033_v37  ;;  %12060 = vpow2.f32 %v10091_v56  ;;  %v9986_v55 = vpop.f32.mrf.mxu1  ;;  %v12852_v17 = vld [vmem:[%s13178_s30 + $0x1a0] sm:$0xff] }
 0xd51   : > { %v12037_v61 = vpop.eup %12036  ;;  %10464 = vst [vmem:[%s19265_s24 + $0x38] sm:$0xff] %v10400_v3  ;;  %v10415_v22 = vmul.f32 %v12845_v49, %v12035_v14  ;;  %12062 = vpow2.f32 %v10095_v50  ;;  %v12850_v50 = vld [vmem:[%s13178_s30 + $0x128] sm:$0xff]  ;;  %v9899_v60 = vpop.f32.mrf.mxu0  ;;  %v10068_v32 = vsub.f32 0.0, %v9829_v21 }
 0xd52   : > { %v12039_v0 = vpop.eup %12038  ;;  %10477 = vst [vmem:[%s19265_s24 + $0xa0] sm:$0xff] %v10413_v7  ;;  %v10414_v47 = vmul.f32 %v12846_v46, %v12037_v61  ;;  %12064 = vpow2.f32 %v10121_v25  ;;  %v9988_v14 = vpop.f32.mrf.mxu1 }
 0xd53   : > { %v12041_v57 = vpop.eup %12040  ;;  %10479 = vst [vmem:[%s19265_s24 + $0xb0] sm:$0xff] %v10415_v22  ;;  %v10416_v23 = vmul.f32 %v12847_v12, %v12039_v0  ;;  %12066 = vpow2.f32 %v10125_v39  ;;  %v9903_v1 = vpop.f32.mrf.mxu0  ;;  %v10066_v22 = vsub.f32 0.0, %v9740_v40  ;;  %v10191_v18 = vmul.f32 1.442695, %v10068_v32 }
 0xd54   : > { %v12043_v9 = vpop.eup %12042  ;;  %10478 = vst [vmem:[%s19265_s24 + $0xa8] sm:$0xff] %v10414_v47  ;;  %v10255_v13 = vadd.f32 1.0, %v12041_v57  ;;  %12068 = vpow2.f32 %v10123_v31  ;;  %v9898_v31 = vadd.f32 %v9897_v30, %v19227_v45  ;;  %v10189_v47 = vmul.f32 1.442695, %v10067_v63  ;;  %v9992_v5 = vpop.f32.mrf.mxu1 }
 0xd55   : > { %v12045_v34 = vpop.eup %12044  ;;  %10480 = vst [vmem:[%s19265_s24 + $0xb8] sm:$0xff] %v10416_v23  ;;  %v10254_v43 = vadd.f32 1.0, %v12043_v9  ;;  %12070 = vpow2.f32 %v10127_v10  ;;  %v9987_v23 = vadd.f32 %v9986_v55, %v19227_v45  ;;  %v9905_v6 = vpop.f32.mrf.mxu0  ;;  %v10187_v38 = vmul.f32 1.442695, %v10066_v22 }
 0xd56   : > { %v12047_v11 = vpop.eup %12046  ;;  %12072 = vrcp.f32 %v10255_v13  ;;  %v10256_v54 = vadd.f32 1.0, %v12045_v34  ;;  %v10021_v12 = vsub.f32 0.0, %v9898_v31  ;;  %v9900_v34 = vadd.f32 %v9899_v60, %v19227_v45 }
 0xd57   : > { %v12049_v27 = vpop.eup %12048  ;;  %v10429_v24 = vmul.f32 %v12848_v53, %v12047_v11  ;;  %12074 = vrcp.f32 %v10254_v43  ;;  %v9989_v11 = vadd.f32 %v9988_v14, %v19227_v45  ;;  %v9994_v53 = vpop.f32.mrf.mxu1 }
 0xd58   : > { %v12051_v56 = vpop.eup %12050  ;;  %v10431_v15 = vmul.f32 %v12849_v44, %v12049_v27  ;;  %12076 = vrcp.f32 %v10256_v54  ;;  %v9904_v27 = vadd.f32 %v9903_v1, %v19232_v8  ;;  %v10023_v44 = vsub.f32 0.0, %v9987_v23  ;;  %v12859_v23 = vld [vmem:[%s13178_s30 + $0x58] sm:$0xff] }
 0xd59   : > { %v12053_v62 = vpop.eup %12052  ;;  %10493 = vst [vmem:[%s19265_s24 + $0x120] sm:$0xff] %v10429_v24  ;;  %v10430_v29 = vmul.f32 %v12850_v50, %v12051_v56  ;;  %12078 = vpow2.f32 %v10153_v59  ;;  %v12853_v59 = vld [vmem:[%s13178_s30 + $0x1b0] sm:$0xff]  ;;  %v10097_v50 = vmul.f32 1.442695, %v10021_v12  ;;  %v10024_v55 = vsub.f32 0.0, %v9989_v11 }
 0xd5a   : > { %v12055_v25 = vpop.eup %12054  ;;  %10495 = vst [vmem:[%s19265_s24 + $0x130] sm:$0xff] %v10431_v15  ;;  %v10432_v26 = vmul.f32 %v12851_v52, %v12053_v62  ;;  %12080 = vpow2.f32 %v10157_v33  ;;  %v12854_v33 = vld [vmem:[%s13178_s30 + $0x1a8] sm:$0xff]  ;;  %v9993_v15 = vadd.f32 %v9992_v5, %v19232_v8  ;;  %v10037_v60 = vsub.f32 0.0, %v9904_v27  ;;  %v12861_v11 = vld [vmem:[%s13178_s30 + $0xd0] sm:$0xff] }
 0xd5b   : > { %v12057_v36 = vpop.eup %12056  ;;  %10494 = vst [vmem:[%s19265_s24 + $0x128] sm:$0xff] %v10430_v29  ;;  %v10445_v39 = vmul.f32 %v12852_v17, %v12055_v25  ;;  %12082 = vpow2.f32 %v10155_v4  ;;  %v12855_v4 = vld [vmem:[%s13178_s30 + $0x1b8] sm:$0xff]  ;;  %v10022_v29 = vsub.f32 0.0, %v9900_v34  ;;  %v9906_v25 = vadd.f32 %v9905_v6, %v19232_v8  ;;  %v9998_v17 = vpop.f32.mrf.mxu1  ;;  %v12860_v34 = vld [vmem:[%s13178_s30 + $0xc0] sm:$0xff] }
 0xd5c   : > { %v12059_v41 = vpop.eup %12058  ;;  %10496 = vst [vmem:[%s19265_s24 + $0x138] sm:$0xff] %v10432_v26  ;;  %v10209_v37 = vadd.f32 1.0, %v12057_v36  ;;  %12084 = vpow2.f32 %v10159_v20  ;;  %v9909_v20 = vpop.f32.mrf.mxu0  ;;  %v9995_v36 = vadd.f32 %v9994_v53, %v19232_v8  ;;  %v10103_v31 = vmul.f32 1.442695, %v10024_v55  ;;  %v12862_v53 = vld [vmem:[%s13178_s30 + $0xc8] sm:$0xff] }
 0xd5d   : > { %v12061_v3 = vpop.eup %12060  ;;  %10509 = vst [vmem:[%s19265_s24 + $0x1a0] sm:$0xff] %v10445_v39  ;;  %v10211_v51 = vadd.f32 1.0, %v12059_v41  ;;  %12086 = vpow2.f32 %v10185_v42  ;;  %v10101_v41 = vmul.f32 1.442695, %v10023_v44  ;;  %v10099_v63 = vmul.f32 1.442695, %v10022_v29  ;;  %v10000_v32 = vpop.f32.mrf.mxu1 }
 0xd5e   : > { %v12063_v16 = vpop.eup %12062  ;;  %12088 = vrcp.f32 %v10209_v37  ;;  %v10210_v7 = vadd.f32 1.0, %v12061_v3  ;;  %v10039_v37 = vsub.f32 0.0, %v9993_v15  ;;  %v9911_v21 = vpop.f32.mrf.mxu0  ;;  %v19365_v14 = vadd.f32 %v9909_v20, %v19239_v19 }
 0xd5f   : > { %v12065_v61 = vpop.eup %12064  ;;  %12090 = vrcp.f32 %v10211_v51  ;;  %v10212_v49 = vadd.f32 1.0, %v12063_v16  ;;  %v10038_v1 = vsub.f32 0.0, %v9906_v25  ;;  %v10004_v55 = vpop.f32.mrf.mxu1 }
 0xd60   : > { %v12067_v10 = vpop.eup %12066  ;;  %12092 = vrcp.f32 %v10210_v7  ;;  %v10225_v28 = vadd.f32 1.0, %v12065_v61  ;;  %v12856_v7 = vld [vmem:[%s13178_s30 + $0x40] sm:$0xff]  ;;  %v10133_v5 = vmul.f32 1.442695, %v10039_v37 }
 0xd61   : > { %v12069_v0 = vpop.eup %12068  ;;  %12094 = vrcp.f32 %v10212_v49  ;;  %v10227_v46 = vadd.f32 1.0, %v12067_v10  ;;  %v12857_v49 = vld [vmem:[%s13178_s30 + $0x50] sm:$0xff]  ;;  %v10129_v10 = vmul.f32 1.442695, %v10037_v60 }
 0xd62   : > { %v12071_v48 = vpop.eup %12070  ;;  %12096 = vrcp.f32 %v10225_v28  ;;  %v10226_v57 = vadd.f32 1.0, %v12069_v0  ;;  %v10040_v28 = vsub.f32 0.0, %v9995_v36  ;;  %v12864_v36 = vld [vmem:[%s13178_s30 + $0x140] sm:$0xff] }
 0xd63   : > { %v12073_v9 = vpop.eup %12072  ;;  %12098 = vrcp.f32 %v10227_v46  ;;  %v10228_v13 = vadd.f32 1.0, %v12071_v48  ;;  %v12858_v46 = vld [vmem:[%s13178_s30 + $0x48] sm:$0xff]  ;;  %v9999_v48 = vadd.f32 %v9998_v17, %v19239_v19 }
 0xd64   : > { %v12075_v43 = vpop.eup %12074  ;;  %v10447_v35 = vmul.f32 %v12853_v59, %v12073_v9  ;;  %12100 = vrcp.f32 %v10226_v57  ;;  %v9915_v57 = vpop.f32.mrf.mxu0  ;;  %v10053_v9 = vsub.f32 0.0, %v19365_v14  ;;  %v10131_v59 = vmul.f32 1.442695, %v10038_v1 }
 0xd65   : > { %v12077_v54 = vpop.eup %12076  ;;  %v10446_v30 = vmul.f32 %v12854_v33, %v12075_v43  ;;  %12102 = vrcp.f32 %v10228_v13  ;;  %v9912_v13 = vadd.f32 %v9911_v21, %v19239_v19  ;;  %v10135_v33 = vmul.f32 1.442695, %v10040_v28 }
 0xd66   : > { %v12079_v24 = vpop.eup %12078  ;;  %10511 = vst [vmem:[%s19265_s24 + $0x1b0] sm:$0xff] %v10447_v35  ;;  %v10448_v56 = vmul.f32 %v12855_v4, %v12077_v54  ;;  %12104 = vpow2.f32 %v10189_v47  ;;  %v10001_v35 = vadd.f32 %v10000_v32, %v19239_v19  ;;  %v10055_v4 = vsub.f32 0.0, %v9999_v48  ;;  %v12863_v19 = vld [vmem:[%s13178_s30 + $0xd8] sm:$0xff] }
 0xd67   : > { %v12081_v62 = vpop.eup %12080  ;;  %10510 = vst [vmem:[%s19265_s24 + $0x1a8] sm:$0xff] %v10446_v30  ;;  %v10241_v45 = vadd.f32 1.0, %v12079_v24  ;;  %12106 = vpow2.f32 %v10187_v38  ;;  %v9916_v30 = vadd.f32 %v9915_v57, %v19244_v58  ;;  %v10054_v15 = vsub.f32 0.0, %v9912_v13 }
 0xd68   : > { %v12083_v42 = vpop.eup %12082  ;;  %10512 = vst [vmem:[%s19265_s24 + $0x1b8] sm:$0xff] %v10448_v56  ;;  %v10243_v2 = vadd.f32 1.0, %v12081_v62  ;;  %12108 = vpow2.f32 %v10191_v18 }
 0xd69   : > { %v12085_v52 = vpop.eup %12084  ;;  %12110 = vrcp.f32 %v10241_v45  ;;  %v10242_v26 = vadd.f32 1.0, %v12083_v42  ;;  %v10056_v45 = vsub.f32 0.0, %v10001_v35  ;;  %v10161_v42 = vmul.f32 1.442695, %v10053_v9 }
 0xd6a   : > { %v12087_v39 = vpop.eup %12086  ;;  %12112 = vrcp.f32 %v10243_v2  ;;  %v10244_v40 = vadd.f32 1.0, %v12085_v52  ;;  %v10069_v2 = vsub.f32 0.0, %v9916_v30 }
 0xd6b   : > { %v12089_v3 = vpop.eup %12088  ;;  %12114 = vrcp.f32 %v10242_v26  ;;  %v10257_v51 = vadd.f32 1.0, %v12087_v39  ;;  %v10165_v26 = vmul.f32 1.442695, %v10055_v4  ;;  %v10163_v39 = vmul.f32 1.442695, %v10054_v15  ;;  %v12871_v15 = vld [vmem:[%s13178_s30 + $0x1d8] sm:$0xff] }
 0xd6c   : > { %v12091_v16 = vpop.eup %12090  ;;  %v10401_v8 = vmul.f32 %v12856_v7, %v12089_v3  ;;  %12116 = vrcp.f32 %v10244_v40  ;;  %v10167_v21 = vmul.f32 1.442695, %v10056_v45  ;;  %v9917_v3 = vpop.f32.mrf.mxu0 }
 0xd6d   : > { %v12093_v61 = vpop.eup %12092  ;;  %v10403_v22 = vmul.f32 %v12857_v49, %v12091_v16  ;;  %12118 = vrcp.f32 %v10257_v51  ;;  %v10193_v16 = vmul.f32 1.442695, %v10069_v2  ;;  %v10006_v7 = vpop.f32.mrf.mxu1  ;;  %v9918_v28 = vadd.f32 %v9917_v3, %v19244_v58 }
 0xd6e   : > { %v12095_v0 = vpop.eup %12094  ;;  %10465 = vst [vmem:[%s19265_s24 + $0x40] sm:$0xff] %v10401_v8  ;;  %v10402_v47 = vmul.f32 %v12858_v46, %v12093_v61  ;;  %12120 = vpow2.f32 %v10097_v50  ;;  %v10005_v61 = vadd.f32 %v10004_v55, %v19244_v58  ;;  %v10007_v46 = vadd.f32 %v10006_v7, %v19244_v58  ;;  %v12876_v7 = vld [vmem:[%s13178_s30 + $0xe0] sm:$0xff] }
 0xd6f   : > { %v12097_v12 = vpop.eup %12096  ;;  %10467 = vst [vmem:[%s19265_s24 + $0x50] sm:$0xff] %v10403_v22  ;;  %v10404_v6 = vmul.f32 %v12859_v23, %v12095_v0  ;;  %12122 = vpow2.f32 %v10101_v41  ;;  %v12865_v41 = vld [vmem:[%s13178_s30 + $0x150] sm:$0xff]  ;;  %v12868_v22 = vld [vmem:[%s13178_s30 + $0x1c0] sm:$0xff]  ;;  %v10070_v9 = vsub.f32 0.0, %v9918_v28 }
 0xd70   : > { %v12099_v38 = vpop.eup %12098  ;;  %10466 = vst [vmem:[%s19265_s24 + $0x48] sm:$0xff] %v10402_v47  ;;  %v10417_v43 = vmul.f32 %v12860_v34, %v12097_v12  ;;  %12124 = vpow2.f32 %v10099_v63  ;;  %v12866_v63 = vld [vmem:[%s13178_s30 + $0x148] sm:$0xff]  ;;  %v10071_v12 = vsub.f32 0.0, %v10005_v61  ;;  %v10072_v34 = vsub.f32 0.0, %v10007_v46 }
 0xd71   : > { %v12101_v18 = vpop.eup %12100  ;;  %10468 = vst [vmem:[%s19265_s24 + $0x58] sm:$0xff] %v10404_v6  ;;  %v10419_v54 = vmul.f32 %v12861_v11, %v12099_v38  ;;  %12126 = vpow2.f32 %v10103_v31  ;;  %v12867_v31 = vld [vmem:[%s13178_s30 + $0x158] sm:$0xff] }
 0xd72   : > { %v12103_v27 = vpop.eup %12102  ;;  %10481 = vst [vmem:[%s19265_s24 + $0xc0] sm:$0xff] %v10417_v43  ;;  %v10418_v24 = vmul.f32 %v12862_v53, %v12101_v18  ;;  %12128 = vpow2.f32 %v10129_v10  ;;  %v10197_v18 = vmul.f32 1.442695, %v10071_v12 }
 0xd73   : > { %v12105_v56 = vpop.eup %12104  ;;  %10483 = vst [vmem:[%s19265_s24 + $0xd0] sm:$0xff] %v10419_v54  ;;  %v10420_v44 = vmul.f32 %v12863_v19, %v12103_v27  ;;  %12130 = vpow2.f32 %v10133_v5  ;;  %v12869_v27 = vld [vmem:[%s13178_s30 + $0x1d0] sm:$0xff] }
 0xd74   : > { %v12107_v20 = vpop.eup %12106  ;;  %10482 = vst [vmem:[%s19265_s24 + $0xc8] sm:$0xff] %v10418_v24  ;;  %v10259_v62 = vadd.f32 1.0, %v12105_v56  ;;  %12132 = vpow2.f32 %v10131_v59  ;;  %v10199_v24 = vmul.f32 1.442695, %v10072_v34  ;;  %v12870_v56 = vld [vmem:[%s13178_s30 + $0x1c8] sm:$0xff] }
 0xd75   : > { %v12109_v50 = vpop.eup %12108  ;;  %10484 = vst [vmem:[%s19265_s24 + $0xd8] sm:$0xff] %v10420_v44  ;;  %v10258_v29 = vadd.f32 1.0, %v12107_v20  ;;  %12134 = vpow2.f32 %v10135_v33  ;;  %v10195_v33 = vmul.f32 1.442695, %v10070_v9 }
 0xd76   : > { %v12111_v25 = vpop.eup %12110  ;;  %12136 = vrcp.f32 %v10259_v62  ;;  %v10260_v52 = vadd.f32 1.0, %v12109_v50 }
 0xd77   : > { %v12113_v60 = vpop.eup %12112  ;;  %v10433_v17 = vmul.f32 %v12864_v36, %v12111_v25  ;;  %12138 = vrcp.f32 %v10258_v29  ;;  %v12872_v36 = vld [vmem:[%s13178_s30 + $0x60] sm:$0xff] }
 0xd78   : > { %v12115_v40 = vpop.eup %12114  ;;  %v10435_v37 = vmul.f32 %v12865_v41, %v12113_v60  ;;  %12140 = vrcp.f32 %v10260_v52 }
 0xd79   : > { %v12117_v51 = vpop.eup %12116  ;;  %10497 = vst [vmem:[%s19265_s24 + $0x140] sm:$0xff] %v10433_v17  ;;  %v10434_v14 = vmul.f32 %v12866_v63, %v12115_v40  ;;  %12142 = vpow2.f32 %v10161_v42  ;;  %v12873_v40 = vld [vmem:[%s13178_s30 + $0x70] sm:$0xff]  ;;  %v12875_v63 = vld [vmem:[%s13178_s30 + $0x78] sm:$0xff] }
 0xd7a   : > { %v12119_v8 = vpop.eup %12118  ;;  %10499 = vst [vmem:[%s19265_s24 + $0x150] sm:$0xff] %v10435_v37  ;;  %v10436_v1 = vmul.f32 %v12867_v31, %v12117_v51  ;;  %12144 = vpow2.f32 %v10165_v26 }
 0xd7b   : > { %v12121_v49 = vpop.eup %12120  ;;  %10498 = vst [vmem:[%s19265_s24 + $0x148] sm:$0xff] %v10434_v14  ;;  %v10449_v10 = vmul.f32 %v12868_v22, %v12119_v8  ;;  %12146 = vpow2.f32 %v10163_v39  ;;  %v12878_v22 = vld [vmem:[%s13178_s30 + $0xe8] sm:$0xff] }
 0xd7c   : > { %v12123_v32 = vpop.eup %12122  ;;  %10500 = vst [vmem:[%s19265_s24 + $0x158] sm:$0xff] %v10436_v1  ;;  %v10213_v0 = vadd.f32 1.0, %v12121_v49  ;;  %12148 = vpow2.f32 %v10167_v21  ;;  %v12874_v21 = vld [vmem:[%s13178_s30 + $0x68] sm:$0xff]  ;;  %v12877_v1 = vld [vmem:[%s13178_s30 + $0xf0] sm:$0xff] }
 0xd7d   : > { %v12125_v47 = vpop.eup %12124  ;;  %10513 = vst [vmem:[%s19265_s24 + $0x1c0] sm:$0xff] %v10449_v10  ;;  %v10215_v5 = vadd.f32 1.0, %v12123_v32  ;;  %12150 = vpow2.f32 %v10193_v16  ;;  %v12879_v32 = vld [vmem:[%s13178_s30 + $0xf8] sm:$0xff] }
 0xd7e   : > { %v12127_v48 = vpop.eup %12126  ;;  %12152 = vrcp.f32 %v10213_v0  ;;  %v10214_v57 = vadd.f32 1.0, %v12125_v47 }
 0xd7f   : > { %v12129_v23 = vpop.eup %12128  ;;  %12154 = vrcp.f32 %v10215_v5  ;;  %v10216_v6 = vadd.f32 1.0, %v12127_v48 }
 0xd80   : > { %v12131_v13 = vpop.eup %12130  ;;  %12156 = vrcp.f32 %v10214_v57  ;;  %v10229_v38 = vadd.f32 1.0, %v12129_v23 }
 0xd81   : > { %v12133_v43 = vpop.eup %12132  ;;  %12158 = vrcp.f32 %v10216_v6  ;;  %v10231_v58 = vadd.f32 1.0, %v12131_v13  ;;  %v12880_v6 = vld [vmem:[%s13178_s30 + $0x160] sm:$0xff] }
 0xd82   : > { %v12135_v59 = vpop.eup %12134  ;;  %12160 = vrcp.f32 %v10229_v38  ;;  %v10230_v35 = vadd.f32 1.0, %v12133_v43  ;;  %v12881_v38 = vld [vmem:[%s13178_s30 + $0x170] sm:$0xff] }
 0xd83   : > { %v12137_v11 = vpop.eup %12136  ;;  %12162 = vrcp.f32 %v10231_v58  ;;  %v10232_v54 = vadd.f32 1.0, %v12135_v59  ;;  %v12882_v58 = vld [vmem:[%s13178_s30 + $0x168] sm:$0xff] }
 0xd84   : > { %v12139_v30 = vpop.eup %12138  ;;  %v10451_v53 = vmul.f32 %v12869_v27, %v12137_v11  ;;  %12164 = vrcp.f32 %v10230_v35 }
 0xd85   : > { %v12141_v4 = vpop.eup %12140  ;;  %v10450_v19 = vmul.f32 %v12870_v56, %v12139_v30  ;;  %12166 = vrcp.f32 %v10232_v54  ;;  %v12884_v54 = vld [vmem:[%s13178_s30 + $0x1e0] sm:$0xff]  ;;  %v12886_v56 = vld [vmem:[%s13178_s30 + $0x1e8] sm:$0xff] }
 0xd86   : > { %v12143_v44 = vpop.eup %12142  ;;  %10515 = vst [vmem:[%s19265_s24 + $0x1d0] sm:$0xff] %v10451_v53  ;;  %v10452_v20 = vmul.f32 %v12871_v15, %v12141_v4  ;;  %12168 = vpow2.f32 %v10197_v18  ;;  %v12883_v18 = vld [vmem:[%s13178_s30 + $0x178] sm:$0xff]  ;;  %v12885_v53 = vld [vmem:[%s13178_s30 + $0x1f0] sm:$0xff] }
 0xd87   : > { %v12145_v62 = vpop.eup %12144  ;;  %10514 = vst [vmem:[%s19265_s24 + $0x1c8] sm:$0xff] %v10450_v19  ;;  %v10245_v45 = vadd.f32 1.0, %v12143_v44  ;;  %12170 = vpow2.f32 %v10195_v33  ;;  %v12887_v44 = vld [vmem:[%s13178_s30 + $0x1f8] sm:$0xff] }
 0xd88   : > { %v12147_v50 = vpop.eup %12146  ;;  %10516 = vst [vmem:[%s19265_s24 + $0x1d8] sm:$0xff] %v10452_v20  ;;  %v10247_v29 = vadd.f32 1.0, %v12145_v62  ;;  %12172 = vpow2.f32 %v10199_v24  ;;  %v10543_v20 = vld [vmem:[%s19265_s24] sm:$0xff] (%p13025_p5)  ;;  %v10545_v62 = vld [vmem:[%s19265_s24 + $0x8] sm:$0xff] (%p13025_p5) }
 0xd89   : > { %v12149_v42 = vpop.eup %12148  ;;  %12174 = vrcp.f32 %v10245_v45  ;;  %v10246_v2 = vadd.f32 1.0, %v12147_v50  ;;  %v10547_v45 = vld [vmem:[%s19265_s24 + $0x10] sm:$0xff] (%p13025_p5)  ;;  %v10549_v50 = vld [vmem:[%s19265_s24 + $0x18] sm:$0xff] (%p13025_p5)  ;;  %10544 = vst [vmem:[%s19449_s26] sm:$0xff] (%p13025_p5), %v10543_v20  ;;  %10546 = vst [vmem:[%s19449_s26 + $0x8] sm:$0xff] (%p13025_p5), %v10545_v62 }
 0xd8a   : > { %v12151_v55 = vpop.eup %12150  ;;  %12176 = vrcp.f32 %v10247_v29  ;;  %v10248_v25 = vadd.f32 1.0, %v12149_v42  ;;  %v10551_v29 = vld [vmem:[%s19265_s24 + $0x20] sm:$0xff] (%p13025_p5)  ;;  %v10553_v42 = vld [vmem:[%s19265_s24 + $0x28] sm:$0xff] (%p13025_p5)  ;;  %10548 = vst [vmem:[%s19449_s26 + $0x10] sm:$0xff] (%p13025_p5), %v10547_v45  ;;  %10550 = vst [vmem:[%s19449_s26 + $0x18] sm:$0xff] (%p13025_p5), %v10549_v50 }
 0xd8b   : > { %v12153_v52 = vpop.eup %12152  ;;  %12178 = vrcp.f32 %v10246_v2  ;;  %v10261_v26 = vadd.f32 1.0, %v12151_v55  ;;  %10552 = vst [vmem:[%s19449_s26 + $0x20] sm:$0xff] (%p13025_p5), %v10551_v29  ;;  %10554 = vst [vmem:[%s19449_s26 + $0x28] sm:$0xff] (%p13025_p5), %v10553_v42  ;;  %v10555_v2 = vld [vmem:[%s19265_s24 + $0x30] sm:$0xff] (%p13025_p5)  ;;  %v10557_v55 = vld [vmem:[%s19265_s24 + $0x38] sm:$0xff] (%p13025_p5) }
 0xd8c   : > { %v12155_v60 = vpop.eup %12154  ;;  %v10405_v17 = vmul.f32 %v12872_v36, %v12153_v52  ;;  %12180 = vrcp.f32 %v10248_v25  ;;  %v10559_v25 = vld [vmem:[%s19265_s24 + $0x40] sm:$0xff] (%p13025_p5)  ;;  %10556 = vst [vmem:[%s19449_s26 + $0x30] sm:$0xff] (%p13025_p5), %v10555_v2  ;;  %10558 = vst [vmem:[%s19449_s26 + $0x38] sm:$0xff] (%p13025_p5), %v10557_v55  ;;  %v10561_v52 = vld [vmem:[%s19265_s24 + $0x48] sm:$0xff] (%p13025_p5) }
 0xd8d   : > { %v12157_v39 = vpop.eup %12156  ;;  %v10407_v41 = vmul.f32 %v12873_v40, %v12155_v60  ;;  %12182 = vrcp.f32 %v10261_v26  ;;  %10560 = vst [vmem:[%s19449_s26 + $0x40] sm:$0xff] (%p13025_p5), %v10559_v25  ;;  %v10563_v26 = vld [vmem:[%s19265_s24 + $0x50] sm:$0xff] (%p13025_p5)  ;;  %v10565_v60 = vld [vmem:[%s19265_s24 + $0x58] sm:$0xff] (%p13025_p5)  ;;  %10562 = vst [vmem:[%s19449_s26 + $0x48] sm:$0xff] (%p13025_p5), %v10561_v52 }
 0xd8e   : > { %v12159_v37 = vpop.eup %12158  ;;  %10469 = vst [vmem:[%s19265_s24 + $0x60] sm:$0xff] %v10405_v17  ;;  %v10406_v3 = vmul.f32 %v12874_v21, %v12157_v39  ;;  %10564 = vst [vmem:[%s19449_s26 + $0x50] sm:$0xff] (%p13025_p5), %v10563_v26  ;;  %v10579_v21 = vld [vmem:[%s19265_s24 + $0x90] sm:$0xff] (%p13025_p5) }
 0xd8f   : > { %v12161_v51 = vpop.eup %12160  ;;  %10471 = vst [vmem:[%s19265_s24 + $0x70] sm:$0xff] %v10407_v41  ;;  %v10408_v14 = vmul.f32 %v12875_v63, %v12159_v37  ;;  %10566 = vst [vmem:[%s19449_s26 + $0x58] sm:$0xff] (%p13025_p5), %v10565_v60  ;;  %v10575_v41 = vld [vmem:[%s19265_s24 + $0x80] sm:$0xff] (%p13025_p5)  ;;  %v10577_v37 = vld [vmem:[%s19265_s24 + $0x88] sm:$0xff] (%p13025_p5) }
 0xd90   : > { %v12163_v16 = vpop.eup %12162  ;;  %10470 = vst [vmem:[%s19265_s24 + $0x68] sm:$0xff] %v10406_v3  ;;  %v10421_v8 = vmul.f32 %v12876_v7, %v12161_v51  ;;  %10576 = vst [vmem:[%s19449_s26 + $0x100] sm:$0xff] (%p13025_p5), %v10575_v41  ;;  %v10581_v3 = vld [vmem:[%s19265_s24 + $0x98] sm:$0xff] (%p13025_p5)  ;;  %v10583_v51 = vld [vmem:[%s19265_s24 + $0xa0] sm:$0xff] (%p13025_p5) }
 0xd91   : > { %v12165_v31 = vpop.eup %12164  ;;  %10472 = vst [vmem:[%s19265_s24 + $0x78] sm:$0xff] %v10408_v14  ;;  %v10423_v61 = vmul.f32 %v12877_v1, %v12163_v16  ;;  %10578 = vst [vmem:[%s19449_s26 + $0x108] sm:$0xff] (%p13025_p5), %v10577_v37  ;;  %v10585_v63 = vld [vmem:[%s19265_s24 + $0xa8] sm:$0xff] (%p13025_p5)  ;;  %v10587_v14 = vld [vmem:[%s19265_s24 + $0xb0] sm:$0xff] (%p13025_p5) }
 0xd92   : > { %v12167_v49 = vpop.eup %12166  ;;  %10485 = vst [vmem:[%s19265_s24 + $0xe0] sm:$0xff] %v10421_v8  ;;  %v10422_v10 = vmul.f32 %v12878_v22, %v12165_v31  ;;  %10580 = vst [vmem:[%s19449_s26 + $0x110] sm:$0xff] (%p13025_p5), %v10579_v21  ;;  %v10589_v16 = vld [vmem:[%s19265_s24 + $0xb8] sm:$0xff] (%p13025_p5)  ;;  %v10591_v7 = vld [vmem:[%s19265_s24 + $0xc0] sm:$0xff] (%p13025_p5) }
 0xd93   : > { %v12169_v28 = vpop.eup %12168  ;;  %10487 = vst [vmem:[%s19265_s24 + $0xf0] sm:$0xff] %v10423_v61  ;;  %v10424_v0 = vmul.f32 %v12879_v32, %v12167_v49  ;;  %10582 = vst [vmem:[%s19449_s26 + $0x118] sm:$0xff] (%p13025_p5), %v10581_v3  ;;  %v10593_v8 = vld [vmem:[%s19265_s24 + $0xc8] sm:$0xff] (%p13025_p5)  ;;  %v10595_v31 = vld [vmem:[%s19265_s24 + $0xd0] sm:$0xff] (%p13025_p5) }
 0xd94   : > { %v12171_v46 = vpop.eup %12170  ;;  %10486 = vst [vmem:[%s19265_s24 + $0xe8] sm:$0xff] %v10422_v10  ;;  %v10263_v47 = vadd.f32 1.0, %v12169_v28  ;;  %10584 = vst [vmem:[%s19449_s26 + $0x120] sm:$0xff] (%p13025_p5), %v10583_v51  ;;  %v10597_v1 = vld [vmem:[%s19265_s24 + $0xd8] sm:$0xff] (%p13025_p5)  ;;  %v10607_v28 = vld [vmem:[%s19265_s24 + $0x100] sm:$0xff] (%p13025_p5) }
 0xd95   : > { %v12173_v5 = vpop.eup %12172  ;;  %10488 = vst [vmem:[%s19265_s24 + $0xf8] sm:$0xff] %v10424_v0  ;;  %v10262_v48 = vadd.f32 1.0, %v12171_v46  ;;  %v10567_v36 = vld [vmem:[%s19265_s24 + $0x60] sm:$0xff] (%p13025_p5)  ;;  %10586 = vst [vmem:[%s19449_s26 + $0x128] sm:$0xff] (%p13025_p5), %v10585_v63  ;;  %v10609_v32 = vld [vmem:[%s19265_s24 + $0x108] sm:$0xff] (%p13025_p5) }
 0xd96   : > { %v12175_v57 = vpop.eup %12174  ;;  %12184 = vrcp.f32 %v10263_v47  ;;  %v10264_v12 = vadd.f32 1.0, %v12173_v5  ;;  %v10571_v39 = vld [vmem:[%s19265_s24 + $0x70] sm:$0xff] (%p13025_p5)  ;;  %10568 = vst [vmem:[%s19449_s26 + $0x60] sm:$0xff] (%p13025_p5), %v10567_v36  ;;  %10588 = vst [vmem:[%s19449_s26 + $0x130] sm:$0xff] (%p13025_p5), %v10587_v14  ;;  %v10613_v46 = vld [vmem:[%s19265_s24 + $0x118] sm:$0xff] (%p13025_p5) }
 0xd97   : > { %v12177_v23 = vpop.eup %12176  ;;  %v10437_v9 = vmul.f32 %v12880_v6, %v12175_v57  ;;  %12186 = vrcp.f32 %v10262_v48  ;;  %v10569_v17 = vld [vmem:[%s19265_s24 + $0x68] sm:$0xff] (%p13025_p5)  ;;  %10572 = vst [vmem:[%s19449_s26 + $0x70] sm:$0xff] (%p13025_p5), %v10571_v39  ;;  %10590 = vst [vmem:[%s19449_s26 + $0x138] sm:$0xff] (%p13025_p5), %v10589_v16  ;;  %v10611_v0 = vld [vmem:[%s19265_s24 + $0x110] sm:$0xff] (%p13025_p5) }
 0xd98   : > { %v12179_v13 = vpop.eup %12178  ;;  %v10439_v34 = vmul.f32 %v12881_v38, %v12177_v23  ;;  %12188 = vrcp.f32 %v10264_v12  ;;  %10570 = vst [vmem:[%s19449_s26 + $0x68] sm:$0xff] (%p13025_p5), %v10569_v17  ;;  %v10573_v40 = vld [vmem:[%s19265_s24 + $0x78] sm:$0xff] (%p13025_p5)  ;;  %10592 = vst [vmem:[%s19449_s26 + $0x140] sm:$0xff] (%p13025_p5), %v10591_v7  ;;  %v10615_v47 = vld [vmem:[%s19265_s24 + $0x120] sm:$0xff] (%p13025_p5) }
 0xd99   : > { %v12181_v43 = vpop.eup %12180  ;;  %10501 = vst [vmem:[%s19265_s24 + $0x160] sm:$0xff] %v10437_v9  ;;  %v10438_v59 = vmul.f32 %v12882_v58, %v12179_v13  ;;  %10574 = vst [vmem:[%s19449_s26 + $0x78] sm:$0xff] (%p13025_p5), %v10573_v40  ;;  %v10599_v61 = vld [vmem:[%s19265_s24 + $0xe0] sm:$0xff] (%p13025_p5)  ;;  %v10617_v5 = vld [vmem:[%s19265_s24 + $0x128] sm:$0xff] (%p13025_p5) }
 0xd9a   : > { %v12183_v35 = vpop.eup %12182  ;;  %10503 = vst [vmem:[%s19265_s24 + $0x170] sm:$0xff] %v10439_v34  ;;  %v10440_v11 = vmul.f32 %v12883_v18, %v12181_v43  ;;  %10594 = vst [vmem:[%s19449_s26 + $0x148] sm:$0xff] (%p13025_p5), %v10593_v8  ;;  %v10603_v22 = vld [vmem:[%s19265_s24 + $0xf0] sm:$0xff] (%p13025_p5)  ;;  %v10621_v57 = vld [vmem:[%s19265_s24 + $0x138] sm:$0xff] (%p13025_p5) }
 0xd9b   : > { %10502 = vst [vmem:[%s19265_s24 + $0x168] sm:$0xff] %v10438_v59  ;;  %v10453_v33 = vmul.f32 %v12884_v54, %v12183_v35  ;;  %10596 = vst [vmem:[%s19449_s26 + $0x150] sm:$0xff] (%p13025_p5), %v10595_v31  ;;  %v10601_v49 = vld [vmem:[%s19265_s24 + $0xe8] sm:$0xff] (%p13025_p5)  ;;  %v10619_v48 = vld [vmem:[%s19265_s24 + $0x130] sm:$0xff] (%p13025_p5) }
 0xd9c   : > { %10504 = vst [vmem:[%s19265_s24 + $0x178] sm:$0xff] %v10440_v11  ;;  %10598 = vst [vmem:[%s19449_s26 + $0x158] sm:$0xff] (%p13025_p5), %v10597_v1  ;;  %v10605_v10 = vld [vmem:[%s19265_s24 + $0xf8] sm:$0xff] (%p13025_p5)  ;;  %v10623_v12 = vld [vmem:[%s19265_s24 + $0x140] sm:$0xff] (%p13025_p5) }
 0xd9d   : > { %10517 = vst [vmem:[%s19265_s24 + $0x1e0] sm:$0xff] %v10453_v33  ;;  %10600 = vst [vmem:[%s19449_s26 + $0x160] sm:$0xff] (%p13025_p5), %v10599_v61  ;;  %v10625_v23 = vld [vmem:[%s19265_s24 + $0x148] sm:$0xff] (%p13025_p5)  ;;  %v10627_v6 = vld [vmem:[%s19265_s24 + $0x150] sm:$0xff] (%p13025_p5) }
 0xd9e   : > { %10602 = vst [vmem:[%s19449_s26 + $0x168] sm:$0xff] (%p13025_p5), %v10601_v49  ;;  %10604 = vst [vmem:[%s19449_s26 + $0x170] sm:$0xff] (%p13025_p5), %v10603_v22  ;;  %v10629_v9 = vld [vmem:[%s19265_s24 + $0x158] sm:$0xff] (%p13025_p5)  ;;  %v10639_v58 = vld [vmem:[%s19265_s24 + $0x180] sm:$0xff] (%p13025_p5) }
 0xd9f   : > { %10606 = vst [vmem:[%s19449_s26 + $0x178] sm:$0xff] (%p13025_p5), %v10605_v10  ;;  %10608 = vst [vmem:[%s19449_s26 + $0x200] sm:$0xff] (%p13025_p5), %v10607_v28  ;;  %v10641_v59 = vld [vmem:[%s19265_s24 + $0x188] sm:$0xff] (%p13025_p5)  ;;  %v10643_v35 = vld [vmem:[%s19265_s24 + $0x190] sm:$0xff] (%p13025_p5) }
 0xda0   : > { %10610 = vst [vmem:[%s19449_s26 + $0x208] sm:$0xff] (%p13025_p5), %v10609_v32  ;;  %10612 = vst [vmem:[%s19449_s26 + $0x210] sm:$0xff] (%p13025_p5), %v10611_v0  ;;  %v10631_v13 = vld [vmem:[%s19265_s24 + $0x160] sm:$0xff] (%p13025_p5)  ;;  %v10645_v18 = vld [vmem:[%s19265_s24 + $0x198] sm:$0xff] (%p13025_p5) }
 0xda1   : > { %10614 = vst [vmem:[%s19449_s26 + $0x218] sm:$0xff] (%p13025_p5), %v10613_v46  ;;  %10616 = vst [vmem:[%s19449_s26 + $0x220] sm:$0xff] (%p13025_p5), %v10615_v47  ;;  %v10635_v34 = vld [vmem:[%s19265_s24 + $0x170] sm:$0xff] (%p13025_p5)  ;;  %v10647_v11 = vld [vmem:[%s19265_s24 + $0x1a0] sm:$0xff] (%p13025_p5) }
 0xda2   : > { %10618 = vst [vmem:[%s19449_s26 + $0x228] sm:$0xff] (%p13025_p5), %v10617_v5  ;;  %10620 = vst [vmem:[%s19449_s26 + $0x230] sm:$0xff] (%p13025_p5), %v10619_v48  ;;  %v10633_v38 = vld [vmem:[%s19265_s24 + $0x168] sm:$0xff] (%p13025_p5)  ;;  %v10651_v33 = vld [vmem:[%s19265_s24 + $0x1b0] sm:$0xff] (%p13025_p5) }
 0xda3   : > { %v12185_v30 = vpop.eup %12184  ;;  %10622 = vst [vmem:[%s19449_s26 + $0x238] sm:$0xff] (%p13025_p5), %v10621_v57  ;;  %10624 = vst [vmem:[%s19449_s26 + $0x240] sm:$0xff] (%p13025_p5), %v10623_v12  ;;  %v10637_v43 = vld [vmem:[%s19265_s24 + $0x178] sm:$0xff] (%p13025_p5)  ;;  %v10649_v54 = vld [vmem:[%s19265_s24 + $0x1a8] sm:$0xff] (%p13025_p5) }
 0xda4   : > { %v12187_v27 = vpop.eup %12186  ;;  %v10455_v24 = vmul.f32 %v12885_v53, %v12185_v30  ;;  %10527 = sbr.rel (!%p13025_p5) target bundleno = 3505 (0xdb1), region = 107  ;;  %10626 = vst [vmem:[%s19449_s26 + $0x248] sm:$0xff] (%p13025_p5), %v10625_v23  ;;  %10628 = vst [vmem:[%s19449_s26 + $0x250] sm:$0xff] (%p13025_p5), %v10627_v6  ;;  %v10653_v30 = vld [vmem:[%s19265_s24 + $0x1b8] sm:$0xff] (%p13025_p5)  ;;  %v10657_v53 = vld [vmem:[%s19265_s24 + $0x1c8] sm:$0xff] (%p13025_p5) }
 0xda5   : > { %v12189_v4 = vpop.eup %12188  ;;  %v10454_v19 = vmul.f32 %v12886_v56, %v12187_v27  ;;  %10630 = vst [vmem:[%s19449_s26 + $0x258] sm:$0xff] (%p13025_p5), %v10629_v9  ;;  %10632 = vst [vmem:[%s19449_s26 + $0x260] sm:$0xff] (%p13025_p5), %v10631_v13  ;;  %v10655_v27 = vld [vmem:[%s19265_s24 + $0x1c0] sm:$0xff] (%p13025_p5) }
 0xda6   : > { %10519 = vst [vmem:[%s19265_s24 + $0x1f0] sm:$0xff] %v10455_v24  ;;  %v10456_v15 = vmul.f32 %v12887_v44, %v12189_v4  ;;  %10634 = vst [vmem:[%s19449_s26 + $0x268] sm:$0xff] (%p13025_p5), %v10633_v38  ;;  %v10659_v24 = vld [vmem:[%s19265_s24 + $0x1d0] sm:$0xff] (%p13025_p5)  ;;  %v10661_v4 = vld [vmem:[%s19265_s24 + $0x1d8] sm:$0xff] (%p13025_p5) }
 0xda7   : > { %10518 = vst [vmem:[%s19265_s24 + $0x1e8] sm:$0xff] %v10454_v19  ;;  %10636 = vst [vmem:[%s19449_s26 + $0x270] sm:$0xff] (%p13025_p5), %v10635_v34  ;;  %v10663_v56 = vld [vmem:[%s19265_s24 + $0x1e0] sm:$0xff] (%p13025_p5) }
 0xda8   : > { %10520 = vst [vmem:[%s19265_s24 + $0x1f8] sm:$0xff] %v10456_v15  ;;  %10638 = vst [vmem:[%s19449_s26 + $0x278] sm:$0xff] (%p13025_p5), %v10637_v43 }
 0xda9   : > { %10640 = vst [vmem:[%s19449_s26 + $0x300] sm:$0xff] %v10639_v58  ;;  %10642 = vst [vmem:[%s19449_s26 + $0x308] sm:$0xff] %v10641_v59 }
 0xdaa   : > { %10644 = vst [vmem:[%s19449_s26 + $0x310] sm:$0xff] %v10643_v35  ;;  %10646 = vst [vmem:[%s19449_s26 + $0x318] sm:$0xff] %v10645_v18 }
 0xdab   : > { %10648 = vst [vmem:[%s19449_s26 + $0x320] sm:$0xff] %v10647_v11  ;;  %10650 = vst [vmem:[%s19449_s26 + $0x328] sm:$0xff] %v10649_v54 }
 0xdac   : > { %10652 = vst [vmem:[%s19449_s26 + $0x330] sm:$0xff] %v10651_v33  ;;  %10654 = vst [vmem:[%s19449_s26 + $0x338] sm:$0xff] %v10653_v30 }
 0xdad   : > { %10656 = vst [vmem:[%s19449_s26 + $0x340] sm:$0xff] %v10655_v27  ;;  %10658 = vst [vmem:[%s19449_s26 + $0x348] sm:$0xff] %v10657_v53  ;;  %v10667_v44 = vld [vmem:[%s19265_s24 + $0x1f0] sm:$0xff] }
 0xdae   : > { %10660 = vst [vmem:[%s19449_s26 + $0x350] sm:$0xff] %v10659_v24  ;;  %10662 = vst [vmem:[%s19449_s26 + $0x358] sm:$0xff] %v10661_v4  ;;  %v10665_v19 = vld [vmem:[%s19265_s24 + $0x1e8] sm:$0xff] }
 0xdaf   : > { %10664 = vst [vmem:[%s19449_s26 + $0x360] sm:$0xff] %v10663_v56  ;;  %10666 = vst [vmem:[%s19449_s26 + $0x368] sm:$0xff] %v10665_v19  ;;  %v10669_v15 = vld [vmem:[%s19265_s24 + $0x1f8] sm:$0xff] }
 0xdb0   : > { %10668 = vst [vmem:[%s19449_s26 + $0x370] sm:$0xff] %v10667_v44  ;;  %10670 = vst [vmem:[%s19449_s26 + $0x378] sm:$0xff] %v10669_v15 }
 0xdb1 PF: > { %p22_p10 = scmp.ge.s32.totalorder %s13012_s22, 4   ;;  %s19761_s18 = smov %s12906_s19 }
 0xdb2   : > { %s19762_s19 = smov %s13023_s25  ;;  %s19763_s20 = smov %s13012_s22 }
 0xdb3   :  { %24 = sbr.rel (!%p22_p10) target bundleno = 5 (0x5), region = 177 }

</bundles_post_ra>
